<compile_context>
chip_gen: v7x
topology: tpu7x:2x2x1
jax: 0.10.0
libtpu: 0.0.40
codegen_flags: <defaults>
</compile_context>

<pallas_src>
import functools

import jax
import jax.numpy as jnp
from jax.experimental import pallas as pl
from jax.experimental.pallas import tpu as pltpu


def _transformer_block_kernel(
    x_ref, cos_ref, sina_ref, sinb_ref,
    attn_nw_ref, wq_ref, wk_ref, wv_ref, wo_ref,
    ffn_nw_ref, w1_ref, w2_ref, w3_ref,
    out_ref,
    *, n_heads, n_kv_heads, head_dim, eps):
  """One grid step processes one batch element end-to-end (everything fits in VMEM)."""
  repeats = n_heads // n_kv_heads
  scale = head_dim ** -0.5
  hd = head_dim
  hd2 = hd // 2

  x = x_ref[...].astype(jnp.float32)                                  # (T, D)

  # ---- attention RMSNorm (f32 math) -> bf16 for the MXU ----
  ms = jnp.mean(x * x, axis=-1, keepdims=True)
  xn = (x * jax.lax.rsqrt(ms + eps) * attn_nw_ref[...]).astype(jnp.bfloat16)

  # ---- fused Q/K/V projections: one wide lane-dense matmul each, f32 accumulation ----
  q = jnp.dot(xn, wq_ref[...], preferred_element_type=jnp.float32)    # (T, Hq*hd)
  k = jnp.dot(xn, wk_ref[...], preferred_element_type=jnp.float32)    # (T, Hkv*hd)
  v = jnp.dot(xn, wv_ref[...], preferred_element_type=jnp.float32)    # (T, Hkv*hd)

  # ---- RoPE (rotate-half) applied once on the head-concatenated layout ----
  # cos_t[:, h*hd + j]  = cos(theta_{j mod hd2} * pos)
  # sin_a[:, h*hd + j]  = -sin(...) for j <  hd2, 0 otherwise
  # sin_b[:, h*hd + j]  = +sin(...) for j >= hd2, 0 otherwise
  cos_t = cos_ref[...]                                                # (T, Hq*hd)
  sin_a = sina_ref[...]
  sin_b = sinb_ref[...]

  def rope(t):
    w = t.shape[-1]
    rot_hi = pltpu.roll(t, (w - hd2) % w, axis=1)   # t[..., j + hd2] on first-half lanes
    rot_lo = pltpu.roll(t, hd2, axis=1)             # t[..., j - hd2] on second-half lanes
    return t * cos_t[:, :w] + rot_hi * sin_a[:, :w] + rot_lo * sin_b[:, :w]

  q = (rope(q) * scale).astype(jnp.bfloat16)        # fold the attention scale into q
  k = rope(k).astype(jnp.bfloat16)
  v = v.astype(jnp.bfloat16)

  # ---- attention per head (lane-aligned head slices; GQA kv-head sharing) ----
  outs = []
  for h in range(n_heads):                          # small static unroll
    kvh = h // repeats
    qh = q[:, h * hd:(h + 1) * hd]
    kh = k[:, kvh * hd:(kvh + 1) * hd]
    vh = v[:, kvh * hd:(kvh + 1) * hd]
    s = jax.lax.dot_general(qh, kh, (((1,), (1,)), ((), ())),
                            preferred_element_type=jnp.float32)       # (T, T)
    m = jnp.max(s, axis=-1, keepdims=True)
    e = jnp.exp(s - m)
    p = e * pl.reciprocal(jnp.sum(e, axis=-1, keepdims=True), approx=True)
    outs.append(jnp.dot(p.astype(jnp.bfloat16), vh,
                        preferred_element_type=jnp.float32))          # (T, hd)

  # ---- fused output projection: one (T, Hq*hd) @ (Hq*hd, D) matmul ----
  o_cat = jnp.concatenate(outs, axis=-1).astype(jnp.bfloat16)
  attn = jnp.dot(o_cat, wo_ref[...], preferred_element_type=jnp.float32)

  h_res = x + attn                                                    # first residual (f32)

  # ---- FFN RMSNorm + SwiGLU ----
  ms2 = jnp.mean(h_res * h_res, axis=-1, keepdims=True)
  hn = (h_res * jax.lax.rsqrt(ms2 + eps) * ffn_nw_ref[...]).astype(jnp.bfloat16)
  g = jnp.dot(hn, w1_ref[...], preferred_element_type=jnp.float32)    # (T, hidden)
  u = jnp.dot(hn, w3_ref[...], preferred_element_type=jnp.float32)    # (T, hidden)
  silu_g = g * pl.reciprocal(1.0 + jnp.exp(-g), approx=True)          # sigmoid on the EUP path
  ff = jnp.dot((silu_g * u).astype(jnp.bfloat16), w2_ref[...],
               preferred_element_type=jnp.float32)                    # (T, D)

  out_ref[...] = (h_res + ff).astype(out_ref.dtype)


def transformer_block(x, rope_tables, params, *, n_heads, n_kv_heads, head_dim, eps):
  """x: (B, S, K, D). rope_tables: (cos_full, sin_first, sin_second), each (T, n_heads*head_dim)."""
  B, S, K, D = x.shape
  T = S * K
  Wq = n_heads * head_dim
  Wk = n_kv_heads * head_dim
  hidden = params["w1"].shape[1]
  x2 = x.reshape(B, T, D)
  cos_full, sin_first, sin_second = rope_tables

  # bf16 weights for the MXU (accumulation stays f32 inside the kernel).
  wq = params["wq"].astype(jnp.bfloat16)     # (D, Wq)   fused per-head layout
  wk = params["wk"].astype(jnp.bfloat16)     # (D, Wk)
  wv = params["wv"].astype(jnp.bfloat16)     # (D, Wk)
  wo = params["wo"].astype(jnp.bfloat16)     # (Wq, D)
  w1 = params["w1"].astype(jnp.bfloat16)     # (D, hidden)
  w2 = params["w2"].astype(jnp.bfloat16)     # (hidden, D)
  w3 = params["w3"].astype(jnp.bfloat16)     # (D, hidden)

  kernel = functools.partial(
      _transformer_block_kernel,
      n_heads=n_heads, n_kv_heads=n_kv_heads, head_dim=head_dim, eps=eps)

  out = pl.pallas_call(
      kernel,
      out_shape=jax.ShapeDtypeStruct((B, T, D), x.dtype),
      grid_spec=pltpu.PrefetchScalarGridSpec(
          num_scalar_prefetch=0,
          grid=(B,),
          in_specs=[
              pl.BlockSpec((pl.Squeezed(), T, D), lambda b: (b, 0, 0)),  # x
              pl.BlockSpec((T, Wq), lambda b: (0, 0)),                   # cos_full
              pl.BlockSpec((T, Wq), lambda b: (0, 0)),                   # sin_first (signed)
              pl.BlockSpec((T, Wq), lambda b: (0, 0)),                   # sin_second
              pl.BlockSpec((1, D), lambda b: (0, 0)),                    # attn norm weight
              pl.BlockSpec((D, Wq), lambda b: (0, 0)),                   # wq (fused heads)
              pl.BlockSpec((D, Wk), lambda b: (0, 0)),                   # wk
              pl.BlockSpec((D, Wk), lambda b: (0, 0)),                   # wv
              pl.BlockSpec((Wq, D), lambda b: (0, 0)),                   # wo (fused heads)
              pl.BlockSpec((1, D), lambda b: (0, 0)),                    # ffn norm weight
              pl.BlockSpec((D, hidden), lambda b: (0, 0)),               # w1
              pl.BlockSpec((hidden, D), lambda b: (0, 0)),               # w2
              pl.BlockSpec((D, hidden), lambda b: (0, 0)),               # w3
          ],
          out_specs=pl.BlockSpec((pl.Squeezed(), T, D), lambda b: (b, 0, 0)),
      ),
      compiler_params=pltpu.CompilerParams(
          dimension_semantics=("parallel",),
          vmem_limit_bytes=32 * 1024 * 1024),
  )(x2, cos_full, sin_first, sin_second,
    params["attn_nw"], wq, wk, wv, wo,
    params["ffn_nw"], w1, w2, w3)

  return out.reshape(B, S, K, D)


def reference_block(x, cos, sin, params, *, n_heads, n_kv_heads, head_dim, eps):
  """Pure-JAX f32 reference of the same forward pass (for correctness check)."""
  B, S, K, D = x.shape
  T = S * K
  hd2 = head_dim // 2
  x2 = x.reshape(B, T, D).astype(jnp.float32)

  def rms(v, w):
    return v * jax.lax.rsqrt(jnp.mean(v * v, axis=-1, keepdims=True) + eps) * w

  xn = rms(x2, params["attn_nw"][0])
  q = (xn @ params["wq"]).reshape(B, T, n_heads, head_dim)
  k = (xn @ params["wk"]).reshape(B, T, n_kv_heads, head_dim)
  v = (xn @ params["wv"]).reshape(B, T, n_kv_heads, head_dim)
  repeats = n_heads // n_kv_heads
  k = jnp.repeat(k, repeats, axis=2)          # repeat_interleave over the head axis
  v = jnp.repeat(v, repeats, axis=2)

  def rope(t):
    t1, t2 = t[..., :hd2], t[..., hd2:]
    c = cos[None, :, None, :]
    s = sin[None, :, None, :]
    return jnp.concatenate([t1 * c - t2 * s, t2 * c + t1 * s], axis=-1)

  q = rope(q)
  k = rope(k)
  s = jnp.einsum("bthe,bshe->bhts", q, k) * head_dim ** -0.5
  p = jax.nn.softmax(s, axis=-1)
  o = jnp.einsum("bhts,bshe->bthe", p, v)
  attn = o.reshape(B, T, n_heads * head_dim) @ params["wo"]
  h = x2 + attn

  hn = rms(h, params["ffn_nw"][0])
  ff = (jax.nn.silu(hn @ params["w1"]) * (hn @ params["w3"])) @ params["w2"]
  return (h + ff).reshape(B, S, K, D)


if __name__ == "__main__":
  # small, lane-dense config consistent with the module's args dict
  dim = 128
  n_heads = 4
  n_kv_heads = 2
  head_dim = 128
  hidden_dim = 256
  norm_eps = 1e-5
  rope_theta = 10000.0
  B, S, K = 2, 8, 16          # batch, seqlen_sum, num_keypoints
  T = S * K
  hd2 = head_dim // 2
  Wq = n_heads * head_dim

  key = jax.random.PRNGKey(0)
  ks = jax.random.split(key, 8)

  x = jax.random.normal(ks[0], (B, S, K, dim), dtype=jnp.float32)

  def init(k, shape, scale=0.05):
    return scale * jax.random.normal(k, shape, dtype=jnp.float32)

  params = {
      # fused per-head layouts: columns of wq are [head0 | head1 | ...]
      "wq": init(ks[1], (dim, n_heads * head_dim)),
      "wk": init(ks[2], (dim, n_kv_heads * head_dim)),
      "wv": init(ks[3], (dim, n_kv_heads * head_dim)),
      "wo": init(ks[4], (n_heads * head_dim, dim)),
      "w1": init(ks[5], (dim, hidden_dim)),
      "w2": init(ks[6], (hidden_dim, dim)),
      "w3": init(ks[7], (dim, hidden_dim)),
      "attn_nw": jnp.ones((1, dim), jnp.float32),   # RMSNorm weights init to ones
      "ffn_nw": jnp.ones((1, dim), jnp.float32),
  }

  # rotary tables (rotate-half); keypoints of the same frame share a rotary position
  pos = (jnp.arange(T) // K).astype(jnp.float32)
  inv_freq = 1.0 / (rope_theta ** (jnp.arange(0, head_dim, 2, dtype=jnp.float32) / head_dim))
  ang = pos[:, None] * inv_freq[None, :]            # (T, head_dim//2)
  cos = jnp.cos(ang)
  sin = jnp.sin(ang)

  # full-width, lane-dense tables replicated across the head-concatenated layout
  zeros = jnp.zeros_like(sin)
  cos_full = jnp.tile(jnp.concatenate([cos, cos], axis=-1), (1, n_heads))        # (T, Wq)
  sin_first = jnp.tile(jnp.concatenate([-sin, zeros], axis=-1), (1, n_heads))    # (T, Wq)
  sin_second = jnp.tile(jnp.concatenate([zeros, sin], axis=-1), (1, n_heads))    # (T, Wq)

  out = transformer_block(
      x, (cos_full, sin_first, sin_second), params,
      n_heads=n_heads, n_kv_heads=n_kv_heads, head_dim=head_dim, eps=norm_eps)
  out = jax.block_until_ready(out)

  ref = reference_block(
      x, cos, sin, params,
      n_heads=n_heads, n_kv_heads=n_kv_heads, head_dim=head_dim, eps=norm_eps)

  assert out.shape == (B, S, K, dim)
  max_err = float(jnp.max(jnp.abs(out - ref)))
  # bf16 MXU inputs + approx reciprocals vs. an f32 reference -> modest tolerance
  assert jnp.allclose(out, ref, atol=3e-2, rtol=3e-2), f"mismatch vs reference: {max_err}"
  print("KERNEL_OK")
</pallas_src>

<mosaic_0001>
module attributes {stable_mosaic.version = 11 : i64} {
  func.func @_transformer_block_kernel(%arg0: i32, %arg1: memref<1x128x128xf32, #tpu.memory_space<vmem>>, %arg2: memref<128x512xf32, #tpu.memory_space<vmem>>, %arg3: memref<128x512xf32, #tpu.memory_space<vmem>>, %arg4: memref<128x512xf32, #tpu.memory_space<vmem>>, %arg5: memref<1x128xf32, #tpu.memory_space<vmem>>, %arg6: memref<128x512xbf16, #tpu.memory_space<vmem>>, %arg7: memref<128x256xbf16, #tpu.memory_space<vmem>>, %arg8: memref<128x256xbf16, #tpu.memory_space<vmem>>, %arg9: memref<512x128xbf16, #tpu.memory_space<vmem>>, %arg10: memref<1x128xf32, #tpu.memory_space<vmem>>, %arg11: memref<128x256xbf16, #tpu.memory_space<vmem>>, %arg12: memref<256x128xbf16, #tpu.memory_space<vmem>>, %arg13: memref<128x256xbf16, #tpu.memory_space<vmem>>, %arg14: memref<1x128x128xf32, #tpu.memory_space<vmem>>) attributes {dimension_semantics = [#tpu.dimension_semantics<parallel>], iteration_bounds = array<i64: 2>, scalar_prefetch = 0 : i64, scratch_operands = 0 : i64, tpu.core_type = #tpu.core_type<tc>, window_params = [{transform_indices = @transform_0, window_bounds = array<i64: 1, 128, 128>}, {pipeline_mode = #tpu.pipeline_mode<synchronous>, transform_indices = @transform_1, window_bounds = array<i64: 128, 512>}, {pipeline_mode = #tpu.pipeline_mode<synchronous>, transform_indices = @transform_2, window_bounds = array<i64: 128, 512>}, {pipeline_mode = #tpu.pipeline_mode<synchronous>, transform_indices = @transform_3, window_bounds = array<i64: 128, 512>}, {pipeline_mode = #tpu.pipeline_mode<synchronous>, transform_indices = @transform_4, window_bounds = array<i64: 1, 128>}, {pipeline_mode = #tpu.pipeline_mode<synchronous>, transform_indices = @transform_5, window_bounds = array<i64: 128, 512>}, {pipeline_mode = #tpu.pipeline_mode<synchronous>, transform_indices = @transform_6, window_bounds = array<i64: 128, 256>}, {pipeline_mode = #tpu.pipeline_mode<synchronous>, transform_indices = @transform_7, window_bounds = array<i64: 128, 256>}, {pipeline_mode = #tpu.pipeline_mode<synchronous>, transform_indices = @transform_8, window_bounds = array<i64: 512, 128>}, {pipeline_mode = #tpu.pipeline_mode<synchronous>, transform_indices = @transform_9, window_bounds = array<i64: 1, 128>}, {pipeline_mode = #tpu.pipeline_mode<synchronous>, transform_indices = @transform_10, window_bounds = array<i64: 128, 256>}, {pipeline_mode = #tpu.pipeline_mode<synchronous>, transform_indices = @transform_11, window_bounds = array<i64: 256, 128>}, {pipeline_mode = #tpu.pipeline_mode<synchronous>, transform_indices = @transform_12, window_bounds = array<i64: 128, 256>}, {transform_indices = @transform_13, window_bounds = array<i64: 1, 128, 128>}]} {
    %c0 = arith.constant 0 : index
    %c0_0 = arith.constant 0 : index
    %c0_1 = arith.constant 0 : index
    %0 = vector.load %arg1[%c0, %c0_0, %c0_1] : memref<1x128x128xf32, #tpu.memory_space<vmem>>, vector<1x128x128xf32>
    %1 = vector.shape_cast %0 : vector<1x128x128xf32> to vector<128x128xf32>
    %2 = arith.mulf %1, %1 : vector<128x128xf32>
    %cst = arith.constant dense<0.000000e+00> : vector<128xf32>
    %3 = vector.multi_reduction <add>, %2, %cst [1] : vector<128x128xf32> to vector<128xf32>
    %4 = vector.shape_cast %3 : vector<128xf32> to vector<128x1xf32>
    %cst_2 = arith.constant 1.280000e+02 : f32
    %5 = vector.broadcast %cst_2 : f32 to vector<128x1xf32>
    %6 = arith.divf %4, %5 : vector<128x1xf32>
    %cst_3 = arith.constant 9.99999974E-6 : f32
    %7 = vector.broadcast %cst_3 : f32 to vector<128x1xf32>
    %8 = arith.addf %6, %7 : vector<128x1xf32>
    %9 = math.rsqrt %8 : vector<128x1xf32>
    %10 = vector.broadcast %9 : vector<128x1xf32> to vector<128x128xf32>
    %11 = arith.mulf %1, %10 : vector<128x128xf32>
    %c0_4 = arith.constant 0 : index
    %c0_5 = arith.constant 0 : index
    %12 = vector.load %arg5[%c0_4, %c0_5] : memref<1x128xf32, #tpu.memory_space<vmem>>, vector<1x128xf32>
    %13 = vector.broadcast %12 : vector<1x128xf32> to vector<128x128xf32>
    %14 = arith.mulf %11, %13 : vector<128x128xf32>
    %15 = arith.truncf %14 : vector<128x128xf32> to vector<128x128xbf16>
    %c0_6 = arith.constant 0 : index
    %c0_7 = arith.constant 0 : index
    %16 = vector.load %arg6[%c0_6, %c0_7] : memref<128x512xbf16, #tpu.memory_space<vmem>>, vector<128x512xbf16>
    %cst_8 = arith.constant dense<0.000000e+00> : vector<128x512xf32>
    %17 = tpu.matmul %15, %16, %cst_8 {dimension_numbers = #tpu.dot_dimension_numbers<[1], [0], [0], [1], [0, 0, 1, 1], [], []>} : vector<128x128xbf16>, vector<128x512xbf16>, vector<128x512xf32> -> vector<128x512xf32>
    %c0_9 = arith.constant 0 : index
    %c0_10 = arith.constant 0 : index
    %18 = vector.load %arg7[%c0_9, %c0_10] : memref<128x256xbf16, #tpu.memory_space<vmem>>, vector<128x256xbf16>
    %cst_11 = arith.constant dense<0.000000e+00> : vector<128x256xf32>
    %19 = tpu.matmul %15, %18, %cst_11 {dimension_numbers = #tpu.dot_dimension_numbers<[1], [0], [0], [1], [0, 0, 1, 1], [], []>} : vector<128x128xbf16>, vector<128x256xbf16>, vector<128x256xf32> -> vector<128x256xf32>
    %c0_12 = arith.constant 0 : index
    %c0_13 = arith.constant 0 : index
    %20 = vector.load %arg8[%c0_12, %c0_13] : memref<128x256xbf16, #tpu.memory_space<vmem>>, vector<128x256xbf16>
    %cst_14 = arith.constant dense<0.000000e+00> : vector<128x256xf32>
    %21 = tpu.matmul %15, %20, %cst_14 {dimension_numbers = #tpu.dot_dimension_numbers<[1], [0], [0], [1], [0, 0, 1, 1], [], []>} : vector<128x128xbf16>, vector<128x256xbf16>, vector<128x256xf32> -> vector<128x256xf32>
    %c0_15 = arith.constant 0 : index
    %c0_16 = arith.constant 0 : index
    %22 = vector.load %arg2[%c0_15, %c0_16] : memref<128x512xf32, #tpu.memory_space<vmem>>, vector<128x512xf32>
    %c0_17 = arith.constant 0 : index
    %c0_18 = arith.constant 0 : index
    %23 = vector.load %arg3[%c0_17, %c0_18] : memref<128x512xf32, #tpu.memory_space<vmem>>, vector<128x512xf32>
    %c0_19 = arith.constant 0 : index
    %c0_20 = arith.constant 0 : index
    %24 = vector.load %arg4[%c0_19, %c0_20] : memref<128x512xf32, #tpu.memory_space<vmem>>, vector<128x512xf32>
    %c448_i32 = arith.constant 448 : i32
    %25 = tpu.dynamic_rotate %17 by %c448_i32 dim 1 : vector<128x512xf32>, i32 -> vector<128x512xf32>
    %c64_i32 = arith.constant 64 : i32
    %26 = tpu.dynamic_rotate %17 by %c64_i32 dim 1 : vector<128x512xf32>, i32 -> vector<128x512xf32>
    %27 = arith.mulf %17, %22 : vector<128x512xf32>
    %28 = arith.mulf %25, %23 : vector<128x512xf32>
    %29 = arith.addf %27, %28 : vector<128x512xf32>
    %30 = arith.mulf %26, %24 : vector<128x512xf32>
    %31 = arith.addf %29, %30 : vector<128x512xf32>
    %cst_21 = arith.constant 0.0883883461 : f32
    %32 = vector.broadcast %cst_21 : f32 to vector<128x512xf32>
    %33 = arith.mulf %31, %32 : vector<128x512xf32>
    %34 = arith.truncf %33 : vector<128x512xf32> to vector<128x512xbf16>
    %c192_i32 = arith.constant 192 : i32
    %35 = tpu.dynamic_rotate %19 by %c192_i32 dim 1 : vector<128x256xf32>, i32 -> vector<128x256xf32>
    %c64_i32_22 = arith.constant 64 : i32
    %36 = tpu.dynamic_rotate %19 by %c64_i32_22 dim 1 : vector<128x256xf32>, i32 -> vector<128x256xf32>
    %37 = vector.extract_strided_slice %22 {offsets = [0, 0], sizes = [128, 256], strides = [1, 1]} : vector<128x512xf32> to vector<128x256xf32>
    %38 = arith.mulf %19, %37 : vector<128x256xf32>
    %39 = vector.extract_strided_slice %23 {offsets = [0, 0], sizes = [128, 256], strides = [1, 1]} : vector<128x512xf32> to vector<128x256xf32>
    %40 = arith.mulf %35, %39 : vector<128x256xf32>
    %41 = arith.addf %38, %40 : vector<128x256xf32>
    %42 = vector.extract_strided_slice %24 {offsets = [0, 0], sizes = [128, 256], strides = [1, 1]} : vector<128x512xf32> to vector<128x256xf32>
    %43 = arith.mulf %36, %42 : vector<128x256xf32>
    %44 = arith.addf %41, %43 : vector<128x256xf32>
    %45 = arith.truncf %44 : vector<128x256xf32> to vector<128x256xbf16>
    %46 = arith.truncf %21 : vector<128x256xf32> to vector<128x256xbf16>
    %47 = vector.extract_strided_slice %34 {offsets = [0, 0], sizes = [128, 128], strides = [1, 1]} : vector<128x512xbf16> to vector<128x128xbf16>
    %48 = vector.extract_strided_slice %45 {offsets = [0, 0], sizes = [128, 128], strides = [1, 1]} : vector<128x256xbf16> to vector<128x128xbf16>
    %49 = vector.extract_strided_slice %46 {offsets = [0, 0], sizes = [128, 128], strides = [1, 1]} : vector<128x256xbf16> to vector<128x128xbf16>
    %cst_23 = arith.constant dense<0.000000e+00> : vector<128x128xf32>
    %50 = tpu.matmul %47, %48, %cst_23 {dimension_numbers = #tpu.dot_dimension_numbers<[1], [1], [0], [0], [0, 0, 1, 0], [], []>} : vector<128x128xbf16>, vector<128x128xbf16>, vector<128x128xf32> -> vector<128x128xf32>
    %cst_24 = arith.constant dense<0xFF800000> : vector<128xf32>
    %51 = vector.multi_reduction <maximumf>, %50, %cst_24 [1] : vector<128x128xf32> to vector<128xf32>
    %52 = vector.shape_cast %51 : vector<128xf32> to vector<128x1xf32>
    %53 = vector.broadcast %52 : vector<128x1xf32> to vector<128x128xf32>
    %54 = arith.subf %50, %53 : vector<128x128xf32>
    %55 = math.exp %54 : vector<128x128xf32>
    %cst_25 = arith.constant dense<0.000000e+00> : vector<128xf32>
    %56 = vector.multi_reduction <add>, %55, %cst_25 [1] : vector<128x128xf32> to vector<128xf32>
    %57 = vector.shape_cast %56 : vector<128xf32> to vector<128x1xf32>
    %58 = tpu.reciprocal %57 {approx = true} : vector<128x1xf32> -> vector<128x1xf32>
    %59 = vector.broadcast %58 : vector<128x1xf32> to vector<128x128xf32>
    %60 = arith.mulf %55, %59 : vector<128x128xf32>
    %61 = arith.truncf %60 : vector<128x128xf32> to vector<128x128xbf16>
    %cst_26 = arith.constant dense<0.000000e+00> : vector<128x128xf32>
    %62 = tpu.matmul %61, %49, %cst_26 {dimension_numbers = #tpu.dot_dimension_numbers<[1], [0], [0], [1], [0, 0, 1, 1], [], []>} : vector<128x128xbf16>, vector<128x128xbf16>, vector<128x128xf32> -> vector<128x128xf32>
    %63 = vector.extract_strided_slice %34 {offsets = [0, 128], sizes = [128, 128], strides = [1, 1]} : vector<128x512xbf16> to vector<128x128xbf16>
    %64 = vector.extract_strided_slice %45 {offsets = [0, 0], sizes = [128, 128], strides = [1, 1]} : vector<128x256xbf16> to vector<128x128xbf16>
    %65 = vector.extract_strided_slice %46 {offsets = [0, 0], sizes = [128, 128], strides = [1, 1]} : vector<128x256xbf16> to vector<128x128xbf16>
    %cst_27 = arith.constant dense<0.000000e+00> : vector<128x128xf32>
    %66 = tpu.matmul %63, %64, %cst_27 {dimension_numbers = #tpu.dot_dimension_numbers<[1], [1], [0], [0], [0, 0, 1, 0], [], []>} : vector<128x128xbf16>, vector<128x128xbf16>, vector<128x128xf32> -> vector<128x128xf32>
    %cst_28 = arith.constant dense<0xFF800000> : vector<128xf32>
    %67 = vector.multi_reduction <maximumf>, %66, %cst_28 [1] : vector<128x128xf32> to vector<128xf32>
    %68 = vector.shape_cast %67 : vector<128xf32> to vector<128x1xf32>
    %69 = vector.broadcast %68 : vector<128x1xf32> to vector<128x128xf32>
    %70 = arith.subf %66, %69 : vector<128x128xf32>
    %71 = math.exp %70 : vector<128x128xf32>
    %cst_29 = arith.constant dense<0.000000e+00> : vector<128xf32>
    %72 = vector.multi_reduction <add>, %71, %cst_29 [1] : vector<128x128xf32> to vector<128xf32>
    %73 = vector.shape_cast %72 : vector<128xf32> to vector<128x1xf32>
    %74 = tpu.reciprocal %73 {approx = true} : vector<128x1xf32> -> vector<128x1xf32>
    %75 = vector.broadcast %74 : vector<128x1xf32> to vector<128x128xf32>
    %76 = arith.mulf %71, %75 : vector<128x128xf32>
    %77 = arith.truncf %76 : vector<128x128xf32> to vector<128x128xbf16>
    %cst_30 = arith.constant dense<0.000000e+00> : vector<128x128xf32>
    %78 = tpu.matmul %77, %65, %cst_30 {dimension_numbers = #tpu.dot_dimension_numbers<[1], [0], [0], [1], [0, 0, 1, 1], [], []>} : vector<128x128xbf16>, vector<128x128xbf16>, vector<128x128xf32> -> vector<128x128xf32>
    %79 = vector.extract_strided_slice %34 {offsets = [0, 256], sizes = [128, 128], strides = [1, 1]} : vector<128x512xbf16> to vector<128x128xbf16>
    %80 = vector.extract_strided_slice %45 {offsets = [0, 128], sizes = [128, 128], strides = [1, 1]} : vector<128x256xbf16> to vector<128x128xbf16>
    %81 = vector.extract_strided_slice %46 {offsets = [0, 128], sizes = [128, 128], strides = [1, 1]} : vector<128x256xbf16> to vector<128x128xbf16>
    %cst_31 = arith.constant dense<0.000000e+00> : vector<128x128xf32>
    %82 = tpu.matmul %79, %80, %cst_31 {dimension_numbers = #tpu.dot_dimension_numbers<[1], [1], [0], [0], [0, 0, 1, 0], [], []>} : vector<128x128xbf16>, vector<128x128xbf16>, vector<128x128xf32> -> vector<128x128xf32>
    %cst_32 = arith.constant dense<0xFF800000> : vector<128xf32>
    %83 = vector.multi_reduction <maximumf>, %82, %cst_32 [1] : vector<128x128xf32> to vector<128xf32>
    %84 = vector.shape_cast %83 : vector<128xf32> to vector<128x1xf32>
    %85 = vector.broadcast %84 : vector<128x1xf32> to vector<128x128xf32>
    %86 = arith.subf %82, %85 : vector<128x128xf32>
    %87 = math.exp %86 : vector<128x128xf32>
    %cst_33 = arith.constant dense<0.000000e+00> : vector<128xf32>
    %88 = vector.multi_reduction <add>, %87, %cst_33 [1] : vector<128x128xf32> to vector<128xf32>
    %89 = vector.shape_cast %88 : vector<128xf32> to vector<128x1xf32>
    %90 = tpu.reciprocal %89 {approx = true} : vector<128x1xf32> -> vector<128x1xf32>
    %91 = vector.broadcast %90 : vector<128x1xf32> to vector<128x128xf32>
    %92 = arith.mulf %87, %91 : vector<128x128xf32>
    %93 = arith.truncf %92 : vector<128x128xf32> to vector<128x128xbf16>
    %cst_34 = arith.constant dense<0.000000e+00> : vector<128x128xf32>
    %94 = tpu.matmul %93, %81, %cst_34 {dimension_numbers = #tpu.dot_dimension_numbers<[1], [0], [0], [1], [0, 0, 1, 1], [], []>} : vector<128x128xbf16>, vector<128x128xbf16>, vector<128x128xf32> -> vector<128x128xf32>
    %95 = vector.extract_strided_slice %34 {offsets = [0, 384], sizes = [128, 128], strides = [1, 1]} : vector<128x512xbf16> to vector<128x128xbf16>
    %96 = vector.extract_strided_slice %45 {offsets = [0, 128], sizes = [128, 128], strides = [1, 1]} : vector<128x256xbf16> to vector<128x128xbf16>
    %97 = vector.extract_strided_slice %46 {offsets = [0, 128], sizes = [128, 128], strides = [1, 1]} : vector<128x256xbf16> to vector<128x128xbf16>
    %cst_35 = arith.constant dense<0.000000e+00> : vector<128x128xf32>
    %98 = tpu.matmul %95, %96, %cst_35 {dimension_numbers = #tpu.dot_dimension_numbers<[1], [1], [0], [0], [0, 0, 1, 0], [], []>} : vector<128x128xbf16>, vector<128x128xbf16>, vector<128x128xf32> -> vector<128x128xf32>
    %cst_36 = arith.constant dense<0xFF800000> : vector<128xf32>
    %99 = vector.multi_reduction <maximumf>, %98, %cst_36 [1] : vector<128x128xf32> to vector<128xf32>
    %100 = vector.shape_cast %99 : vector<128xf32> to vector<128x1xf32>
    %101 = vector.broadcast %100 : vector<128x1xf32> to vector<128x128xf32>
    %102 = arith.subf %98, %101 : vector<128x128xf32>
    %103 = math.exp %102 : vector<128x128xf32>
    %cst_37 = arith.constant dense<0.000000e+00> : vector<128xf32>
    %104 = vector.multi_reduction <add>, %103, %cst_37 [1] : vector<128x128xf32> to vector<128xf32>
    %105 = vector.shape_cast %104 : vector<128xf32> to vector<128x1xf32>
    %106 = tpu.reciprocal %105 {approx = true} : vector<128x1xf32> -> vector<128x1xf32>
    %107 = vector.broadcast %106 : vector<128x1xf32> to vector<128x128xf32>
    %108 = arith.mulf %103, %107 : vector<128x128xf32>
    %109 = arith.truncf %108 : vector<128x128xf32> to vector<128x128xbf16>
    %cst_38 = arith.constant dense<0.000000e+00> : vector<128x128xf32>
    %110 = tpu.matmul %109, %97, %cst_38 {dimension_numbers = #tpu.dot_dimension_numbers<[1], [0], [0], [1], [0, 0, 1, 1], [], []>} : vector<128x128xbf16>, vector<128x128xbf16>, vector<128x128xf32> -> vector<128x128xf32>
    %111 = tpu.concatenate %62, %78, %94, %110 in 1 : vector<128x128xf32>, vector<128x128xf32>, vector<128x128xf32>, vector<128x128xf32> -> vector<128x512xf32>
    %112 = arith.truncf %111 : vector<128x512xf32> to vector<128x512xbf16>
    %c0_39 = arith.constant 0 : index
    %c0_40 = arith.constant 0 : index
    %113 = vector.load %arg9[%c0_39, %c0_40] : memref<512x128xbf16, #tpu.memory_space<vmem>>, vector<512x128xbf16>
    %cst_41 = arith.constant dense<0.000000e+00> : vector<128x128xf32>
    %114 = tpu.matmul %112, %113, %cst_41 {dimension_numbers = #tpu.dot_dimension_numbers<[1], [0], [0], [1], [0, 0, 1, 1], [], []>} : vector<128x512xbf16>, vector<512x128xbf16>, vector<128x128xf32> -> vector<128x128xf32>
    %115 = arith.addf %1, %114 : vector<128x128xf32>
    %116 = arith.mulf %115, %115 : vector<128x128xf32>
    %cst_42 = arith.constant dense<0.000000e+00> : vector<128xf32>
    %117 = vector.multi_reduction <add>, %116, %cst_42 [1] : vector<128x128xf32> to vector<128xf32>
    %118 = vector.shape_cast %117 : vector<128xf32> to vector<128x1xf32>
    %cst_43 = arith.constant 1.280000e+02 : f32
    %119 = vector.broadcast %cst_43 : f32 to vector<128x1xf32>
    %120 = arith.divf %118, %119 : vector<128x1xf32>
    %cst_44 = arith.constant 9.99999974E-6 : f32
    %121 = vector.broadcast %cst_44 : f32 to vector<128x1xf32>
    %122 = arith.addf %120, %121 : vector<128x1xf32>
    %123 = math.rsqrt %122 : vector<128x1xf32>
    %124 = vector.broadcast %123 : vector<128x1xf32> to vector<128x128xf32>
    %125 = arith.mulf %115, %124 : vector<128x128xf32>
    %c0_45 = arith.constant 0 : index
    %c0_46 = arith.constant 0 : index
    %126 = vector.load %arg10[%c0_45, %c0_46] : memref<1x128xf32, #tpu.memory_space<vmem>>, vector<1x128xf32>
    %127 = vector.broadcast %126 : vector<1x128xf32> to vector<128x128xf32>
    %128 = arith.mulf %125, %127 : vector<128x128xf32>
    %129 = arith.truncf %128 : vector<128x128xf32> to vector<128x128xbf16>
    %c0_47 = arith.constant 0 : index
    %c0_48 = arith.constant 0 : index
    %130 = vector.load %arg11[%c0_47, %c0_48] : memref<128x256xbf16, #tpu.memory_space<vmem>>, vector<128x256xbf16>
    %cst_49 = arith.constant dense<0.000000e+00> : vector<128x256xf32>
    %131 = tpu.matmul %129, %130, %cst_49 {dimension_numbers = #tpu.dot_dimension_numbers<[1], [0], [0], [1], [0, 0, 1, 1], [], []>} : vector<128x128xbf16>, vector<128x256xbf16>, vector<128x256xf32> -> vector<128x256xf32>
    %c0_50 = arith.constant 0 : index
    %c0_51 = arith.constant 0 : index
    %132 = vector.load %arg13[%c0_50, %c0_51] : memref<128x256xbf16, #tpu.memory_space<vmem>>, vector<128x256xbf16>
    %cst_52 = arith.constant dense<0.000000e+00> : vector<128x256xf32>
    %133 = tpu.matmul %129, %132, %cst_52 {dimension_numbers = #tpu.dot_dimension_numbers<[1], [0], [0], [1], [0, 0, 1, 1], [], []>} : vector<128x128xbf16>, vector<128x256xbf16>, vector<128x256xf32> -> vector<128x256xf32>
    %cst_53 = arith.constant 0.000000e+00 : f32
    %134 = vector.broadcast %cst_53 : f32 to vector<128x256xf32>
    %135 = arith.subf %134, %131 : vector<128x256xf32>
    %136 = math.exp %135 : vector<128x256xf32>
    %cst_54 = arith.constant 1.000000e+00 : f32
    %137 = vector.broadcast %cst_54 : f32 to vector<128x256xf32>
    %138 = arith.addf %137, %136 : vector<128x256xf32>
    %139 = tpu.reciprocal %138 {approx = true} : vector<128x256xf32> -> vector<128x256xf32>
    %140 = arith.mulf %131, %139 : vector<128x256xf32>
    %141 = arith.mulf %140, %133 : vector<128x256xf32>
    %142 = arith.truncf %141 : vector<128x256xf32> to vector<128x256xbf16>
    %c0_55 = arith.constant 0 : index
    %c0_56 = arith.constant 0 : index
    %143 = vector.load %arg12[%c0_55, %c0_56] : memref<256x128xbf16, #tpu.memory_space<vmem>>, vector<256x128xbf16>
    %cst_57 = arith.constant dense<0.000000e+00> : vector<128x128xf32>
    %144 = tpu.matmul %142, %143, %cst_57 {dimension_numbers = #tpu.dot_dimension_numbers<[1], [0], [0], [1], [0, 0, 1, 1], [], []>} : vector<128x256xbf16>, vector<256x128xbf16>, vector<128x128xf32> -> vector<128x128xf32>
    %145 = arith.addf %115, %144 : vector<128x128xf32>
    %c0_58 = arith.constant 0 : index
    %c0_59 = arith.constant 0 : index
    %c0_60 = arith.constant 0 : index
    %146 = vector.load %arg14[%c0_58, %c0_59, %c0_60] : memref<1x128x128xf32, #tpu.memory_space<vmem>>, vector<1x128x128xf32>
    %147 = vector.shape_cast %146 : vector<1x128x128xf32> to vector<128x128xf32>
    %148 = vector.shape_cast %145 : vector<128x128xf32> to vector<1x128x128xf32>
    tpu.vector_store %arg14[%c0_58, %c0_59, %c0_60], %148 {strides = array<i32>} : memref<1x128x128xf32, #tpu.memory_space<vmem>>, vector<1x128x128xf32>,
    return
  }
  func.func @transform_0(%arg0: i32) -> (i32, i32, i32) {
    %c0_i32 = arith.constant 0 : i32
    %c0_i32_0 = arith.constant 0 : i32
    %c0_i32_1 = arith.constant 0 : i32
    return %arg0, %c0_i32, %c0_i32_0 : i32, i32, i32
  }
  func.func @transform_1(%arg0: i32) -> (i32, i32) {
    %c0_i32 = arith.constant 0 : i32
    %c0_i32_0 = arith.constant 0 : i32
    %c0_i32_1 = arith.constant 0 : i32
    return %c0_i32, %c0_i32_0 : i32, i32
  }
  func.func @transform_2(%arg0: i32) -> (i32, i32) {
    %c0_i32 = arith.constant 0 : i32
    %c0_i32_0 = arith.constant 0 : i32
    %c0_i32_1 = arith.constant 0 : i32
    return %c0_i32, %c0_i32_0 : i32, i32
  }
  func.func @transform_3(%arg0: i32) -> (i32, i32) {
    %c0_i32 = arith.constant 0 : i32
    %c0_i32_0 = arith.constant 0 : i32
    %c0_i32_1 = arith.constant 0 : i32
    return %c0_i32, %c0_i32_0 : i32, i32
  }
  func.func @transform_4(%arg0: i32) -> (i32, i32) {
    %c0_i32 = arith.constant 0 : i32
    %c0_i32_0 = arith.constant 0 : i32
    %c0_i32_1 = arith.constant 0 : i32
    return %c0_i32, %c0_i32_0 : i32, i32
  }
  func.func @transform_5(%arg0: i32) -> (i32, i32) {
    %c0_i32 = arith.constant 0 : i32
    %c0_i32_0 = arith.constant 0 : i32
    %c0_i32_1 = arith.constant 0 : i32
    return %c0_i32, %c0_i32_0 : i32, i32
  }
  func.func @transform_6(%arg0: i32) -> (i32, i32) {
    %c0_i32 = arith.constant 0 : i32
    %c0_i32_0 = arith.constant 0 : i32
    %c0_i32_1 = arith.constant 0 : i32
    return %c0_i32, %c0_i32_0 : i32, i32
  }
  func.func @transform_7(%arg0: i32) -> (i32, i32) {
    %c0_i32 = arith.constant 0 : i32
    %c0_i32_0 = arith.constant 0 : i32
    %c0_i32_1 = arith.constant 0 : i32
    return %c0_i32, %c0_i32_0 : i32, i32
  }
  func.func @transform_8(%arg0: i32) -> (i32, i32) {
    %c0_i32 = arith.constant 0 : i32
    %c0_i32_0 = arith.constant 0 : i32
    %c0_i32_1 = arith.constant 0 : i32
    return %c0_i32, %c0_i32_0 : i32, i32
  }
  func.func @transform_9(%arg0: i32) -> (i32, i32) {
    %c0_i32 = arith.constant 0 : i32
    %c0_i32_0 = arith.constant 0 : i32
    %c0_i32_1 = arith.constant 0 : i32
    return %c0_i32, %c0_i32_0 : i32, i32
  }
  func.func @transform_10(%arg0: i32) -> (i32, i32) {
    %c0_i32 = arith.constant 0 : i32
    %c0_i32_0 = arith.constant 0 : i32
    %c0_i32_1 = arith.constant 0 : i32
    return %c0_i32, %c0_i32_0 : i32, i32
  }
  func.func @transform_11(%arg0: i32) -> (i32, i32) {
    %c0_i32 = arith.constant 0 : i32
    %c0_i32_0 = arith.constant 0 : i32
    %c0_i32_1 = arith.constant 0 : i32
    return %c0_i32, %c0_i32_0 : i32, i32
  }
  func.func @transform_12(%arg0: i32) -> (i32, i32) {
    %c0_i32 = arith.constant 0 : i32
    %c0_i32_0 = arith.constant 0 : i32
    %c0_i32_1 = arith.constant 0 : i32
    return %c0_i32, %c0_i32_0 : i32, i32
  }
  func.func @transform_13(%arg0: i32) -> (i32, i32, i32) {
    %c0_i32 = arith.constant 0 : i32
    %c0_i32_0 = arith.constant 0 : i32
    %c0_i32_1 = arith.constant 0 : i32
    return %arg0, %c0_i32, %c0_i32_0 : i32, i32, i32
  }
}

</mosaic_0001>

<bundles_post_ra>
// kernel: tpu_custom_call.1
= control target key start
LH: loop header
LB: loop body
LE: loop exit
PB: predicated region body
PF: predicated region fallthrough
CT: control target
= control target key end

     0   :  { %s11476_s0 = inlined_call_operand.hbm [shape: f32[2,128,128], index: 0, kind: input, shape index: {}]   ;;  %s11477_s1 = inlined_call_operand.hbm [shape: f32[128,512], index: 1, kind: input, shape index: {}]   ;;  %s11478_s2 = inlined_call_operand.hbm [shape: f32[128,512], index: 2, kind: input, shape index: {}]   ;;  %s11479_s3 = inlined_call_operand.hbm [shape: f32[128,512], index: 3, kind: input, shape index: {}]   ;;  %s11480_s4 = inlined_call_operand.vmem [shape: f32[1,128], index: 4, kind: input, shape index: {}]   ;;  %s11481_s5 = inlined_call_operand.hbm [shape: bf16[128,512], index: 5, kind: input, shape index: {}]   ;;  %s11482_s6 = inlined_call_operand.hbm [shape: bf16[128,256], index: 6, kind: input, shape index: {}]   ;;  %s11483_s7 = inlined_call_operand.hbm [shape: bf16[128,256], index: 7, kind: input, shape index: {}]   ;;  %s11484_s8 = inlined_call_operand.hbm [shape: bf16[512,128], index: 8, kind: input, shape index: {}]   ;;  %s11485_s9 = inlined_call_operand.vmem [shape: f32[1,128], index: 9, kind: input, shape index: {}]   ;;  %s11486_s10 = inlined_call_operand.hbm [shape: bf16[128,256], index: 10, kind: input, shape index: {}]   ;;  %s11487_s11 = inlined_call_operand.hbm [shape: bf16[256,128], index: 11, kind: input, shape index: {}]   ;;  %s11488_s12 = inlined_call_operand.hbm [shape: bf16[128,256], index: 12, kind: input, shape index: {}]   ;;  %s11489_s13 = inlined_call_operand.hbm [shape: f32[2,128,128], index: 13, kind: output, shape index: {}]  }
   0x1   :  { %11706 = sst [smem:[#allocation158_spill]] %s11476_s0 }
   0x2   :  { %11707 = sst [smem:[#allocation159_spill]] %s11477_s1 }
   0x3   :  { %11708 = sst [smem:[#allocation160_spill]] %s11478_s2 }
   0x4   :  { %11709 = sst [smem:[#allocation161_spill]] %s11479_s3 }
   0x5   :  { %11710 = sst [smem:[#allocation162_spill]] %s11480_s4 }
   0x6   :  { %11711 = sst [smem:[#allocation163_spill]] %s11485_s9 }
   0x7   :  { %11712 = sst [smem:[#allocation164_spill]] %s11489_s13 }
   0x8   :  { %18 = vsyncpa [#allocation3], 0 }
   0x9   :  { %20 = vsyncpa [#allocation3 + $0x1], 0 }
   0xa   :  { %21 = vsyncpa [#allocation6], 0 }
   0xb   :  { %22 = vsyncpa [#allocation9], 0 }
   0xc   :  { %23 = vsyncpa [#allocation12], 0 }
   0xd   :  { %24 = vsyncpa [#allocation15], 0 }
   0xe   :  { %25 = vsyncpa [#allocation18], 0 }
   0xf   :  { %26 = vsyncpa [#allocation4], 0 }
  0x10   :  { %28 = vsyncpa [#allocation4 + $0x1], 0  ;;  %s7929_s25 = smov 0   ;;  %s7931_s26 = smov 0  }
  0x11   :  { %s7933_s27 = smov 0   ;;  %s7935_s28 = smov 0  }
  0x12 LB: > { %s7835_s29 = smov [#allocation5]   ;;  %s7950_s14 = sadd.s32 4294967295, %s7833_s28   ;;  %s7833_s28 = sphi %s7935_s28, %s12336_s28   ;;  %s7829_s27 = sphi %s7933_s27, %s12335_s27   ;;  %s7825_s26 = sphi %s7931_s26, %s12334_s26   ;;  %s7821_s25 = sphi %s7929_s25, %s12333_s25  }
  0x13   : > { %s355_s30 = sshll.u32 %s7835_s29, 4  ;;  %p5815_p0 = scmp.ge.s32.totalorder %s7833_s28, 1  ;;  %s7955_s30 = int_to_ptr.vmem [resolvable:$true] %s355_s30 }
  0x14   : > { %p11495_p1 = scmp.eq.s32.totalorder %s7950_s14, 0  ;;  %p343_p2 = scmp.lt.s32.totalorder %s7833_s28, 3 }
  0x15   : > { %s7836_s16 = smov [#allocation8]   ;;  %s7837_s19 = smov [#allocation11]  }
  0x16   : > { %p7957_p3 = pnand %p5815_p0, %p343_p2  ;;  %s381_s17 = sshll.u32 %s7836_s16, 4  ;;  %s7970_s17 = int_to_ptr.vmem [resolvable:$true] %s381_s17 }
  0x17   : > { %s410_s20 = sshll.u32 %s7837_s19, 4  ;;  %s11716_s1 = sld [smem:[#allocation159_spill]]  ;;  %s7972_s20 = int_to_ptr.vmem [resolvable:$true] %s410_s20 }
  0x18   : > { %s11713_s15 = scalar_select %p7957_p3, 1, 0 }
  0x19   : > { %p6632_p5 = pneg %p7957_p3 }
  0x1a   : > { %11714 = sst [smem:[#allocation28_spill]] %s11713_s15 }
  0x1b   : > { %p7966_p6 = pnand %p6632_p5, %p11495_p1 }
  0x1d   : > { %s7437_s23 = scalar_lea.hbm %s11716_s1, 8192  ;;  %p7982_p8 = pneg %p7966_p6 }
  0x1e   : > { %p7438_p7 = scmp.ne.s32.totalorder %s11716_s1, %s7437_s23  ;;  %p7444_p11 = scmp.lt.u32.totalorder %s7437_s23, %s11716_s1 }
  0x20   : > { %p7440_p9 = pnand %p7982_p8, %p7438_p7 }
  0x22   : > { %p7441_p10 = pneg %p7440_p9 }
  0x24   : > { %p7446_p12 = pnand %p7444_p11, %p7441_p10 }
  0x26   : > { %7449 = shalt.err (!%p7446_p12)
}
  0x27   : > { %s7450_s21 = scalar_lea.vmem %s7955_s30, 8192  ;;  %p7458_p5 = scmp.lt.s32.totalorder %s7955_s30, %s7955_s30 }
  0x28   : > { %p7451_p13 = scmp.ne.s32.totalorder %s7955_s30, %s7450_s21  ;;  %p7459_p4 = scmp.lt.s32.totalorder %s7450_s21, %s7450_s21 }
  0x2a   : > { %p7453_p0 = pnand %p7451_p13, %p7982_p8  ;;  %p7460_p7 = por %p7459_p4, %p7458_p5 }
  0x2c   : > { %p7454_p2 = pneg %p7453_p0 }
  0x2e   : > { %p7461_p9 = pnand %p7460_p7, %p7454_p2 }
  0x30   : > { %7464 = shalt.err (!%p7461_p9)
}
  0x31   : > { %s11493_s22 = smov 512   ;;  %s11494_s13 = smov 32  }
  0x32   : > { %6635 = dma.hbm_to_vmem [thread:$0]  (!%p7966_p6), %s11716_s1, 8192, %s7955_s30, [#allocation6], %s11493_s22, %s11493_s22, %s11494_s13  }
  0x33   : > { %s11718_s3 = sld [smem:[#allocation161_spill]] }
  0x39   : > { %s7465_s21 = scalar_lea.hbm %s11718_s3, 8192 }
  0x3a   : > { %p7466_p4 = scmp.ne.s32.totalorder %s11718_s3, %s7465_s21  ;;  %p7472_p12 = scmp.lt.u32.totalorder %s7465_s21, %s11718_s3 }
  0x3c   : > { %p7468_p10 = pnand %p7466_p4, %p7982_p8 }
  0x3e   : > { %p7469_p11 = pneg %p7468_p10 }
  0x40   : > { %p7474_p13 = pnand %p7472_p12, %p7469_p11 }
  0x42   : > { %7477 = shalt.err (!%p7474_p13)
}
  0x43   : > { %s7478_s30 = scalar_lea.vmem %s7970_s17, 8192  ;;  %p7486_p7 = scmp.lt.s32.totalorder %s7970_s17, %s7970_s17 }
  0x44   : > { %p7479_p0 = scmp.ne.s32.totalorder %s7970_s17, %s7478_s30  ;;  %p7487_p9 = scmp.lt.s32.totalorder %s7478_s30, %s7478_s30 }
  0x46   : > { %p7481_p2 = pnand %p7479_p0, %p7982_p8  ;;  %p7488_p4 = por %p7487_p9, %p7486_p7 }
  0x48   : > { %p7482_p5 = pneg %p7481_p2 }
  0x4a   : > { %p7489_p10 = pnand %p7488_p4, %p7482_p5 }
  0x4c   : > { %7492 = shalt.err (!%p7489_p10)
}
  0x4d   : > { %6641 = dma.hbm_to_vmem [thread:$0]  (!%p7966_p6), %s11718_s3, 8192, %s7970_s17, [#allocation9], %s11493_s22, %s11493_s22, %s11494_s13  }
  0x4e   : > { %s7493_s23 = scalar_lea.hbm %s11482_s6, 2048 }
  0x4f   : > { %p7494_p11 = scmp.ne.s32.totalorder %s11482_s6, %s7493_s23  ;;  %p7500_p0 = scmp.lt.u32.totalorder %s7493_s23, %s11482_s6 }
  0x51   : > { %p7496_p12 = pnand %p7494_p11, %p7982_p8 }
  0x53   : > { %p7497_p13 = pneg %p7496_p12 }
  0x55   : > { %p7502_p2 = pnand %p7500_p0, %p7497_p13 }
  0x57   : > { %7505 = shalt.err (!%p7502_p2)
}
  0x58   : > { %s7506_s17 = scalar_lea.vmem %s7972_s20, 2048  ;;  %p7514_p4 = scmp.lt.s32.totalorder %s7972_s20, %s7972_s20 }
  0x59   : > { %p7507_p5 = scmp.ne.s32.totalorder %s7972_s20, %s7506_s17  ;;  %p7515_p10 = scmp.lt.s32.totalorder %s7506_s17, %s7506_s17 }
  0x5b   : > { %p7509_p7 = pnand %p7507_p5, %p7982_p8  ;;  %p7516_p11 = por %p7515_p10, %p7514_p4 }
  0x5d   : > { %p7510_p9 = pneg %p7509_p7 }
  0x5f   : > { %p7517_p12 = pnand %p7516_p11, %p7510_p9 }
  0x61   : > { %7520 = shalt.err (!%p7517_p12)
}
  0x62   : > { %s11497_s30 = smov 128   ;;  %s11499_s0 = smov 8  }
  0x63   : > { %6647 = dma.hbm_to_vmem [thread:$0]  (!%p7966_p6), %s11482_s6, 2048, %s7972_s20, [#allocation12], %s11497_s30, %s11497_s30, %s11499_s0  }
  0x64   : > { %s7842_s15 = smov [#allocation14]   ;;  %s7521_s19 = scalar_lea.hbm %s11484_s8, 4096 }
  0x65   : > { %s436_s23 = sshll.u32 %s7842_s15, 4  ;;  %p7522_p13 = scmp.ne.s32.totalorder %s11484_s8, %s7521_s19  ;;  %s437_s23 = int_to_ptr.vmem [resolvable:$true] %s436_s23 }
  0x66   : > { %p7528_p5 = scmp.lt.u32.totalorder %s7521_s19, %s11484_s8 }
  0x67   : > { %p7524_p0 = pnand %p7522_p13, %p7982_p8 }
  0x69   : > { %p7525_p2 = pneg %p7524_p0 }
  0x6b   : > { %p7530_p7 = pnand %p7528_p5, %p7525_p2 }
  0x6d   : > { %7533 = shalt.err (!%p7530_p7)
}
  0x6e   : > { %s7534_s20 = scalar_lea.vmem %s437_s23, 4096  ;;  %p7542_p11 = scmp.lt.s32.totalorder %s437_s23, %s437_s23 }
  0x6f   : > { %p7535_p9 = scmp.ne.s32.totalorder %s437_s23, %s7534_s20  ;;  %p7543_p12 = scmp.lt.s32.totalorder %s7534_s20, %s7534_s20 }
  0x71   : > { %p7537_p4 = pnand %p7535_p9, %p7982_p8  ;;  %p7544_p1 = por %p7543_p12, %p7542_p11 }
  0x73   : > { %p7538_p10 = pneg %p7537_p4 }
  0x75   : > { %p7545_p3 = pnand %p7544_p1, %p7538_p10 }
  0x77   : > { %7548 = shalt.err (!%p7545_p3)
}
  0x78   : > { %s7843_s4 = smov 64   ;;  %s7844_s9 = smov 4  }
  0x79   : > { %6653 = dma.hbm_to_vmem [thread:$0]  (!%p7966_p6), %s11484_s8, 4096, %s437_s23, [#allocation15], %s7843_s4, %s7843_s4, %s7844_s9  }
  0x7a   : > { %s7845_s15 = smov [#allocation17]   ;;  %s7846_s29 = smov [#allocation7]  }
  0x7b   : > { %s465_s24 = sshll.u32 %s7845_s15, 4  ;;  %s368_s19 = sshll.u32 %s7846_s29, 4  ;;  %s466_s24 = int_to_ptr.vmem [resolvable:$true] %s465_s24  ;;  %s8076_s19 = int_to_ptr.vmem [resolvable:$true] %s368_s19 }
  0x7c   : > { %s7549_s20 = scalar_lea.hbm %s11487_s11, 2048 }
  0x7d   : > { %p7550_p1 = scmp.ne.s32.totalorder %s11487_s11, %s7549_s20  ;;  %p7556_p0 = scmp.lt.u32.totalorder %s7549_s20, %s11487_s11 }
  0x7f   : > { %p7552_p3 = pnand %p7550_p1, %p7982_p8 }
  0x81   : > { %p7553_p13 = pneg %p7552_p3 }
  0x83   : > { %p7558_p2 = pnand %p7556_p0, %p7553_p13 }
  0x85   : > { %7561 = shalt.err (!%p7558_p2)
}
  0x86   : > { %s7562_s13 = scalar_lea.vmem %s466_s24, 2048  ;;  %p7570_p4 = scmp.lt.s32.totalorder %s466_s24, %s466_s24 }
  0x87   : > { %p7563_p5 = scmp.ne.s32.totalorder %s466_s24, %s7562_s13  ;;  %p7571_p10 = scmp.lt.s32.totalorder %s7562_s13, %s7562_s13 }
  0x89   : > { %p7565_p7 = pnand %p7563_p5, %p7982_p8  ;;  %p7572_p11 = por %p7571_p10, %p7570_p4 }
  0x8b   : > { %p7566_p9 = pneg %p7565_p7 }
  0x8d   : > { %p7573_p12 = pnand %p7572_p11, %p7566_p9 }
  0x8f   : > { %7576 = shalt.err (!%p7573_p12)
}
  0x90   : > { %6659 = dma.hbm_to_vmem [thread:$0]  (!%p7966_p6), %s11487_s11, 2048, %s466_s24, [#allocation18], %s7843_s4, %s7843_s4, %s7844_s9  }
  0x91   : > { %s11719_s2 = sld [smem:[#allocation160_spill]] }
  0x97   : > { %s7577_s21 = scalar_lea.hbm %s11719_s2, 8192 }
  0x98   : > { %p7578_p1 = scmp.ne.s32.totalorder %s11719_s2, %s7577_s21  ;;  %p7584_p0 = scmp.lt.u32.totalorder %s7577_s21, %s11719_s2 }
  0x9a   : > { %p7580_p3 = pnand %p7578_p1, %p7982_p8 }
  0x9c   : > { %p7581_p13 = pneg %p7580_p3 }
  0x9e   : > { %p7586_p2 = pnand %p7584_p0, %p7581_p13 }
  0xa0   : > { %7589 = shalt.err (!%p7586_p2)
}
  0xa1   : > { %s7590_s4 = scalar_lea.vmem %s8076_s19, 8192  ;;  %p7598_p4 = scmp.lt.s32.totalorder %s8076_s19, %s8076_s19 }
  0xa2   : > { %p7591_p5 = scmp.ne.s32.totalorder %s8076_s19, %s7590_s4  ;;  %p7599_p10 = scmp.lt.s32.totalorder %s7590_s4, %s7590_s4 }
  0xa4   : > { %p7593_p7 = pnand %p7591_p5, %p7982_p8  ;;  %p7600_p11 = por %p7599_p10, %p7598_p4 }
  0xa6   : > { %p7594_p9 = pneg %p7593_p7 }
  0xa8   : > { %p7601_p12 = pnand %p7600_p11, %p7594_p9 }
  0xaa   : > { %7604 = shalt.err (!%p7601_p12)
}
  0xab   : > { %s11720_s9 = smov 32   ;;  %s11721_s24 = smov 512  }
  0xac   : > { %6638 = dma.hbm_to_vmem [thread:$0]  (!%p7966_p6), %s11719_s2, 8192, %s8076_s19, [#allocation6], %s11721_s24, %s11721_s24, %s11720_s9  }
  0xad   : > { %s7847_s0 = smov [#allocation10]   ;;  %s7605_s17 = scalar_lea.hbm %s11481_s5, 4096 }
  0xae   : > { %s397_s15 = sshll.u32 %s7847_s0, 4  ;;  %p7606_p1 = scmp.ne.s32.totalorder %s11481_s5, %s7605_s17  ;;  %s398_s15 = int_to_ptr.vmem [resolvable:$true] %s397_s15 }
  0xaf   : > { %p7612_p0 = scmp.lt.u32.totalorder %s7605_s17, %s11481_s5 }
  0xb0   : > { %p7608_p3 = pnand %p7606_p1, %p7982_p8 }
  0xb2   : > { %p7609_p13 = pneg %p7608_p3 }
  0xb4   : > { %p7614_p2 = pnand %p7612_p0, %p7609_p13 }
  0xb6   : > { %7617 = shalt.err (!%p7614_p2)
}
  0xb7   : > { %s7618_s19 = scalar_lea.vmem %s398_s15, 4096  ;;  %p7626_p4 = scmp.lt.s32.totalorder %s398_s15, %s398_s15 }
  0xb8   : > { %p7619_p5 = scmp.ne.s32.totalorder %s398_s15, %s7618_s19  ;;  %p7627_p10 = scmp.lt.s32.totalorder %s7618_s19, %s7618_s19 }
  0xba   : > { %p7621_p7 = pnand %p7619_p5, %p7982_p8  ;;  %p7628_p11 = por %p7627_p10, %p7626_p4 }
  0xbc   : > { %p7622_p9 = pneg %p7621_p7 }
  0xbe   : > { %p7629_p12 = pnand %p7628_p11, %p7622_p9 }
  0xc0   : > { %7632 = shalt.err (!%p7629_p12)
}
  0xc1   : > { %s7848_s9 = smov 256   ;;  %s7849_s24 = smov 16  }
  0xc2   : > { %6644 = dma.hbm_to_vmem [thread:$0]  (!%p7966_p6), %s11481_s5, 4096, %s398_s15, [#allocation9], %s7848_s9, %s7848_s9, %s7849_s24  }
  0xc3   : > { %s7850_s0 = smov [#allocation13]   ;;  %s7851_s21 = smov [#allocation16]  }
  0xc4   : > { %s423_s29 = sshll.u32 %s7850_s0, 4  ;;  %s452_s17 = sshll.u32 %s7851_s21, 4  ;;  %s424_s29 = int_to_ptr.vmem [resolvable:$true] %s423_s29  ;;  %s453_s17 = int_to_ptr.vmem [resolvable:$true] %s452_s17 }
  0xc5   : > { %s7633_s23 = scalar_lea.hbm %s11483_s7, 2048 }
  0xc6   : > { %p7634_p1 = scmp.ne.s32.totalorder %s11483_s7, %s7633_s23  ;;  %p7640_p0 = scmp.lt.u32.totalorder %s7633_s23, %s11483_s7 }
  0xc8   : > { %p7636_p3 = pnand %p7634_p1, %p7982_p8 }
  0xca   : > { %p7637_p13 = pneg %p7636_p3 }
  0xcc   : > { %p7642_p2 = pnand %p7640_p0, %p7637_p13 }
  0xce   : > { %7645 = shalt.err (!%p7642_p2)
}
  0xcf   : > { %s7646_s15 = scalar_lea.vmem %s424_s29, 2048  ;;  %p7654_p4 = scmp.lt.s32.totalorder %s424_s29, %s424_s29 }
  0xd0   : > { %p7647_p5 = scmp.ne.s32.totalorder %s424_s29, %s7646_s15  ;;  %p7655_p10 = scmp.lt.s32.totalorder %s7646_s15, %s7646_s15 }
  0xd2   : > { %p7649_p7 = pnand %p7647_p5, %p7982_p8  ;;  %p7656_p11 = por %p7655_p10, %p7654_p4 }
  0xd4   : > { %p7650_p9 = pneg %p7649_p7 }
  0xd6   : > { %p7657_p12 = pnand %p7656_p11, %p7650_p9 }
  0xd8   : > { %7660 = shalt.err (!%p7657_p12)
}
  0xd9   : > { %s11722_s9 = smov 8   ;;  %s11723_s24 = smov 128  }
  0xda   : > { %6650 = dma.hbm_to_vmem [thread:$0]  (!%p7966_p6), %s11483_s7, 2048, %s424_s29, [#allocation12], %s11723_s24, %s11723_s24, %s11722_s9  }
  0xdb   : > { %s7661_s0 = scalar_lea.hbm %s11486_s10, 2048 }
  0xdc   : > { %p7662_p1 = scmp.ne.s32.totalorder %s11486_s10, %s7661_s0  ;;  %p7668_p0 = scmp.lt.u32.totalorder %s7661_s0, %s11486_s10 }
  0xde   : > { %p7664_p3 = pnand %p7662_p1, %p7982_p8 }
  0xe0   : > { %p7665_p13 = pneg %p7664_p3 }
  0xe2   : > { %p7670_p2 = pnand %p7668_p0, %p7665_p13 }
  0xe4   : > { %7673 = shalt.err (!%p7670_p2)
}
  0xe5   : > { %s7674_s4 = scalar_lea.vmem %s453_s17, 2048  ;;  %p7682_p4 = scmp.lt.s32.totalorder %s453_s17, %s453_s17 }
  0xe6   : > { %p7675_p5 = scmp.ne.s32.totalorder %s453_s17, %s7674_s4  ;;  %p7683_p10 = scmp.lt.s32.totalorder %s7674_s4, %s7674_s4 }
  0xe8   : > { %p7677_p7 = pnand %p7675_p5, %p7982_p8  ;;  %p7684_p11 = por %p7683_p10, %p7682_p4 }
  0xea   : > { %p7678_p9 = pneg %p7677_p7 }
  0xec   : > { %p7685_p12 = pnand %p7684_p11, %p7678_p9 }
  0xee   : > { %7688 = shalt.err (!%p7685_p12)
}
  0xef   : > { %6656 = dma.hbm_to_vmem [thread:$0]  (!%p7966_p6), %s11486_s10, 2048, %s453_s17, [#allocation15], %s11723_s24, %s11723_s24, %s11722_s9  }
  0xf0   : > { %s7852_s15 = smov [#allocation19]   ;;  %s7689_s30 = scalar_lea.hbm %s11488_s12, 2048 }
  0xf1   : > { %s478_s1 = sshll.u32 %s7852_s15, 4  ;;  %p7690_p1 = scmp.ne.s32.totalorder %s11488_s12, %s7689_s30  ;;  %s479_s1 = int_to_ptr.vmem [resolvable:$true] %s478_s1 }
  0xf2   : > { %p7696_p0 = scmp.lt.u32.totalorder %s7689_s30, %s11488_s12 }
  0xf3   : > { %p7692_p3 = pnand %p7690_p1, %p7982_p8 }
  0xf5   : > { %p7693_p13 = pneg %p7692_p3 }
  0xf7   : > { %p7698_p2 = pnand %p7696_p0, %p7693_p13 }
  0xf9   : > { %7701 = shalt.err (!%p7698_p2)
}
  0xfa   : > { %s7702_s17 = scalar_lea.vmem %s479_s1, 2048  ;;  %p7710_p4 = scmp.lt.s32.totalorder %s479_s1, %s479_s1 }
  0xfb   : > { %p7703_p5 = scmp.ne.s32.totalorder %s479_s1, %s7702_s17  ;;  %p7711_p10 = scmp.lt.s32.totalorder %s7702_s17, %s7702_s17 }
  0xfd   : > { %p7705_p7 = pnand %p7703_p5, %p7982_p8  ;;  %p7712_p11 = por %p7711_p10, %p7710_p4 }
  0xff   : > { %p7706_p9 = pneg %p7705_p7 }
 0x101   : > { %p7713_p12 = pnand %p7712_p11, %p7706_p9 }
 0x103   : > { %7716 = shalt.err (!%p7713_p12)
}
 0x104   : > { %6662 = dma.hbm_to_vmem [thread:$0]  (!%p7966_p6), %s11488_s12, 2048, %s479_s1, [#allocation18], %s11723_s24, %s11723_s24, %s11722_s9  }
 0x105   : > { %s5814_s18 = sadd.s32 4294967294, %s7833_s28   ;;  %s8205_s16 = sadd.s32 1, %s7833_s28  }
 0x106   : > { %s38_s29 = ssub.s32 %s7833_s28, %s8205_s16  ;;  %s41_s19 = sadd.s32 1, %s7829_s27 }
 0x107   : > { %p39_p8 = scmp.eq.s32.totalorder %s38_s29, 0  ;;  %p48_p1 = scmp.ne.s32.totalorder %s7829_s27, %s7825_s26 }
 0x108   : > { %p49_p3 = scmp.eq.s32.totalorder %s7833_s28, 0  ;;  %p54_p13 = scmp.ne.s32.totalorder %s7825_s26, %s7821_s25 }
 0x109   : > { %s8216_s15 = scalar_select %p39_p8, %s7829_s27, %s41_s19  }
 0x10a   : > { %p8218_p0 = por %p49_p3, %p48_p1  ;;  %p11725_p2 = scmp.eq.s32.totalorder %s7950_s14, 0 }
 0x10b   : > { %p330_p5 = scmp.eq.s32.totalorder %s7950_s14, 1  ;;  %p336_p7 = scmp.eq.s32.totalorder %s5814_s18, 1 }
 0x10c   : > { %p8224_p6 = por %p11725_p2, %p54_p13  ;;  %p6681_p9 = scmp.lt.s32.totalorder %s7833_s28, 2 }
 0x10d   : > { %s492_s13 = sand.u32 1, %s7829_s27   ;;  %p8231_p4 = por %p330_p5, %p48_p1 }
 0x10e   : > { %p8235_p10 = por %p336_p7, %p54_p13  ;;  %s5827_s21 = sshll.u32 %s492_s13, 7 }
 0x10f   : > { %s11727_s30 = scalar_select %p8231_p4, 1, 0 }
 0x110   : > { %s11728_s0 = scalar_select %p8235_p10, 1, 0 }
 0x111   : > { %s5994_s20 = sshll.u32 %s7833_s28, 11  ;;  %s11729_s23 = sld [smem:[#allocation158_spill]] }
 0x112   : > { %s496_s18 = scalar_lea.vmem [#allocation2], %s5827_s21  ;;  %p8249_p11 = pnand %p6681_p9, %p8218_p0 }
 0x113   : > { %s503_s29 = sshll.u32 %s496_s18, 4  ;;  %s8253_s3 = scalar_lea.sflag [#allocation3], %s492_s13  ;;  %s8245_s29 = int_to_ptr.vmem [resolvable:$true] %s503_s29 }
 0x114   : > { %p7719_p8 = pneg %p8249_p11 }
 0x117   : > { %s8243_s4 = scalar_lea.hbm %s11729_s23, %s5994_s20  ;;  %s7722_s2 = scalar_lea.hbm %s11729_s23, 4096 }
 0x118   : > { %s7717_s22 = scalar_lea.hbm %s8243_s4, 2048  ;;  %p7723_p13 = scmp.lt.u32.totalorder %s8243_s4, %s11729_s23 }
 0x119   : > { %p7718_p12 = scmp.ne.s32.totalorder %s8243_s4, %s7717_s22  ;;  %p7724_p0 = scmp.lt.u32.totalorder %s7722_s2, %s7717_s22 }
 0x11a   : > { %p7726_p5 = scmp.lt.u32.totalorder %s7717_s22, %s8243_s4 }
 0x11b   : > { %p7720_p1 = pnand %p7719_p8, %p7718_p12  ;;  %p7725_p2 = por %p7724_p0, %p7723_p13 }
 0x11d   : > { %p7721_p3 = pneg %p7720_p1  ;;  %p7727_p7 = por %p7726_p5, %p7725_p2 }
 0x11f   : > { %p7728_p9 = pnand %p7727_p7, %p7721_p3 }
 0x121   : > { %7731 = shalt.err (!%p7728_p9)
}
 0x122   : > { %s7732_s13 = scalar_lea.vmem %s8245_s29, 2048  ;;  %s7853_s21 = smov [#allocation2]  }
 0x123   : > { %p7733_p12 = scmp.ne.s32.totalorder %s8245_s29, %s7732_s13  ;;  %s7737_s20 = sshll.u32 %s7853_s21, 4  ;;  %s7738_s20 = int_to_ptr.vmem [resolvable:$false] %s7737_s20 }
 0x124   : > { %s7739_s17 = scalar_lea.vmem %s7738_s20, 4096  ;;  %p7740_p4 = scmp.lt.s32.totalorder %s8245_s29, %s7738_s20 }
 0x125   : > { %p7735_p1 = pnand %p7733_p12, %p7719_p8  ;;  %p7741_p13 = scmp.lt.s32.totalorder %s7739_s17, %s7732_s13 }
 0x127   : > { %p7736_p10 = pneg %p7735_p1  ;;  %p7742_p0 = por %p7741_p13, %p7740_p4 }
 0x129   : > { %p7743_p2 = pnand %p7742_p0, %p7736_p10 }
 0x12b   : > { %7746 = shalt.err (!%p7743_p2)
}
 0x12c   : > { %6666 = dma.hbm_to_vmem [thread:$0]  (!%p8249_p11), %s8243_s4, 2048, %s8245_s29, %s8253_s3, %s11723_s24, %s11723_s24, %s11722_s9  }
 0x12d   : > { %s11731_s22 = sld [smem:[#allocation28_spill]] }
 0x133   : > { %p11732_p8 = scmp.ne.s32.totalorder %s11731_s22, 0 }
 0x135   : > { %515 = sbr.rel (%p11732_p8) target bundleno = 3972 (0xf84), region = 72 }
 0x13c   : > { %s8287_s2 = sand.u32 1, %s7825_s26  }
 0x13d   : > { %s5831_s18 = sshll.u32 %s8287_s2, 7  ;;  %s518_s13 = scalar_lea.sflag [#allocation3], %s8287_s2 }
 0x13e   : > { %s8293_s19 = scalar_lea.vmem [#allocation2], %s5831_s18 }
 0x13f   : > { %7792 = dma.done.wait (%p8224_p6), %s518_s13, 2048  }
 0x140   : > { %7794 = vsyncadd (%p8224_p6), %s518_s13, 4294965248  ;;  %p11733_p4 = scmp.eq.s32.totalorder %s7950_s14, 0 }
 0x142   : > { %7796 = dma.done.wait (%p11733_p4), [#allocation6], 16384   ;;  %p11734_p10 = pmov %p11733_p4 }
 0x143   : > { %p11735_p11 = pmov %p11733_p4 }
 0x144   : > { %7798 = vsyncadd (%p11734_p10), [#allocation6], 4294950912 }
 0x145   : > { %7800 = dma.done.wait (%p11735_p11), [#allocation9], 12288   ;;  %p11736_p3 = pmov %p11733_p4 }
 0x147   : > { %7802 = vsyncadd (%p11736_p3), [#allocation9], 4294955008  ;;  %p11737_p5 = pmov %p11736_p3 }
 0x148   : > { %p11738_p7 = pmov %p11736_p3 }
 0x149   : > { %7804 = dma.done.wait (%p11737_p5), [#allocation12], 4096  }
 0x14a   : > { %7806 = vsyncadd (%p11738_p7), [#allocation12], 4294963200  ;;  %p11739_p6 = pmov %p11736_p3 }
 0x14b   : > { %p11740_p9 = pmov %p11736_p3 }
 0x14c   : > { %7808 = dma.done.wait (%p11739_p6), [#allocation15], 6144  }
 0x14d   : > { %7810 = vsyncadd (%p11740_p9), [#allocation15], 4294961152  ;;  %p11741_p12 = pmov %p11736_p3 }
 0x14e   : > { %p11742_p1 = pmov %p11736_p3 }
 0x14f   : > { %7812 = dma.done.wait (%p11741_p12), [#allocation18], 4096  }
 0x150   : > { %7814 = vsyncadd (%p11742_p1), [#allocation18], 4294963200  ;;  %v8320_v0 = vld [vmem:[%s8293_s19] sm:$0xff]  ;;  %v8323_v1 = vld [vmem:[%s8293_s19 + $0x10] sm:$0xff]  ;;  %s11743_s24 = sld [smem:[#allocation162_spill]]  ;;  %s7855_s1 = smov 64  }
 0x151   : > { %v8326_v2 = vld [vmem:[%s8293_s19 + $0x8] sm:$0xff]  ;;  %v621_v3 = vmul.f32 %v8320_v0, %v8320_v0  ;;  %v623_v4 = vmul.f32 %v8323_v1, %v8323_v1  ;;  %v8333_v5 = vld [vmem:[%s8293_s19 + $0x18] sm:$0xff]  ;;  %v8343_v9 = vld [vmem:[%s8293_s19 + $0x20] sm:$0xff]  ;;  %s12320_s21 = sld [smem:[#allocation163_spill]]  ;;  %s11392_s20 = scalar_lea.vmem [#allocation20], %s5831_s18 }
 0x152   : > { %v622_v6 = vmul.f32 %v8326_v2, %v8326_v2  ;;  %v624_v7 = vmul.f32 %v8333_v5, %v8333_v5  ;;  %v8340_v8 = vld [vmem:[%s8293_s19 + $0x28] sm:$0xff]  ;;  %v8346_v10 = vld [vmem:[%s8293_s19 + $0x38] sm:$0xff]  ;;  %v8349_v11 = vld [vmem:[%s8293_s19 + $0x30] sm:$0xff]  ;;  %v625_v14 = vmul.f32 %v8343_v9, %v8343_v9  ;;  %s5995_s17 = sshll.u32 %s7950_s14, 11  ;;  %s5646_s22 = sshll.u32 %s11392_s20, 4  ;;  %s11429_s22 = int_to_ptr.vmem [resolvable:$true] %s5646_s22 }
 0x153   : > { %637 = vadd.xlane.f32.xlu0 %v621_v3  ;;  %641 = vadd.xlane.f32.xlu1 %v623_v4  ;;  %v6747_v12 = vld [vmem:[#allocation10 + $0x4] ss:$16 sps:$4 sm:$0xff]   ;;  %v626_v13 = vmul.f32 %v8340_v8, %v8340_v8  ;;  %v6749_v15 = vld [vmem:[#allocation10 + $0xc] ss:$16 sps:$4 sm:$0xff]   ;;  %v6751_v16 = vld [vmem:[#allocation10] ss:$16 sps:$4 sm:$0xff]   ;;  %v628_v24 = vmul.f32 %v8346_v10, %v8346_v10  ;;  %v627_v25 = vmul.f32 %v8349_v11, %v8349_v11 }
 0x154   : > { %v6752_v17 = vld [vmem:[#allocation10 + $0x8] ss:$16 sps:$4 sm:$0xff]   ;;  %957 = vmatprep.subr.bf16.mxu0 %v6747_v12  ;;  %v6753_v18 = vld [vmem:[#allocation10 + $0x24] ss:$16 sps:$4 sm:$0xff]   ;;  %1070 = vmatprep.subr.bf16.mxu1 %v6749_v15  ;;  %v6755_v19 = vld [vmem:[#allocation10 + $0x2c] ss:$16 sps:$4 sm:$0xff]  }
 0x155   : > { %958 = vmatpush1.bf16.msra.mxu0 %v6751_v16  ;;  %v8356_v20 = vld [vmem:[%s8293_s19 + $0x48] sm:$0xff]  ;;  %v8359_v21 = vld [vmem:[%s8293_s19 + $0x40] sm:$0xff]  ;;  %1071 = vmatpush1.bf16.msra.mxu1 %v6752_v17  ;;  %v8366_v26 = vld [vmem:[%s8293_s19 + $0x58] sm:$0xff]  ;;  %v11502_v3 = vmov 0   ;;  %s5633_s14 = scalar_lea.sflag [#allocation4], %s8287_s2  ;;  %s7747_s9 = scalar_lea.vmem %s11429_s22, 2048 }
 0x156   : > { %959 = vmatprep.subr.bf16.mxu0 %v6753_v18  ;;  %v6757_v22 = vld [vmem:[#allocation10 + $0x20] ss:$16 sps:$4 sm:$0xff]   ;;  %v6758_v23 = vld [vmem:[#allocation10 + $0x28] ss:$16 sps:$4 sm:$0xff]   ;;  %1072 = vmatprep.subr.bf16.mxu1 %v6755_v19  ;;  %v630_v28 = vmul.f32 %v8356_v20, %v8356_v20  ;;  %v629_v29 = vmul.f32 %v8359_v21, %v8359_v21  ;;  %v6759_v30 = vld [vmem:[#allocation10 + $0x44] ss:$16 sps:$4 sm:$0xff]   ;;  %v632_v36 = vmul.f32 %v8366_v26, %v8366_v26  ;;  %p7748_p13 = scmp.ne.s32.totalorder %s11429_s22, %s7747_s9 }
 0x157   : > { %639 = vadd.xlane.f32.xlu0 %v622_v6  ;;  %643 = vadd.xlane.f32.xlu1 %v624_v7  ;;  %v8369_v27 = vld [vmem:[%s8293_s19 + $0x50] sm:$0xff]  ;;  %v6761_v31 = vld [vmem:[#allocation10 + $0x4c] ss:$16 sps:$4 sm:$0xff]   ;;  %v6764_v33 = vld [vmem:[#allocation10 + $0x48] ss:$16 sps:$4 sm:$0xff]   ;;  %p12330_p0 = scmp.ne.s32.totalorder %s11727_s30, 0 }
 0x158   : > { %v6763_v32 = vld [vmem:[#allocation10 + $0x40] ss:$16 sps:$4 sm:$0xff]   ;;  %v8376_v34 = vld [vmem:[%s8293_s19 + $0x68] sm:$0xff]  ;;  %v631_v37 = vmul.f32 %v8369_v27, %v8369_v27  ;;  %v6765_v38 = vld [vmem:[#allocation10 + $0x64] ss:$16 sps:$4 sm:$0xff]   ;;  %989 = vmatprep.mubr.bf16.mxu0 %v11502_v3  ;;  %1102 = vmatprep.mubr.bf16.mxu1 %v11502_v3 }
 0x159   : > { %960 = vmatpush1.bf16.msra.mxu0 %v6757_v22  ;;  %1073 = vmatpush1.bf16.msra.mxu1 %v6758_v23  ;;  %v8379_v35 = vld [vmem:[%s8293_s19 + $0x60] sm:$0xff]  ;;  %v6767_v39 = vld [vmem:[#allocation10 + $0x6c] ss:$16 sps:$4 sm:$0xff]   ;;  %v6770_v41 = vld [vmem:[#allocation10 + $0x68] ss:$16 sps:$4 sm:$0xff]   ;;  %v634_v44 = vmul.f32 %v8376_v34, %v8376_v34  ;;  %p7749_p2 = pnand %p7748_p13, %p12330_p0 }
 0x15a   : > { %961 = vmatprep.subr.bf16.mxu0 %v6759_v30  ;;  %1074 = vmatprep.subr.bf16.mxu1 %v6761_v31  ;;  %v6769_v40 = vld [vmem:[#allocation10 + $0x60] ss:$16 sps:$4 sm:$0xff]   ;;  %v8386_v42 = vld [vmem:[%s8293_s19 + $0x78] sm:$0xff]  ;;  %v633_v45 = vmul.f32 %v8379_v35, %v8379_v35  ;;  %v6771_v46 = vld [vmem:[#allocation10 + $0x84] ss:$16 sps:$4 sm:$0xff]  }
 0x15b   : > { %647 = vadd.xlane.f32.xlu1 %v626_v13  ;;  %645 = vadd.xlane.f32.xlu0 %v625_v14  ;;  %v8389_v43 = vld [vmem:[%s8293_s19 + $0x70] sm:$0xff]  ;;  %v6773_v47 = vld [vmem:[#allocation10 + $0x8c] ss:$16 sps:$4 sm:$0xff]   ;;  %v6776_v49 = vld [vmem:[#allocation10 + $0x88] ss:$16 sps:$4 sm:$0xff]   ;;  %v636_v52 = vmul.f32 %v8386_v42, %v8386_v42  ;;  %p7750_p8 = pneg %p7749_p2 }
 0x15c   : > { %v6775_v48 = vld [vmem:[#allocation10 + $0x80] ss:$16 sps:$4 sm:$0xff]   ;;  %v6777_v50 = vld [vmem:[#allocation10 + $0xa4] ss:$16 sps:$4 sm:$0xff]   ;;  %v6779_v51 = vld [vmem:[#allocation10 + $0xac] ss:$16 sps:$4 sm:$0xff]   ;;  %v635_v53 = vmul.f32 %v8389_v43, %v8389_v43 }
 0x15d   : > { %962 = vmatpush1.bf16.msra.mxu0 %v6763_v32  ;;  %1075 = vmatpush1.bf16.msra.mxu1 %v6764_v33  ;;  %v6781_v54 = vld [vmem:[#allocation10 + $0xa0] ss:$16 sps:$4 sm:$0xff]   ;;  %v6782_v55 = vld [vmem:[#allocation10 + $0xa8] ss:$16 sps:$4 sm:$0xff]   ;;  %v6783_v56 = vld [vmem:[#allocation10 + $0xc4] ss:$16 sps:$4 sm:$0xff]  }
 0x15e   : > { %963 = vmatprep.subr.bf16.mxu0 %v6765_v38  ;;  %1076 = vmatprep.subr.bf16.mxu1 %v6767_v39  ;;  %v6785_v57 = vld [vmem:[#allocation10 + $0xcc] ss:$16 sps:$4 sm:$0xff]   ;;  %v6787_v58 = vld [vmem:[#allocation10 + $0xc0] ss:$16 sps:$4 sm:$0xff]   ;;  %v6788_v59 = vld [vmem:[#allocation10 + $0xc8] ss:$16 sps:$4 sm:$0xff]  }
 0x15f   : > { %651 = vadd.xlane.f32.xlu1 %v628_v24  ;;  %649 = vadd.xlane.f32.xlu0 %v627_v25  ;;  %v6789_v60 = vld [vmem:[#allocation10 + $0xe4] ss:$16 sps:$4 sm:$0xff]   ;;  %v6791_v61 = vld [vmem:[#allocation10 + $0xec] ss:$16 sps:$4 sm:$0xff]   ;;  %v6793_v62 = vld [vmem:[#allocation10 + $0xe0] ss:$16 sps:$4 sm:$0xff]  }
 0x160   : > { %v6794_v63 = vld [vmem:[#allocation10 + $0xe8] ss:$16 sps:$4 sm:$0xff]   ;;  %v6797_v4 = vld [vmem:[#allocation11 + $0x4] ss:$8 sps:$4 sm:$0xff]  }
 0x161   : > { %964 = vmatpush1.bf16.msra.mxu0 %v6769_v40  ;;  %1077 = vmatpush1.bf16.msra.mxu1 %v6770_v41  ;;  %v6812_v6 = vld [vmem:[#allocation13 + $0x4] ss:$8 sps:$4 sm:$0xff]  }
 0x162   : > { %965 = vmatprep.subr.bf16.mxu0 %v6771_v46  ;;  %1078 = vmatprep.subr.bf16.mxu1 %v6773_v47 }
 0x163   : > { %655 = vadd.xlane.f32.xlu1 %v630_v28  ;;  %653 = vadd.xlane.f32.xlu0 %v629_v29 }
 0x165   : > { %966 = vmatpush1.bf16.msra.mxu0 %v6775_v48  ;;  %1079 = vmatpush1.bf16.msra.mxu1 %v6776_v49 }
 0x166   : > { %967 = vmatprep.subr.bf16.mxu0 %v6777_v50  ;;  %1080 = vmatprep.subr.bf16.mxu1 %v6779_v51 }
 0x167   : > { %659 = vadd.xlane.f32.xlu1 %v632_v36  ;;  %657 = vadd.xlane.f32.xlu0 %v631_v37 }
 0x169   : > { %968 = vmatpush1.bf16.msra.mxu0 %v6781_v54  ;;  %1081 = vmatpush1.bf16.msra.mxu1 %v6782_v55  ;;  %v6795_v54 = vld [vmem:[#allocation11] ss:$8 sps:$4 sm:$0xff]  }
 0x16a   : > { %969 = vmatprep.subr.bf16.mxu0 %v6783_v56  ;;  %1082 = vmatprep.subr.bf16.mxu1 %v6785_v57  ;;  %v6800_v57 = vld [vmem:[#allocation11 + $0x14] ss:$8 sps:$4 sm:$0xff]  }
 0x16b   : > { %663 = vadd.xlane.f32.xlu1 %v634_v44  ;;  %661 = vadd.xlane.f32.xlu0 %v633_v45  ;;  %v8405_v44 = vld [vmem:[%s11743_s24] ss:$0 sm:$0xff]  ;;  %s7856_s24 = smov [#allocation20]  }
 0x16d   : > { %970 = vmatpush1.bf16.msra.mxu0 %v6787_v58  ;;  %1083 = vmatpush1.bf16.msra.mxu1 %v6788_v59  ;;  %v6810_v59 = vld [vmem:[#allocation13] ss:$8 sps:$4 sm:$0xff]  }
 0x16e   : > { %971 = vmatprep.subr.bf16.mxu0 %v6789_v60  ;;  %1084 = vmatprep.subr.bf16.mxu1 %v6791_v61  ;;  %v6815_v61 = vld [vmem:[#allocation13 + $0x14] ss:$8 sps:$4 sm:$0xff]  }
 0x16f   : > { %667 = vadd.xlane.f32.xlu1 %v636_v52  ;;  %665 = vadd.xlane.f32.xlu0 %v635_v53 }
 0x171   : > { %972 = vmatpush1.bf16.msra.mxu0 %v6793_v62  ;;  %1085 = vmatpush1.bf16.msra.mxu1 %v6794_v63  ;;  %v6798_v63 = vld [vmem:[#allocation11 + $0x10] ss:$8 sps:$4 sm:$0xff]  }
 0x172   : > { %1279 = vmatprep.subr.bf16.mxu0 %v6797_v4  ;;  %1488 = vmatprep.subr.bf16.mxu1 %v6812_v6  ;;  %v6803_v6 = vld [vmem:[#allocation11 + $0x24] ss:$8 sps:$4 sm:$0xff]  }
 0x1e0   : > { %v638_v7 = vpop.xlane.xlu0 %637  ;;  %v642_v12 = vpop.xlane.xlu1 %641 }
 0x1e1   : > { %v670_v13 = vmul.f32 0.0078125, %v638_v7  ;;  %v672_v14 = vmul.f32 0.0078125, %v642_v12 }
 0x1e3   : > { %v686_v15 = vadd.f32 1e-05, %v670_v13  ;;  %v688_v22 = vadd.f32 1e-05, %v672_v14  ;;  %v6813_v13 = vld [vmem:[#allocation13 + $0x10] ss:$8 sps:$4 sm:$0xff]  }
 0x1e4   : > { %v640_v16 = vpop.xlane.xlu0 %639  ;;  %v644_v17 = vpop.xlane.xlu1 %643 }
 0x1e5   : > { %6939 = vrsqrt.f32 %v686_v15  ;;  %v671_v18 = vmul.f32 0.0078125, %v640_v16  ;;  %v673_v19 = vmul.f32 0.0078125, %v644_v17 }
 0x1e7   : > { %v687_v23 = vadd.f32 1e-05, %v671_v18  ;;  %v689_v24 = vadd.f32 1e-05, %v673_v19  ;;  %v6801_v18 = vld [vmem:[#allocation11 + $0x20] ss:$8 sps:$4 sm:$0xff]  }
 0x1e8   : > { %v648_v25 = vpop.xlane.xlu1 %647  ;;  %v646_v28 = vpop.xlane.xlu0 %645 }
 0x1e9   : > { %6941 = vrsqrt.f32 %v687_v23  ;;  %v675_v29 = vmul.f32 0.0078125, %v648_v25  ;;  %v674_v30 = vmul.f32 0.0078125, %v646_v28  ;;  %v6806_v25 = vld [vmem:[#allocation11 + $0x34] ss:$8 sps:$4 sm:$0xff]   ;;  %v6819_v28 = vld [vmem:[#allocation13 + $0x20] ss:$8 sps:$4 sm:$0xff]  }
 0x1ea   : > { %6943 = vrsqrt.f32 %v688_v22  ;;  %v6821_v22 = vld [vmem:[#allocation13 + $0x24] ss:$8 sps:$4 sm:$0xff]  }
 0x1eb   : > { %6945 = vrsqrt.f32 %v689_v24  ;;  %v691_v31 = vadd.f32 1e-05, %v675_v29  ;;  %v690_v33 = vadd.f32 1e-05, %v674_v30  ;;  %v6824_v29 = vld [vmem:[#allocation13 + $0x34] ss:$8 sps:$4 sm:$0xff]  }
 0x1ec   : > { %v652_v32 = vpop.xlane.xlu1 %651  ;;  %v650_v36 = vpop.xlane.xlu0 %649 }
 0x1ed   : > { %v677_v38 = vmul.f32 0.0078125, %v652_v32  ;;  %6947 = vrsqrt.f32 %v691_v31  ;;  %v676_v39 = vmul.f32 0.0078125, %v650_v36  ;;  %v6804_v32 = vld [vmem:[#allocation11 + $0x30] ss:$8 sps:$4 sm:$0xff]  }
 0x1ee   : > { %6949 = vrsqrt.f32 %v690_v33 }
 0x1ef   : > { %v6940_v37 = vpop.eup %6939  ;;  %v693_v45 = vadd.f32 1e-05, %v677_v38  ;;  %v692_v49 = vadd.f32 1e-05, %v676_v39  ;;  %v6822_v38 = vld [vmem:[#allocation13 + $0x30] ss:$8 sps:$4 sm:$0xff]  }
 0x1f0   : > { %v718_v40 = vmul.f32 %v6940_v37, %v8320_v0  ;;  %v656_v50 = vpop.xlane.xlu1 %655  ;;  %v654_v53 = vpop.xlane.xlu0 %653  ;;  %v6809_v37 = vld [vmem:[#allocation11 + $0x44] ss:$8 sps:$4 sm:$0xff]  }
 0x1f1   : > { %6951 = vrsqrt.f32 %v693_v45  ;;  %v679_v58 = vmul.f32 0.0078125, %v656_v50  ;;  %v6818_v50 = vld [vmem:[#allocation11 + $0x54] ss:$8 sps:$4 sm:$0xff]  }
 0x1f2   : > { %v741_v51 = vmul.f32 %v8405_v44, %v718_v40  ;;  %6953 = vrsqrt.f32 %v692_v49 }
 0x1f3   : > { %v6942_v41 = vpop.eup %6941  ;;  %v695_v4 = vadd.f32 1e-05, %v679_v58 }
 0x1f4   : > { %v6944_v46 = vpop.eup %6943  ;;  %v719_v47 = vmul.f32 %v6942_v41, %v8326_v2  ;;  %v678_v2 = vmul.f32 0.0078125, %v654_v53  ;;  %v660_v12 = vpop.xlane.xlu1 %659  ;;  %v6833_v53 = vld [vmem:[#allocation13 + $0x54] ss:$8 sps:$4 sm:$0xff]  }
 0x1f5   : > { %v6946_v48 = vpop.eup %6945  ;;  %v720_v55 = vmul.f32 %v6944_v46, %v8323_v1  ;;  %v658_v16 = vpop.xlane.xlu0 %657  ;;  %6955 = vrsqrt.f32 %v695_v4  ;;  %v681_v19 = vmul.f32 0.0078125, %v660_v12  ;;  %v6839_v4 = vld [vmem:[#allocation13 + $0x64] ss:$8 sps:$4 sm:$0xff]   ;;  %v6837_v12 = vld [vmem:[#allocation13 + $0x60] ss:$8 sps:$4 sm:$0xff]  }
 0x1f6   : > { %v742_v52 = vmul.f32 %v8405_v44, %v719_v47  ;;  %v721_v56 = vmul.f32 %v6946_v48, %v8333_v5  ;;  %v694_v7 = vadd.f32 1e-05, %v678_v2  ;;  %v680_v24 = vmul.f32 0.0078125, %v658_v16  ;;  %v6807_v47 = vld [vmem:[#allocation11 + $0x40] ss:$8 sps:$4 sm:$0xff]  }
 0x1f7   : > { %v6948_v60 = vpop.eup %6947  ;;  %v743_v1 = vmul.f32 %v8405_v44, %v720_v55  ;;  %v697_v31 = vadd.f32 1e-05, %v681_v19  ;;  %v6830_v48 = vld [vmem:[#allocation13 + $0x44] ss:$8 sps:$4 sm:$0xff]  }
 0x1f8   : > { %v8410_v0 = vpack.c.bf16 %v742_v52, %v741_v51  ;;  %v6950_v62 = vpop.eup %6949  ;;  %v744_v5 = vmul.f32 %v8405_v44, %v721_v56  ;;  %v723_v15 = vmul.f32 %v6948_v60, %v8340_v8  ;;  %6957 = vrsqrt.f32 %v694_v7  ;;  %v664_v36 = vpop.xlane.xlu1 %663  ;;  %v6828_v51 = vld [vmem:[#allocation13 + $0x40] ss:$8 sps:$4 sm:$0xff]   ;;  %v6816_v56 = vld [vmem:[#allocation11 + $0x50] ss:$8 sps:$4 sm:$0xff]   ;;  %v6827_v2 = vld [vmem:[#allocation11 + $0x64] ss:$8 sps:$4 sm:$0xff]  }
 0x1f9   : > { %v722_v14 = vmul.f32 %v6950_v62, %v8343_v9  ;;  %v696_v33 = vadd.f32 1e-05, %v680_v24  ;;  %v662_v45 = vpop.xlane.xlu0 %661  ;;  %6959 = vrsqrt.f32 %v697_v31  ;;  %v683_v46 = vmul.f32 0.0078125, %v664_v36  ;;  %v6836_v7 = vld [vmem:[#allocation11 + $0x74] ss:$8 sps:$4 sm:$0xff]  }
 0x1fa   : > { %990 = vmatmul.mubr.bf16.vlgmr.msra.gmra.mrb[0].mxu0 %v8410_v0  ;;  %1103 = vmatmul.mubr.bf16.vlgmr.msra.gmra.mrb[0].mxu1 %v8410_v0  ;;  %v8422_v17 = vpack.c.bf16 %v744_v5, %v743_v1  ;;  %v746_v9 = vmul.f32 %v8405_v44, %v723_v15  ;;  %v682_v49 = vmul.f32 0.0078125, %v662_v45  ;;  %v6825_v5 = vld [vmem:[#allocation11 + $0x60] ss:$8 sps:$4 sm:$0xff]  }
 0x1fb   : > { %1280 = vmatpush1.bf16.msra.mxu0 %v6795_v54  ;;  %999 = vmatprep.mubr.bf16.mxu0 %v11502_v3  ;;  %v6952_v23 = vpop.eup %6951  ;;  %v745_v8 = vmul.f32 %v8405_v44, %v722_v14  ;;  %6961 = vrsqrt.f32 %v696_v33  ;;  %v699_v55 = vadd.f32 1e-05, %v683_v46  ;;  %v6842_v14 = vld [vmem:[#allocation13 + $0x74] ss:$8 sps:$4 sm:$0xff]  }
 0x1fc   : > { %1112 = vmatprep.mubr.bf16.mxu1 %v11502_v3  ;;  %1281 = vmatprep.subr.bf16.mxu0 %v6800_v57  ;;  %v6954_v30 = vpop.eup %6953  ;;  %v725_v41 = vmul.f32 %v6952_v23, %v8346_v10  ;;  %v698_v57 = vadd.f32 1e-05, %v682_v49  ;;  %v668_v58 = vpop.xlane.xlu1 %667 }
 0x1fd   : > { %1489 = vmatpush1.bf16.msra.mxu1 %v6810_v59  ;;  %v8430_v39 = vpack.c.bf16 %v746_v9, %v745_v8  ;;  %v724_v40 = vmul.f32 %v6954_v30, %v8349_v11  ;;  %v6831_v59 = vld [vmem:[#allocation13 + $0x50] ss:$8 sps:$4 sm:$0xff]   ;;  %6963 = vrsqrt.f32 %v699_v55  ;;  %v685_v1 = vmul.f32 0.0078125, %v668_v58 }
 0x1fe   : > { %1490 = vmatprep.subr.bf16.mxu1 %v6815_v61  ;;  %v748_v11 = vmul.f32 %v8405_v44, %v725_v41  ;;  %6965 = vrsqrt.f32 %v698_v57 }
 0x1ff   : > { %1282 = vmatpush1.bf16.msra.mxu0 %v6798_v63  ;;  %v6956_v52 = vpop.eup %6955  ;;  %v747_v10 = vmul.f32 %v8405_v44, %v724_v40  ;;  %v666_v63 = vpop.xlane.xlu0 %665  ;;  %v701_v16 = vadd.f32 1e-05, %v685_v1 }
 0x200   : > { %1283 = vmatprep.subr.bf16.mxu0 %v6803_v6  ;;  %v727_v62 = vmul.f32 %v6956_v52, %v8356_v20  ;;  %v684_v6 = vmul.f32 0.0078125, %v666_v63 }
 0x201   : > { %1491 = vmatpush1.bf16.msra.mxu1 %v6813_v13  ;;  %v8440_v60 = vpack.c.bf16 %v748_v11, %v747_v10  ;;  %6967 = vrsqrt.f32 %v701_v16 }
 0x202   : > { %1000 = vmatmul.mubr.bf16.gmra.mrb[4].mxu0 %v8422_v17  ;;  %1113 = vmatmul.mubr.bf16.gmra.mrb[4].mxu1 %v8422_v17  ;;  %v6958_v54 = vpop.eup %6957  ;;  %v700_v19 = vadd.f32 1e-05, %v684_v6 }
 0x203   : > { %1009 = vmatprep.mubr.bf16.mxu0 %v11502_v3  ;;  %1122 = vmatprep.mubr.bf16.mxu1 %v11502_v3  ;;  %v726_v61 = vmul.f32 %v6958_v54, %v8359_v21  ;;  %v6960_v13 = vpop.eup %6959  ;;  %v750_v21 = vmul.f32 %v8405_v44, %v727_v62 }
 0x204   : > { %1284 = vmatpush1.bf16.msra.mxu0 %v6801_v18  ;;  %1492 = vmatprep.subr.bf16.mxu1 %v6821_v22  ;;  %v6834_v18 = vld [vmem:[#allocation11 + $0x70] ss:$8 sps:$4 sm:$0xff]   ;;  %6969 = vrsqrt.f32 %v700_v19 }
 0x205   : > { %1285 = vmatprep.subr.bf16.mxu0 %v6806_v25  ;;  %1493 = vmatpush1.bf16.msra.mxu1 %v6819_v28  ;;  %v749_v20 = vmul.f32 %v8405_v44, %v726_v61  ;;  %v6962_v15 = vpop.eup %6961  ;;  %v6840_v22 = vld [vmem:[#allocation13 + $0x70] ss:$8 sps:$4 sm:$0xff]   ;;  %v729_v25 = vmul.f32 %v6960_v13, %v8366_v26 }
 0x206   : > { %1494 = vmatprep.subr.bf16.mxu1 %v6824_v29  ;;  %v728_v24 = vmul.f32 %v6962_v15, %v8369_v27 }
 0x207   : > { %v761_v23 = vpack.c.bf16 %v750_v21, %v749_v20  ;;  %v6964_v28 = vpop.eup %6963  ;;  %v752_v9 = vmul.f32 %v8405_v44, %v729_v25 }
 0x208   : > { %1286 = vmatpush1.bf16.msra.mxu0 %v6804_v32  ;;  %v751_v8 = vmul.f32 %v8405_v44, %v728_v24  ;;  %v6966_v29 = vpop.eup %6965  ;;  %v731_v30 = vmul.f32 %v6964_v28, %v8376_v34 }
 0x209   : > { %1287 = vmatprep.subr.bf16.mxu0 %v6809_v37  ;;  %1495 = vmatpush1.bf16.msra.mxu1 %v6822_v38  ;;  %v730_v26 = vmul.f32 %v6966_v29, %v8379_v35 }
 0x20a   : > { %1010 = vmatmul.mubr.bf16.gmra.mrb[8].mxu0 %v8430_v39  ;;  %1123 = vmatmul.mubr.bf16.gmra.mrb[8].mxu1 %v8430_v39  ;;  %v762_v27 = vpack.c.bf16 %v752_v9, %v751_v8  ;;  %v754_v33 = vmul.f32 %v8405_v44, %v731_v30  ;;  %v1649_v9 = vld [vmem:[#allocation5 + $0x180] sm:$0xff] }
 0x20b   : > { %1019 = vmatprep.mubr.bf16.mxu0 %v11502_v3  ;;  %1132 = vmatprep.mubr.bf16.mxu1 %v11502_v3  ;;  %v6968_v31 = vpop.eup %6967  ;;  %v753_v32 = vmul.f32 %v8405_v44, %v730_v26  ;;  %v1653_v26 = vld [vmem:[#allocation5 + $0x1a0] sm:$0xff] }
 0x20c   : > { %1288 = vmatpush1.bf16.msra.mxu0 %v6807_v47  ;;  %1496 = vmatprep.subr.bf16.mxu1 %v6830_v48  ;;  %v733_v40 = vmul.f32 %v6968_v31, %v8386_v42 }
 0x20d   : > { %1289 = vmatprep.subr.bf16.mxu0 %v6818_v50  ;;  %1497 = vmatpush1.bf16.msra.mxu1 %v6828_v51  ;;  %v763_v37 = vpack.c.bf16 %v754_v33, %v753_v32 }
 0x20e   : > { %1498 = vmatprep.subr.bf16.mxu1 %v6833_v53  ;;  %v6970_v36 = vpop.eup %6969  ;;  %v756_v35 = vmul.f32 %v8405_v44, %v733_v40 }
 0x20f   : > { %v732_v38 = vmul.f32 %v6970_v36, %v8389_v43 }
 0x210   : > { %1290 = vmatpush1.bf16.msra.mxu0 %v6816_v56 }
 0x211   : > { %1291 = vmatprep.subr.bf16.mxu0 %v6827_v2  ;;  %1499 = vmatpush1.bf16.msra.mxu1 %v6831_v59  ;;  %v755_v34 = vmul.f32 %v8405_v44, %v732_v38 }
 0x212   : > { %1020 = vmatmul.mubr.bf16.gmra.mrb[12].mxu0 %v8440_v60  ;;  %1133 = vmatmul.mubr.bf16.gmra.mrb[12].mxu1 %v8440_v60 }
 0x213   : > { %1029 = vmatprep.mubr.bf16.mxu0 %v11502_v3  ;;  %1142 = vmatprep.mubr.bf16.mxu1 %v11502_v3  ;;  %v764_v41 = vpack.c.bf16 %v756_v35, %v755_v34  ;;  %v1657_v34 = vld [vmem:[#allocation5 + $0x1c0] sm:$0xff] }
 0x214   : > { %1292 = vmatpush1.bf16.msra.mxu0 %v6825_v5  ;;  %1500 = vmatprep.subr.bf16.mxu1 %v6839_v4 }
 0x215   : > { %1293 = vmatprep.subr.bf16.mxu0 %v6836_v7  ;;  %1501 = vmatpush1.bf16.msra.mxu1 %v6837_v12 }
 0x216   : > { %1502 = vmatprep.subr.bf16.mxu1 %v6842_v14 }
 0x218   : > { %1294 = vmatpush1.bf16.msra.mxu0 %v6834_v18 }
 0x219   : > { %1503 = vmatpush1.bf16.msra.mxu1 %v6840_v22 }
 0x21a   : > { %1030 = vmatmul.mubr.bf16.gmra.mrb[16].mxu0 %v761_v23  ;;  %1143 = vmatmul.mubr.bf16.gmra.mrb[16].mxu1 %v761_v23 }
 0x21b   : > { %1039 = vmatprep.mubr.bf16.mxu0 %v11502_v3  ;;  %1152 = vmatprep.mubr.bf16.mxu1 %v11502_v3 }
 0x222   : > { %1040 = vmatmul.mubr.bf16.gmra.mrb[20].mxu0 %v762_v27  ;;  %1153 = vmatmul.mubr.bf16.gmra.mrb[20].mxu1 %v762_v27 }
 0x223   : > { %1049 = vmatprep.mubr.bf16.mxu0 %v11502_v3  ;;  %1162 = vmatprep.mubr.bf16.mxu1 %v11502_v3 }
 0x22a   : > { %1050 = vmatmul.mubr.bf16.gmra.mrb[24].mxu0 %v763_v37  ;;  %1163 = vmatmul.mubr.bf16.gmra.mrb[24].mxu1 %v763_v37 }
 0x22b   : > { %1059 = vmatprep.mubr.bf16.mxu0 %v11502_v3  ;;  %1172 = vmatprep.mubr.bf16.mxu1 %v11502_v3 }
 0x232   : > { %1060 = vmatmul.mubr.bf16.gmra.mrb[28].mxu0 %v764_v41  ;;  %1173 = vmatmul.mubr.bf16.gmra.mrb[28].mxu1 %v764_v41 }
 0x233   : > { %1311 = vmatprep.mubr.bf16.mxu0 %v11502_v3  ;;  %1520 = vmatprep.mubr.bf16.mxu1 %v11502_v3 }
 0x23a   : > { %1312 = vmatmul.mubr.bf16.vlgmr.msra.gmra.mrb[32].mxu0 %v8410_v0  ;;  %1521 = vmatmul.mubr.bf16.vlgmr.msra.gmra.mrb[32].mxu1 %v8410_v0 }
 0x23b   : > { %1321 = vmatprep.mubr.bf16.mxu0 %v11502_v3  ;;  %1530 = vmatprep.mubr.bf16.mxu1 %v11502_v3 }
 0x242   : > { %1322 = vmatmul.mubr.bf16.gmra.mrb[36].mxu0 %v8422_v17  ;;  %1531 = vmatmul.mubr.bf16.gmra.mrb[36].mxu1 %v8422_v17 }
 0x243   : > { %1331 = vmatprep.mubr.bf16.mxu0 %v11502_v3  ;;  %1540 = vmatprep.mubr.bf16.mxu1 %v11502_v3 }
 0x24a   : > { %1332 = vmatmul.mubr.bf16.gmra.mrb[40].mxu0 %v8430_v39  ;;  %1541 = vmatmul.mubr.bf16.gmra.mrb[40].mxu1 %v8430_v39 }
 0x24b   : > { %1341 = vmatprep.mubr.bf16.mxu0 %v11502_v3  ;;  %1550 = vmatprep.mubr.bf16.mxu1 %v11502_v3 }
 0x252   : > { %1342 = vmatmul.mubr.bf16.gmra.mrb[44].mxu0 %v8440_v60  ;;  %1551 = vmatmul.mubr.bf16.gmra.mrb[44].mxu1 %v8440_v60 }
 0x253   : > { %1351 = vmatprep.mubr.bf16.mxu0 %v11502_v3  ;;  %1560 = vmatprep.mubr.bf16.mxu1 %v11502_v3 }
 0x25a   : > { %1352 = vmatmul.mubr.bf16.gmra.mrb[48].mxu0 %v761_v23  ;;  %1561 = vmatmul.mubr.bf16.gmra.mrb[48].mxu1 %v761_v23 }
 0x25b   : > { %1361 = vmatprep.mubr.bf16.mxu0 %v11502_v3  ;;  %1570 = vmatprep.mubr.bf16.mxu1 %v11502_v3 }
 0x262   : > { %1362 = vmatmul.mubr.bf16.gmra.mrb[52].mxu0 %v762_v27  ;;  %1571 = vmatmul.mubr.bf16.gmra.mrb[52].mxu1 %v762_v27 }
 0x263   : > { %1371 = vmatprep.mubr.bf16.mxu0 %v11502_v3  ;;  %1580 = vmatprep.mubr.bf16.mxu1 %v11502_v3 }
 0x26a   : > { %1372 = vmatmul.mubr.bf16.gmra.mrb[56].mxu0 %v763_v37  ;;  %1581 = vmatmul.mubr.bf16.gmra.mrb[56].mxu1 %v763_v37 }
 0x26b   : > { %1381 = vmatprep.mubr.bf16.mxu0 %v11502_v3  ;;  %1590 = vmatprep.mubr.bf16.mxu1 %v11502_v3 }
 0x272   : > { %1382 = vmatmul.mubr.bf16.gmra.mrb[60].mxu0 %v764_v41  ;;  %1591 = vmatmul.mubr.bf16.gmra.mrb[60].mxu1 %v764_v41 }
 0x2cd   : > { %v8492_v42 = vpop.f32.mrb[0].mxu0  ;;  %v8494_v43 = vpop.f32.mrb[0].mxu1 }
 0x2ce   : > { %11744 = vst [vmem:[#allocation29_spill] sm:$0xff] %v8494_v43  ;;  %v8496_v44 = vpop.f32.mrb[1].mxu1  ;;  %1793 = vrot.lane.b32.xlu0 %v8492_v42, %s7855_s1  ;;  %v8500_v0 = vpop.f32.mrb[1].mxu0 }
 0x2cf   : > { %11745 = vst [vmem:[#allocation30_spill] sm:$0xff] %v8500_v0  ;;  %v8502_v17 = vpop.f32.mrb[2].mxu0  ;;  %v8504_v39 = vpop.f32.mrb[2].mxu1 }
 0x2d0   : > { %11746 = vst [vmem:[#allocation31_spill] sm:$0xff] %v8504_v39  ;;  %v8506_v45 = vpop.f32.mrb[3].mxu1  ;;  %1795 = vrot.lane.b32.xlu1 %v8502_v17, %s7855_s1  ;;  %v8510_v46 = vpop.f32.mrb[3].mxu0 }
 0x2d1   : > { %11747 = vst [vmem:[#allocation32_spill] sm:$0xff] %v8510_v46 }
 0x2d2   : > { %1825 = vrot.lane.b32.xlu0 %v8500_v0, %s7855_s1 }
 0x2d4   : > { %1827 = vrot.lane.b32.xlu1 %v8510_v46, %s7855_s1 }
 0x2d5   : > { %v8516_v47 = vpop.f32.mrb[4].mxu0  ;;  %v8518_v48 = vpop.f32.mrb[4].mxu1 }
 0x2d6   : > { %11748 = vst [vmem:[#allocation33_spill] sm:$0xff] %v8518_v48  ;;  %v8520_v49 = vpop.f32.mrb[5].mxu1  ;;  %1889 = vrot.lane.b32.xlu0 %v8496_v44, %s7855_s1  ;;  %v8524_v50 = vpop.f32.mrb[5].mxu0 }
 0x2d7   : > { %11749 = vst [vmem:[#allocation34_spill] sm:$0xff] %v8524_v50  ;;  %v8526_v51 = vpop.f32.mrb[6].mxu0  ;;  %v8528_v52 = vpop.f32.mrb[6].mxu1 }
 0x2d8   : > { %11750 = vst [vmem:[#allocation35_spill] sm:$0xff] %v8528_v52  ;;  %v8530_v10 = vpop.f32.mrb[7].mxu1  ;;  %1891 = vrot.lane.b32.xlu1 %v8506_v45, %s7855_s1  ;;  %v8534_v11 = vpop.f32.mrb[7].mxu0 }
 0x2d9   : > { %11751 = vst [vmem:[#allocation36_spill] sm:$0xff] %v8534_v11 }
 0x2da   : > { %1797 = vrot.lane.b32.xlu0 %v8516_v47, %s7855_s1 }
 0x2dc   : > { %1799 = vrot.lane.b32.xlu1 %v8526_v51, %s7855_s1 }
 0x2dd   : > { %v8540_v53 = vpop.f32.mrb[8].mxu0  ;;  %v8542_v54 = vpop.f32.mrb[8].mxu1 }
 0x2de   : > { %11752 = vst [vmem:[#allocation37_spill] sm:$0xff] %v8540_v53  ;;  %11753 = vst [vmem:[#allocation38_spill] sm:$0xff] %v8542_v54  ;;  %1829 = vrot.lane.b32.xlu0 %v8524_v50, %s7855_s1  ;;  %v8546_v55 = vpop.f32.mrb[9].mxu0  ;;  %v8548_v56 = vpop.f32.mrb[9].mxu1 }
 0x2df   : > { %11754 = vst [vmem:[#allocation39_spill] sm:$0xff] %v8546_v55  ;;  %v8550_v57 = vpop.f32.mrb[10].mxu0  ;;  %v8552_v58 = vpop.f32.mrb[10].mxu1 }
 0x2e0   : > { %11755 = vst [vmem:[#allocation40_spill] sm:$0xff] %v8550_v57  ;;  %11756 = vst [vmem:[#allocation41_spill] sm:$0xff] %v8552_v58  ;;  %1831 = vrot.lane.b32.xlu1 %v8534_v11, %s7855_s1  ;;  %v8556_v2 = vpop.f32.mrb[11].mxu0  ;;  %v8558_v59 = vpop.f32.mrb[11].mxu1  ;;  %v8661_v11 = vld [vmem:[#allocation5] sm:$0xff] }
 0x2e1   : > { %11757 = vst [vmem:[#allocation42_spill] sm:$0xff] %v8556_v2 }
 0x2e2   : > { %1893 = vrot.lane.b32.xlu0 %v8520_v49, %s7855_s1 }
 0x2e4   : > { %1895 = vrot.lane.b32.xlu1 %v8530_v10, %s7855_s1 }
 0x2e5   : > { %v8564_v60 = vpop.f32.mrb[12].mxu0  ;;  %v8566_v61 = vpop.f32.mrb[12].mxu1 }
 0x2e6   : > { %11758 = vst [vmem:[#allocation43_spill] sm:$0xff] %v8566_v61  ;;  %1801 = vrot.lane.b32.xlu0 %v8540_v53, %s7855_s1  ;;  %v8570_v62 = vpop.f32.mrb[13].mxu0  ;;  %v8572_v63 = vpop.f32.mrb[13].mxu1 }
 0x2e7   : > { %11759 = vst [vmem:[#allocation44_spill] sm:$0xff] %v8570_v62  ;;  %v8574_v1 = vpop.f32.mrb[14].mxu0  ;;  %v8576_v5 = vpop.f32.mrb[14].mxu1 }
 0x2e8   : > { %11760 = vst [vmem:[#allocation45_spill] sm:$0xff] %v8576_v5  ;;  %1803 = vrot.lane.b32.xlu1 %v8550_v57, %s7855_s1  ;;  %v8580_v4 = vpop.f32.mrb[15].mxu0  ;;  %v8582_v6 = vpop.f32.mrb[15].mxu1  ;;  %v8669_v57 = vld [vmem:[#allocation5 + $0x20] sm:$0xff]  ;;  %v1610_v5 = vld [vmem:[#allocation5 + $0x48] sm:$0xff] }
 0x2e9   : > { %11761 = vst [vmem:[#allocation46_spill] sm:$0xff] %v8580_v4 }
 0x2ea   : > { %1833 = vrot.lane.b32.xlu0 %v8546_v55, %s7855_s1 }
 0x2ec   : > { %1835 = vrot.lane.b32.xlu1 %v8556_v2, %s7855_s1 }
 0x2ed   : > { %v8588_v7 = vpop.f32.mrb[16].mxu0  ;;  %v8590_v12 = vpop.f32.mrb[16].mxu1 }
 0x2ee   : > { %11762 = vst [vmem:[#allocation47_spill] sm:$0xff] %v8590_v12  ;;  %v8592_v13 = vpop.f32.mrb[17].mxu0  ;;  %v8594_v20 = vpop.f32.mrb[17].mxu1 }
 0x2ef   : > { %11763 = vst [vmem:[#allocation48_spill] sm:$0xff] %v8592_v13  ;;  %v8596_v21 = vpop.f32.mrb[18].mxu0  ;;  %v8598_v14 = vpop.f32.mrb[18].mxu1 }
 0x2f0   : > { %11764 = vst [vmem:[#allocation49_spill] sm:$0xff] %v8596_v21  ;;  %11765 = vst [vmem:[#allocation50_spill] sm:$0xff] %v8598_v14  ;;  %v8600_v15 = vpop.f32.mrb[19].mxu0  ;;  %v8602_v16 = vpop.f32.mrb[19].mxu1 }
 0x2f1   : > { %11766 = vst [vmem:[#allocation51_spill] sm:$0xff] %v8600_v15  ;;  %11767 = vst [vmem:[#allocation52_spill] sm:$0xff] %v8602_v16 }
 0x2f5   : > { %v8604_v18 = vpop.f32.mrb[20].mxu0  ;;  %v8606_v19 = vpop.f32.mrb[20].mxu1 }
 0x2f6   : > { %11768 = vst [vmem:[#allocation53_spill] sm:$0xff] %v8604_v18  ;;  %11769 = vst [vmem:[#allocation54_spill] sm:$0xff] %v8606_v19  ;;  %v8608_v22 = vpop.f32.mrb[21].mxu0  ;;  %v8610_v23 = vpop.f32.mrb[21].mxu1 }
 0x2f7   : > { %11770 = vst [vmem:[#allocation55_spill] sm:$0xff] %v8608_v22  ;;  %11771 = vst [vmem:[#allocation56_spill] sm:$0xff] %v8610_v23  ;;  %v8612_v24 = vpop.f32.mrb[22].mxu0  ;;  %v8614_v25 = vpop.f32.mrb[22].mxu1 }
 0x2f8   : > { %11772 = vst [vmem:[#allocation57_spill] sm:$0xff] %v8612_v24  ;;  %11773 = vst [vmem:[#allocation58_spill] sm:$0xff] %v8614_v25  ;;  %v8616_v28 = vpop.f32.mrb[23].mxu0  ;;  %v8618_v8 = vpop.f32.mrb[23].mxu1 }
 0x2f9   : > { %11774 = vst [vmem:[#allocation59_spill] sm:$0xff] %v8616_v28  ;;  %11775 = vst [vmem:[#allocation60_spill] sm:$0xff] %v8618_v8 }
 0x2fd   : > { %v8620_v29 = vpop.f32.mrb[24].mxu0  ;;  %v8622_v27 = vpop.f32.mrb[24].mxu1 }
 0x2fe   : > { %11776 = vst [vmem:[#allocation61_spill] sm:$0xff] %v8622_v27  ;;  %v8625_v30 = vmul.f32 %v1649_v9, %v8620_v29  ;;  %v8627_v31 = vpop.f32.mrb[25].mxu0  ;;  %v8629_v32 = vpop.f32.mrb[25].mxu1 }
 0x2ff   : > { %11778 = vst [vmem:[#allocation63_spill] sm:$0xff] %v8627_v31  ;;  %11779 = vst [vmem:[#allocation64_spill] sm:$0xff] %v8629_v32  ;;  %v8631_v33 = vpop.f32.mrb[26].mxu0  ;;  %v8633_v36 = vpop.f32.mrb[26].mxu1  ;;  %v8850_v32 = vld [vmem:[#allocation8 + $0x20] sm:$0xff] }
 0x300   : > { %11777 = vst [vmem:[#allocation62_spill] sm:$0xff] %v8625_v30  ;;  %11780 = vst [vmem:[#allocation65_spill] sm:$0xff] %v8633_v36  ;;  %v8636_v37 = vmul.f32 %v1653_v26, %v8631_v33  ;;  %v8638_v38 = vpop.f32.mrb[27].mxu0  ;;  %v8640_v40 = vpop.f32.mrb[27].mxu1 }
 0x301   : > { %11782 = vst [vmem:[#allocation67_spill] sm:$0xff] %v8638_v38  ;;  %11783 = vst [vmem:[#allocation68_spill] sm:$0xff] %v8640_v40  ;;  %v1992_v40 = vmul.f32 %v8669_v57, %v8502_v17 }
 0x302   : > { %11781 = vst [vmem:[#allocation66_spill] sm:$0xff] %v8636_v37 }
 0x305   : > { %v8642_v35 = vpop.f32.mrb[28].mxu0  ;;  %v8644_v41 = vpop.f32.mrb[28].mxu1 }
 0x306   : > { %11784 = vst [vmem:[#allocation69_spill] sm:$0xff] %v8644_v41  ;;  %v8647_v9 = vmul.f32 %v1657_v34, %v8642_v35  ;;  %v8649_v3 = vpop.f32.mrb[29].mxu0  ;;  %v8651_v30 = vpop.f32.mrb[29].mxu1 }
 0x307   : > { %11786 = vst [vmem:[#allocation71_spill] sm:$0xff] %v8649_v3  ;;  %11787 = vst [vmem:[#allocation72_spill] sm:$0xff] %v8651_v30  ;;  %v8653_v2 = vpop.f32.mrb[30].mxu0  ;;  %v8655_v26 = vpop.f32.mrb[30].mxu1 }
 0x308   : > { %11785 = vst [vmem:[#allocation70_spill] sm:$0xff] %v8647_v9  ;;  %11788 = vst [vmem:[#allocation73_spill] sm:$0xff] %v8653_v2  ;;  %v8657_v37 = vpop.f32.mrb[31].mxu0  ;;  %v8659_v55 = vpop.f32.mrb[31].mxu1 }
 0x309   : > { %11789 = vst [vmem:[#allocation74_spill] sm:$0xff] %v8655_v26  ;;  %11790 = vst [vmem:[#allocation75_spill] sm:$0xff] %v8657_v37  ;;  %v8848_v37 = vld [vmem:[#allocation8] sm:$0xff] }
 0x30a   : > { %11791 = vst [vmem:[#allocation76_spill] sm:$0xff] %v8659_v55 }
 0x30d   : > { %v1313_v50 = vpop.f32.mrb[32].mxu0  ;;  %v1522_v46 = vpop.f32.mrb[32].mxu1 }
 0x30e   : > { %v8664_v0 = vmul.f32 %v8661_v11, %v1313_v50  ;;  %v1524_v34 = vpop.f32.mrb[33].mxu1  ;;  %2404 = vrot.lane.b32.xlu0 %v1313_v50, %s7855_s1  ;;  %v8667_v9 = vpop.f32.mrb[33].mxu0 }
 0x30f   : > { %v1526_v53 = vpop.f32.mrb[34].mxu1  ;;  %2436 = vrot.lane.b32.xlu1 %v8667_v9, %s7855_s1  ;;  %v1317_v26 = vpop.f32.mrb[34].mxu0 }
 0x310   : > { %11792 = vst [vmem:[#allocation77_spill] sm:$0xff] %v8664_v0  ;;  %v8673_v36 = vpack.c.bf16 %v1526_v53, %v1522_v46  ;;  %v8676_v41 = vmul.f32 %v8669_v57, %v1317_v26  ;;  %v8678_v25 = vpop.f32.mrb[35].mxu0  ;;  %v1528_v27 = vpop.f32.mrb[35].mxu1 }
 0x311   : > { %11795 = vst [vmem:[#allocation80_spill] sm:$0xff] %v8678_v25  ;;  %v8680_v14 = vpack.c.bf16 %v1528_v27, %v1524_v34  ;;  %v1614_v34 = vld [vmem:[#allocation5 + $0x68] sm:$0xff] }
 0x312   : > { %11793 = vst [vmem:[#allocation78_spill] sm:$0xff] %v8673_v36  ;;  %11794 = vst [vmem:[#allocation79_spill] sm:$0xff] %v8676_v41  ;;  %6348 = vmatprep.subr.bf16.mxu1 %v8673_v36 }
 0x313   : > { %11796 = vst [vmem:[#allocation81_spill] sm:$0xff] %v8680_v14  ;;  %6349 = vmatpush3.bf16.msra.mxu1 %v8673_v36  ;;  %2406 = vrot.lane.b32.xlu1 %v1317_v26, %s7855_s1 }
 0x315   : > { %v8685_v50 = vpop.f32.mrb[36].mxu0  ;;  %v1532_v19 = vpop.f32.mrb[36].mxu1 }
 0x316   : > { %11797 = vst [vmem:[#allocation82_spill] sm:$0xff] %v8685_v50  ;;  %v1534_v46 = vpop.f32.mrb[37].mxu1  ;;  %2408 = vrot.lane.b32.xlu0 %v8685_v50, %s7855_s1  ;;  %v1325_v53 = vpop.f32.mrb[37].mxu0 }
 0x317   : > { %v8689_v12 = vmul.f32 %v1610_v5, %v1325_v53  ;;  %v1536_v58 = vpop.f32.mrb[38].mxu1  ;;  %2438 = vrot.lane.b32.xlu1 %v8678_v25, %s7855_s1  ;;  %v8693_v27 = vpop.f32.mrb[38].mxu0 }
 0x318   : > { %11799 = vst [vmem:[#allocation84_spill] sm:$0xff] %v8693_v27  ;;  %v8695_v14 = vpack.c.bf16 %v1536_v58, %v1532_v19  ;;  %v1329_v26 = vpop.f32.mrb[39].mxu0  ;;  %v1538_v61 = vpop.f32.mrb[39].mxu1  ;;  %v1618_v58 = vld [vmem:[#allocation5 + $0x88] sm:$0xff] }
 0x319   : > { %11798 = vst [vmem:[#allocation83_spill] sm:$0xff] %v8689_v12  ;;  %v8697_v52 = vmul.f32 %v1614_v34, %v1329_v26  ;;  %v8699_v54 = vpack.c.bf16 %v1538_v61, %v1534_v46 }
 0x31a   : > { %11800 = vst [vmem:[#allocation85_spill] sm:$0xff] %v8695_v14  ;;  %6350 = vmatprep.subr.bf16.mxu1 %v8695_v14  ;;  %2440 = vrot.lane.b32.xlu0 %v1325_v53, %s7855_s1 }
 0x31b   : > { %11801 = vst [vmem:[#allocation86_spill] sm:$0xff] %v8697_v52  ;;  %11802 = vst [vmem:[#allocation87_spill] sm:$0xff] %v8699_v54  ;;  %6351 = vmatpush3.bf16.msra.mxu1 %v8695_v14  ;;  %2410 = vrot.lane.b32.xlu1 %v8693_v27, %s7855_s1  ;;  %v1622_v14 = vld [vmem:[#allocation5 + $0xa8] sm:$0xff] }
 0x31d   : > { %v8706_v5 = vpop.f32.mrb[40].mxu0  ;;  %v1542_v39 = vpop.f32.mrb[40].mxu1 }
 0x31e   : > { %11803 = vst [vmem:[#allocation88_spill] sm:$0xff] %v8706_v5  ;;  %v1544_v19 = vpop.f32.mrb[41].mxu1  ;;  %2412 = vrot.lane.b32.xlu0 %v8706_v5, %s7855_s1  ;;  %v1335_v34 = vpop.f32.mrb[41].mxu0 }
 0x31f   : > { %v8710_v61 = vmul.f32 %v1618_v58, %v1335_v34  ;;  %v1546_v46 = vpop.f32.mrb[42].mxu1  ;;  %2442 = vrot.lane.b32.xlu1 %v1329_v26, %s7855_s1  ;;  %v8713_v53 = vpop.f32.mrb[42].mxu0 }
 0x320   : > { %11805 = vst [vmem:[#allocation90_spill] sm:$0xff] %v8713_v53  ;;  %v8715_v54 = vpack.c.bf16 %v1546_v46, %v1542_v39  ;;  %v1339_v52 = vpop.f32.mrb[43].mxu0  ;;  %v1548_v48 = vpop.f32.mrb[43].mxu1  ;;  %v1626_v39 = vld [vmem:[#allocation5 + $0xc8] sm:$0xff] }
 0x321   : > { %11804 = vst [vmem:[#allocation89_spill] sm:$0xff] %v8710_v61  ;;  %v8717_v27 = vmul.f32 %v1622_v14, %v1339_v52  ;;  %v8719_v50 = vpack.c.bf16 %v1548_v48, %v1544_v19 }
 0x322   : > { %11806 = vst [vmem:[#allocation91_spill] sm:$0xff] %v8715_v54  ;;  %6352 = vmatprep.subr.bf16.mxu1 %v8715_v54  ;;  %2444 = vrot.lane.b32.xlu0 %v1335_v34, %s7855_s1 }
 0x323   : > { %11807 = vst [vmem:[#allocation92_spill] sm:$0xff] %v8717_v27  ;;  %11808 = vst [vmem:[#allocation93_spill] sm:$0xff] %v8719_v50  ;;  %6353 = vmatpush3.bf16.msra.mxu1 %v8715_v54  ;;  %2414 = vrot.lane.b32.xlu1 %v8713_v53, %s7855_s1  ;;  %v1630_v54 = vld [vmem:[#allocation5 + $0xe8] sm:$0xff] }
 0x325   : > { %v8726_v26 = vpop.f32.mrb[44].mxu0  ;;  %v1552_v58 = vpop.f32.mrb[44].mxu1 }
 0x326   : > { %11809 = vst [vmem:[#allocation94_spill] sm:$0xff] %v8726_v26  ;;  %v1554_v46 = vpop.f32.mrb[45].mxu1  ;;  %2416 = vrot.lane.b32.xlu0 %v8726_v26, %s7855_s1  ;;  %v1345_v14 = vpop.f32.mrb[45].mxu0 }
 0x327   : > { %v8730_v48 = vmul.f32 %v1626_v39, %v1345_v14  ;;  %v1556_v19 = vpop.f32.mrb[46].mxu1  ;;  %2446 = vrot.lane.b32.xlu1 %v1339_v52, %s7855_s1  ;;  %v8733_v34 = vpop.f32.mrb[46].mxu0 }
 0x328   : > { %11811 = vst [vmem:[#allocation96_spill] sm:$0xff] %v8733_v34  ;;  %v8735_v50 = vpack.c.bf16 %v1556_v19, %v1552_v58  ;;  %v1349_v27 = vpop.f32.mrb[47].mxu0  ;;  %v1558_v53 = vpop.f32.mrb[47].mxu1  ;;  %v1634_v58 = vld [vmem:[#allocation5 + $0x108] sm:$0xff] }
 0x329   : > { %11810 = vst [vmem:[#allocation95_spill] sm:$0xff] %v8730_v48  ;;  %v8737_v5 = vmul.f32 %v1630_v54, %v1349_v27  ;;  %v8739_v61 = vpack.c.bf16 %v1558_v53, %v1554_v46 }
 0x32a   : > { %11812 = vst [vmem:[#allocation97_spill] sm:$0xff] %v8735_v50  ;;  %6354 = vmatprep.subr.bf16.mxu1 %v8735_v50  ;;  %2448 = vrot.lane.b32.xlu0 %v1345_v14, %s7855_s1 }
 0x32b   : > { %11813 = vst [vmem:[#allocation98_spill] sm:$0xff] %v8737_v5  ;;  %11814 = vst [vmem:[#allocation99_spill] sm:$0xff] %v8739_v61  ;;  %6355 = vmatpush3.bf16.msra.mxu1 %v8735_v50  ;;  %2418 = vrot.lane.b32.xlu1 %v8733_v34, %s7855_s1  ;;  %v1638_v50 = vld [vmem:[#allocation5 + $0x128] sm:$0xff] }
 0x32d   : > { %v8746_v52 = vpop.f32.mrb[48].mxu0  ;;  %v1562_v39 = vpop.f32.mrb[48].mxu1 }
 0x32e   : > { %11815 = vst [vmem:[#allocation100_spill] sm:$0xff] %v8746_v52  ;;  %v1564_v19 = vpop.f32.mrb[49].mxu1  ;;  %2420 = vrot.lane.b32.xlu0 %v8746_v52, %s7855_s1  ;;  %v1355_v54 = vpop.f32.mrb[49].mxu0 }
 0x32f   : > { %v8750_v53 = vmul.f32 %v1634_v58, %v1355_v54  ;;  %v1566_v46 = vpop.f32.mrb[50].mxu1  ;;  %2450 = vrot.lane.b32.xlu1 %v1349_v27, %s7855_s1  ;;  %v8753_v14 = vpop.f32.mrb[50].mxu0 }
 0x330   : > { %11817 = vst [vmem:[#allocation102_spill] sm:$0xff] %v8753_v14  ;;  %v8755_v61 = vpack.c.bf16 %v1566_v46, %v1562_v39  ;;  %v1359_v5 = vpop.f32.mrb[51].mxu0  ;;  %v1568_v34 = vpop.f32.mrb[51].mxu1  ;;  %v1642_v39 = vld [vmem:[#allocation5 + $0x148] sm:$0xff] }
 0x331   : > { %11816 = vst [vmem:[#allocation101_spill] sm:$0xff] %v8750_v53  ;;  %v8757_v26 = vmul.f32 %v1638_v50, %v1359_v5  ;;  %v8759_v48 = vpack.c.bf16 %v1568_v34, %v1564_v19 }
 0x332   : > { %11818 = vst [vmem:[#allocation103_spill] sm:$0xff] %v8755_v61  ;;  %6356 = vmatprep.subr.bf16.mxu1 %v8755_v61  ;;  %2452 = vrot.lane.b32.xlu0 %v1355_v54, %s7855_s1 }
 0x333   : > { %11819 = vst [vmem:[#allocation104_spill] sm:$0xff] %v8757_v26  ;;  %11820 = vst [vmem:[#allocation105_spill] sm:$0xff] %v8759_v48  ;;  %6357 = vmatpush3.bf16.msra.mxu1 %v8755_v61  ;;  %2422 = vrot.lane.b32.xlu1 %v8753_v14, %s7855_s1  ;;  %v1646_v61 = vld [vmem:[#allocation5 + $0x168] sm:$0xff] }
 0x335   : > { %v8766_v27 = vpop.f32.mrb[52].mxu0  ;;  %v1572_v58 = vpop.f32.mrb[52].mxu1 }
 0x336   : > { %11821 = vst [vmem:[#allocation106_spill] sm:$0xff] %v8766_v27  ;;  %v1574_v46 = vpop.f32.mrb[53].mxu1  ;;  %2424 = vrot.lane.b32.xlu0 %v8766_v27, %s7855_s1  ;;  %v1365_v50 = vpop.f32.mrb[53].mxu0 }
 0x337   : > { %v8770_v34 = vmul.f32 %v1642_v39, %v1365_v50  ;;  %v1576_v19 = vpop.f32.mrb[54].mxu1  ;;  %2454 = vrot.lane.b32.xlu1 %v1359_v5, %s7855_s1  ;;  %v8773_v54 = vpop.f32.mrb[54].mxu0  ;;  %v1921_v5 = vlaneseq }
 0x338   : > { %11823 = vst [vmem:[#allocation108_spill] sm:$0xff] %v8773_v54  ;;  %v8775_v48 = vpack.c.bf16 %v1576_v19, %v1572_v58  ;;  %v1369_v26 = vpop.f32.mrb[55].mxu0  ;;  %v1578_v14 = vpop.f32.mrb[55].mxu1  ;;  %v1650_v19 = vld [vmem:[#allocation5 + $0x188] sm:$0xff] }
 0x339   : > { %11822 = vst [vmem:[#allocation107_spill] sm:$0xff] %v8770_v34  ;;  %v8777_v52 = vmul.f32 %v1646_v61, %v1369_v26  ;;  %v8779_v53 = vpack.c.bf16 %v1578_v14, %v1574_v46 }
 0x33a   : > { %11824 = vst [vmem:[#allocation109_spill] sm:$0xff] %v8775_v48  ;;  %6358 = vmatprep.subr.bf16.mxu1 %v8775_v48  ;;  %2456 = vrot.lane.b32.xlu0 %v1365_v50, %s7855_s1 }
 0x33b   : > { %11825 = vst [vmem:[#allocation110_spill] sm:$0xff] %v8777_v52  ;;  %11826 = vst [vmem:[#allocation111_spill] sm:$0xff] %v8779_v53  ;;  %6359 = vmatpush3.bf16.msra.mxu1 %v8775_v48  ;;  %2426 = vrot.lane.b32.xlu1 %v8773_v54, %s7855_s1  ;;  %v8795_v48 = vand.u32 127, %v1921_v5  ;;  %v1654_v53 = vld [vmem:[#allocation5 + $0x1a8] sm:$0xff] }
 0x33d   : > { %v8786_v39 = vpop.f32.mrb[56].mxu0  ;;  %v1582_v58 = vpop.f32.mrb[56].mxu1  ;;  %vm1923_vm0 = vcmp.lt.s32.totalorder %v8795_v48, 64 }
 0x33e   : > { %11827 = vst [vmem:[#allocation112_spill] sm:$0xff] %v8786_v39  ;;  %v1584_v27 = vpop.f32.mrb[57].mxu1  ;;  %2428 = vrot.lane.b32.xlu0 %v8786_v39, %s7855_s1  ;;  %v1375_v61 = vpop.f32.mrb[57].mxu0 }
 0x33f   : > { %v8790_v14 = vmul.f32 %v1650_v19, %v1375_v61  ;;  %v1586_v46 = vpop.f32.mrb[58].mxu1  ;;  %2458 = vrot.lane.b32.xlu1 %v1369_v26, %s7855_s1  ;;  %v8793_v50 = vpop.f32.mrb[58].mxu0  ;;  %v8809_v26 = vld [vmem:[#allocation7] sm:$0xff] }
 0x340   : > { %11829 = vst [vmem:[#allocation114_spill] sm:$0xff] %v8793_v50  ;;  %v8797_v52 = vpack.c.bf16 %v1586_v46, %v1582_v58  ;;  %v1379_v54 = vpop.f32.mrb[59].mxu0  ;;  %v1588_v34 = vpop.f32.mrb[59].mxu1  ;;  %v1608_v46 = vld [vmem:[#allocation5 + $0x38] sm:$0xff] }
 0x341   : > { %11828 = vst [vmem:[#allocation113_spill] sm:$0xff] %v8790_v14  ;;  %v8799_v12 = vmul.f32 %v1654_v53, %v1379_v54  ;;  %v8801_v55 = vpack.c.bf16 %v1588_v34, %v1584_v27  ;;  %v1794_v39 = vpop.permute.xlu0 %1793  ;;  %v8815_v27 = vld [vmem:[#allocation7 + $0x20] sm:$0xff] }
 0x342   : > { %11830 = vst [vmem:[#allocation115_spill] sm:$0xff] %v8797_v52  ;;  %v1796_v43 = vpop.permute.xlu1 %1795  ;;  %6360 = vmatprep.subr.bf16.mxu1 %v8797_v52  ;;  %2460 = vrot.lane.b32.xlu0 %v1375_v61, %s7855_s1  ;;  %11835 = vst [vmem:[#allocation120_spill] sm:$0xff] %v8815_v27  ;;  %v1604_v61 = vld [vmem:[#allocation5 + $0x18] sm:$0xff] }
 0x343   : > { %11831 = vst [vmem:[#allocation116_spill] sm:$0xff] %v8799_v12  ;;  %11832 = vst [vmem:[#allocation117_spill] sm:$0xff] %v8801_v55  ;;  %6361 = vmatpush3.bf16.msra.mxu1 %v8797_v52  ;;  %2430 = vrot.lane.b32.xlu1 %v8793_v50, %s7855_s1 }
 0x345   : > { %v8811_v5 = vpop.permute.xlu0 %1825  ;;  %v8813_v53 = vpop.f32.mrb[60].mxu0 }
 0x346   : > { %11833 = vst [vmem:[#allocation118_spill] sm:$0xff] %v8811_v5  ;;  %11834 = vst [vmem:[#allocation119_spill] sm:$0xff] %v8813_v53  ;;  %v8820_v34 = vsel %vm1923_vm0, %v1794_v39, %v8811_v5  ;;  %v1592_v58 = vpop.f32.mrb[60].mxu1  ;;  %v8822_v19 = vpop.permute.xlu1 %1827  ;;  %2432 = vrot.lane.b32.xlu0 %v8813_v53, %s7855_s1  ;;  %v1988_v5 = vmul.f32 %v8661_v11, %v8492_v42  ;;  %v1991_v42 = vmul.f32 %v1604_v61, %v8496_v44 }
 0x347   : > { %11836 = vst [vmem:[#allocation121_spill] sm:$0xff] %v8820_v34  ;;  %11837 = vst [vmem:[#allocation122_spill] sm:$0xff] %v8822_v19  ;;  %v2052_v52 = vmul.f32 %v8820_v34, %v8809_v26  ;;  %v8831_v55 = vsel %vm1923_vm0, %v1796_v43, %v8822_v19  ;;  %v1594_v12 = vpop.f32.mrb[61].mxu1  ;;  %v8833_v50 = vpop.f32.mrb[61].mxu0  ;;  %2462 = vrot.lane.b32.xlu1 %v1379_v54, %s7855_s1  ;;  %v1668_v34 = vld [vmem:[#allocation7 + $0x18] sm:$0xff]  ;;  %v1995_v11 = vmul.f32 %v1608_v46, %v8506_v45  ;;  %v8883_v46 = vld [vmem:[#allocation7 + $0x40] sm:$0xff] }
 0x348   : > { %11838 = vst [vmem:[#allocation123_spill] sm:$0xff] %v8831_v55  ;;  %v2056_v53 = vmul.f32 %v8831_v55, %v8815_v27  ;;  %v1596_v14 = vpop.f32.mrb[62].mxu1  ;;  %v8840_v41 = vpop.f32.mrb[62].mxu0  ;;  %v1672_v54 = vld [vmem:[#allocation7 + $0x38] sm:$0xff] }
 0x349   : > { %v8844_v19 = vpack.c.bf16 %v1596_v14, %v1592_v58  ;;  %v8846_v25 = vpop.f32.mrb[63].mxu0  ;;  %v1598_v30 = vpop.f32.mrb[63].mxu1  ;;  %v2116_v55 = vadd.f32 %v2052_v52, %v1988_v5 }
 0x34a   : > { %v8854_v27 = vpack.c.bf16 %v1598_v30, %v1594_v12  ;;  %v8856_v0 = vpop.permute.xlu0 %1889  ;;  %v8858_v17 = vpop.permute.xlu1 %1891  ;;  %2464 = vrot.lane.b32.xlu0 %v8833_v50, %s7855_s1  ;;  %v2120_v57 = vadd.f32 %v2056_v53, %v1992_v40 }
 0x34b   : > { %11839 = vst [vmem:[#allocation124_spill] sm:$0xff] %v8844_v19  ;;  %11841 = vst [vmem:[#allocation126_spill] sm:$0xff] %v8856_v0  ;;  %v1972_v14 = vsel %vm1923_vm0, %v8856_v0, %v1794_v39  ;;  %v1973_v44 = vsel %vm1923_vm0, %v8858_v17, %v1796_v43  ;;  %6362 = vmatprep.subr.bf16.mxu1 %v8844_v19  ;;  %2434 = vrot.lane.b32.xlu1 %v8840_v41, %s7855_s1 }
 0x34c   : > { %11840 = vst [vmem:[#allocation125_spill] sm:$0xff] %v8854_v27  ;;  %11842 = vst [vmem:[#allocation127_spill] sm:$0xff] %v8858_v17  ;;  %v2055_v45 = vmul.f32 %v1972_v14, %v1668_v34  ;;  %v2180_v12 = vmul.f32 %v1972_v14, %v8848_v37  ;;  %v2059_v30 = vmul.f32 %v1973_v44, %v1672_v54  ;;  %6363 = vmatpush3.bf16.msra.mxu1 %v8844_v19  ;;  %v8885_v54 = vld [vmem:[#allocation7 + $0x60] sm:$0xff] }
 0x34d   : > { %v2184_v52 = vmul.f32 %v1973_v44, %v8850_v32  ;;  %6412 = vmatprep.subr.bf16.mxu1 %v8673_v36  ;;  %v8917_v19 = vld [vmem:[#allocation8 + $0x40] sm:$0xff]  ;;  %v1680_v36 = vld [vmem:[#allocation7 + $0x78] sm:$0xff] }
 0x34e   : > { %v8875_v40 = vadd.f32 %v2055_v45, %v1991_v42  ;;  %v8877_v39 = vadd.f32 %v2059_v30, %v1995_v11  ;;  %v1798_v43 = vpop.permute.xlu0 %1797  ;;  %v1800_v5 = vpop.permute.xlu1 %1799  ;;  %1805 = vrot.lane.b32.xlu0 %v8564_v60, %s7855_s1  ;;  %v2244_v53 = vadd.f32 %v2180_v12, %v2116_v55  ;;  %v8887_v42 = vld [vmem:[#allocation5 + $0x40] sm:$0xff]  ;;  %v1616_v45 = vld [vmem:[#allocation5 + $0x78] sm:$0xff] }
 0x34f   : > { %v2248_v34 = vadd.f32 %v2184_v52, %v2120_v57  ;;  %2466 = vrot.lane.b32.xlu1 %v8846_v25, %s7855_s1  ;;  %v8889_v11 = vld [vmem:[#allocation5 + $0x60] sm:$0xff]  ;;  %v1612_v57 = vld [vmem:[#allocation5 + $0x58] sm:$0xff] }
 0x350   : > { %11843 = vst [vmem:[#allocation128_spill] sm:$0xff] %v8875_v40  ;;  %11844 = vst [vmem:[#allocation129_spill] sm:$0xff] %v8877_v39  ;;  %v2308_v58 = vmul.f32 0.088388346, %v2244_v53  ;;  %v8919_v27 = vld [vmem:[#allocation8 + $0x60] sm:$0xff]  ;;  %v1999_v39 = vmul.f32 %v1612_v57, %v8520_v49 }
 0x351   : > { %v2312_v61 = vmul.f32 0.088388346, %v2248_v34  ;;  %v1676_v34 = vld [vmem:[#allocation7 + $0x58] sm:$0xff] }
 0x352   : > { %v8891_v14 = vpop.permute.xlu0 %1829  ;;  %v8893_v44 = vpop.permute.xlu1 %1831  ;;  %1837 = vrot.lane.b32.xlu0 %v8570_v62, %s7855_s1  ;;  %v9127_v62 = vld [vmem:[#allocation5 + $0xc0] sm:$0xff] }
 0x353   : > { %11845 = vst [vmem:[#allocation130_spill] sm:$0xff] %v8891_v14  ;;  %11846 = vst [vmem:[#allocation131_spill] sm:$0xff] %v8893_v44  ;;  %v2372_v55 = vpack.c.bf16 %v2312_v61, %v2308_v58  ;;  %v8900_v12 = vsel %vm1923_vm0, %v1798_v43, %v8891_v14  ;;  %v8905_v30 = vsel %vm1923_vm0, %v1800_v5, %v8893_v44  ;;  %1807 = vrot.lane.b32.xlu1 %v8574_v1, %s7855_s1 }
 0x354   : > { %11847 = vst [vmem:[#allocation132_spill] sm:$0xff] %v8900_v12  ;;  %11848 = vst [vmem:[#allocation133_spill] sm:$0xff] %v8905_v30  ;;  %v2060_v52 = vmul.f32 %v8900_v12, %v8883_v46  ;;  %v2064_v53 = vmul.f32 %v8905_v30, %v8885_v54  ;;  %v1996_v58 = vmul.f32 %v8887_v42, %v8516_v47  ;;  %v9016_v30 = vld [vmem:[#allocation5 + $0x28] sm:$0xff] }
 0x355   : > { %6332 = vmatprep.mubr.bf16.mxu0 %v2372_v55  ;;  %v2000_v61 = vmul.f32 %v8889_v11, %v8526_v51  ;;  %v2003_v44 = vmul.f32 %v1616_v45, %v8530_v10 }
 0x356   : > { %v8923_v17 = vpop.permute.xlu0 %1893  ;;  %v8925_v40 = vpop.permute.xlu1 %1895  ;;  %1897 = vrot.lane.b32.xlu0 %v8548_v56, %s7855_s1  ;;  %v2124_v47 = vadd.f32 %v2060_v52, %v1996_v58 }
 0x357   : > { %11849 = vst [vmem:[#allocation134_spill] sm:$0xff] %v8923_v17  ;;  %11850 = vst [vmem:[#allocation135_spill] sm:$0xff] %v8925_v40  ;;  %v2128_v55 = vadd.f32 %v2064_v53, %v2000_v61  ;;  %v1974_v51 = vsel %vm1923_vm0, %v8923_v17, %v1798_v43  ;;  %v1975_v14 = vsel %vm1923_vm0, %v8925_v40, %v1800_v5  ;;  %1839 = vrot.lane.b32.xlu1 %v8580_v4, %s7855_s1  ;;  %v1666_v61 = vld [vmem:[#allocation7 + $0x8] sm:$0xff]  ;;  %v11887_v4 = vld [vmem:[#allocation47_spill] sm:$0xff] }
 0x358   : > { %v2063_v49 = vmul.f32 %v1974_v51, %v1676_v34  ;;  %v2188_v10 = vmul.f32 %v1974_v51, %v8917_v19  ;;  %v2067_v57 = vmul.f32 %v1975_v14, %v1680_v36  ;;  %v2192_v45 = vmul.f32 %v1975_v14, %v8919_v27 }
 0x35a   : > { %v8939_v0 = vadd.f32 %v2063_v49, %v1999_v39  ;;  %v2252_v52 = vadd.f32 %v2188_v10, %v2124_v47  ;;  %v8941_v53 = vadd.f32 %v2067_v57, %v2003_v44  ;;  %v2256_v58 = vadd.f32 %v2192_v45, %v2128_v55  ;;  %1901 = vrot.lane.b32.xlu0 %v8572_v63, %s7855_s1  ;;  %v8977_v39 = vpop.permute.xlu0 %1801  ;;  %v8981_v14 = vpop.permute.xlu1 %1803  ;;  %v8997_v55 = vld [vmem:[#allocation5 + $0x8] sm:$0xff]  ;;  %v11856_v45 = vld [vmem:[#allocation77_spill] sm:$0xff] }
 0x35b   : > { %1899 = vrot.lane.b32.xlu1 %v8558_v59, %s7855_s1  ;;  %11855 = vst [vmem:[#allocation140_spill] sm:$0xff] %v8997_v55  ;;  %v1730_v57 = vld [vmem:[#allocation8 + $0x8] sm:$0xff]  ;;  %11859 = vst [vmem:[#allocation77_spill] sm:$0xff] %v9016_v30 }
 0x35c   : > { %11851 = vst [vmem:[#allocation136_spill] sm:$0xff] %v8939_v0  ;;  %11852 = vst [vmem:[#allocation137_spill] sm:$0xff] %v8941_v53  ;;  %v8947_v43 = vmul.f32 0.088388346, %v2252_v52  ;;  %v8949_v5 = vmul.f32 0.088388346, %v2256_v58 }
 0x35e   : > { %1809 = vrot.lane.b32.xlu0 %v8588_v7, %s7855_s1  ;;  %v8989_v44 = vpop.permute.xlu0 %1833  ;;  %v8991_v34 = vpop.permute.xlu1 %1835 }
 0x35f   : > { %1903 = vrot.lane.b32.xlu1 %v8582_v6, %s7855_s1  ;;  %11853 = vst [vmem:[#allocation138_spill] sm:$0xff] %v8989_v44  ;;  %11854 = vst [vmem:[#allocation139_spill] sm:$0xff] %v8991_v34 }
 0x362   : > { %1841 = vrot.lane.b32.xlu0 %v8592_v13, %s7855_s1 }
 0x363   : > { %1811 = vrot.lane.b32.xlu1 %v8596_v21, %s7855_s1  ;;  %v9231_v21 = vld [vmem:[#allocation7 + $0x160] sm:$0xff] }
 0x366   : > { %1813 = vrot.lane.b32.xlu0 %v8604_v18, %s7855_s1 }
 0x367   : > { %1843 = vrot.lane.b32.xlu1 %v8600_v15, %s7855_s1 }
 0x36a   : > { %1845 = vrot.lane.b32.xlu0 %v8608_v22, %s7855_s1  ;;  %v11883_v22 = vld [vmem:[#allocation43_spill] sm:$0xff] }
 0x36b   : > { %1815 = vrot.lane.b32.xlu1 %v8612_v24, %s7855_s1  ;;  %v9187_v24 = vld [vmem:[#allocation5 + $0x120] sm:$0xff] }
 0x36e   : > { %1905 = vrot.lane.b32.xlu0 %v8594_v20, %s7855_s1 }
 0x36f   : > { %1847 = vrot.lane.b32.xlu1 %v8616_v28, %s7855_s1 }
 0x372   : > { %1909 = vrot.lane.b32.xlu0 %v8610_v23, %s7855_s1 }
 0x373   : > { %1907 = vrot.lane.b32.xlu1 %v8602_v16, %s7855_s1 }
 0x376   : > { %1817 = vrot.lane.b32.xlu0 %v8620_v29, %s7855_s1 }
 0x377   : > { %1911 = vrot.lane.b32.xlu1 %v8618_v8, %s7855_s1 }
 0x37a   : > { %1849 = vrot.lane.b32.xlu0 %v8627_v31, %s7855_s1  ;;  %v11870_v31 = vld [vmem:[#allocation84_spill] sm:$0xff] }
 0x37b   : > { %1819 = vrot.lane.b32.xlu1 %v8631_v33, %s7855_s1 }
 0x37e   : > { %1821 = vrot.lane.b32.xlu0 %v8642_v35, %s7855_s1  ;;  %v2501_v35 = vmul.f32 %v8997_v55, %v8667_v9  ;;  %v11858_v9 = vld [vmem:[#allocation75_spill] sm:$0xff]  ;;  %v11899_v55 = vld [vmem:[#allocation58_spill] sm:$0xff] }
 0x37f   : > { %1851 = vrot.lane.b32.xlu1 %v8638_v38, %s7855_s1 }
 0x380   : > { %v2405_v29 = vpop.permute.xlu0 %2404 }
 0x381   : > { %v2437_v47 = vpop.permute.xlu1 %2436 }
 0x382   : > { %v2468_v51 = vsel %vm1923_vm0, %v2405_v29, %v2437_v47  ;;  %v2484_v33 = vsel %vm1923_vm0, %v2437_v47, %v2405_v29  ;;  %1853 = vrot.lane.b32.xlu0 %v8649_v3, %s7855_s1  ;;  %v11857_v47 = vld [vmem:[#allocation64_spill] sm:$0xff] }
 0x383   : > { %v2532_v49 = vmul.f32 %v2468_v51, %v8809_v26  ;;  %v2533_v10 = vmul.f32 %v2484_v33, %v1666_v61  ;;  %1823 = vrot.lane.b32.xlu1 %v8653_v2, %s7855_s1  ;;  %v2596_v36 = vmul.f32 %v2484_v33, %v8848_v37  ;;  %v2597_v53 = vmul.f32 %v2468_v51, %v1730_v57  ;;  %v1670_v61 = vld [vmem:[#allocation7 + $0x28] sm:$0xff]  ;;  %v11860_v51 = vld [vmem:[#allocation72_spill] sm:$0xff] }
 0x384   : > { %v11861_v33 = vld [vmem:[#allocation80_spill] sm:$0xff]  ;;  %v1738_v2 = vld [vmem:[#allocation8 + $0x48] sm:$0xff] }
 0x385   : > { %v2564_v52 = vadd.f32 %v2532_v49, %v11856_v45  ;;  %v2565_v58 = vadd.f32 %v2533_v10, %v2501_v35  ;;  %v2407_v29 = vpop.permute.xlu1 %2406  ;;  %v11862_v49 = vld [vmem:[#allocation120_spill] sm:$0xff] }
 0x386   : > { %1913 = vrot.lane.b32.xlu0 %v11857_v47, %s7855_s1  ;;  %v11863_v45 = vld [vmem:[#allocation68_spill] sm:$0xff] }
 0x387   : > { %v2628_v40 = vadd.f32 %v2596_v36, %v2564_v52  ;;  %v2629_v0 = vadd.f32 %v2597_v53, %v2565_v58  ;;  %1855 = vrot.lane.b32.xlu1 %v11858_v9, %s7855_s1  ;;  %v2503_v53 = vmul.f32 %v9016_v30, %v11861_v33  ;;  %v1734_v36 = vld [vmem:[#allocation8 + $0x28] sm:$0xff] }
 0x388   : > { %v2409_v26 = vpop.permute.xlu0 %2408  ;;  %v1674_v52 = vld [vmem:[#allocation7 + $0x48] sm:$0xff] }
 0x389   : > { %v2439_v17 = vpop.permute.xlu1 %2438 }
 0x38a   : > { %v2469_v35 = vsel %vm1923_vm0, %v2407_v29, %v2439_v17  ;;  %v2485_v37 = vsel %vm1923_vm0, %v2439_v17, %v2407_v29  ;;  %1917 = vrot.lane.b32.xlu0 %v11860_v51, %s7855_s1  ;;  %v11864_v17 = vld [vmem:[#allocation79_spill] sm:$0xff] }
 0x38b   : > { %v2534_v10 = vmul.f32 %v2469_v35, %v11862_v49  ;;  %v2535_v57 = vmul.f32 %v2485_v37, %v1670_v61  ;;  %1915 = vrot.lane.b32.xlu1 %v11863_v45, %s7855_s1  ;;  %v2598_v58 = vmul.f32 %v2485_v37, %v8850_v32  ;;  %v2599_v12 = vmul.f32 %v2469_v35, %v1734_v36  ;;  %v11865_v45 = vld [vmem:[#allocation29_spill] sm:$0xff]  ;;  %v11866_v37 = vld [vmem:[#allocation76_spill] sm:$0xff] }
 0x38c   : > { %v2441_v9 = vpop.permute.xlu0 %2440 }
 0x38d   : > { %v2566_v29 = vadd.f32 %v2534_v10, %v11864_v17  ;;  %v2567_v3 = vadd.f32 %v2535_v57, %v2503_v53  ;;  %v2470_v51 = vsel %vm1923_vm0, %v2409_v26, %v2441_v9  ;;  %v2486_v33 = vsel %vm1923_vm0, %v2441_v9, %v2409_v26  ;;  %v2411_v49 = vpop.permute.xlu1 %2410  ;;  %v11867_v53 = vld [vmem:[#allocation83_spill] sm:$0xff]  ;;  %v1678_v57 = vld [vmem:[#allocation7 + $0x68] sm:$0xff] }
 0x38e   : > { %v2537_v61 = vmul.f32 %v2486_v33, %v1674_v52  ;;  %v2601_v38 = vmul.f32 %v2470_v51, %v1738_v2  ;;  %1857 = vrot.lane.b32.xlu0 %v11865_v45, %s7855_s1  ;;  %v2536_v35 = vmul.f32 %v2470_v51, %v8883_v46  ;;  %v11868_v17 = vld [vmem:[#allocation82_spill] sm:$0xff]  ;;  %v11900_v45 = vld [vmem:[#allocation101_spill] sm:$0xff] }
 0x38f   : > { %v2630_v47 = vadd.f32 %v2598_v58, %v2566_v29  ;;  %v2631_v32 = vadd.f32 %v2599_v12, %v2567_v3  ;;  %1919 = vrot.lane.b32.xlu1 %v11866_v37, %s7855_s1  ;;  %v2504_v9 = vmul.f32 %v8887_v42, %v11868_v17  ;;  %v2506_v3 = vmul.f32 %v8889_v11, %v11870_v31  ;;  %v9049_v12 = vld [vmem:[#allocation8 + $0x68] sm:$0xff]  ;;  %v11872_v29 = vld [vmem:[#allocation33_spill] sm:$0xff]  ;;  %v11873_v31 = vld [vmem:[#allocation31_spill] sm:$0xff] }
 0x390   : > { %v2569_v36 = vadd.f32 %v2537_v61, %v11867_v53  ;;  %v2413_v10 = vpop.permute.xlu0 %2412  ;;  %11871 = vst [vmem:[#allocation120_spill] sm:$0xff] %v9049_v12  ;;  %v1682_v11 = vld [vmem:[#allocation7 + $0x88] sm:$0xff]  ;;  %v9087_v37 = vld [vmem:[#allocation8 + $0x80] sm:$0xff] }
 0x391   : > { %v2443_v26 = vpop.permute.xlu1 %2442  ;;  %v9043_v52 = vpack.c.bf16 %v2630_v47, %v2628_v40  ;;  %v9045_v2 = vpack.c.bf16 %v2631_v32, %v2629_v0  ;;  %v2568_v42 = vadd.f32 %v2536_v35, %v2504_v9  ;;  %v9064_v32 = vld [vmem:[#allocation8 + $0x88] sm:$0xff] }
 0x392   : > { %v2633_v46 = vadd.f32 %v2601_v38, %v2569_v36  ;;  %v2471_v51 = vsel %vm1923_vm0, %v2411_v49, %v2443_v26  ;;  %v2487_v58 = vsel %vm1923_vm0, %v2443_v26, %v2411_v49  ;;  %1861 = vrot.lane.b32.xlu0 %v11872_v29, %s7855_s1  ;;  %v2600_v38 = vmul.f32 %v2486_v33, %v8917_v19  ;;  %v11875_v35 = vld [vmem:[#allocation86_spill] sm:$0xff]  ;;  %v9072_v19 = vld [vmem:[#allocation7 + $0x80] sm:$0xff] }
 0x393   : > { %11869 = vst [vmem:[#allocation80_spill] sm:$0xff] %v9045_v2  ;;  %v2538_v40 = vmul.f32 %v2471_v51, %v8885_v54  ;;  %v2539_v0 = vmul.f32 %v2487_v58, %v1678_v57  ;;  %v2603_v47 = vmul.f32 %v2471_v51, %v9049_v12  ;;  %1859 = vrot.lane.b32.xlu1 %v11873_v31, %s7855_s1  ;;  %11874 = vst [vmem:[#allocation79_spill] sm:$0xff] %v9064_v32  ;;  %v11876_v9 = vld [vmem:[#allocation38_spill] sm:$0xff] }
 0x394   : > { %v2602_v61 = vmul.f32 %v2487_v58, %v8919_v27  ;;  %6316 = vmatprep.subr.bf16.mxu0 %v9043_v52  ;;  %v2445_v49 = vpop.permute.xlu0 %2444  ;;  %v2632_v26 = vadd.f32 %v2600_v38, %v2568_v42  ;;  %v1686_v2 = vld [vmem:[#allocation7 + $0xa8] sm:$0xff]  ;;  %v9089_v42 = vld [vmem:[#allocation8 + $0xa0] sm:$0xff] }
 0x395   : > { %v2570_v53 = vadd.f32 %v2538_v40, %v2506_v3  ;;  %v2571_v36 = vadd.f32 %v2539_v0, %v11875_v35  ;;  %6317 = vmatpush3.bf16.xpose.msra.mxu0 %v9043_v52  ;;  %v2472_v54 = vsel %vm1923_vm0, %v2413_v10, %v2445_v49  ;;  %v2488_v57 = vsel %vm1923_vm0, %v2445_v49, %v2413_v10  ;;  %v2415_v17 = vpop.permute.xlu1 %2414  ;;  %v11877_v40 = vld [vmem:[#allocation35_spill] sm:$0xff]  ;;  %v9080_v0 = vld [vmem:[#allocation5 + $0x80] sm:$0xff] }
 0x396   : > { %v2541_v27 = vmul.f32 %v2488_v57, %v1682_v11  ;;  %v2605_v33 = vmul.f32 %v2472_v54, %v9064_v32  ;;  %1865 = vrot.lane.b32.xlu0 %v11876_v9, %s7855_s1  ;;  %v2540_v58 = vmul.f32 %v2472_v54, %v9072_v19  ;;  %v11878_v10 = vld [vmem:[#allocation89_spill] sm:$0xff]  ;;  %v11879_v32 = vld [vmem:[#allocation88_spill] sm:$0xff] }
 0x397   : > { %v2634_v3 = vadd.f32 %v2602_v61, %v2570_v53  ;;  %v2635_v51 = vadd.f32 %v2603_v47, %v2571_v36  ;;  %1863 = vrot.lane.b32.xlu1 %v11877_v40, %s7855_s1  ;;  %v9083_v11 = vld [vmem:[#allocation5 + $0xa0] sm:$0xff]  ;;  %v2508_v12 = vmul.f32 %v9080_v0, %v11879_v32  ;;  %v11881_v53 = vld [vmem:[#allocation90_spill] sm:$0xff] }
 0x398   : > { %v2573_v49 = vadd.f32 %v2541_v27, %v11878_v10  ;;  %v2417_v35 = vpop.permute.xlu0 %2416  ;;  %v2510_v36 = vmul.f32 %v9083_v11, %v11881_v53  ;;  %v9097_v54 = vld [vmem:[#allocation7 + $0xa0] sm:$0xff]  ;;  %v9099_v27 = vld [vmem:[#allocation8 + $0xa8] sm:$0xff] }
 0x399   : > { %v2447_v47 = vpop.permute.xlu1 %2446  ;;  %v9091_v38 = vpack.c.bf16 %v2634_v3, %v2632_v26  ;;  %v9093_v61 = vpack.c.bf16 %v2635_v51, %v2633_v46  ;;  %11882 = vst [vmem:[#allocation82_spill] sm:$0xff] %v9099_v27  ;;  %v2572_v26 = vadd.f32 %v2540_v58, %v2508_v12  ;;  %v11884_v53 = vld [vmem:[#allocation41_spill] sm:$0xff] }
 0x39a   : > { %v2637_v10 = vadd.f32 %v2605_v33, %v2573_v49  ;;  %v2473_v32 = vsel %vm1923_vm0, %v2415_v17, %v2447_v47  ;;  %v2489_v28 = vsel %vm1923_vm0, %v2447_v47, %v2415_v17  ;;  %1869 = vrot.lane.b32.xlu0 %v11883_v22, %s7855_s1  ;;  %v9111_v33 = vld [vmem:[#allocation8 + $0xc8] sm:$0xff]  ;;  %v2604_v49 = vmul.f32 %v2488_v57, %v9087_v37  ;;  %v9116_v17 = vld [vmem:[#allocation7 + $0xc0] sm:$0xff]  ;;  %v11886_v47 = vld [vmem:[#allocation92_spill] sm:$0xff] }
 0x39b   : > { %11880 = vst [vmem:[#allocation83_spill] sm:$0xff] %v9093_v61  ;;  %v2542_v46 = vmul.f32 %v2473_v32, %v9097_v54  ;;  %v2543_v3 = vmul.f32 %v2489_v28, %v1686_v2  ;;  %v2607_v51 = vmul.f32 %v2473_v32, %v9099_v27  ;;  %1867 = vrot.lane.b32.xlu1 %v11884_v53, %s7855_s1  ;;  %v1690_v61 = vld [vmem:[#allocation7 + $0xc8] sm:$0xff]  ;;  %11885 = vst [vmem:[#allocation84_spill] sm:$0xff] %v9111_v33  ;;  %v11888_v22 = vld [vmem:[#allocation45_spill] sm:$0xff] }
 0x39c   : > { %v2606_v15 = vmul.f32 %v2489_v28, %v9089_v42  ;;  %6318 = vmatprep.subr.bf16.mxu0 %v9091_v38  ;;  %v2449_v12 = vpop.permute.xlu0 %2448  ;;  %v11889_v53 = vld [vmem:[#allocation95_spill] sm:$0xff]  ;;  %v9137_v40 = vld [vmem:[#allocation5 + $0xe0] sm:$0xff] }
 0x39d   : > { %v2574_v58 = vadd.f32 %v2542_v46, %v2510_v36  ;;  %v2575_v2 = vadd.f32 %v2543_v3, %v11886_v47  ;;  %6319 = vmatpush3.bf16.xpose.msra.mxu0 %v9091_v38  ;;  %v2474_v32 = vsel %vm1923_vm0, %v2417_v35, %v2449_v12  ;;  %v2490_v27 = vsel %vm1923_vm0, %v2449_v12, %v2417_v35  ;;  %v2419_v13 = vpop.permute.xlu1 %2418  ;;  %v9133_v12 = vld [vmem:[#allocation7 + $0xe0] sm:$0xff] }
 0x39e   : > { %v2545_v57 = vmul.f32 %v2490_v27, %v1690_v61  ;;  %v2609_v28 = vmul.f32 %v2474_v32, %v9111_v33  ;;  %1873 = vrot.lane.b32.xlu0 %v11887_v4, %s7855_s1  ;;  %v2636_v36 = vadd.f32 %v2604_v49, %v2572_v26  ;;  %v2544_v47 = vmul.f32 %v2474_v32, %v9116_v17  ;;  %v1694_v61 = vld [vmem:[#allocation7 + $0xe8] sm:$0xff] }
 0x39f   : > { %v2638_v46 = vadd.f32 %v2606_v15, %v2574_v58  ;;  %v2639_v3 = vadd.f32 %v2607_v51, %v2575_v2  ;;  %1871 = vrot.lane.b32.xlu1 %v11888_v22, %s7855_s1  ;;  %v9135_v33 = vld [vmem:[#allocation8 + $0xe8] sm:$0xff]  ;;  %v9141_v15 = vld [vmem:[#allocation8 + $0xc0] sm:$0xff]  ;;  %11903 = vst [vmem:[#allocation95_spill] sm:$0xff] %v9187_v24 }
 0x3a0   : > { %v2577_v9 = vadd.f32 %v2545_v57, %v11889_v53  ;;  %v2421_v35 = vpop.permute.xlu0 %2420  ;;  %11890 = vst [vmem:[#allocation86_spill] sm:$0xff] %v9135_v33  ;;  %v11891_v4 = vld [vmem:[#allocation94_spill] sm:$0xff]  ;;  %v9143_v51 = vld [vmem:[#allocation8 + $0xe0] sm:$0xff]  ;;  %v11893_v53 = vld [vmem:[#allocation96_spill] sm:$0xff] }
 0x3a1   : > { %v2512_v26 = vmul.f32 %v9127_v62, %v11891_v4  ;;  %v2451_v49 = vpop.permute.xlu1 %2450  ;;  %v9145_v58 = vpack.c.bf16 %v2638_v46, %v2636_v36  ;;  %v9147_v2 = vpack.c.bf16 %v2639_v3, %v2637_v10  ;;  %v2514_v32 = vmul.f32 %v9137_v40, %v11893_v53  ;;  %v11894_v4 = vld [vmem:[#allocation54_spill] sm:$0xff] }
 0x3a2   : > { %v2641_v57 = vadd.f32 %v2609_v28, %v2577_v9  ;;  %v2475_v22 = vsel %vm1923_vm0, %v2419_v13, %v2451_v49  ;;  %v2491_v29 = vsel %vm1923_vm0, %v2451_v49, %v2419_v13  ;;  %1877 = vrot.lane.b32.xlu0 %v11894_v4, %s7855_s1  ;;  %v11895_v46 = vld [vmem:[#allocation50_spill] sm:$0xff]  ;;  %v2608_v28 = vmul.f32 %v2490_v27, %v9141_v15  ;;  %v9166_v13 = vld [vmem:[#allocation7 + $0x100] sm:$0xff] }
 0x3a3   : > { %11892 = vst [vmem:[#allocation89_spill] sm:$0xff] %v9147_v2  ;;  %v2576_v30 = vadd.f32 %v2544_v47, %v2512_v26  ;;  %v2546_v31 = vmul.f32 %v2475_v22, %v9133_v12  ;;  %v2547_v36 = vmul.f32 %v2491_v29, %v1694_v61  ;;  %v2611_v10 = vmul.f32 %v2475_v22, %v9135_v33  ;;  %v1698_v3 = vld [vmem:[#allocation7 + $0x108] sm:$0xff]  ;;  %v11898_v4 = vld [vmem:[#allocation61_spill] sm:$0xff] }
 0x3a4   : > { %1875 = vrot.lane.b32.xlu1 %v11895_v46, %s7855_s1  ;;  %v9161_v9 = vld [vmem:[#allocation8 + $0x108] sm:$0xff]  ;;  %v2610_v53 = vmul.f32 %v2491_v29, %v9143_v51  ;;  %6320 = vmatprep.subr.bf16.mxu0 %v9145_v58  ;;  %v2453_v47 = vpop.permute.xlu0 %2452  ;;  %v9177_v46 = vld [vmem:[#allocation5 + $0x100] sm:$0xff] }
 0x3a5   : > { %11896 = vst [vmem:[#allocation88_spill] sm:$0xff] %v9161_v9  ;;  %v2578_v26 = vadd.f32 %v2546_v31, %v2514_v32  ;;  %v11897_v49 = vld [vmem:[#allocation98_spill] sm:$0xff]  ;;  %6321 = vmatpush3.bf16.xpose.msra.mxu0 %v9145_v58  ;;  %v2476_v22 = vsel %vm1923_vm0, %v2421_v35, %v2453_v47  ;;  %v2492_v2 = vsel %vm1923_vm0, %v2453_v47, %v2421_v35  ;;  %v2423_v33 = vpop.permute.xlu1 %2422  ;;  %v9183_v47 = vld [vmem:[#allocation7 + $0x120] sm:$0xff] }
 0x3a6   : > { %v2579_v61 = vadd.f32 %v2547_v36, %v11897_v49  ;;  %v2549_v27 = vmul.f32 %v2492_v2, %v1698_v3  ;;  %v2613_v29 = vmul.f32 %v2476_v22, %v9161_v9  ;;  %1881 = vrot.lane.b32.xlu0 %v11898_v4, %s7855_s1  ;;  %v2640_v31 = vadd.f32 %v2608_v28, %v2576_v30  ;;  %v1702_v3 = vld [vmem:[#allocation7 + $0x128] sm:$0xff]  ;;  %v11904_v4 = vld [vmem:[#allocation100_spill] sm:$0xff]  ;;  %v9191_v28 = vld [vmem:[#allocation8 + $0x100] sm:$0xff] }
 0x3a7   : > { %v2642_v32 = vadd.f32 %v2610_v53, %v2578_v26  ;;  %v2548_v49 = vmul.f32 %v2476_v22, %v9166_v13  ;;  %11901 = vst [vmem:[#allocation90_spill] sm:$0xff] %v9183_v47  ;;  %v9185_v9 = vld [vmem:[#allocation8 + $0x128] sm:$0xff]  ;;  %v2516_v30 = vmul.f32 %v9177_v46, %v11904_v4  ;;  %11905 = vst [vmem:[#allocation94_spill] sm:$0xff] %v9191_v28  ;;  %v11910_v4 = vld [vmem:[#allocation69_spill] sm:$0xff] }
 0x3a8   : > { %v2643_v36 = vadd.f32 %v2611_v10, %v2579_v61  ;;  %1879 = vrot.lane.b32.xlu1 %v11899_v55, %s7855_s1  ;;  %v2581_v8 = vadd.f32 %v2549_v27, %v11900_v45  ;;  %v2425_v35 = vpop.permute.xlu0 %2424  ;;  %11902 = vst [vmem:[#allocation92_spill] sm:$0xff] %v9185_v9  ;;  %v9193_v10 = vld [vmem:[#allocation8 + $0x120] sm:$0xff]  ;;  %v11909_v45 = vld [vmem:[#allocation102_spill] sm:$0xff] }
 0x3a9   : > { %11906 = vst [vmem:[#allocation96_spill] sm:$0xff] %v9193_v10  ;;  %v2455_v53 = vpop.permute.xlu1 %2454  ;;  %v9195_v26 = vpack.c.bf16 %v2642_v32, %v2640_v31  ;;  %v2518_v22 = vmul.f32 %v9187_v24, %v11909_v45  ;;  %v2580_v18 = vadd.f32 %v2548_v49, %v2516_v30  ;;  %v11911_v32 = vld [vmem:[#allocation65_spill] sm:$0xff] }
 0x3aa   : > { %v9197_v61 = vpack.c.bf16 %v2643_v36, %v2641_v57  ;;  %v2645_v27 = vadd.f32 %v2613_v29, %v2581_v8  ;;  %v2477_v55 = vsel %vm1923_vm0, %v2423_v33, %v2455_v53  ;;  %v2493_v23 = vsel %vm1923_vm0, %v2455_v53, %v2423_v33  ;;  %1885 = vrot.lane.b32.xlu0 %v11910_v4, %s7855_s1  ;;  %v1706_v36 = vld [vmem:[#allocation7 + $0x148] sm:$0xff]  ;;  %v9216_v33 = vld [vmem:[#allocation7 + $0x140] sm:$0xff]  ;;  %v11914_v53 = vld [vmem:[#allocation104_spill] sm:$0xff] }
 0x3ab   : > { %11907 = vst [vmem:[#allocation98_spill] sm:$0xff] %v9195_v26  ;;  %v2550_v16 = vmul.f32 %v2477_v55, %v9183_v47  ;;  %v2551_v31 = vmul.f32 %v2493_v23, %v1702_v3  ;;  %v2615_v57 = vmul.f32 %v2477_v55, %v9185_v9  ;;  %v9211_v8 = vld [vmem:[#allocation8 + $0x148] sm:$0xff]  ;;  %v2612_v29 = vmul.f32 %v2492_v2, %v9191_v28  ;;  %v9225_v4 = vld [vmem:[#allocation5 + $0x140] sm:$0xff] }
 0x3ac   : > { %11908 = vst [vmem:[#allocation101_spill] sm:$0xff] %v9197_v61  ;;  %1883 = vrot.lane.b32.xlu1 %v11911_v32, %s7855_s1  ;;  %11912 = vst [vmem:[#allocation100_spill] sm:$0xff] %v9211_v8  ;;  %v2614_v45 = vmul.f32 %v2493_v23, %v9193_v10  ;;  %6322 = vmatprep.subr.bf16.mxu0 %v9195_v26  ;;  %v2457_v49 = vpop.permute.xlu0 %2456 }
 0x3ad   : > { %11913 = vst [vmem:[#allocation102_spill] sm:$0xff] %v9216_v33  ;;  %v2582_v30 = vadd.f32 %v2550_v16, %v2518_v22  ;;  %v2583_v3 = vadd.f32 %v2551_v31, %v11914_v53  ;;  %6323 = vmatpush3.bf16.xpose.msra.mxu0 %v9195_v26  ;;  %v2478_v55 = vsel %vm1923_vm0, %v2425_v35, %v2457_v49  ;;  %v2427_v9 = vpop.permute.xlu1 %2426  ;;  %11915 = vst [vmem:[#allocation104_spill] sm:$0xff] %v9225_v4  ;;  %v11916_v22 = vld [vmem:[#allocation74_spill] sm:$0xff]  ;;  %v11917_v31 = vld [vmem:[#allocation107_spill] sm:$0xff] }
 0x3ae   : > { %v2494_v61 = vsel %vm1923_vm0, %v2457_v49, %v2425_v35  ;;  %v2617_v23 = vmul.f32 %v2478_v55, %v9211_v8  ;;  %v2644_v32 = vadd.f32 %v2612_v29, %v2580_v18  ;;  %v2552_v16 = vmul.f32 %v2478_v55, %v9216_v33  ;;  %11918 = vst [vmem:[#allocation107_spill] sm:$0xff] %v9231_v21  ;;  %v1710_v35 = vld [vmem:[#allocation7 + $0x168] sm:$0xff]  ;;  %v9239_v29 = vld [vmem:[#allocation8 + $0x140] sm:$0xff]  ;;  %v11926_v55 = vld [vmem:[#allocation108_spill] sm:$0xff] }
 0x3af   : > { %v2553_v2 = vmul.f32 %v2494_v61, %v1706_v36  ;;  %v2646_v10 = vadd.f32 %v2614_v45, %v2582_v30  ;;  %v2647_v24 = vadd.f32 %v2615_v57, %v2583_v3  ;;  %v9233_v49 = vld [vmem:[#allocation8 + $0x168] sm:$0xff]  ;;  %v9235_v36 = vld [vmem:[#allocation5 + $0x160] sm:$0xff] }
 0x3b0   : > { %1887 = vrot.lane.b32.xlu1 %v11916_v22, %s7855_s1  ;;  %v2429_v26 = vpop.permute.xlu0 %2428  ;;  %11919 = vst [vmem:[#allocation141_spill] sm:$0xff] %v9233_v49  ;;  %11920 = vst [vmem:[#allocation142_spill] sm:$0xff] %v9235_v36  ;;  %v11921_v8 = vld [vmem:[#allocation106_spill] sm:$0xff]  ;;  %v9241_v57 = vld [vmem:[#allocation8 + $0x160] sm:$0xff]  ;;  %s7751_s1 = sshll.u32 %s7856_s24, 4  ;;  %s7752_s1 = int_to_ptr.vmem [resolvable:$false] %s7751_s1 }
 0x3b1   : > { %v2585_v53 = vadd.f32 %v2553_v2, %v11917_v31  ;;  %v2520_v18 = vmul.f32 %v9225_v4, %v11921_v8  ;;  %11922 = vst [vmem:[#allocation106_spill] sm:$0xff] %v9239_v29  ;;  %11923 = vst [vmem:[#allocation143_spill] sm:$0xff] %v9241_v57  ;;  %v2459_v45 = vpop.permute.xlu1 %2458  ;;  %v9243_v30 = vpack.c.bf16 %v2646_v10, %v2644_v32  ;;  %v9256_v10 = vld [vmem:[#allocation8 + $0x188] sm:$0xff]  ;;  %s7753_s4 = scalar_lea.vmem %s7752_s1, 4096  ;;  %p7754_p4 = scmp.lt.s32.totalorder %s11429_s22, %s7752_s1 }
 0x3b2   : > { %v9245_v3 = vpack.c.bf16 %v2647_v24, %v2645_v27  ;;  %v2522_v2 = vmul.f32 %v9235_v36, %v11926_v55  ;;  %v2479_v22 = vsel %vm1923_vm0, %v2427_v9, %v2459_v45  ;;  %v2495_v33 = vsel %vm1923_vm0, %v2459_v45, %v2427_v9  ;;  %v1714_v24 = vld [vmem:[#allocation7 + $0x188] sm:$0xff]  ;;  %11927 = vst [vmem:[#allocation108_spill] sm:$0xff] %v9256_v10  ;;  %p7755_p10 = scmp.lt.s32.totalorder %s7753_s4, %s7747_s9 }
 0x3b3   : > { %11924 = vst [vmem:[#allocation144_spill] sm:$0xff] %v9243_v30  ;;  %v2649_v31 = vadd.f32 %v2617_v23, %v2585_v53  ;;  %v2584_v8 = vadd.f32 %v2552_v16, %v2520_v18  ;;  %v2554_v4 = vmul.f32 %v2479_v22, %v9231_v21  ;;  %v2555_v47 = vmul.f32 %v2495_v33, %v1710_v35  ;;  %v9260_v23 = vld [vmem:[#allocation7 + $0x180] sm:$0xff]  ;;  %v11929_v9 = vld [vmem:[#allocation110_spill] sm:$0xff]  ;;  %v11932_v21 = vld [vmem:[#allocation112_spill] sm:$0xff] }
 0x3b4   : > { %11925 = vst [vmem:[#allocation145_spill] sm:$0xff] %v9245_v3  ;;  %v2619_v28 = vmul.f32 %v2479_v22, %v9233_v49  ;;  %6324 = vmatprep.subr.bf16.mxu0 %v9243_v30  ;;  %v2616_v27 = vmul.f32 %v2494_v61, %v9239_v29  ;;  %v2618_v32 = vmul.f32 %v2495_v33, %v9241_v57  ;;  %11928 = vst [vmem:[#allocation146_spill] sm:$0xff] %v9260_v23  ;;  %v2461_v53 = vpop.permute.xlu0 %2460  ;;  %v9273_v36 = vld [vmem:[#allocation8 + $0x1a8] sm:$0xff]  ;;  %v7387_v29 = vld [vmem:[#allocation5 + $0x180] sm:$0xff]  ;;  %p7756_p11 = por %p7755_p10, %p7754_p4 }
 0x3b5   : > { %v2586_v55 = vadd.f32 %v2554_v4, %v2522_v2  ;;  %v2587_v16 = vadd.f32 %v2555_v47, %v11929_v9  ;;  %6325 = vmatpush3.bf16.xpose.msra.mxu0 %v9243_v30  ;;  %v2480_v22 = vsel %vm1923_vm0, %v2429_v26, %v2461_v53  ;;  %v2496_v35 = vsel %vm1923_vm0, %v2461_v53, %v2429_v26  ;;  %v2431_v18 = vpop.permute.xlu1 %2430  ;;  %v11930_v4 = vld [vmem:[#allocation113_spill] sm:$0xff]  ;;  %v1718_v30 = vld [vmem:[#allocation7 + $0x1a8] sm:$0xff] }
 0x3b6   : > { %v2557_v45 = vmul.f32 %v2496_v35, %v1714_v24  ;;  %v2621_v61 = vmul.f32 %v2480_v22, %v9256_v10  ;;  %v2648_v3 = vadd.f32 %v2616_v27, %v2584_v8  ;;  %v2556_v57 = vmul.f32 %v2480_v22, %v9260_v23  ;;  %v9271_v9 = vld [vmem:[#allocation7 + $0x1a0] sm:$0xff]  ;;  %11931 = vst [vmem:[#allocation110_spill] sm:$0xff] %v9273_v36  ;;  %p7757_p3 = pnand %p7756_p11, %p7750_p8 }
 0x3b7   : > { %v2650_v33 = vadd.f32 %v2618_v32, %v2586_v55  ;;  %v2651_v49 = vadd.f32 %v2619_v28, %v2587_v16  ;;  %v2524_v26 = vmul.f32 %v7387_v29, %v11932_v21  ;;  %v9276_v53 = vld [vmem:[#allocation8 + $0x180] sm:$0xff]  ;;  %v11937_v55 = vld [vmem:[#allocation114_spill] sm:$0xff] }
 0x3b8   : > { %v2589_v2 = vadd.f32 %v2557_v45, %v11930_v4  ;;  %v2433_v47 = vpop.permute.xlu0 %2432  ;;  %11933 = vst [vmem:[#allocation113_spill] sm:$0xff] %v9276_v53  ;;  %v9278_v24 = vld [vmem:[#allocation8 + $0x1a0] sm:$0xff] }
 0x3b9   : > { %11934 = vst [vmem:[#allocation112_spill] sm:$0xff] %v9278_v24  ;;  %v2463_v8 = vpop.permute.xlu1 %2462  ;;  %v9280_v27 = vpack.c.bf16 %v2650_v33, %v2648_v3  ;;  %v9282_v28 = vpack.c.bf16 %v2651_v49, %v2649_v31  ;;  %v7388_v32 = vld [vmem:[#allocation5 + $0x1a0] sm:$0xff]  ;;  %v2588_v21 = vadd.f32 %v2556_v57, %v2524_v26  ;;  %v1722_v49 = vld [vmem:[#allocation7 + $0x1c8] sm:$0xff]  ;;  %v2620_v31 = vmul.f32 %v2496_v35, %v9276_v53 }
 0x3ba   : > { %v2526_v16 = vmul.f32 %v7388_v32, %v11937_v55  ;;  %v2653_v22 = vadd.f32 %v2621_v61, %v2589_v2  ;;  %v2481_v45 = vsel %vm1923_vm0, %v2431_v18, %v2463_v8  ;;  %v2497_v4 = vsel %vm1923_vm0, %v2463_v8, %v2431_v18  ;;  %v9292_v3 = vld [vmem:[#allocation8 + $0x1c8] sm:$0xff]  ;;  %v9296_v33 = vld [vmem:[#allocation7 + $0x1c0] sm:$0xff]  ;;  %v11939_v18 = vld [vmem:[#allocation116_spill] sm:$0xff] }
 0x3bb   : > { %11935 = vst [vmem:[#allocation147_spill] sm:$0xff] %v9280_v27  ;;  %11936 = vst [vmem:[#allocation148_spill] sm:$0xff] %v9282_v28  ;;  %v2558_v29 = vmul.f32 %v2481_v45, %v9271_v9  ;;  %v2559_v10 = vmul.f32 %v2497_v4, %v1718_v30  ;;  %v2623_v23 = vmul.f32 %v2481_v45, %v9273_v36  ;;  %6326 = vmatprep.subr.bf16.mxu0 %v9280_v27  ;;  %v9298_v32 = vld [vmem:[#allocation5 + $0x1c8] sm:$0xff]  ;;  %v9309_v28 = vld [vmem:[#allocation5 + $0x1e0] sm:$0xff] }
 0x3bc   : > { %11938 = vst [vmem:[#allocation114_spill] sm:$0xff] %v9292_v3  ;;  %v2622_v61 = vmul.f32 %v2497_v4, %v9278_v24  ;;  %v2465_v2 = vpop.permute.xlu0 %2464  ;;  %v2529_v35 = vmul.f32 %v9298_v32, %v8833_v50  ;;  %v9314_v53 = vld [vmem:[#allocation7 + $0x1e0] sm:$0xff] }
 0x3bd   : > { %v2590_v57 = vadd.f32 %v2558_v29, %v2526_v16  ;;  %v2591_v26 = vadd.f32 %v2559_v10, %v11939_v18  ;;  %6327 = vmatpush3.bf16.xpose.msra.mxu0 %v9280_v27  ;;  %v2482_v30 = vsel %vm1923_vm0, %v2433_v47, %v2465_v2  ;;  %v2498_v8 = vsel %vm1923_vm0, %v2465_v2, %v2433_v47  ;;  %v2435_v55 = vpop.permute.xlu1 %2434  ;;  %v1726_v47 = vld [vmem:[#allocation7 + $0x1e8] sm:$0xff]  ;;  %v7389_v50 = vld [vmem:[#allocation5 + $0x1c0] sm:$0xff] }
 0x3be   : > { %v2561_v45 = vmul.f32 %v2498_v8, %v1722_v49  ;;  %v2625_v4 = vmul.f32 %v2482_v30, %v9292_v3  ;;  %v2652_v16 = vadd.f32 %v2620_v31, %v2588_v21  ;;  %v2560_v18 = vmul.f32 %v2482_v30, %v9296_v33  ;;  %v9316_v2 = vld [vmem:[#allocation8 + $0x1e8] sm:$0xff]  ;;  %v11940_v49 = vld [vmem:[#allocation119_spill] sm:$0xff] }
 0x3bf   : > { %v2654_v29 = vadd.f32 %v2622_v61, %v2590_v57  ;;  %v2655_v10 = vadd.f32 %v2623_v23, %v2591_v26  ;;  %v9318_v27 = vld [vmem:[#allocation5 + $0x1e8] sm:$0xff]  ;;  %v2528_v3 = vmul.f32 %v7389_v50, %v11940_v49  ;;  %v2530_v21 = vmul.f32 %v9309_v28, %v8840_v41  ;;  %v9329_v26 = vld [vmem:[#allocation8 + $0x1c0] sm:$0xff] }
 0x3c0   : > { %v2593_v24 = vadd.f32 %v2561_v45, %v2529_v35  ;;  %v9312_v36 = vpop.permute.xlu0 %1805  ;;  %v2531_v57 = vmul.f32 %v9318_v27, %v8846_v25  ;;  %v9331_v35 = vld [vmem:[#allocation8 + $0x1e0] sm:$0xff]  ;;  %v9344_v25 = vsel %vm1923_vm0, %v8977_v39, %v8989_v44 }
 0x3c1   : > { %v2467_v31 = vpop.permute.xlu1 %2466  ;;  %v9323_v23 = vpack.c.bf16 %v2654_v29, %v2652_v16  ;;  %v9325_v61 = vpack.c.bf16 %v2655_v10, %v2653_v22  ;;  %v2592_v41 = vadd.f32 %v2560_v18, %v2528_v3  ;;  %v2068_v44 = vmul.f32 %v9344_v25, %v9072_v19 }
 0x3c2   : > { %v2657_v30 = vadd.f32 %v2625_v4, %v2593_v24  ;;  %v2483_v45 = vsel %vm1923_vm0, %v2435_v55, %v2467_v31  ;;  %v2499_v50 = vsel %vm1923_vm0, %v2467_v31, %v2435_v55  ;;  %v2624_v4 = vmul.f32 %v2498_v8, %v9329_v26 }
 0x3c3   : > { %11941 = vst [vmem:[#allocation116_spill] sm:$0xff] %v9325_v61  ;;  %v2562_v16 = vmul.f32 %v2483_v45, %v9314_v53  ;;  %v2563_v29 = vmul.f32 %v2499_v50, %v1726_v47  ;;  %v2627_v22 = vmul.f32 %v2483_v45, %v9316_v2  ;;  %6328 = vmatprep.subr.bf16.mxu0 %v9323_v23  ;;  %v1620_v47 = vld [vmem:[#allocation5 + $0x98] sm:$0xff] }
 0x3c4   : > { %v9346_v24 = vpop.permute.xlu0 %1837  ;;  %v2626_v3 = vmul.f32 %v2499_v50, %v9331_v35  ;;  %v2656_v49 = vadd.f32 %v2624_v4, %v2592_v41  ;;  %v1684_v61 = vld [vmem:[#allocation7 + $0x98] sm:$0xff]  ;;  %v9357_v8 = vsel %vm1923_vm0, %v8981_v14, %v8991_v34  ;;  %v2007_v4 = vmul.f32 %v1620_v47, %v8548_v56 }
 0x3c5   : > { %v2594_v10 = vadd.f32 %v2562_v16, %v2530_v21  ;;  %v2595_v55 = vadd.f32 %v2563_v29, %v2531_v57  ;;  %6329 = vmatpush3.bf16.xpose.msra.mxu0 %v9323_v23  ;;  %v1808_v18 = vpop.permute.xlu1 %1807  ;;  %v11942_v57 = vld [vmem:[#allocation37_spill] sm:$0xff]  ;;  %v1624_v16 = vld [vmem:[#allocation5 + $0xb8] sm:$0xff] }
 0x3c6   : > { %v2004_v50 = vmul.f32 %v9080_v0, %v11942_v57  ;;  %v9378_v0 = vsel %vm1923_vm0, %v9312_v36, %v9346_v24  ;;  %v1692_v56 = vld [vmem:[#allocation7 + $0xd8] sm:$0xff] }
 0x3c7   : > { %v2658_v31 = vadd.f32 %v2626_v3, %v2594_v10  ;;  %v2659_v45 = vadd.f32 %v2627_v22, %v2595_v55  ;;  %v1628_v10 = vld [vmem:[#allocation5 + $0xd8] sm:$0xff] }
 0x3c8   : > { %v9359_v21 = vpop.permute.xlu0 %1897  ;;  %v11945_v47 = vld [vmem:[#allocation40_spill] sm:$0xff] }
 0x3c9   : > { %v1976_v41 = vsel %vm1923_vm0, %v9359_v21, %v8977_v39  ;;  %v9367_v29 = vpop.permute.xlu1 %1839  ;;  %v9369_v19 = vpack.c.bf16 %v2658_v31, %v2656_v49  ;;  %v9371_v22 = vpack.c.bf16 %v2659_v45, %v2657_v30  ;;  %v2072_v39 = vmul.f32 %v9357_v8, %v9097_v54  ;;  %v1688_v57 = vld [vmem:[#allocation7 + $0xb8] sm:$0xff] }
 0x3ca   : > { %11943 = vst [vmem:[#allocation119_spill] sm:$0xff] %v9367_v29  ;;  %v2071_v55 = vmul.f32 %v1976_v41, %v1684_v61  ;;  %v2196_v3 = vmul.f32 %v1976_v41, %v9087_v37  ;;  %v9386_v30 = vsel %vm1923_vm0, %v1808_v18, %v9367_v29  ;;  %v2008_v49 = vmul.f32 %v9083_v11, %v11945_v47  ;;  %v12000_v29 = vld [vmem:[#allocation62_spill] sm:$0xff] }
 0x3cb   : > { %11944 = vst [vmem:[#allocation37_spill] sm:$0xff] %v9371_v22  ;;  %6330 = vmatprep.subr.bf16.mxu0 %v9369_v19  ;;  %v2011_v31 = vmul.f32 %v1624_v16, %v8558_v59  ;;  %v2132_v45 = vadd.f32 %v2068_v44, %v2004_v50  ;;  %v2012_v54 = vmul.f32 %v9127_v62, %v8564_v60 }
 0x3cc   : > { %v9392_v61 = vadd.f32 %v2071_v55, %v2007_v4  ;;  %v9394_v37 = vpop.permute.xlu0 %1901  ;;  %v2015_v41 = vmul.f32 %v1628_v10, %v8572_v63  ;;  %v2076_v22 = vmul.f32 %v9378_v0, %v9116_v17  ;;  %v2080_v11 = vmul.f32 %v9386_v30, %v9133_v12  ;;  %v1632_v63 = vld [vmem:[#allocation5 + $0xf8] sm:$0xff] }
 0x3cd   : > { %6331 = vmatpush3.bf16.xpose.msra.mxu0 %v9369_v19  ;;  %v1978_v59 = vsel %vm1923_vm0, %v9394_v37, %v9312_v36  ;;  %v9406_v44 = vpop.permute.xlu1 %1899  ;;  %v2260_v62 = vadd.f32 %v2196_v3, %v2132_v45  ;;  %v2136_v17 = vadd.f32 %v2072_v39, %v2008_v49  ;;  %v2016_v10 = vmul.f32 %v9137_v40, %v8574_v1 }
 0x3ce   : > { %11946 = vst [vmem:[#allocation40_spill] sm:$0xff] %v9392_v61  ;;  %v2079_v50 = vmul.f32 %v1978_v59, %v1692_v56  ;;  %v1977_v60 = vsel %vm1923_vm0, %v9406_v44, %v8981_v14  ;;  %6380 = vmatprep.subr.bf16.mxu0 %v9043_v52  ;;  %v2204_v16 = vmul.f32 %v1978_v59, %v9141_v15  ;;  %v1696_v56 = vld [vmem:[#allocation7 + $0xf8] sm:$0xff] }
 0x3cf   : > { %v2075_v4 = vmul.f32 %v1977_v60, %v1688_v57  ;;  %v2200_v36 = vmul.f32 %v1977_v60, %v9089_v42  ;;  %v2140_v47 = vadd.f32 %v2076_v22, %v2012_v54  ;;  %v2019_v39 = vmul.f32 %v1632_v63, %v8582_v6  ;;  %v1700_v63 = vld [vmem:[#allocation7 + $0x118] sm:$0xff] }
 0x3d0   : > { %v9419_v12 = vadd.f32 %v2079_v50, %v2015_v41  ;;  %v1810_v55 = vpop.permute.xlu0 %1809  ;;  %v2144_v49 = vadd.f32 %v2080_v11, %v2016_v10  ;;  %v2324_v15 = vmul.f32 0.088388346, %v2260_v62  ;;  %v11950_v22 = vpack.c.bf16 %v8949_v5, %v8947_v43  ;;  %v1636_v62 = vld [vmem:[#allocation5 + $0x118] sm:$0xff] }
 0x3d1   : > { %v9421_v61 = vadd.f32 %v2075_v4, %v2011_v31  ;;  %v9423_v14 = vpop.permute.xlu1 %1903  ;;  %v2264_v3 = vadd.f32 %v2200_v36, %v2136_v17  ;;  %v2268_v57 = vadd.f32 %v2204_v16, %v2140_v47  ;;  %v2020_v36 = vmul.f32 %v9177_v46, %v8588_v7  ;;  %v1640_v10 = vld [vmem:[#allocation5 + $0x138] sm:$0xff] }
 0x3d2   : > { %11947 = vst [vmem:[#allocation149_spill] sm:$0xff] %v9419_v12  ;;  %11949 = vst [vmem:[#allocation151_spill] sm:$0xff] %v9423_v14  ;;  %v1979_v42 = vsel %vm1923_vm0, %v9423_v14, %v1808_v18  ;;  %v2023_v47 = vmul.f32 %v1636_v62, %v8594_v20  ;;  %v11960_v20 = vld [vmem:[#allocation95_spill] sm:$0xff] }
 0x3d3   : > { %11948 = vst [vmem:[#allocation150_spill] sm:$0xff] %v9421_v61  ;;  %v2083_v45 = vmul.f32 %v1979_v42, %v1696_v56  ;;  %v2208_v1 = vmul.f32 %v1979_v42, %v9143_v51  ;;  %v2328_v40 = vmul.f32 0.088388346, %v2264_v3  ;;  %v2332_v18 = vmul.f32 0.088388346, %v2268_v57  ;;  %v1647_v14 = vld [vmem:[#allocation5 + $0x170] sm:$0xff] }
 0x3d4   : > { %6333 = vmatmul.mubr.bf16.vlgmr.msra.gmra.mrb[64].mxu0 %v11950_v22  ;;  %v9433_v31 = vpop.permute.xlu0 %1841 }
 0x3d5   : > { %11951 = vst [vmem:[#allocation152_spill] sm:$0xff] %v9433_v31  ;;  %v9435_v54 = vadd.f32 %v2083_v45, %v2019_v39  ;;  %6381 = vmatpush3.bf16.xpose.msra.mxu0 %v9043_v52  ;;  %v1812_v6 = vpop.permute.xlu1 %1811  ;;  %v2380_v41 = vpack.c.bf16 %v2328_v40, %v2324_v15  ;;  %v2272_v59 = vadd.f32 %v2208_v1, %v2144_v49  ;;  %v11957_v49 = vld [vmem:[#allocation94_spill] sm:$0xff]  ;;  %v11959_v45 = vld [vmem:[#allocation49_spill] sm:$0xff]  ;;  %v11961_v40 = vld [vmem:[#allocation52_spill] sm:$0xff] }
 0x3d6   : > { %6382 = vmatprep.subr.bf16.mxu0 %v9091_v38  ;;  %v9446_v5 = vsel %vm1923_vm0, %v1810_v55, %v9433_v31  ;;  %v11958_v15 = vld [vmem:[#allocation90_spill] sm:$0xff]  ;;  %v2024_v1 = vmul.f32 %v11960_v20, %v11959_v45  ;;  %v2027_v57 = vmul.f32 %v1640_v10, %v11961_v40  ;;  %v1648_v40 = vld [vmem:[#allocation5 + $0x178] sm:$0xff] }
 0x3d7   : > { %11952 = vst [vmem:[#allocation153_spill] sm:$0xff] %v9435_v54  ;;  %6336 = vmatprep.mubr.bf16.mxu0 %v2380_v41  ;;  %v2336_v51 = vmul.f32 0.088388346, %v2272_v59  ;;  %v2084_v17 = vmul.f32 %v9446_v5, %v9166_v13  ;;  %v1644_v13 = vld [vmem:[#allocation5 + $0x158] sm:$0xff]  ;;  %v11974_v54 = vld [vmem:[#allocation142_spill] sm:$0xff] }
 0x3d8   : > { %v1814_v11 = vpop.permute.xlu0 %1813  ;;  %v7395_v31 = vld [vmem:[#allocation5 + $0xe8] sm:$0xff] }
 0x3d9   : > { %v9439_v50 = vpop.permute.xlu1 %1843  ;;  %v2384_v60 = vpack.c.bf16 %v2336_v51, %v2332_v18  ;;  %v2148_v22 = vadd.f32 %v2084_v17, %v2020_v36  ;;  %v1704_v18 = vld [vmem:[#allocation7 + $0x138] sm:$0xff]  ;;  %v11964_v51 = vld [vmem:[#allocation53_spill] sm:$0xff]  ;;  %v11969_v36 = vld [vmem:[#allocation107_spill] sm:$0xff] }
 0x3da   : > { %11953 = vst [vmem:[#allocation154_spill] sm:$0xff] %v9439_v50  ;;  %v9455_v16 = vsel %vm1923_vm0, %v1812_v6, %v9439_v50 }
 0x3db   : > { %v2088_v7 = vmul.f32 %v9455_v16, %v11958_v15 }
 0x3dc   : > { %6337 = vmatmul.mubr.bf16.gmra.mrb[68].mxu0 %v2384_v60  ;;  %v9441_v43 = vpop.permute.xlu0 %1845  ;;  %v11965_v60 = vld [vmem:[#allocation104_spill] sm:$0xff] }
 0x3dd   : > { %11954 = vst [vmem:[#allocation155_spill] sm:$0xff] %v9441_v43  ;;  %6383 = vmatpush3.bf16.xpose.msra.mxu0 %v9091_v38  ;;  %v1816_v52 = vpop.permute.xlu1 %1815  ;;  %v9470_v3 = vsel %vm1923_vm0, %v1814_v11, %v9441_v43  ;;  %v2028_v62 = vmul.f32 %v11965_v60, %v11964_v51  ;;  %v2152_v51 = vadd.f32 %v2088_v7, %v2024_v1  ;;  %v11978_v1 = vld [vmem:[#allocation60_spill] sm:$0xff]  ;;  %v11998_v43 = vld [vmem:[#allocation42_spill] sm:$0xff] }
 0x3de   : > { %6384 = vmatprep.subr.bf16.mxu0 %v9145_v58 }
 0x3e0   : > { %v9457_v4 = vpop.permute.xlu0 %1905 }
 0x3e1   : > { %11955 = vst [vmem:[#allocation156_spill] sm:$0xff] %v9457_v4  ;;  %v1980_v38 = vsel %vm1923_vm0, %v9457_v4, %v1810_v55  ;;  %v9464_v56 = vpop.permute.xlu1 %1847  ;;  %v1708_v55 = vld [vmem:[#allocation7 + $0x158] sm:$0xff]  ;;  %v12009_v4 = vld [vmem:[#allocation47_spill] sm:$0xff] }
 0x3e2   : > { %11956 = vst [vmem:[#allocation157_spill] sm:$0xff] %v9464_v56  ;;  %v2087_v39 = vmul.f32 %v1980_v38, %v1700_v63  ;;  %v2212_v42 = vmul.f32 %v1980_v38, %v11957_v49  ;;  %v9478_v46 = vsel %vm1923_vm0, %v1816_v52, %v9464_v56  ;;  %v11966_v63 = vld [vmem:[#allocation56_spill] sm:$0xff]  ;;  %v11967_v49 = vld [vmem:[#allocation102_spill] sm:$0xff]  ;;  %v1603_v56 = vld [vmem:[#allocation5 + $0x10] sm:$0xff] }
 0x3e3   : > { %v2031_v38 = vmul.f32 %v1644_v13, %v11966_v63  ;;  %v2092_v15 = vmul.f32 %v9470_v3, %v11967_v49  ;;  %v11970_v13 = vld [vmem:[#allocation98_spill] sm:$0xff]  ;;  %v11972_v49 = vld [vmem:[#allocation96_spill] sm:$0xff] }
 0x3e4   : > { %v9483_v41 = vadd.f32 %v2087_v39, %v2023_v47  ;;  %v9485_v59 = vpop.permute.xlu0 %1909  ;;  %v2096_v47 = vmul.f32 %v9478_v46, %v11969_v36  ;;  %v2276_v20 = vadd.f32 %v2212_v42, %v2148_v22  ;;  %v1712_v36 = vld [vmem:[#allocation7 + $0x178] sm:$0xff]  ;;  %v2035_v22 = vmul.f32 %v1648_v40, %v11978_v1  ;;  %v1619_v1 = vld [vmem:[#allocation5 + $0x90] sm:$0xff] }
 0x3e5   : > { %11963 = vst [vmem:[#allocation90_spill] sm:$0xff] %v9485_v59  ;;  %6385 = vmatpush3.bf16.xpose.msra.mxu0 %v9145_v58  ;;  %v1982_v10 = vsel %vm1923_vm0, %v9485_v59, %v1814_v11  ;;  %v9496_v17 = vpop.permute.xlu1 %1907  ;;  %v11971_v58 = vld [vmem:[#allocation106_spill] sm:$0xff]  ;;  %v2156_v50 = vadd.f32 %v2092_v15, %v2028_v62  ;;  %v11984_v40 = vld [vmem:[#allocation32_spill] sm:$0xff] }
 0x3e6   : > { %11962 = vst [vmem:[#allocation94_spill] sm:$0xff] %v9483_v41  ;;  %11968 = vst [vmem:[#allocation49_spill] sm:$0xff] %v9496_v17  ;;  %v2095_v39 = vmul.f32 %v1982_v10, %v1708_v55  ;;  %v1981_v45 = vsel %vm1923_vm0, %v9496_v17, %v1812_v6  ;;  %6386 = vmatprep.subr.bf16.mxu0 %v11970_v13  ;;  %v2220_v60 = vmul.f32 %v1982_v10, %v11971_v58  ;;  %v11973_v41 = vld [vmem:[#allocation57_spill] sm:$0xff]  ;;  %v1607_v6 = vld [vmem:[#allocation5 + $0x30] sm:$0xff] }
 0x3e7   : > { %v2091_v63 = vmul.f32 %v1981_v45, %v1704_v18  ;;  %v2216_v11 = vmul.f32 %v1981_v45, %v11972_v49  ;;  %v2032_v12 = vmul.f32 %v11974_v54, %v11973_v41  ;;  %v2340_v41 = vmul.f32 0.088388346, %v2276_v20  ;;  %v1615_v10 = vld [vmem:[#allocation5 + $0x70] sm:$0xff] }
 0x3e8   : > { %v9508_v61 = vadd.f32 %v2095_v39, %v2031_v38  ;;  %v9510_v55 = vpop.permute.xlu0 %1817  ;;  %v1611_v38 = vld [vmem:[#allocation5 + $0x50] sm:$0xff]  ;;  %v2284_v62 = vadd.f32 %v2220_v60, %v2156_v50 }
 0x3e9   : > { %v9512_v17 = vadd.f32 %v2091_v63, %v2027_v57  ;;  %v9514_v42 = vpop.permute.xlu1 %1911  ;;  %v2280_v7 = vadd.f32 %v2216_v11, %v2152_v51  ;;  %v2160_v18 = vadd.f32 %v2096_v47, %v2032_v12  ;;  %v11979_v45 = vld [vmem:[#allocation143_spill] sm:$0xff]  ;;  %v11980_v57 = vld [vmem:[#allocation29_spill] sm:$0xff]  ;;  %v11981_v63 = vld [vmem:[#allocation30_spill] sm:$0xff] }
 0x3ea   : > { %11975 = vst [vmem:[#allocation95_spill] sm:$0xff] %v9508_v61  ;;  %11977 = vst [vmem:[#allocation53_spill] sm:$0xff] %v9514_v42  ;;  %v1983_v54 = vsel %vm1923_vm0, %v9514_v42, %v1816_v52  ;;  %v9522_v15 = vmul.f32 %v1603_v56, %v11980_v57  ;;  %v11982_v51 = vld [vmem:[#allocation140_spill] sm:$0xff]  ;;  %v11983_v12 = vld [vmem:[#allocation31_spill] sm:$0xff] }
 0x3eb   : > { %11976 = vst [vmem:[#allocation52_spill] sm:$0xff] %v9512_v17  ;;  %v2099_v39 = vmul.f32 %v1983_v54, %v1712_v36  ;;  %v2224_v58 = vmul.f32 %v1983_v54, %v11979_v45  ;;  %v2344_v49 = vmul.f32 0.088388346, %v2280_v7  ;;  %v9526_v11 = vmul.f32 %v11982_v51, %v11981_v63  ;;  %v11985_v52 = vld [vmem:[#allocation77_spill] sm:$0xff]  ;;  %v1623_v54 = vld [vmem:[#allocation5 + $0xb0] sm:$0xff]  ;;  %v7390_v63 = vld [vmem:[#allocation5 + $0x48] sm:$0xff] }
 0x3ec   : > { %v9529_v47 = vmul.f32 %v1607_v6, %v11983_v12  ;;  %v9533_v20 = vmul.f32 %v11985_v52, %v11984_v40  ;;  %v9535_v36 = vpop.permute.xlu0 %1849  ;;  %v11988_v45 = vld [vmem:[#allocation33_spill] sm:$0xff]  ;;  %v11989_v51 = vld [vmem:[#allocation34_spill] sm:$0xff]  ;;  %v1631_v40 = vld [vmem:[#allocation5 + $0xf0] sm:$0xff] }
 0x3ed   : > { %11986 = vst [vmem:[#allocation104_spill] sm:$0xff] %v9535_v36  ;;  %v9537_v7 = vadd.f32 %v2099_v39, %v2035_v22  ;;  %6387 = vmatpush3.bf16.xpose.msra.mxu0 %v11970_v13  ;;  %v9544_v50 = vsel %vm1923_vm0, %v9510_v55, %v9535_v36  ;;  %v9546_v56 = vpop.permute.xlu1 %1819  ;;  %v2388_v60 = vpack.c.bf16 %v2344_v49, %v2340_v41  ;;  %v11990_v22 = vld [vmem:[#allocation35_spill] sm:$0xff]  ;;  %v11991_v52 = vld [vmem:[#allocation146_spill] sm:$0xff]  ;;  %v11992_v61 = vld [vmem:[#allocation144_spill] sm:$0xff] }
 0x3ee   : > { %v2288_v6 = vadd.f32 %v2224_v58, %v2160_v18  ;;  %v9549_v57 = vmul.f32 %v1611_v38, %v11988_v45  ;;  %v9552_v12 = vmul.f32 %v7390_v63, %v11989_v51  ;;  %v9555_v39 = vmul.f32 %v1615_v10, %v11990_v22  ;;  %v1627_v13 = vld [vmem:[#allocation5 + $0xd0] sm:$0xff]  ;;  %6388 = vmatprep.subr.bf16.mxu0 %v11992_v61  ;;  %v7391_v17 = vld [vmem:[#allocation5 + $0x68] sm:$0xff]  ;;  %v11993_v41 = vld [vmem:[#allocation36_spill] sm:$0xff] }
 0x3ef   : > { %11987 = vst [vmem:[#allocation56_spill] sm:$0xff] %v9537_v7  ;;  %v2100_v7 = vmul.f32 %v9544_v50, %v11991_v52  ;;  %v9561_v18 = vmul.f32 %v7391_v17, %v11993_v41  ;;  %v11994_v38 = vld [vmem:[#allocation38_spill] sm:$0xff]  ;;  %v1635_v49 = vld [vmem:[#allocation5 + $0x110] sm:$0xff]  ;;  %6340 = vmatprep.mubr.bf16.mxu0 %v2388_v60  ;;  %v2348_v45 = vmul.f32 0.088388346, %v2284_v62  ;;  %v11996_v42 = vld [vmem:[#allocation41_spill] sm:$0xff] }
 0x3f0   : > { %v9564_v58 = vmul.f32 %v1619_v1, %v11994_v38  ;;  %v2352_v63 = vmul.f32 0.088388346, %v2288_v6  ;;  %v7392_v10 = vld [vmem:[#allocation5 + $0x88] sm:$0xff]  ;;  %v11995_v51 = vld [vmem:[#allocation39_spill] sm:$0xff]  ;;  %v9570_v36 = vmul.f32 %v1623_v54, %v11996_v42  ;;  %v9578_v38 = vpop.permute.xlu0 %1821  ;;  %v12004_v42 = vld [vmem:[#allocation45_spill] sm:$0xff] }
 0x3f1   : > { %v9567_v22 = vmul.f32 %v7392_v10, %v11995_v51  ;;  %v7393_v52 = vld [vmem:[#allocation5 + $0xa8] sm:$0xff]  ;;  %v1639_v17 = vld [vmem:[#allocation5 + $0x130] sm:$0xff]  ;;  %v9576_v1 = vadd.f32 %v2100_v7, %v12000_v29  ;;  %v12003_v10 = vld [vmem:[#allocation44_spill] sm:$0xff]  ;;  %v9587_v54 = vmul.f32 %v1631_v40, %v12004_v42 }
 0x3f2   : > { %11997 = vst [vmem:[#allocation102_spill] sm:$0xff] %v9570_v36  ;;  %v9573_v59 = vmul.f32 %v7393_v52, %v11998_v43  ;;  %v1643_v41 = vld [vmem:[#allocation5 + $0x150] sm:$0xff]  ;;  %v7394_v6 = vld [vmem:[#allocation5 + $0xc8] sm:$0xff]  ;;  %v9589_v52 = vpop.permute.xlu1 %1851  ;;  %v9595_v36 = vmul.f32 %v1635_v49, %v12009_v4 }
 0x3f3   : > { %v12001_v62 = vld [vmem:[#allocation43_spill] sm:$0xff]  ;;  %v9584_v51 = vmul.f32 %v7394_v6, %v12003_v10  ;;  %12005 = vst [vmem:[#allocation106_spill] sm:$0xff] %v9587_v54  ;;  %12006 = vst [vmem:[#allocation96_spill] sm:$0xff] %v9589_v52  ;;  %v12007_v29 = vld [vmem:[#allocation46_spill] sm:$0xff]  ;;  %v9604_v40 = vsel %vm1923_vm0, %v9546_v56, %v9589_v52 }
 0x3f4   : > { %11999 = vst [vmem:[#allocation107_spill] sm:$0xff] %v9573_v59  ;;  %v9581_v60 = vmul.f32 %v1627_v13, %v12001_v62  ;;  %v1651_v43 = vld [vmem:[#allocation5 + $0x190] sm:$0xff]  ;;  %v2392_v59 = vpack.c.bf16 %v2352_v63, %v2348_v45  ;;  %v9592_v7 = vmul.f32 %v7395_v31, %v12007_v29  ;;  %12010 = vst [vmem:[#allocation142_spill] sm:$0xff] %v9595_v36  ;;  %v7396_v13 = vld [vmem:[#allocation5 + $0x108] sm:$0xff] }
 0x3f5   : > { %v12011_v62 = vld [vmem:[#allocation48_spill] sm:$0xff]  ;;  %v12013_v10 = vld [vmem:[#allocation50_spill] sm:$0xff]  ;;  %v12015_v31 = vld [vmem:[#allocation51_spill] sm:$0xff]  ;;  %6389 = vmatpush3.bf16.xpose.msra.mxu0 %v11992_v61 }
 0x3f6   : > { %12002 = vst [vmem:[#allocation98_spill] sm:$0xff] %v9581_v60  ;;  %12008 = vst [vmem:[#allocation57_spill] sm:$0xff] %v9592_v7  ;;  %v9598_v34 = vmul.f32 %v7396_v13, %v12011_v62  ;;  %v1652_v6 = vld [vmem:[#allocation5 + $0x198] sm:$0xff]  ;;  %v9607_v45 = vmul.f32 %v1639_v17, %v12013_v10  ;;  %v7397_v63 = vld [vmem:[#allocation5 + $0x128] sm:$0xff]  ;;  %v2104_v62 = vmul.f32 %v9604_v40, %v9271_v9  ;;  %6341 = vmatmul.mubr.bf16.gmra.mrb[72].mxu0 %v2392_v59 }
 0x3f7   : > { %v9610_v42 = vmul.f32 %v7397_v63, %v12015_v31  ;;  %v12017_v4 = vld [vmem:[#allocation54_spill] sm:$0xff]  ;;  %v1655_v29 = vld [vmem:[#allocation5 + $0x1b0] sm:$0xff]  ;;  %v1656_v13 = vld [vmem:[#allocation5 + $0x1b8] sm:$0xff] }
 0x3f8   : > { %12012 = vst [vmem:[#allocation60_spill] sm:$0xff] %v9598_v34  ;;  %12014 = vst [vmem:[#allocation143_spill] sm:$0xff] %v9607_v45  ;;  %v9613_v49 = vmul.f32 %v1643_v41, %v12017_v4  ;;  %v7398_v7 = vld [vmem:[#allocation5 + $0x148] sm:$0xff]  ;;  %v12019_v54 = vld [vmem:[#allocation55_spill] sm:$0xff] }
 0x3f9   : > { %12016 = vst [vmem:[#allocation29_spill] sm:$0xff] %v9610_v42  ;;  %v9618_v52 = vmul.f32 %v7398_v7, %v12019_v54  ;;  %v12021_v36 = vld [vmem:[#allocation58_spill] sm:$0xff]  ;;  %v12023_v45 = vld [vmem:[#allocation59_spill] sm:$0xff]  ;;  %v12025_v31 = vld [vmem:[#allocation61_spill] sm:$0xff] }
 0x3fa   : > { %12018 = vst [vmem:[#allocation30_spill] sm:$0xff] %v9613_v49  ;;  %v9621_v17 = vmul.f32 %v1647_v14, %v12021_v36  ;;  %v7399_v10 = vld [vmem:[#allocation5 + $0x168] sm:$0xff]  ;;  %v9627_v41 = vmul.f32 %v1651_v43, %v12025_v31  ;;  %v1659_v4 = vld [vmem:[#allocation5 + $0x1d0] sm:$0xff]  ;;  %v1660_v42 = vld [vmem:[#allocation5 + $0x1d8] sm:$0xff]  ;;  %v9629_v49 = vpop.permute.xlu0 %1853 }
 0x3fb   : > { %12020 = vst [vmem:[#allocation140_spill] sm:$0xff] %v9618_v52  ;;  %v9624_v63 = vmul.f32 %v7399_v10, %v12023_v45  ;;  %12027 = vst [vmem:[#allocation33_spill] sm:$0xff] %v9629_v49  ;;  %v7400_v9 = vld [vmem:[#allocation5 + $0x188] sm:$0xff]  ;;  %v12028_v59 = vld [vmem:[#allocation63_spill] sm:$0xff]  ;;  %v1970_v43 = vsel %vm1923_vm0, %v9578_v38, %v9629_v49  ;;  %v9643_v45 = vpop.permute.xlu1 %1823 }
 0x3fc   : > { %12022 = vst [vmem:[#allocation31_spill] sm:$0xff] %v9621_v17  ;;  %12026 = vst [vmem:[#allocation77_spill] sm:$0xff] %v9627_v41  ;;  %v9632_v34 = vmul.f32 %v7400_v9, %v12028_v59  ;;  %v12030_v54 = vld [vmem:[#allocation64_spill] sm:$0xff]  ;;  %v1663_v52 = vld [vmem:[#allocation5 + $0x1f0] sm:$0xff] }
 0x3fd   : > { %12024 = vst [vmem:[#allocation32_spill] sm:$0xff] %v9624_v63  ;;  %v2039_v7 = vmul.f32 %v1652_v6, %v12030_v54  ;;  %v1664_v14 = vld [vmem:[#allocation5 + $0x1f8] sm:$0xff]  ;;  %v12031_v36 = vld [vmem:[#allocation66_spill] sm:$0xff]  ;;  %v12032_v10 = vld [vmem:[#allocation65_spill] sm:$0xff] }
 0x3fe   : > { %12029 = vst [vmem:[#allocation34_spill] sm:$0xff] %v9632_v34  ;;  %v9636_v17 = vadd.f32 %v2104_v62, %v12031_v36  ;;  %v9646_v31 = vmul.f32 %v1655_v29, %v12032_v10  ;;  %v7401_v9 = vld [vmem:[#allocation5 + $0x1a8] sm:$0xff]  ;;  %v12034_v59 = vld [vmem:[#allocation67_spill] sm:$0xff]  ;;  %v12036_v54 = vld [vmem:[#allocation68_spill] sm:$0xff]  ;;  %v2108_v62 = vmul.f32 %v1970_v43, %v9296_v33 }
 0x3ff   : > { %v9649_v6 = vmul.f32 %v7401_v9, %v12034_v59  ;;  %v2043_v63 = vmul.f32 %v1656_v13, %v12036_v54  ;;  %v12037_v36 = vld [vmem:[#allocation147_spill] sm:$0xff]  ;;  %v12038_v61 = vld [vmem:[#allocation69_spill] sm:$0xff]  ;;  %v12042_v60 = vld [vmem:[#allocation72_spill] sm:$0xff] }
 0x400   : > { %12033 = vst [vmem:[#allocation35_spill] sm:$0xff] %v9646_v31  ;;  %6390 = vmatprep.subr.bf16.mxu0 %v12037_v36  ;;  %v9655_v41 = vmul.f32 %v1659_v4, %v12038_v61  ;;  %v12040_v34 = vld [vmem:[#allocation71_spill] sm:$0xff]  ;;  %v2047_v29 = vmul.f32 %v1660_v42, %v12042_v60  ;;  %v12043_v10 = vld [vmem:[#allocation73_spill] sm:$0xff]  ;;  %v1716_v9 = vld [vmem:[#allocation7 + $0x198] sm:$0xff] }
 0x401   : > { %12035 = vst [vmem:[#allocation146_spill] sm:$0xff] %v9649_v6  ;;  %v9659_v49 = vmul.f32 %v9298_v32, %v12040_v34  ;;  %v2048_v31 = vmul.f32 %v9309_v28, %v12043_v10  ;;  %v12044_v59 = vld [vmem:[#allocation74_spill] sm:$0xff]  ;;  %v12046_v13 = vld [vmem:[#allocation75_spill] sm:$0xff]  ;;  %v12048_v54 = vld [vmem:[#allocation76_spill] sm:$0xff]  ;;  %v9675_v34 = vpop.permute.xlu0 %1913  ;;  %6391 = vmatpush3.bf16.xpose.msra.mxu0 %v12037_v36 }
 0x402   : > { %12039 = vst [vmem:[#allocation144_spill] sm:$0xff] %v9655_v41  ;;  %v9665_v6 = vmul.f32 %v1663_v52, %v12044_v59  ;;  %v9669_v33 = vmul.f32 %v9318_v27, %v12046_v13  ;;  %v9672_v4 = vmul.f32 %v1664_v14, %v12048_v54  ;;  %v12049_v61 = vld [vmem:[#allocation70_spill] sm:$0xff]  ;;  %12050 = vst [vmem:[#allocation41_spill] sm:$0xff] %v9675_v34  ;;  %v12051_v60 = vld [vmem:[#allocation121_spill] sm:$0xff]  ;;  %v9690_v14 = vpop.permute.xlu1 %1855  ;;  %6392 = vmatprep.subr.bf16.mxu0 %v9323_v23 }
 0x403   : > { %12041 = vst [vmem:[#allocation36_spill] sm:$0xff] %v9659_v49  ;;  %v2172_v41 = vadd.f32 %v2108_v62, %v12049_v61  ;;  %v7402_v32 = vld [vmem:[#allocation8 + $0x8] sm:$0xff]  ;;  %v12052_v10 = vld [vmem:[#allocation123_spill] sm:$0xff]  ;;  %v12053_v59 = vld [vmem:[#allocation132_spill] sm:$0xff]  ;;  %v1984_v27 = vsel %vm1923_vm0, %v9675_v34, %v9510_v55 }
 0x404   : > { %12045 = vst [vmem:[#allocation38_spill] sm:$0xff] %v9665_v6  ;;  %12047 = vst [vmem:[#allocation39_spill] sm:$0xff] %v9669_v33  ;;  %v9678_v42 = vmul.f32 %v7402_v32, %v12051_v60  ;;  %v7403_v28 = vld [vmem:[#allocation8 + $0x28] sm:$0xff]  ;;  %v12055_v62 = vld [vmem:[#allocation120_spill] sm:$0xff]  ;;  %v2103_v61 = vmul.f32 %v1984_v27, %v1716_v9 }
 0x405   : > { %v9681_v49 = vmul.f32 %v7403_v28, %v12052_v10  ;;  %v7404_v52 = vld [vmem:[#allocation8 + $0x48] sm:$0xff]  ;;  %12054 = vst [vmem:[#allocation42_spill] sm:$0xff] %v9690_v14  ;;  %v12056_v13 = vld [vmem:[#allocation133_spill] sm:$0xff]  ;;  %v1971_v28 = vsel %vm1923_vm0, %v9643_v45, %v9690_v14  ;;  %v12058_v10 = vld [vmem:[#allocation79_spill] sm:$0xff] }
 0x406   : > { %v9684_v6 = vmul.f32 %v7404_v52, %v12053_v59  ;;  %v9694_v54 = vmul.f32 %v12056_v13, %v12055_v62  ;;  %v12057_v32 = vld [vmem:[#allocation113_spill] sm:$0xff]  ;;  %v9703_v52 = vmul.f32 %v9344_v25, %v12058_v10  ;;  %v12059_v59 = vld [vmem:[#allocation82_spill] sm:$0xff]  ;;  %v12060_v33 = vld [vmem:[#allocation84_spill] sm:$0xff]  ;;  %v2112_v9 = vmul.f32 %v1971_v28, %v9314_v53 }
 0x407   : > { %v2228_v60 = vmul.f32 %v1984_v27, %v12057_v32  ;;  %v9707_v55 = vmul.f32 %v9357_v8, %v12059_v59  ;;  %v9711_v62 = vmul.f32 %v9378_v0, %v12060_v33  ;;  %v1724_v27 = vld [vmem:[#allocation7 + $0x1d8] sm:$0xff]  ;;  %v12062_v13 = vld [vmem:[#allocation86_spill] sm:$0xff]  ;;  %v9726_v8 = vadd.f32 %v2103_v61, %v2039_v7  ;;  %v9728_v59 = vpop.permute.xlu0 %1917 }
 0x408   : > { %v9716_v32 = vmul.f32 %v9386_v30, %v12062_v13  ;;  %v12063_v14 = vld [vmem:[#allocation88_spill] sm:$0xff]  ;;  %v9738_v13 = vadd.f32 %v2112_v9, %v2048_v31  ;;  %v12069_v61 = vld [vmem:[#allocation110_spill] sm:$0xff] }
 0x409   : > { %12061 = vst [vmem:[#allocation62_spill] sm:$0xff] %v9711_v62  ;;  %v9720_v34 = vmul.f32 %v9446_v5, %v12063_v14  ;;  %v12064_v25 = vld [vmem:[#allocation92_spill] sm:$0xff]  ;;  %12065 = vst [vmem:[#allocation43_spill] sm:$0xff] %v9726_v8  ;;  %v12067_v62 = vld [vmem:[#allocation141_spill] sm:$0xff]  ;;  %v1986_v5 = vsel %vm1923_vm0, %v9728_v59, %v9578_v38  ;;  %v9760_v38 = vmul.f32 %v9604_v40, %v12069_v61  ;;  %6393 = vmatpush3.bf16.xpose.msra.mxu0 %v9323_v23 }
 0x40a   : > { %v9724_v10 = vmul.f32 %v9455_v16, %v12064_v25  ;;  %v1720_v0 = vld [vmem:[#allocation7 + $0x1b8] sm:$0xff]  ;;  %v9736_v30 = vmul.f32 %v9478_v46, %v12067_v62  ;;  %v9745_v16 = vpop.permute.xlu1 %1915  ;;  %v2111_v7 = vmul.f32 %v1986_v5, %v1724_v27  ;;  %v2236_v14 = vmul.f32 %v1986_v5, %v9329_v26  ;;  %v1667_v27 = vld [vmem:[#allocation7 + $0x10] sm:$0xff]  ;;  %v12074_v40 = vld [vmem:[#allocation126_spill] sm:$0xff]  ;;  %6394 = vmatprep.subr.bf16.mxu0 %v9369_v19 }
 0x40b   : > { %v12066_v33 = vld [vmem:[#allocation100_spill] sm:$0xff]  ;;  %v2292_v46 = vadd.f32 %v2228_v60, %v9576_v1  ;;  %v1731_v60 = vld [vmem:[#allocation8 + $0x10] sm:$0xff] }
 0x40c   : > { %v9732_v53 = vmul.f32 %v9470_v3, %v12066_v33  ;;  %v1985_v3 = vsel %vm1923_vm0, %v9745_v16, %v9546_v56  ;;  %v12068_v31 = vld [vmem:[#allocation108_spill] sm:$0xff]  ;;  %v12071_v33 = vld [vmem:[#allocation114_spill] sm:$0xff]  ;;  %v9767_v56 = vmul.f32 %v1971_v28, %v9316_v2  ;;  %v9769_v1 = vadd.f32 %v2111_v7, %v2047_v29 }
 0x40d   : > { %v9756_v36 = vmul.f32 %v9544_v50, %v12068_v31  ;;  %v2107_v62 = vmul.f32 %v1985_v3, %v1720_v0  ;;  %v12070_v9 = vld [vmem:[#allocation112_spill] sm:$0xff]  ;;  %v9764_v5 = vmul.f32 %v1970_v43, %v12071_v33  ;;  %v1858_v50 = vpop.permute.xlu0 %1857  ;;  %v2300_v31 = vadd.f32 %v2236_v14, %v2172_v41  ;;  %v7405_v29 = vld [vmem:[#allocation7 + $0x8] sm:$0xff] }
 0x40e   : > { %v2232_v26 = vmul.f32 %v1985_v3, %v12070_v9  ;;  %v1732_v25 = vld [vmem:[#allocation8 + $0x18] sm:$0xff]  ;;  %12072 = vst [vmem:[#allocation44_spill] sm:$0xff] %v9769_v1  ;;  %v1924_v0 = vsel %vm1923_vm0, %v1858_v50, %v12074_v40  ;;  %v12075_v3 = vld [vmem:[#allocation118_spill] sm:$0xff]  ;;  %v9779_v9 = vpop.permute.xlu1 %1919  ;;  %v2356_v41 = vmul.f32 0.088388346, %v2292_v46  ;;  %v1739_v40 = vld [vmem:[#allocation8 + $0x50] sm:$0xff] }
 0x40f   : > { %v9771_v8 = vadd.f32 %v2107_v62, %v2043_v63  ;;  %v1940_v61 = vsel %vm1923_vm0, %v12075_v3, %v1858_v50  ;;  %v1728_v43 = vld [vmem:[#allocation7 + $0x1f8] sm:$0xff]  ;;  %v2054_v7 = vmul.f32 %v1924_v0, %v1667_v27  ;;  %v2183_v33 = vmul.f32 %v1924_v0, %v1732_v25  ;;  %v1675_v62 = vld [vmem:[#allocation7 + $0x50] sm:$0xff]  ;;  %v12078_v0 = vld [vmem:[#allocation130_spill] sm:$0xff] }
 0x410   : > { %v2296_v2 = vadd.f32 %v2232_v26, %v9636_v17  ;;  %v2053_v28 = vmul.f32 %v7405_v29, %v1940_v61  ;;  %v9782_v63 = vmul.f32 %v1940_v61, %v1731_v60  ;;  %v1987_v14 = vsel %vm1923_vm0, %v9779_v9, %v9643_v45  ;;  %v1740_v27 = vld [vmem:[#allocation8 + $0x58] sm:$0xff]  ;;  %v12077_v60 = vld [vmem:[#allocation134_spill] sm:$0xff] }
 0x411   : > { %12073 = vst [vmem:[#allocation45_spill] sm:$0xff] %v9771_v8  ;;  %v9788_v3 = vmul.f32 0.088388346, %v2300_v31  ;;  %v9794_v17 = vadd.f32 %v2054_v7, %v9522_v15  ;;  %v2115_v26 = vmul.f32 %v1987_v14, %v1728_v43  ;;  %v2240_v46 = vmul.f32 %v1987_v14, %v9331_v35  ;;  %v1862_v25 = vpop.permute.xlu0 %1861  ;;  %v12079_v15 = vld [vmem:[#allocation128_spill] sm:$0xff]  ;;  %v7406_v43 = vld [vmem:[#allocation7 + $0x48] sm:$0xff]  ;;  %v1735_v14 = vld [vmem:[#allocation8 + $0x30] sm:$0xff]  ;;  %6395 = vmatpush3.bf16.xpose.msra.mxu0 %v9369_v19 }
 0x412   : > { %12076 = vst [vmem:[#allocation46_spill] sm:$0xff] %v9782_v63  ;;  %v2360_v50 = vmul.f32 0.088388346, %v2296_v2  ;;  %v9791_v1 = vadd.f32 %v2053_v28, %v9526_v11  ;;  %v1926_v45 = vsel %vm1923_vm0, %v1862_v25, %v12077_v60  ;;  %v1942_v31 = vsel %vm1923_vm0, %v12078_v0, %v1862_v25  ;;  %v1671_v11 = vld [vmem:[#allocation7 + $0x30] sm:$0xff]  ;;  %v1860_v61 = vpop.permute.xlu1 %1859  ;;  %v1736_v8 = vld [vmem:[#allocation8 + $0x38] sm:$0xff] }
 0x413   : > { %v9805_v29 = vadd.f32 %v2183_v33, %v12079_v15  ;;  %v9808_v35 = vadd.f32 %v2115_v26, %v9672_v4  ;;  %v2061_v28 = vmul.f32 %v7406_v43, %v1942_v31  ;;  %v2062_v23 = vmul.f32 %v1926_v45, %v1675_v62  ;;  %v12082_v63 = vld [vmem:[#allocation127_spill] sm:$0xff]  ;;  %v12084_v15 = vld [vmem:[#allocation136_spill] sm:$0xff] }
 0x414   : > { %v2396_v2 = vpack.c.bf16 %v2360_v50, %v2356_v41  ;;  %v2190_v7 = vmul.f32 %v1942_v31, %v1739_v40  ;;  %v2191_v60 = vmul.f32 %v1926_v45, %v1740_v27  ;;  %v1925_v25 = vsel %vm1923_vm0, %v1860_v61, %v12082_v63  ;;  %v12083_v41 = vld [vmem:[#allocation122_spill] sm:$0xff]  ;;  %v1683_v31 = vld [vmem:[#allocation7 + $0x90] sm:$0xff]  ;;  %v1748_v27 = vld [vmem:[#allocation8 + $0x98] sm:$0xff] }
 0x415   : > { %12080 = vst [vmem:[#allocation47_spill] sm:$0xff] %v9805_v29  ;;  %12081 = vst [vmem:[#allocation48_spill] sm:$0xff] %v9808_v35  ;;  %v1941_v33 = vsel %vm1923_vm0, %v12083_v41, %v1860_v61  ;;  %v2304_v4 = vadd.f32 %v2240_v46, %v9738_v13  ;;  %v2125_v50 = vadd.f32 %v2061_v28, %v9552_v12  ;;  %v7407_v40 = vld [vmem:[#allocation7 + $0x28] sm:$0xff]  ;;  %v1866_v45 = vpop.permute.xlu0 %1865  ;;  %v1747_v61 = vld [vmem:[#allocation8 + $0x90] sm:$0xff] }
 0x416   : > { %6344 = vmatprep.mubr.bf16.mxu0 %v2396_v2  ;;  %v2126_v62 = vadd.f32 %v2062_v23, %v9549_v57  ;;  %v2057_v26 = vmul.f32 %v7407_v40, %v1941_v33  ;;  %v2058_v0 = vmul.f32 %v1925_v25, %v1671_v11  ;;  %v2255_v43 = vadd.f32 %v2191_v60, %v12084_v15  ;;  %v1864_v12 = vpop.permute.xlu1 %1863  ;;  %v12087_v23 = vld [vmem:[#allocation138_spill] sm:$0xff]  ;;  %v12090_v40 = vld [vmem:[#allocation135_spill] sm:$0xff] }
 0x417   : > { %v9821_v63 = vmul.f32 %v1941_v33, %v1735_v14  ;;  %v9823_v35 = vmul.f32 %v1925_v25, %v1736_v8  ;;  %v1928_v13 = vsel %vm1923_vm0, %v1866_v45, %v9359_v21  ;;  %v2253_v57 = vadd.f32 %v9684_v6, %v2125_v50  ;;  %v1679_v21 = vld [vmem:[#allocation7 + $0x70] sm:$0xff] }
 0x418   : > { %v2254_v46 = vadd.f32 %v2190_v7, %v2126_v62  ;;  %v9830_v11 = vadd.f32 %v2057_v26, %v9533_v20  ;;  %v9833_v2 = vadd.f32 %v2058_v0, %v9529_v47  ;;  %v9835_v28 = vmul.f32 0.088388346, %v2255_v43  ;;  %v1743_v25 = vld [vmem:[#allocation8 + $0x70] sm:$0xff]  ;;  %v7408_v20 = vld [vmem:[#allocation7 + $0x88] sm:$0xff]  ;;  %v1744_v47 = vld [vmem:[#allocation8 + $0x78] sm:$0xff] }
 0x419   : > { %12085 = vst [vmem:[#allocation50_spill] sm:$0xff] %v9823_v35  ;;  %v1944_v8 = vsel %vm1923_vm0, %v12087_v23, %v1866_v45  ;;  %v2070_v14 = vmul.f32 %v1928_v13, %v1683_v31  ;;  %v9840_v60 = vmul.f32 %v1928_v13, %v1748_v27  ;;  %v9842_v41 = vmul.f32 0.088388346, %v2253_v57  ;;  %v1870_v50 = vpop.permute.xlu0 %1869  ;;  %v12091_v0 = vld [vmem:[#allocation131_spill] sm:$0xff]  ;;  %v1756_v23 = vld [vmem:[#allocation8 + $0xd8] sm:$0xff] }
 0x41a   : > { %12086 = vst [vmem:[#allocation51_spill] sm:$0xff] %v9835_v28  ;;  %v9844_v6 = vmul.f32 0.088388346, %v2254_v46  ;;  %v2069_v7 = vmul.f32 %v7408_v20, %v1944_v8  ;;  %v9846_v33 = vmul.f32 %v1944_v8, %v1747_v61  ;;  %v1927_v26 = vsel %vm1923_vm0, %v1864_v12, %v12090_v40  ;;  %v1691_v45 = vld [vmem:[#allocation7 + $0xd0] sm:$0xff]  ;;  %v1868_v15 = vpop.permute.xlu1 %1867  ;;  %v7409_v61 = vld [vmem:[#allocation7 + $0x68] sm:$0xff]  ;;  %v12092_v8 = vld [vmem:[#allocation81_spill] sm:$0xff] }
 0x41b   : > { %12088 = vst [vmem:[#allocation54_spill] sm:$0xff] %v9840_v60  ;;  %v9849_v62 = vadd.f32 %v2070_v14, %v9564_v58  ;;  %v1943_v31 = vsel %vm1923_vm0, %v12091_v0, %v1864_v12  ;;  %v2368_v27 = vmul.f32 0.088388346, %v2304_v4  ;;  %v2066_v58 = vmul.f32 %v1927_v26, %v1679_v21  ;;  %v1755_v46 = vld [vmem:[#allocation8 + $0xd0] sm:$0xff]  ;;  %6476 = vmatprep.subr.bf16.mxu0 %v12092_v8  ;;  %v7410_v21 = vld [vmem:[#allocation7 + $0xc8] sm:$0xff]  ;;  %v1752_v0 = vld [vmem:[#allocation8 + $0xb8] sm:$0xff] }
 0x41c   : > { %12089 = vst [vmem:[#allocation55_spill] sm:$0xff] %v9844_v6  ;;  %v9859_v43 = vadd.f32 %v2069_v7, %v9567_v22  ;;  %v2065_v13 = vmul.f32 %v7409_v61, %v1943_v31  ;;  %v2194_v57 = vmul.f32 %v1943_v31, %v1743_v25  ;;  %v2195_v14 = vmul.f32 %v1927_v26, %v1744_v47  ;;  %v1687_v40 = vld [vmem:[#allocation7 + $0xb0] sm:$0xff]  ;;  %v12093_v26 = vld [vmem:[#allocation137_spill] sm:$0xff]  ;;  %v12095_v61 = vld [vmem:[#allocation98_spill] sm:$0xff] }
 0x41d   : > { %v2400_v20 = vpack.c.bf16 %v2368_v27, %v9788_v3  ;;  %v1930_v19 = vsel %vm1923_vm0, %v1870_v50, %v9394_v37  ;;  %v1946_v22 = vsel %vm1923_vm0, %v9346_v24, %v1870_v50  ;;  %v2130_v12 = vadd.f32 %v2066_v58, %v9555_v39  ;;  %v1874_v47 = vpop.permute.xlu0 %1873  ;;  %v1751_v27 = vld [vmem:[#allocation8 + $0xb0] sm:$0xff]  ;;  %v12110_v6 = vld [vmem:[#allocation106_spill] sm:$0xff] }
 0x41e   : > { %v2129_v4 = vadd.f32 %v2065_v13, %v9561_v18  ;;  %v2077_v25 = vmul.f32 %v7410_v21, %v1946_v22  ;;  %v2078_v7 = vmul.f32 %v1930_v19, %v1691_v45  ;;  %v2259_v3 = vadd.f32 %v2195_v14, %v12093_v26  ;;  %v1872_v18 = vpop.permute.xlu1 %1871  ;;  %v12102_v26 = vld [vmem:[#allocation152_spill] sm:$0xff]  ;;  %v12121_v35 = vld [vmem:[#allocation143_spill] sm:$0xff] }
 0x41f   : > { %6345 = vmatmul.mubr.bf16.gmra.mrb[76].mxu0 %v2400_v20  ;;  %v9872_v31 = vmul.f32 %v1946_v22, %v1755_v46  ;;  %v9874_v37 = vmul.f32 %v1930_v19, %v1756_v23  ;;  %v1929_v24 = vsel %vm1923_vm0, %v1868_v15, %v9406_v44  ;;  %v2258_v50 = vadd.f32 %v2194_v57, %v2130_v12  ;;  %v12097_v46 = vld [vmem:[#allocation139_spill] sm:$0xff]  ;;  %v7411_v57 = vld [vmem:[#allocation7 + $0xa8] sm:$0xff]  ;;  %v1764_v12 = vld [vmem:[#allocation8 + $0x118] sm:$0xff] }
 0x420   : > { %v2257_v39 = vadd.f32 %v9694_v54, %v2129_v4  ;;  %v9881_v45 = vadd.f32 %v2077_v25, %v9584_v51  ;;  %v9884_v13 = vadd.f32 %v2078_v7, %v12095_v61  ;;  %v9886_v58 = vmul.f32 0.088388346, %v2259_v3  ;;  %v1699_v44 = vld [vmem:[#allocation7 + $0x110] sm:$0xff]  ;;  %v12100_v7 = vld [vmem:[#allocation102_spill] sm:$0xff] }
 0x421   : > { %12094 = vst [vmem:[#allocation58_spill] sm:$0xff] %v9874_v37  ;;  %v1945_v23 = vsel %vm1923_vm0, %v12097_v46, %v1868_v15  ;;  %v2074_v14 = vmul.f32 %v1929_v24, %v1687_v40  ;;  %v9891_v20 = vmul.f32 %v1929_v24, %v1752_v0  ;;  %v9895_v54 = vmul.f32 0.088388346, %v2258_v50  ;;  %v1763_v4 = vld [vmem:[#allocation8 + $0x110] sm:$0xff]  ;;  %v1878_v21 = vpop.permute.xlu0 %1877  ;;  %v12101_v40 = vld [vmem:[#allocation156_spill] sm:$0xff] }
 0x422   : > { %12096 = vst [vmem:[#allocation59_spill] sm:$0xff] %v9886_v58  ;;  %v9893_v19 = vmul.f32 0.088388346, %v2257_v39  ;;  %v2073_v51 = vmul.f32 %v7411_v57, %v1945_v23  ;;  %v9897_v22 = vmul.f32 %v1945_v23, %v1751_v27  ;;  %v1932_v0 = vsel %vm1923_vm0, %v1874_v47, %v12101_v40  ;;  %v1695_v24 = vld [vmem:[#allocation7 + $0xf0] sm:$0xff]  ;;  %v1760_v27 = vld [vmem:[#allocation8 + $0xf8] sm:$0xff]  ;;  %v1876_v39 = vpop.permute.xlu1 %1875 }
 0x423   : > { %12098 = vst [vmem:[#allocation61_spill] sm:$0xff] %v9891_v20  ;;  %12099 = vst [vmem:[#allocation63_spill] sm:$0xff] %v9895_v54  ;;  %v9902_v15 = vadd.f32 %v2074_v14, %v12100_v7  ;;  %v1948_v3 = vsel %vm1923_vm0, %v12102_v26, %v1874_v47  ;;  %v12103_v46 = vld [vmem:[#allocation107_spill] sm:$0xff]  ;;  %v7412_v14 = vld [vmem:[#allocation7 + $0x108] sm:$0xff]  ;;  %v2086_v40 = vmul.f32 %v1932_v0, %v1699_v44 }
 0x424   : > { %v9915_v23 = vadd.f32 %v2073_v51, %v12103_v46  ;;  %v2085_v57 = vmul.f32 %v7412_v14, %v1948_v3  ;;  %v1759_v7 = vld [vmem:[#allocation8 + $0xf0] sm:$0xff]  ;;  %v9917_v25 = vmul.f32 %v1948_v3, %v1763_v4  ;;  %v9919_v28 = vmul.f32 %v1932_v0, %v1764_v12  ;;  %v12106_v58 = vld [vmem:[#allocation60_spill] sm:$0xff]  ;;  %v12109_v44 = vld [vmem:[#allocation142_spill] sm:$0xff] }
 0x425   : > { %v12105_v47 = vld [vmem:[#allocation151_spill] sm:$0xff]  ;;  %v9933_v4 = vadd.f32 %v2086_v40, %v12109_v44  ;;  %v7413_v12 = vld [vmem:[#allocation7 + $0xe8] sm:$0xff]  ;;  %v12116_v20 = vld [vmem:[#allocation49_spill] sm:$0xff] }
 0x426   : > { %12104 = vst [vmem:[#allocation64_spill] sm:$0xff] %v9919_v28  ;;  %v1931_v26 = vsel %vm1923_vm0, %v1872_v18, %v12105_v47  ;;  %v9925_v50 = vadd.f32 %v2085_v57, %v12106_v58  ;;  %v12107_v37 = vld [vmem:[#allocation119_spill] sm:$0xff]  ;;  %v2245_v47 = vadd.f32 %v9678_v42, %v9791_v1  ;;  %v1772_v57 = vld [vmem:[#allocation8 + $0x158] sm:$0xff]  ;;  %v12113_v42 = vld [vmem:[#allocation57_spill] sm:$0xff] }
 0x427   : > { %v1947_v51 = vsel %vm1923_vm0, %v12107_v37, %v1872_v18  ;;  %v2082_v46 = vmul.f32 %v1931_v26, %v1695_v24  ;;  %v9930_v61 = vmul.f32 %v1931_v26, %v1760_v27  ;;  %v1707_v14 = vld [vmem:[#allocation7 + $0x150] sm:$0xff]  ;;  %v2249_v37 = vadd.f32 %v9681_v49, %v9830_v11  ;;  %v12111_v18 = vld [vmem:[#allocation90_spill] sm:$0xff]  ;;  %v1882_v26 = vpop.permute.xlu0 %1881  ;;  %v1768_v49 = vld [vmem:[#allocation8 + $0x138] sm:$0xff] }
 0x428   : > { %v2081_v0 = vmul.f32 %v7413_v12, %v1947_v51  ;;  %v9935_v3 = vmul.f32 %v1947_v51, %v1759_v7  ;;  %v1771_v58 = vld [vmem:[#allocation8 + $0x150] sm:$0xff]  ;;  %v1934_v24 = vsel %vm1923_vm0, %v1878_v21, %v12111_v18  ;;  %v1880_v51 = vpop.permute.xlu1 %1879  ;;  %v2309_v44 = vmul.f32 0.088388346, %v2245_v47  ;;  %v12119_v47 = vld [vmem:[#allocation154_spill] sm:$0xff] }
 0x429   : > { %12108 = vst [vmem:[#allocation66_spill] sm:$0xff] %v9930_v61  ;;  %v9940_v54 = vadd.f32 %v2082_v46, %v12110_v6  ;;  %v12112_v27 = vld [vmem:[#allocation155_spill] sm:$0xff]  ;;  %v7414_v6 = vld [vmem:[#allocation7 + $0x148] sm:$0xff]  ;;  %v2094_v12 = vmul.f32 %v1934_v24, %v1707_v14  ;;  %v2313_v11 = vmul.f32 0.088388346, %v2249_v37  ;;  %v9955_v18 = vmul.f32 %v1934_v24, %v1772_v57 }
 0x42a   : > { %v1950_v7 = vsel %vm1923_vm0, %v12112_v27, %v1878_v21  ;;  %v1703_v40 = vld [vmem:[#allocation7 + $0x130] sm:$0xff]  ;;  %v9951_v1 = vadd.f32 %v2081_v0, %v12113_v42  ;;  %v1933_v21 = vsel %vm1923_vm0, %v1876_v39, %v12116_v20  ;;  %v12117_v27 = vld [vmem:[#allocation140_spill] sm:$0xff]  ;;  %v12118_v0 = vld [vmem:[#allocation30_spill] sm:$0xff]  ;;  %v1949_v14 = vsel %vm1923_vm0, %v12119_v47, %v1876_v39 }
 0x42b   : > { %v2093_v46 = vmul.f32 %v7414_v6, %v1950_v7  ;;  %v1767_v28 = vld [vmem:[#allocation8 + $0x130] sm:$0xff]  ;;  %v9953_v61 = vmul.f32 %v1950_v7, %v1771_v58  ;;  %12115 = vst [vmem:[#allocation67_spill] sm:$0xff] %v9955_v18  ;;  %v9964_v42 = vadd.f32 %v2094_v12, %v12118_v0  ;;  %v2090_v6 = vmul.f32 %v1933_v21, %v1703_v40  ;;  %v7415_v57 = vld [vmem:[#allocation7 + $0x128] sm:$0xff]  ;;  %v1780_v20 = vld [vmem:[#allocation8 + $0x198] sm:$0xff] }
 0x42c   : > { %v1715_v37 = vld [vmem:[#allocation7 + $0x190] sm:$0xff]  ;;  %v2373_v7 = vpack.c.bf16 %v2313_v11, %v2309_v44  ;;  %v2089_v24 = vmul.f32 %v7415_v57, %v1949_v14  ;;  %v9969_v18 = vmul.f32 %v1949_v14, %v1767_v28  ;;  %v9971_v29 = vmul.f32 %v1933_v21, %v1768_v49  ;;  %v12122_v0 = vld [vmem:[#allocation41_spill] sm:$0xff]  ;;  %v12123_v40 = vld [vmem:[#allocation104_spill] sm:$0xff] }
 0x42d   : > { %12114 = vst [vmem:[#allocation65_spill] sm:$0xff] %v9953_v61  ;;  %v9961_v60 = vadd.f32 %v2093_v46, %v12117_v27  ;;  %v1779_v58 = vld [vmem:[#allocation8 + $0x190] sm:$0xff]  ;;  %v1776_v27 = vld [vmem:[#allocation8 + $0x178] sm:$0xff]  ;;  %v9974_v12 = vadd.f32 %v2090_v6, %v12121_v35  ;;  %v1936_v39 = vsel %vm1923_vm0, %v1882_v26, %v12122_v0  ;;  %v1952_v44 = vsel %vm1923_vm0, %v12123_v40, %v1882_v26  ;;  %v12124_v47 = vld [vmem:[#allocation53_spill] sm:$0xff]  ;;  %v1884_v0 = vpop.permute.xlu1 %1883 }
 0x42e   : > { %12120 = vst [vmem:[#allocation68_spill] sm:$0xff] %v9971_v29  ;;  %v1711_v46 = vld [vmem:[#allocation7 + $0x170] sm:$0xff]  ;;  %v1935_v28 = vsel %vm1923_vm0, %v1880_v51, %v12124_v47  ;;  %6396 = vmatprep.mubr.bf16.mxu0 %v2373_v7  ;;  %v12125_v49 = vld [vmem:[#allocation29_spill] sm:$0xff]  ;;  %v7416_v14 = vld [vmem:[#allocation7 + $0x188] sm:$0xff]  ;;  %v2102_v6 = vmul.f32 %v1936_v39, %v1715_v37  ;;  %v9988_v57 = vmul.f32 %v1952_v44, %v1779_v58  ;;  %v1886_v29 = vpop.permute.xlu0 %1885 }
 0x42f   : > { %v1775_v11 = vld [vmem:[#allocation8 + $0x170] sm:$0xff]  ;;  %v9986_v21 = vadd.f32 %v2089_v24, %v12125_v49  ;;  %v2101_v35 = vmul.f32 %v7416_v14, %v1952_v44  ;;  %v12127_v61 = vpack.c.bf16 %v9893_v19, %v9842_v41  ;;  %v9993_v26 = vmul.f32 %v1936_v39, %v1780_v20  ;;  %v12129_v40 = vld [vmem:[#allocation157_spill] sm:$0xff]  ;;  %v1788_v14 = vld [vmem:[#allocation8 + $0x1d8] sm:$0xff] }
 0x430   : > { %12126 = vst [vmem:[#allocation147_spill] sm:$0xff] %v9988_v57  ;;  %v1951_v7 = vsel %vm1923_vm0, %v12129_v40, %v1880_v51  ;;  %v2098_v47 = vmul.f32 %v1935_v28, %v1711_v46  ;;  %v9998_v24 = vmul.f32 %v1935_v28, %v1776_v27  ;;  %v1723_v49 = vld [vmem:[#allocation7 + $0x1d0] sm:$0xff]  ;;  %v12131_v37 = vld [vmem:[#allocation34_spill] sm:$0xff]  ;;  %v12132_v44 = vld [vmem:[#allocation77_spill] sm:$0xff]  ;;  %v2261_v27 = vadd.f32 %v9703_v52, %v9859_v43 }
 0x431   : > { %6397 = vmatmul.mubr.bf16.vlgmr.msra.gmra.mrb[80].mxu0 %v12127_v61  ;;  %12128 = vst [vmem:[#allocation69_spill] sm:$0xff] %v9993_v26  ;;  %v10002_v58 = vadd.f32 %v2101_v35, %v12131_v37  ;;  %v10005_v57 = vadd.f32 %v2102_v6, %v12132_v44  ;;  %v7417_v41 = vld [vmem:[#allocation7 + $0x168] sm:$0xff]  ;;  %v10007_v61 = vmul.f32 %v1951_v7, %v1775_v11  ;;  %v1787_v20 = vld [vmem:[#allocation8 + $0x1d0] sm:$0xff]  ;;  %v12135_v6 = vld [vmem:[#allocation32_spill] sm:$0xff] }
 0x432   : > { %12130 = vst [vmem:[#allocation71_spill] sm:$0xff] %v9998_v24  ;;  %6477 = vmatpush3.bf16.msra.mxu0 %v12092_v8  ;;  %v2097_v19 = vmul.f32 %v7417_v41, %v1951_v7  ;;  %v12133_v39 = vld [vmem:[#allocation87_spill] sm:$0xff]  ;;  %v2265_v28 = vadd.f32 %v9707_v55, %v9915_v23  ;;  %v1938_v35 = vsel %vm1923_vm0, %v1886_v29, %v9728_v59  ;;  %v12136_v11 = vld [vmem:[#allocation33_spill] sm:$0xff]  ;;  %v2325_v41 = vmul.f32 0.088388346, %v2261_v27  ;;  %v7418_v52 = vld [vmem:[#allocation7 + $0x1c8] sm:$0xff] }
 0x433   : > { %6478 = vmatprep.subr.bf16.mxu0 %v12133_v39  ;;  %v12134_v51 = vld [vmem:[#allocation31_spill] sm:$0xff]  ;;  %v1954_v7 = vsel %vm1923_vm0, %v12136_v11, %v1886_v29  ;;  %v2110_v37 = vmul.f32 %v1938_v35, %v1723_v49  ;;  %v10024_v44 = vmul.f32 %v1938_v35, %v1788_v14  ;;  %v1784_v23 = vld [vmem:[#allocation8 + $0x1b8] sm:$0xff]  ;;  %v1937_v29 = vsel %vm1923_vm0, %v1884_v0, %v9745_v16  ;;  %v12140_v27 = vld [vmem:[#allocation62_spill] sm:$0xff] }
 0x434   : > { %v10011_v46 = vadd.f32 %v2098_v47, %v12134_v51  ;;  %v2161_v40 = vadd.f32 %v2097_v19, %v12135_v6  ;;  %v1719_v47 = vld [vmem:[#allocation7 + $0x1b0] sm:$0xff]  ;;  %v2329_v51 = vmul.f32 0.088388346, %v2265_v28  ;;  %v2109_v43 = vmul.f32 %v7418_v52, %v1954_v7  ;;  %v12138_v59 = vld [vmem:[#allocation144_spill] sm:$0xff]  ;;  %v12141_v6 = vld [vmem:[#allocation93_spill] sm:$0xff] }
 0x435   : > { %12137 = vst [vmem:[#allocation72_spill] sm:$0xff] %v10024_v44  ;;  %v10026_v8 = vmul.f32 %v1954_v7, %v1787_v20  ;;  %v1783_v55 = vld [vmem:[#allocation8 + $0x1b0] sm:$0xff]  ;;  %v10030_v19 = vadd.f32 %v2110_v37, %v12138_v59  ;;  %v12139_v49 = vld [vmem:[#allocation96_spill] sm:$0xff]  ;;  %v2269_v28 = vadd.f32 %v12140_v27, %v9881_v45  ;;  %v1888_v20 = vpop.permute.xlu1 %1887  ;;  %v7419_v52 = vld [vmem:[#allocation7 + $0x1a8] sm:$0xff]  ;;  %v2106_v59 = vmul.f32 %v1937_v29, %v1719_v47 }
 0x436   : > { %6479 = vmatpush3.bf16.msra.mxu0 %v12133_v39  ;;  %v1953_v14 = vsel %vm1923_vm0, %v12139_v49, %v1884_v0  ;;  %v2381_v35 = vpack.c.bf16 %v2329_v51, %v2325_v41  ;;  %v12142_v11 = vld [vmem:[#allocation36_spill] sm:$0xff]  ;;  %v1727_v39 = vld [vmem:[#allocation7 + $0x1f0] sm:$0xff]  ;;  %v10044_v16 = vmul.f32 %v1937_v29, %v1784_v23  ;;  %v2273_v0 = vadd.f32 %v9716_v32, %v9951_v1  ;;  %v12143_v41 = vld [vmem:[#allocation146_spill] sm:$0xff] }
 0x437   : > { %6480 = vmatprep.subr.bf16.mxu0 %v12141_v6  ;;  %v2173_v7 = vadd.f32 %v2109_v43, %v12142_v11  ;;  %v2105_v37 = vmul.f32 %v7419_v52, %v1953_v14  ;;  %v1791_v44 = vld [vmem:[#allocation8 + $0x1f0] sm:$0xff]  ;;  %v10042_v26 = vmul.f32 %v1953_v14, %v1783_v55  ;;  %v2333_v49 = vmul.f32 0.088388346, %v2269_v28  ;;  %v1792_v45 = vld [vmem:[#allocation8 + $0x1f8] sm:$0xff]  ;;  %v12145_v43 = vld [vmem:[#allocation42_spill] sm:$0xff] }
 0x438   : > { %6400 = vmatprep.mubr.bf16.mxu0 %v2381_v35  ;;  %v12144_v27 = vld [vmem:[#allocation35_spill] sm:$0xff]  ;;  %v1939_v47 = vsel %vm1923_vm0, %v1888_v20, %v9779_v9  ;;  %v1955_v55 = vsel %vm1923_vm0, %v12145_v43, %v1888_v20  ;;  %v2337_v23 = vmul.f32 0.088388346, %v2273_v0  ;;  %v7420_v32 = vld [vmem:[#allocation7 + $0x1e8] sm:$0xff]  ;;  %v2277_v11 = vadd.f32 %v9720_v34, %v9925_v50 }
 0x439   : > { %v2169_v51 = vadd.f32 %v2105_v37, %v12143_v41  ;;  %v10050_v24 = vadd.f32 %v2106_v59, %v12144_v27  ;;  %v2113_v1 = vmul.f32 %v7420_v32, %v1955_v55  ;;  %v2114_v29 = vmul.f32 %v1939_v47, %v1727_v39  ;;  %v12146_v28 = vld [vmem:[#allocation99_spill] sm:$0xff]  ;;  %v12148_v59 = vld [vmem:[#allocation38_spill] sm:$0xff] }
 0x43a   : > { %6481 = vmatpush3.bf16.msra.mxu0 %v12141_v6  ;;  %v2242_v14 = vmul.f32 %v1955_v55, %v1791_v44  ;;  %v10060_v35 = vmul.f32 %v1939_v47, %v1792_v45  ;;  %v2281_v9 = vadd.f32 %v9724_v10, %v9986_v21  ;;  %v2285_v48 = vadd.f32 %v9732_v53, %v9961_v60  ;;  %v12147_v52 = vld [vmem:[#allocation39_spill] sm:$0xff]  ;;  %v12150_v47 = vld [vmem:[#allocation105_spill] sm:$0xff] }
 0x43b   : > { %6482 = vmatprep.subr.bf16.mxu0 %v12146_v28  ;;  %v2385_v20 = vpack.c.bf16 %v2337_v23, %v2333_v49  ;;  %v2177_v37 = vadd.f32 %v2113_v1, %v12147_v52  ;;  %v2178_v0 = vadd.f32 %v2114_v29, %v12148_v59  ;;  %v2289_v39 = vadd.f32 %v9736_v30, %v2161_v40  ;;  %v12149_v30 = vld [vmem:[#allocation46_spill] sm:$0xff]  ;;  %v12155_v59 = vld [vmem:[#allocation129_spill] sm:$0xff] }
 0x43c   : > { %v2341_v44 = vmul.f32 0.088388346, %v2277_v11  ;;  %v2345_v41 = vmul.f32 0.088388346, %v2281_v9  ;;  %v2349_v45 = vmul.f32 0.088388346, %v2285_v48  ;;  %v2293_v27 = vadd.f32 %v9756_v36, %v10002_v58 }
 0x43d   : > { %6401 = vmatmul.mubr.bf16.gmra.mrb[84].mxu0 %v2385_v20  ;;  %v2353_v34 = vmul.f32 0.088388346, %v2289_v39  ;;  %v2297_v10 = vadd.f32 %v9760_v38, %v2169_v51  ;;  %v2301_v50 = vadd.f32 %v9764_v5, %v2173_v7  ;;  %v2305_v53 = vadd.f32 %v9767_v56, %v2177_v37  ;;  %v12154_v20 = vld [vmem:[#allocation117_spill] sm:$0xff]  ;;  %v12157_v39 = vld [vmem:[#allocation47_spill] sm:$0xff] }
 0x43e   : > { %v2389_v60 = vpack.c.bf16 %v2345_v41, %v2341_v44  ;;  %6483 = vmatpush3.bf16.msra.mxu0 %v12146_v28  ;;  %v2357_v21 = vmul.f32 0.088388346, %v2293_v27  ;;  %v2246_v40 = vadd.f32 %v12149_v30, %v9794_v17  ;;  %v2250_v49 = vadd.f32 %v9821_v63, %v9833_v2 }
 0x43f   : > { %6484 = vmatprep.subr.bf16.mxu0 %v12150_v47  ;;  %v2393_v36 = vpack.c.bf16 %v2353_v34, %v2349_v45  ;;  %v2361_v58 = vmul.f32 0.088388346, %v2297_v10  ;;  %v10082_v43 = vmul.f32 0.088388346, %v2301_v50  ;;  %v2369_v38 = vmul.f32 0.088388346, %v2305_v53 }
 0x440   : > { %6404 = vmatprep.mubr.bf16.mxu0 %v2389_v60  ;;  %v10084_v5 = vmul.f32 0.088388346, %v2246_v40  ;;  %v10086_v56 = vmul.f32 0.088388346, %v2250_v49  ;;  %v2262_v7 = vadd.f32 %v9846_v33, %v9849_v62  ;;  %v2266_v17 = vadd.f32 %v9897_v22, %v9902_v15  ;;  %v12151_v22 = vld [vmem:[#allocation111_spill] sm:$0xff]  ;;  %v12164_v10 = vld [vmem:[#allocation150_spill] sm:$0xff] }
 0x441   : > { %v2397_v51 = vpack.c.bf16 %v2361_v58, %v2357_v21  ;;  %v2401_v63 = vpack.c.bf16 %v2369_v38, %v10082_v43  ;;  %v2270_v2 = vadd.f32 %v9872_v31, %v9884_v13  ;;  %v2274_v55 = vadd.f32 %v9935_v3, %v9940_v54  ;;  %v12152_v54 = vld [vmem:[#allocation65_spill] sm:$0xff]  ;;  %v12167_v21 = vld [vmem:[#allocation58_spill] sm:$0xff] }
 0x442   : > { %6485 = vmatpush3.bf16.msra.mxu0 %v12150_v47  ;;  %v10100_v32 = vmul.f32 0.088388346, %v2262_v7  ;;  %v10102_v33 = vmul.f32 0.088388346, %v2266_v17  ;;  %v2278_v62 = vadd.f32 %v9917_v25, %v9933_v4  ;;  %v2282_v13 = vadd.f32 %v9969_v18, %v9974_v12  ;;  %v12153_v4 = vld [vmem:[#allocation147_spill] sm:$0xff]  ;;  %v12165_v50 = vld [vmem:[#allocation61_spill] sm:$0xff] }
 0x443   : > { %6486 = vmatprep.subr.bf16.mxu0 %v12151_v22  ;;  %v10107_v15 = vmul.f32 0.088388346, %v2270_v2  ;;  %v10109_v31 = vmul.f32 0.088388346, %v2274_v55  ;;  %v2286_v3 = vadd.f32 %v12152_v54, %v9964_v42  ;;  %v2290_v25 = vadd.f32 %v10007_v61, %v10011_v46  ;;  %v12166_v60 = vld [vmem:[#allocation149_spill] sm:$0xff]  ;;  %v12170_v58 = vld [vmem:[#allocation66_spill] sm:$0xff] }
 0x444   : > { %v10117_v29 = vmul.f32 0.088388346, %v2278_v62  ;;  %v2294_v11 = vadd.f32 %v12153_v4, %v10005_v57  ;;  %v10125_v48 = vmul.f32 0.088388346, %v2282_v13  ;;  %v2298_v42 = vadd.f32 %v10042_v26, %v10050_v24  ;;  %v12156_v26 = vld [vmem:[#allocation50_spill] sm:$0xff]  ;;  %v12172_v7 = vld [vmem:[#allocation64_spill] sm:$0xff] }
 0x445   : > { %6405 = vmatmul.mubr.bf16.gmra.mrb[88].mxu0 %v2393_v36  ;;  %v10127_v18 = vmul.f32 0.088388346, %v2286_v3  ;;  %v10132_v12 = vmul.f32 0.088388346, %v2290_v25  ;;  %v2302_v57 = vadd.f32 %v10026_v8, %v10030_v19  ;;  %v2306_v46 = vadd.f32 %v2242_v14, %v2178_v0  ;;  %v12161_v19 = vld [vmem:[#allocation40_spill] sm:$0xff]  ;;  %v12162_v14 = vld [vmem:[#allocation54_spill] sm:$0xff] }
 0x446   : > { %6408 = vmatprep.mubr.bf16.mxu0 %v2397_v51  ;;  %6487 = vmatpush3.bf16.msra.mxu0 %v12151_v22  ;;  %v10134_v61 = vmul.f32 0.088388346, %v2294_v11  ;;  %v10141_v37 = vmul.f32 0.088388346, %v2298_v42  ;;  %v2251_v24 = vadd.f32 %v12156_v26, %v12155_v59  ;;  %v10146_v44 = vmul.f32 0.088388346, %v12157_v39 }
 0x447   : > { %6488 = vmatprep.subr.bf16.mxu0 %v12154_v20  ;;  %v10150_v45 = vmul.f32 0.088388346, %v2302_v57  ;;  %v10152_v8 = vmul.f32 0.088388346, %v2306_v46  ;;  %v2263_v0 = vadd.f32 %v12162_v14, %v12161_v19  ;;  %v2267_v53 = vadd.f32 %v12165_v50, %v12164_v10  ;;  %v12169_v36 = vld [vmem:[#allocation153_spill] sm:$0xff]  ;;  %v12171_v38 = vld [vmem:[#allocation94_spill] sm:$0xff] }
 0x448   : > { %12158 = vst [vmem:[#allocation73_spill] sm:$0xff] %v10146_v44  ;;  %v10158_v34 = vmul.f32 0.088388346, %v2251_v24  ;;  %v2271_v30 = vadd.f32 %v12167_v21, %v12166_v60  ;;  %v2275_v43 = vadd.f32 %v12170_v58, %v12169_v36  ;;  %v2279_v17 = vadd.f32 %v12172_v7, %v12171_v38  ;;  %v12173_v51 = vld [vmem:[#allocation125_spill] sm:$0xff]  ;;  %v12176_v13 = vld [vmem:[#allocation52_spill] sm:$0xff]  ;;  %v12180_v11 = vld [vmem:[#allocation95_spill] sm:$0xff] }
 0x449   : > { %12159 = vst [vmem:[#allocation74_spill] sm:$0xff] %v10150_v45  ;;  %12160 = vst [vmem:[#allocation75_spill] sm:$0xff] %v10152_v8  ;;  %v10167_v49 = vmul.f32 0.088388346, %v2263_v0  ;;  %v10176_v55 = vmul.f32 0.088388346, %v2267_v53 }
 0x44a   : > { %12163 = vst [vmem:[#allocation76_spill] sm:$0xff] %v10158_v34  ;;  %6489 = vmatpush3.bf16.msra.mxu0 %v12154_v20  ;;  %v10178_v62 = vmul.f32 0.088388346, %v2271_v30  ;;  %v12177_v54 = vld [vmem:[#allocation68_spill] sm:$0xff]  ;;  %v10182_v25 = vmul.f32 0.088388346, %v2275_v43 }
 0x44b   : > { %12168 = vst [vmem:[#allocation70_spill] sm:$0xff] %v10167_v49  ;;  %6490 = vmatprep.subr.bf16.mxu0 %v12173_v51  ;;  %12174 = vst [vmem:[#allocation121_spill] sm:$0xff] %v10176_v55  ;;  %v2283_v3 = vadd.f32 %v12177_v54, %v12176_v13  ;;  %v10184_v4 = vmul.f32 0.088388346, %v2279_v17  ;;  %v12181_v42 = vld [vmem:[#allocation67_spill] sm:$0xff]  ;;  %v12182_v46 = vld [vmem:[#allocation56_spill] sm:$0xff] }
 0x44c   : > { %12175 = vst [vmem:[#allocation123_spill] sm:$0xff] %v10178_v62  ;;  %12178 = vst [vmem:[#allocation132_spill] sm:$0xff] %v10182_v25  ;;  %v2287_v57 = vadd.f32 %v12181_v42, %v12180_v11  ;;  %v12183_v59 = vld [vmem:[#allocation71_spill] sm:$0xff]  ;;  %v12186_v14 = vld [vmem:[#allocation69_spill] sm:$0xff] }
 0x44d   : > { %12179 = vst [vmem:[#allocation120_spill] sm:$0xff] %v10184_v4  ;;  %v2291_v26 = vadd.f32 %v12183_v59, %v12182_v46  ;;  %6409 = vmatmul.mubr.bf16.gmra.mrb[92].mxu0 %v2401_v63  ;;  %v10192_v39 = vmul.f32 0.088388346, %v2283_v3  ;;  %v12185_v19 = vld [vmem:[#allocation43_spill] sm:$0xff]  ;;  %v12187_v10 = vld [vmem:[#allocation45_spill] sm:$0xff]  ;;  %v12190_v63 = vld [vmem:[#allocation44_spill] sm:$0xff] }
 0x44e   : > { %v2295_v0 = vadd.f32 %v12186_v14, %v12185_v19  ;;  %v2299_v50 = vadd.f32 %v10044_v16, %v12187_v10  ;;  %6491 = vmatpush3.bf16.msra.mxu0 %v12173_v51  ;;  %v10201_v60 = vmul.f32 0.088388346, %v2287_v57  ;;  %v12191_v30 = vld [vmem:[#allocation72_spill] sm:$0xff] }
 0x44f   : > { %12184 = vst [vmem:[#allocation133_spill] sm:$0xff] %v10192_v39  ;;  %v10203_v21 = vmul.f32 0.088388346, %v2291_v26  ;;  %v2303_v36 = vadd.f32 %v12191_v30, %v12190_v63  ;;  %v12192_v58 = vld [vmem:[#allocation80_spill] sm:$0xff] }
 0x450   : > { %12188 = vst [vmem:[#allocation113_spill] sm:$0xff] %v10201_v60  ;;  %6508 = vmatprep.subr.bf16.mxu0 %v12192_v58  ;;  %v10210_v38 = vmul.f32 0.088388346, %v2295_v0  ;;  %v10212_v16 = vmul.f32 0.088388346, %v2299_v50  ;;  %v12195_v7 = vld [vmem:[#allocation48_spill] sm:$0xff] }
 0x451   : > { %12189 = vst [vmem:[#allocation79_spill] sm:$0xff] %v10203_v21  ;;  %v2307_v17 = vadd.f32 %v10060_v35, %v12195_v7  ;;  %v10220_v3 = vmul.f32 0.088388346, %v2303_v36 }
 0x452   : > { %12193 = vst [vmem:[#allocation82_spill] sm:$0xff] %v10210_v38  ;;  %12194 = vst [vmem:[#allocation84_spill] sm:$0xff] %v10212_v16 }
 0x453   : > { %12196 = vst [vmem:[#allocation86_spill] sm:$0xff] %v10220_v3  ;;  %v10222_v11 = vmul.f32 0.088388346, %v2307_v17 }
 0x455   : > { %12197 = vst [vmem:[#allocation88_spill] sm:$0xff] %v10222_v11 }
 0x4a7   : > { %v10226_v57 = vpop.f32.mrb[64].mxu0 }
 0x4a8   : > { %v10228_v46 = vpop.f32.mrb[65].mxu0 }
 0x4a9   : > { %2789 = vmax.xlane.f32.xlu0 %v10228_v46  ;;  %v10231_v35 = vpop.f32.mrb[66].mxu0 }
 0x4aa   : > { %v10233_v59 = vpop.f32.mrb[67].mxu0 }
 0x4ab   : > { %2791 = vmax.xlane.f32.xlu1 %v10233_v59 }
 0x4ad   : > { %2793 = vmax.xlane.f32.xlu0 %v10226_v57 }
 0x4af   : > { %v10237_v26 = vpop.f32.mrb[68].mxu0 }
 0x4b0   : > { %v10239_v19 = vpop.f32.mrb[69].mxu0 }
 0x4b1   : > { %2795 = vmax.xlane.f32.xlu0 %v10231_v35  ;;  %v10242_v14 = vpop.f32.mrb[70].mxu0 }
 0x4b2   : > { %v10244_v0 = vpop.f32.mrb[71].mxu0 }
 0x4b3   : > { %2799 = vmax.xlane.f32.xlu1 %v10244_v0 }
 0x4b5   : > { %2797 = vmax.xlane.f32.xlu0 %v10239_v19 }
 0x4b7   : > { %2803 = vmax.xlane.f32.xlu1 %v10242_v14 }
 0x4b9   : > { %2801 = vmax.xlane.f32.xlu0 %v10237_v26 }
 0x4c9   : > { %v10250_v10 = vpop.f32.mrb[72].mxu0 }
 0x4ca   : > { %v10252_v50 = vpop.f32.mrb[73].mxu0 }
 0x4cb   : > { %2805 = vmax.xlane.f32.xlu0 %v10252_v50  ;;  %v10255_v63 = vpop.f32.mrb[74].mxu0 }
 0x4cc   : > { %v10257_v30 = vpop.f32.mrb[75].mxu0 }
 0x4cd   : > { %2807 = vmax.xlane.f32.xlu1 %v10257_v30 }
 0x4cf   : > { %2809 = vmax.xlane.f32.xlu0 %v10250_v10 }
 0x4d1   : > { %2811 = vmax.xlane.f32.xlu1 %v10255_v63 }
 0x4f2   : > { %v10262_v36 = vpop.f32.mrb[76].mxu0 }
 0x4f3   : > { %v10264_v7 = vpop.f32.mrb[77].mxu0 }
 0x4f4   : > { %2813 = vmax.xlane.f32.xlu0 %v10264_v7  ;;  %v10267_v17 = vpop.f32.mrb[78].mxu0 }
 0x4f5   : > { %v10269_v42 = vpop.f32.mrb[79].mxu0 }
 0x4f6   : > { %2815 = vmax.xlane.f32.xlu1 %v10269_v42 }
 0x4f8   : > { %2817 = vmax.xlane.f32.xlu0 %v10262_v36 }
 0x4fa   : > { %2819 = vmax.xlane.f32.xlu1 %v10267_v17 }
 0x504   : > { %v10274_v54 = vpop.f32.mrb[80].mxu0 }
 0x505   : > { %v10276_v13 = vpop.f32.mrb[81].mxu0 }
 0x506   : > { %3135 = vmax.xlane.f32.xlu0 %v10276_v13  ;;  %v10279_v43 = vpop.f32.mrb[82].mxu0 }
 0x507   : > { %v10281_v53 = vpop.f32.mrb[83].mxu0 }
 0x508   : > { %3137 = vmax.xlane.f32.xlu1 %v10281_v53 }
 0x50a   : > { %3139 = vmax.xlane.f32.xlu0 %v10274_v54 }
 0x50c   : > { %3141 = vmax.xlane.f32.xlu1 %v10279_v43 }
 0x510   : > { %v10286_v24 = vpop.f32.mrb[84].mxu0 }
 0x511   : > { %v10288_v2 = vpop.f32.mrb[85].mxu0  ;;  %3147 = vmax.xlane.f32.xlu0 %v10286_v24 }
 0x512   : > { %v10291_v40 = vpop.f32.mrb[86].mxu0 }
 0x513   : > { %v10293_v27 = vpop.f32.mrb[87].mxu0  ;;  %3149 = vmax.xlane.f32.xlu1 %v10291_v40 }
 0x515   : > { %3143 = vmax.xlane.f32.xlu0 %v10288_v2 }
 0x517   : > { %3145 = vmax.xlane.f32.xlu1 %v10293_v27 }
 0x518   : > { %v10298_v41 = vpop.f32.mrb[88].mxu0 }
 0x519   : > { %v10300_v52 = vpop.f32.mrb[89].mxu0  ;;  %3155 = vmax.xlane.f32.xlu0 %v10298_v41 }
 0x51a   : > { %v10303_v9 = vpop.f32.mrb[90].mxu0 }
 0x51b   : > { %v10305_v1 = vpop.f32.mrb[91].mxu0  ;;  %3157 = vmax.xlane.f32.xlu1 %v10303_v9 }
 0x51d   : > { %3151 = vmax.xlane.f32.xlu0 %v10300_v52 }
 0x51f   : > { %3153 = vmax.xlane.f32.xlu1 %v10305_v1 }
 0x520   : > { %v10310_v23 = vpop.f32.mrb[92].mxu0 }
 0x521   : > { %v10312_v3 = vpop.f32.mrb[93].mxu0 }
 0x522   : > { %v10314_v11 = vpop.f32.mrb[94].mxu0 }
 0x523   : > { %v10316_v38 = vpop.f32.mrb[95].mxu0 }
 0x536   : > { %v2790_v16 = vpop.xlane.xlu0 %2789 }
 0x537   : > { %v2821_v60 = vsub.f32 %v10228_v46, %v2790_v16 }
 0x538   : > { %v2792_v39 = vpop.xlane.xlu1 %2791 }
 0x539   : > { %v2837_v25 = vmul.f32 1.442695, %v2821_v60  ;;  %v2822_v55 = vsub.f32 %v10233_v59, %v2792_v39 }
 0x53a   : > { %v2794_v21 = vpop.xlane.xlu0 %2793 }
 0x53b   : > { %v2823_v4 = vsub.f32 %v10226_v57, %v2794_v21  ;;  %v2839_v45 = vmul.f32 1.442695, %v2822_v55 }
 0x53d   : > { %v2841_v62 = vmul.f32 1.442695, %v2823_v4 }
 0x53e   : > { %v2796_v49 = vpop.xlane.xlu0 %2795 }
 0x53f   : > { %6971 = vpow2.f32 %v2841_v62  ;;  %v2824_v44 = vsub.f32 %v10231_v35, %v2796_v49 }
 0x540   : > { %6973 = vpow2.f32 %v2837_v25  ;;  %v2800_v8 = vpop.xlane.xlu1 %2799 }
 0x541   : > { %v2843_v34 = vmul.f32 1.442695, %v2824_v44  ;;  %v2826_v4 = vsub.f32 %v10244_v0, %v2800_v8 }
 0x542   : > { %v2798_v51 = vpop.xlane.xlu0 %2797 }
 0x543   : > { %6975 = vpow2.f32 %v2843_v34  ;;  %v2825_v16 = vsub.f32 %v10239_v19, %v2798_v51  ;;  %v2847_v34 = vmul.f32 1.442695, %v2826_v4 }
 0x544   : > { %6977 = vpow2.f32 %v2839_v45  ;;  %v2804_v44 = vpop.xlane.xlu1 %2803 }
 0x545   : > { %v2845_v39 = vmul.f32 1.442695, %v2825_v16  ;;  %v2828_v45 = vsub.f32 %v10242_v14, %v2804_v44 }
 0x546   : > { %v2802_v46 = vpop.xlane.xlu0 %2801 }
 0x547   : > { %v2827_v62 = vsub.f32 %v10237_v26, %v2802_v46  ;;  %6979 = vpow2.f32 %v2845_v39  ;;  %v2851_v55 = vmul.f32 1.442695, %v2828_v45 }
 0x548   : > { %6981 = vpow2.f32 %v2847_v34 }
 0x549   : > { %v10323_v21 = vpop.eup %6971  ;;  %v2849_v51 = vmul.f32 1.442695, %v2827_v62 }
 0x54a   : > { %2873 = vadd.xlane.f32.xlu0 %v10323_v21  ;;  %v10328_v49 = vpop.eup %6973 }
 0x54b   : > { %6983 = vpow2.f32 %v2849_v51 }
 0x54c   : > { %6985 = vpow2.f32 %v2851_v55 }
 0x54d   : > { %v10330_v25 = vpop.eup %6975 }
 0x54e   : > { %2869 = vadd.xlane.f32.xlu0 %v10328_v49  ;;  %2875 = vadd.xlane.f32.xlu1 %v10330_v25  ;;  %v10335_v8 = vpop.eup %6977 }
 0x551   : > { %v10343_v19 = vpop.eup %6979 }
 0x552   : > { %3159 = vmax.xlane.f32.xlu0 %v10312_v3  ;;  %2871 = vadd.xlane.f32.xlu1 %v10335_v8  ;;  %v10348_v4 = vpop.eup %6981 }
 0x555   : > { %v10351_v62 = vpop.eup %6983 }
 0x556   : > { %3163 = vmax.xlane.f32.xlu0 %v10310_v23  ;;  %3161 = vmax.xlane.f32.xlu1 %v10316_v38  ;;  %v10355_v44 = vpop.eup %6985 }
 0x558   : > { %v2806_v60 = vpop.xlane.xlu0 %2805 }
 0x559   : > { %v2829_v57 = vsub.f32 %v10252_v50, %v2806_v60 }
 0x55a   : > { %v2808_v35 = vpop.xlane.xlu1 %2807  ;;  %3165 = vmax.xlane.f32.xlu1 %v10314_v11  ;;  %2877 = vadd.xlane.f32.xlu0 %v10343_v19 }
 0x55b   : > { %v2853_v59 = vmul.f32 1.442695, %v2829_v57  ;;  %v2830_v26 = vsub.f32 %v10257_v30, %v2808_v35 }
 0x55c   : > { %v2810_v14 = vpop.xlane.xlu0 %2809 }
 0x55d   : > { %6987 = vpow2.f32 %v2853_v59  ;;  %v2855_v0 = vmul.f32 1.442695, %v2830_v26  ;;  %v2831_v16 = vsub.f32 %v10250_v10, %v2810_v14 }
 0x55e   : > { %v2812_v46 = vpop.xlane.xlu1 %2811  ;;  %2879 = vadd.xlane.f32.xlu1 %v10348_v4  ;;  %2881 = vadd.xlane.f32.xlu0 %v10351_v62 }
 0x55f   : > { %6989 = vpow2.f32 %v2855_v0  ;;  %v2857_v50 = vmul.f32 1.442695, %v2831_v16  ;;  %v2832_v39 = vsub.f32 %v10255_v63, %v2812_v46 }
 0x561   : > { %6991 = vpow2.f32 %v2857_v50  ;;  %v2859_v30 = vmul.f32 1.442695, %v2832_v39 }
 0x562   : > { %2883 = vadd.xlane.f32.xlu1 %v10355_v44 }
 0x563   : > { %6993 = vpow2.f32 %v2859_v30 }
 0x567   : > { %v10358_v10 = vpop.eup %6987 }
 0x568   : > { %2885 = vadd.xlane.f32.xlu0 %v10358_v10 }
 0x569   : > { %v10361_v34 = vpop.eup %6989 }
 0x56a   : > { %2887 = vadd.xlane.f32.xlu1 %v10361_v34 }
 0x56b   : > { %v10364_v63 = vpop.eup %6991 }
 0x56c   : > { %2889 = vadd.xlane.f32.xlu0 %v10364_v63 }
 0x56d   : > { %v10367_v45 = vpop.eup %6993 }
 0x56e   : > { %2891 = vadd.xlane.f32.xlu1 %v10367_v45 }
 0x581   : > { %v2814_v51 = vpop.xlane.xlu0 %2813 }
 0x582   : > { %v2833_v55 = vsub.f32 %v10264_v7, %v2814_v51 }
 0x583   : > { %v2816_v60 = vpop.xlane.xlu1 %2815 }
 0x584   : > { %v2861_v57 = vmul.f32 1.442695, %v2833_v55  ;;  %v2834_v35 = vsub.f32 %v10269_v42, %v2816_v60 }
 0x585   : > { %v2818_v59 = vpop.xlane.xlu0 %2817 }
 0x586   : > { %6995 = vpow2.f32 %v2861_v57  ;;  %v2863_v26 = vmul.f32 1.442695, %v2834_v35  ;;  %v2835_v14 = vsub.f32 %v10262_v36, %v2818_v59 }
 0x587   : > { %v2820_v0 = vpop.xlane.xlu1 %2819 }
 0x588   : > { %6997 = vpow2.f32 %v2863_v26  ;;  %v2865_v16 = vmul.f32 1.442695, %v2835_v14  ;;  %v2836_v46 = vsub.f32 %v10267_v17, %v2820_v0 }
 0x58a   : > { %6999 = vpow2.f32 %v2865_v16  ;;  %v2867_v50 = vmul.f32 1.442695, %v2836_v46 }
 0x58c   : > { %7001 = vpow2.f32 %v2867_v50 }
 0x590   : > { %v10374_v39 = vpop.eup %6995 }
 0x591   : > { %2893 = vadd.xlane.f32.xlu0 %v10374_v39 }
 0x592   : > { %v10377_v30 = vpop.eup %6997 }
 0x593   : > { %v3136_v7 = vpop.xlane.xlu0 %3135  ;;  %2895 = vadd.xlane.f32.xlu1 %v10377_v30 }
 0x594   : > { %v3167_v42 = vsub.f32 %v10276_v13, %v3136_v7  ;;  %v10381_v36 = vpop.eup %6999 }
 0x595   : > { %v3138_v51 = vpop.xlane.xlu1 %3137  ;;  %2897 = vadd.xlane.f32.xlu0 %v10381_v36 }
 0x596   : > { %v3183_v55 = vmul.f32 1.442695, %v3167_v42  ;;  %v3168_v17 = vsub.f32 %v10281_v53, %v3138_v51  ;;  %v10385_v57 = vpop.eup %7001 }
 0x597   : > { %v3140_v60 = vpop.xlane.xlu0 %3139  ;;  %2899 = vadd.xlane.f32.xlu1 %v10385_v57 }
 0x598   : > { %7003 = vpow2.f32 %v3183_v55  ;;  %v3185_v35 = vmul.f32 1.442695, %v3168_v17  ;;  %v3169_v59 = vsub.f32 %v10274_v54, %v3140_v60 }
 0x599   : > { %v3142_v26 = vpop.xlane.xlu1 %3141 }
 0x59a   : > { %7005 = vpow2.f32 %v3185_v35  ;;  %v3187_v13 = vmul.f32 1.442695, %v3169_v59  ;;  %v3170_v14 = vsub.f32 %v10279_v43, %v3142_v26 }
 0x59c   : > { %7007 = vpow2.f32 %v3187_v13  ;;  %v3189_v0 = vmul.f32 1.442695, %v3170_v14 }
 0x59e   : > { %7009 = vpow2.f32 %v3189_v0  ;;  %v3148_v53 = vpop.xlane.xlu0 %3147 }
 0x59f   : > { %v3173_v54 = vsub.f32 %v10286_v24, %v3148_v53 }
 0x5a0   : > { %v3150_v16 = vpop.xlane.xlu1 %3149 }
 0x5a1   : > { %v3174_v55 = vsub.f32 %v10291_v40, %v3150_v16  ;;  %v3195_v26 = vmul.f32 1.442695, %v3173_v54 }
 0x5a2   : > { %v10390_v46 = vpop.eup %7003  ;;  %v3144_v50 = vpop.xlane.xlu0 %3143 }
 0x5a3   : > { %3215 = vadd.xlane.f32.xlu0 %v10390_v46  ;;  %v3171_v42 = vsub.f32 %v10288_v2, %v3144_v50  ;;  %v3197_v2 = vmul.f32 1.442695, %v3174_v55 }
 0x5a4   : > { %v10393_v7 = vpop.eup %7005  ;;  %v3146_v51 = vpop.xlane.xlu1 %3145 }
 0x5a5   : > { %3217 = vadd.xlane.f32.xlu1 %v10393_v7  ;;  %v3191_v17 = vmul.f32 1.442695, %v3171_v42  ;;  %v3172_v60 = vsub.f32 %v10293_v27, %v3146_v51 }
 0x5a6   : > { %v10398_v43 = vpop.eup %7007  ;;  %v3156_v35 = vpop.xlane.xlu0 %3155 }
 0x5a7   : > { %3219 = vadd.xlane.f32.xlu0 %v10398_v43  ;;  %7011 = vpow2.f32 %v3191_v17  ;;  %v3193_v24 = vmul.f32 1.442695, %v3172_v60  ;;  %v3177_v40 = vsub.f32 %v10298_v41, %v3156_v35 }
 0x5a8   : > { %v10403_v59 = vpop.eup %7009  ;;  %v3158_v13 = vpop.xlane.xlu1 %3157 }
 0x5a9   : > { %3221 = vadd.xlane.f32.xlu1 %v10403_v59  ;;  %7013 = vpow2.f32 %v3193_v24  ;;  %v3178_v53 = vsub.f32 %v10303_v9, %v3158_v13  ;;  %v3203_v54 = vmul.f32 1.442695, %v3177_v40 }
 0x5aa   : > { %v3152_v14 = vpop.xlane.xlu0 %3151  ;;  %7015 = vpow2.f32 %v3195_v26 }
 0x5ab   : > { %v3175_v0 = vsub.f32 %v10300_v52, %v3152_v14  ;;  %7017 = vpow2.f32 %v3197_v2  ;;  %v3205_v55 = vmul.f32 1.442695, %v3178_v53 }
 0x5ac   : > { %v3154_v27 = vpop.xlane.xlu1 %3153 }
 0x5ad   : > { %v3199_v16 = vmul.f32 1.442695, %v3175_v0  ;;  %v3176_v50 = vsub.f32 %v10305_v1, %v3154_v27 }
 0x5af   : > { %7019 = vpow2.f32 %v3199_v16  ;;  %v3201_v42 = vmul.f32 1.442695, %v3176_v50 }
 0x5b1   : > { %v10410_v51 = vpop.eup %7011  ;;  %7021 = vpow2.f32 %v3201_v42 }
 0x5b2   : > { %3223 = vadd.xlane.f32.xlu0 %v10410_v51  ;;  %7023 = vpow2.f32 %v3203_v54 }
 0x5b3   : > { %v10413_v17 = vpop.eup %7013  ;;  %7025 = vpow2.f32 %v3205_v55 }
 0x5b4   : > { %3225 = vadd.xlane.f32.xlu1 %v10413_v17  ;;  %v10416_v52 = vpop.eup %7015 }
 0x5b5   : > { %v10419_v1 = vpop.eup %7017 }
 0x5b6   : > { %3227 = vadd.xlane.f32.xlu0 %v10416_v52 }
 0x5b8   : > { %3229 = vadd.xlane.f32.xlu1 %v10419_v1 }
 0x5b9   : > { %v10422_v9 = vpop.eup %7019 }
 0x5ba   : > { %3231 = vadd.xlane.f32.xlu0 %v10422_v9 }
 0x5bb   : > { %v10425_v41 = vpop.eup %7021 }
 0x5bc   : > { %3233 = vadd.xlane.f32.xlu1 %v10425_v41  ;;  %v10428_v60 = vpop.eup %7023 }
 0x5bd   : > { %v10431_v35 = vpop.eup %7025 }
 0x5be   : > { %3235 = vadd.xlane.f32.xlu0 %v10428_v60 }
 0x5c0   : > { %3237 = vadd.xlane.f32.xlu1 %v10431_v35 }
 0x5d7   : > { %v2874_v26 = vpop.xlane.xlu0 %2873 }
 0x5db   : > { %v2876_v24 = vpop.xlane.xlu1 %2875  ;;  %v2870_v13 = vpop.xlane.xlu0 %2869 }
 0x5dc   : > { %7027 = vrcp.f32 %v2876_v24 }
 0x5dd   : > { %7029 = vrcp.f32 %v2870_v13 }
 0x5de   : > { %7031 = vrcp.f32 %v2874_v26 }
 0x5df   : > { %v2872_v2 = vpop.xlane.xlu1 %2871  ;;  %v3160_v14 = vpop.xlane.xlu0 %3159 }
 0x5e0   : > { %7033 = vrcp.f32 %v2872_v2  ;;  %v3179_v40 = vsub.f32 %v10312_v3, %v3160_v14 }
 0x5e2   : > { %v3207_v0 = vmul.f32 1.442695, %v3179_v40 }
 0x5e3   : > { %v3162_v27 = vpop.xlane.xlu1 %3161  ;;  %v3164_v53 = vpop.xlane.xlu0 %3163 }
 0x5e4   : > { %7035 = vpow2.f32 %v3207_v0  ;;  %v3180_v16 = vsub.f32 %v10316_v38, %v3162_v27  ;;  %v3181_v50 = vsub.f32 %v10310_v23, %v3164_v53 }
 0x5e6   : > { %v3209_v54 = vmul.f32 1.442695, %v3180_v16  ;;  %v3211_v42 = vmul.f32 1.442695, %v3181_v50  ;;  %v7028_v55 = vpop.eup %7027 }
 0x5e7   : > { %v3166_v20 = vpop.xlane.xlu1 %3165  ;;  %v2878_v24 = vpop.xlane.xlu0 %2877  ;;  %v2920_v14 = vmul.f32 %v7028_v55, %v10330_v25  ;;  %v12198_v25 = vld [vmem:[#allocation78_spill] sm:$0xff] }
 0x5e8   : > { %v7030_v13 = vpop.eup %7029  ;;  %7037 = vpow2.f32 %v3209_v54  ;;  %v3182_v26 = vsub.f32 %v10314_v11, %v3166_v20 }
 0x5e9   : > { %v7032_v2 = vpop.eup %7031  ;;  %7039 = vpow2.f32 %v3211_v42  ;;  %v2917_v23 = vmul.f32 %v7030_v13, %v10328_v49  ;;  %v12200_v13 = vld [vmem:[#allocation91_spill] sm:$0xff] }
 0x5ea   : > { %v7034_v3 = vpop.eup %7033  ;;  %v3213_v40 = vmul.f32 1.442695, %v3182_v26  ;;  %7041 = vrcp.f32 %v2878_v24  ;;  %v2919_v53 = vmul.f32 %v7032_v2, %v10323_v21 }
 0x5eb   : > { %v2880_v0 = vpop.xlane.xlu1 %2879  ;;  %v2882_v38 = vpop.xlane.xlu0 %2881  ;;  %v2918_v27 = vmul.f32 %v7034_v3, %v10335_v8  ;;  %v12199_v8 = vld [vmem:[#allocation85_spill] sm:$0xff] }
 0x5ec   : > { %7043 = vpow2.f32 %v3213_v40  ;;  %v2934_v20 = vpack.c.bf16 %v2920_v14, %v2919_v53 }
 0x5ed   : > { %7045 = vrcp.f32 %v2880_v0  ;;  %v2933_v16 = vpack.c.bf16 %v2918_v27, %v2917_v23  ;;  %v12201_v23 = vld [vmem:[#allocation97_spill] sm:$0xff] }
 0x5ee   : > { %v10442_v50 = vpop.eup %7035  ;;  %7047 = vrcp.f32 %v2882_v38 }
 0x5ef   : > { %v2884_v11 = vpop.xlane.xlu1 %2883  ;;  %6364 = vmatprep.mubr.bf16.mxu1 %v2933_v16  ;;  %3239 = vadd.xlane.f32.xlu0 %v10442_v50 }
 0x5f0   : > { %7049 = vrcp.f32 %v2884_v11  ;;  %6365 = vmatmul.mubr.bf16.vlgmr.msra.gmra.mrb[64].mxu1 %v2934_v20 }
 0x5f1   : > { %6413 = vmatpush3.bf16.msra.mxu1 %v12198_v25  ;;  %v12202_v25 = vld [vmem:[#allocation103_spill] sm:$0xff] }
 0x5f2   : > { %v10446_v49 = vpop.eup %7037  ;;  %6414 = vmatprep.subr.bf16.mxu1 %v12199_v8 }
 0x5f3   : > { %v10449_v54 = vpop.eup %7039  ;;  %3241 = vadd.xlane.f32.xlu1 %v10446_v49 }
 0x5f4   : > { %3243 = vadd.xlane.f32.xlu0 %v10449_v54  ;;  %v7042_v55 = vpop.eup %7041 }
 0x5f5   : > { %v2886_v21 = vpop.xlane.xlu0 %2885  ;;  %6415 = vmatpush3.bf16.msra.mxu1 %v12199_v8  ;;  %v2921_v40 = vmul.f32 %v7042_v55, %v10343_v19 }
 0x5f6   : > { %7051 = vrcp.f32 %v2886_v21  ;;  %v10454_v24 = vpop.eup %7043  ;;  %6416 = vmatprep.subr.bf16.mxu1 %v12200_v13 }
 0x5f7   : > { %v2888_v42 = vpop.xlane.xlu1 %2887  ;;  %v7046_v2 = vpop.eup %7045  ;;  %3245 = vadd.xlane.f32.xlu1 %v10454_v24 }
 0x5f8   : > { %7053 = vrcp.f32 %v2888_v42  ;;  %v7048_v3 = vpop.eup %7047  ;;  %v2922_v0 = vmul.f32 %v7046_v2, %v10348_v4  ;;  %v12203_v42 = vld [vmem:[#allocation109_spill] sm:$0xff] }
 0x5f9   : > { %v2890_v26 = vpop.xlane.xlu0 %2889  ;;  %6417 = vmatpush3.bf16.msra.mxu1 %v12200_v13  ;;  %v2923_v53 = vmul.f32 %v7048_v3, %v10351_v62 }
 0x5fa   : > { %7055 = vrcp.f32 %v2890_v26  ;;  %v7050_v38 = vpop.eup %7049  ;;  %6418 = vmatprep.subr.bf16.mxu1 %v12201_v23  ;;  %v2935_v27 = vpack.c.bf16 %v2922_v0, %v2921_v40  ;;  %v12204_v26 = vld [vmem:[#allocation115_spill] sm:$0xff] }
 0x5fb   : > { %v2892_v14 = vpop.xlane.xlu1 %2891  ;;  %v2924_v16 = vmul.f32 %v7050_v38, %v10355_v44 }
 0x5fc   : > { %7057 = vrcp.f32 %v2892_v14  ;;  %6368 = vmatprep.mubr.bf16.mxu1 %v2935_v27 }
 0x5fd   : > { %6419 = vmatpush3.bf16.msra.mxu1 %v12201_v23  ;;  %v2936_v11 = vpack.c.bf16 %v2924_v16, %v2923_v53 }
 0x5fe   : > { %6420 = vmatprep.subr.bf16.mxu1 %v12202_v25 }
 0x5ff   : > { %6369 = vmatmul.mubr.bf16.gmra.mrb[68].mxu1 %v2936_v11 }
 0x600   : > { %v7052_v20 = vpop.eup %7051 }
 0x601   : > { %v2925_v4 = vmul.f32 %v7052_v20, %v10358_v10  ;;  %6421 = vmatpush3.bf16.msra.mxu1 %v12202_v25  ;;  %v12205_v10 = vld [vmem:[#allocation124_spill] sm:$0xff] }
 0x602   : > { %v7054_v19 = vpop.eup %7053  ;;  %6422 = vmatprep.subr.bf16.mxu1 %v12203_v42 }
 0x603   : > { %v2926_v8 = vmul.f32 %v7054_v19, %v10361_v34 }
 0x604   : > { %v7056_v21 = vpop.eup %7055 }
 0x605   : > { %v2937_v62 = vpack.c.bf16 %v2926_v8, %v2925_v4  ;;  %v2927_v55 = vmul.f32 %v7056_v21, %v10364_v63  ;;  %6423 = vmatpush3.bf16.msra.mxu1 %v12203_v42 }
 0x606   : > { %v7058_v44 = vpop.eup %7057  ;;  %6424 = vmatprep.subr.bf16.mxu1 %v12204_v26 }
 0x607   : > { %6372 = vmatprep.mubr.bf16.mxu1 %v2937_v62  ;;  %v2928_v13 = vmul.f32 %v7058_v44, %v10367_v45 }
 0x609   : > { %v2938_v2 = vpack.c.bf16 %v2928_v13, %v2927_v55  ;;  %6425 = vmatpush3.bf16.msra.mxu1 %v12204_v26 }
 0x60a   : > { %6426 = vmatprep.subr.bf16.mxu1 %v12205_v10 }
 0x60b   : > { %6373 = vmatmul.mubr.bf16.gmra.mrb[72].mxu1 %v2938_v2 }
 0x60d   : > { %6427 = vmatpush3.bf16.msra.mxu1 %v12205_v10 }
 0x60e   : > { %6444 = vmatprep.subr.bf16.mxu1 %v12192_v58 }
 0x61e   : > { %v2894_v34 = vpop.xlane.xlu0 %2893 }
 0x61f   : > { %7059 = vrcp.f32 %v2894_v34 }
 0x620   : > { %v2896_v3 = vpop.xlane.xlu1 %2895 }
 0x621   : > { %7061 = vrcp.f32 %v2896_v3 }
 0x622   : > { %v2898_v63 = vpop.xlane.xlu0 %2897 }
 0x623   : > { %7063 = vrcp.f32 %v2898_v63 }
 0x624   : > { %v2900_v45 = vpop.xlane.xlu1 %2899 }
 0x625   : > { %7065 = vrcp.f32 %v2900_v45 }
 0x629   : > { %v7060_v14 = vpop.eup %7059 }
 0x62a   : > { %v2929_v0 = vmul.f32 %v7060_v14, %v10374_v39 }
 0x62b   : > { %v7062_v40 = vpop.eup %7061 }
 0x62c   : > { %v2930_v38 = vmul.f32 %v7062_v40, %v10377_v30 }
 0x62d   : > { %v7064_v23 = vpop.eup %7063 }
 0x62e   : > { %v2939_v53 = vpack.c.bf16 %v2930_v38, %v2929_v0  ;;  %v2931_v11 = vmul.f32 %v7064_v23, %v10381_v36  ;;  %v12207_v23 = vld [vmem:[#allocation89_spill] sm:$0xff] }
 0x62f   : > { %v7066_v16 = vpop.eup %7065 }
 0x630   : > { %v3216_v27 = vpop.xlane.xlu0 %3215  ;;  %6376 = vmatprep.mubr.bf16.mxu1 %v2939_v53  ;;  %v2932_v25 = vmul.f32 %v7066_v16, %v10385_v57 }
 0x631   : > { %7067 = vrcp.f32 %v3216_v27 }
 0x632   : > { %v3218_v20 = vpop.xlane.xlu1 %3217  ;;  %v2940_v4 = vpack.c.bf16 %v2932_v25, %v2931_v11 }
 0x633   : > { %7069 = vrcp.f32 %v3218_v20 }
 0x634   : > { %v3220_v19 = vpop.xlane.xlu0 %3219  ;;  %6377 = vmatmul.mubr.bf16.gmra.mrb[76].mxu1 %v2940_v4 }
 0x635   : > { %7071 = vrcp.f32 %v3220_v19 }
 0x636   : > { %v3222_v8 = vpop.xlane.xlu1 %3221 }
 0x637   : > { %7073 = vrcp.f32 %v3222_v8  ;;  %v12208_v8 = vld [vmem:[#allocation101_spill] sm:$0xff] }
 0x63b   : > { %v7068_v39 = vpop.eup %7067 }
 0x63c   : > { %v3263_v21 = vmul.f32 %v7068_v39, %v10390_v46 }
 0x63d   : > { %v7070_v30 = vpop.eup %7069 }
 0x63e   : > { %v3264_v42 = vmul.f32 %v7070_v30, %v10393_v7  ;;  %v12206_v7 = vld [vmem:[#allocation83_spill] sm:$0xff] }
 0x63f   : > { %v7072_v62 = vpop.eup %7071  ;;  %v3224_v44 = vpop.xlane.xlu0 %3223 }
 0x640   : > { %v3279_v55 = vpack.c.bf16 %v3264_v42, %v3263_v21  ;;  %7075 = vrcp.f32 %v3224_v44  ;;  %v3265_v36 = vmul.f32 %v7072_v62, %v10398_v43  ;;  %v12209_v21 = vld [vmem:[#allocation145_spill] sm:$0xff] }
 0x641   : > { %v7074_v13 = vpop.eup %7073  ;;  %v3226_v26 = vpop.xlane.xlu1 %3225  ;;  %v12212_v42 = vld [vmem:[#allocation37_spill] sm:$0xff] }
 0x642   : > { %v3266_v57 = vmul.f32 %v7074_v13, %v10403_v59  ;;  %6428 = vmatprep.mubr.bf16.mxu1 %v3279_v55  ;;  %7077 = vrcp.f32 %v3226_v26 }
 0x643   : > { %v3228_v2 = vpop.xlane.xlu0 %3227 }
 0x644   : > { %v3280_v10 = vpack.c.bf16 %v3266_v57, %v3265_v36  ;;  %7079 = vrcp.f32 %v3228_v2 }
 0x645   : > { %v3230_v34 = vpop.xlane.xlu1 %3229 }
 0x646   : > { %6429 = vmatmul.mubr.bf16.vlgmr.msra.gmra.mrb[80].mxu1 %v3280_v10  ;;  %7081 = vrcp.f32 %v3230_v34 }
 0x647   : > { %6445 = vmatpush3.bf16.xpose.msra.mxu1 %v12192_v58  ;;  %v3232_v46 = vpop.xlane.xlu0 %3231 }
 0x648   : > { %6446 = vmatprep.subr.bf16.mxu1 %v12206_v7  ;;  %7083 = vrcp.f32 %v3232_v46 }
 0x649   : > { %v3234_v3 = vpop.xlane.xlu1 %3233 }
 0x64a   : > { %v7076_v63 = vpop.eup %7075  ;;  %7085 = vrcp.f32 %v3234_v3 }
 0x64b   : > { %v3236_v43 = vpop.xlane.xlu0 %3235  ;;  %v3267_v14 = vmul.f32 %v7076_v63, %v10410_v51 }
 0x64c   : > { %v7078_v59 = vpop.eup %7077  ;;  %7087 = vrcp.f32 %v3236_v43  ;;  %v12214_v43 = vpack.c.bf16 %v10086_v56, %v10084_v5  ;;  %v12220_v5 = vpack.c.bf16 %v10109_v31, %v10107_v15  ;;  %v12221_v56 = vpack.c.bf16 %v10125_v48, %v10117_v29  ;;  %v12225_v15 = vld [vmem:[#allocation75_spill] sm:$0xff]  ;;  %v12228_v29 = vld [vmem:[#allocation125_spill] sm:$0xff] }
 0x64d   : > { %v3238_v45 = vpop.xlane.xlu1 %3237  ;;  %v3268_v40 = vmul.f32 %v7078_v59, %v10413_v17  ;;  %v12215_v59 = vld [vmem:[#allocation63_spill] sm:$0xff] }
 0x64e   : > { %v7080_v0 = vpop.eup %7079  ;;  %7089 = vrcp.f32 %v3238_v45  ;;  %v12216_v45 = vld [vmem:[#allocation55_spill] sm:$0xff] }
 0x64f   : > { %6447 = vmatpush3.bf16.xpose.msra.mxu1 %v12206_v7  ;;  %v3281_v38 = vpack.c.bf16 %v3268_v40, %v3267_v14  ;;  %v3269_v53 = vmul.f32 %v7080_v0, %v10416_v52  ;;  %v12217_v14 = vpack.c.bf16 %v12215_v59, %v12216_v45 }
 0x650   : > { %6448 = vmatprep.subr.bf16.mxu1 %v12207_v23  ;;  %v7082_v27 = vpop.eup %7081 }
 0x651   : > { %6432 = vmatprep.mubr.bf16.mxu1 %v3281_v38  ;;  %v3270_v16 = vmul.f32 %v7082_v27, %v10419_v1 }
 0x652   : > { %v7084_v20 = vpop.eup %7083 }
 0x653   : > { %v3282_v11 = vpack.c.bf16 %v3270_v16, %v3269_v53  ;;  %v3271_v51 = vmul.f32 %v7084_v20, %v10422_v9  ;;  %v12210_v9 = vld [vmem:[#allocation148_spill] sm:$0xff] }
 0x654   : > { %v7086_v25 = vpop.eup %7085 }
 0x655   : > { %6433 = vmatmul.mubr.bf16.gmra.mrb[84].mxu1 %v3282_v11  ;;  %v3272_v17 = vmul.f32 %v7086_v25, %v10425_v41  ;;  %v12211_v41 = vld [vmem:[#allocation116_spill] sm:$0xff] }
 0x656   : > { %v7088_v19 = vpop.eup %7087 }
 0x657   : > { %6449 = vmatpush3.bf16.xpose.msra.mxu1 %v12207_v23  ;;  %v3283_v4 = vpack.c.bf16 %v3272_v17, %v3271_v51  ;;  %v3273_v52 = vmul.f32 %v7088_v19, %v10428_v60  ;;  %v12213_v60 = vld [vmem:[#allocation81_spill] sm:$0xff] }
 0x658   : > { %6450 = vmatprep.subr.bf16.mxu1 %v12208_v8  ;;  %v7090_v39 = vpop.eup %7089 }
 0x659   : > { %6436 = vmatprep.mubr.bf16.mxu1 %v3283_v4  ;;  %v3274_v1 = vmul.f32 %v7090_v39, %v10431_v35 }
 0x65b   : > { %v3284_v30 = vpack.c.bf16 %v3274_v1, %v3273_v52 }
 0x65d   : > { %6437 = vmatmul.mubr.bf16.gmra.mrb[88].mxu1 %v3284_v30 }
 0x65f   : > { %6451 = vmatpush3.bf16.xpose.msra.mxu1 %v12208_v8 }
 0x660   : > { %6452 = vmatprep.subr.bf16.mxu1 %v12209_v21 }
 0x667   : > { %6453 = vmatpush3.bf16.xpose.msra.mxu1 %v12209_v21 }
 0x668   : > { %6454 = vmatprep.subr.bf16.mxu1 %v12210_v9 }
 0x66f   : > { %6455 = vmatpush3.bf16.xpose.msra.mxu1 %v12210_v9 }
 0x670   : > { %6456 = vmatprep.subr.bf16.mxu1 %v12211_v41 }
 0x677   : > { %6457 = vmatpush3.bf16.xpose.msra.mxu1 %v12211_v41 }
 0x678   : > { %6458 = vmatprep.subr.bf16.mxu1 %v12212_v42 }
 0x67c   : > { %v3240_v35 = vpop.xlane.xlu0 %3239 }
 0x67d   : > { %7091 = vrcp.f32 %v3240_v35 }
 0x67f   : > { %6459 = vmatpush3.bf16.xpose.msra.mxu1 %v12212_v42 }
 0x680   : > { %6540 = vmatprep.subr.bf16.mxu1 %v12213_v60  ;;  %v3242_v62 = vpop.xlane.xlu1 %3241 }
 0x681   : > { %7093 = vrcp.f32 %v3242_v62  ;;  %v3244_v44 = vpop.xlane.xlu0 %3243 }
 0x682   : > { %7095 = vrcp.f32 %v3244_v44 }
 0x684   : > { %v3246_v55 = vpop.xlane.xlu1 %3245 }
 0x685   : > { %7097 = vrcp.f32 %v3246_v55 }
 0x687   : > { %v7092_v13 = vpop.eup %7091 }
 0x688   : > { %v3275_v57 = vmul.f32 %v7092_v13, %v10442_v50  ;;  %v12218_v50 = vpack.c.bf16 %v10102_v33, %v10100_v32  ;;  %v12222_v32 = vpack.c.bf16 %v10132_v12, %v10127_v18  ;;  %v12223_v33 = vpack.c.bf16 %v10141_v37, %v10134_v61 }
 0x68b   : > { %v7094_v36 = vpop.eup %7093 }
 0x68c   : > { %v3276_v26 = vmul.f32 %v7094_v36, %v10446_v49  ;;  %v7096_v2 = vpop.eup %7095  ;;  %v12219_v49 = vld [vmem:[#allocation87_spill] sm:$0xff] }
 0x68d   : > { %v3277_v46 = vmul.f32 %v7096_v2, %v10449_v54 }
 0x68e   : > { %v3285_v10 = vpack.c.bf16 %v3276_v26, %v3275_v57 }
 0x68f   : > { %v7098_v34 = vpop.eup %7097 }
 0x690   : > { %6440 = vmatprep.mubr.bf16.mxu1 %v3285_v10  ;;  %v3278_v3 = vmul.f32 %v7098_v34, %v10454_v24 }
 0x692   : > { %v3286_v63 = vpack.c.bf16 %v3278_v3, %v3277_v46 }
 0x694   : > { %6441 = vmatmul.mubr.bf16.gmra.mrb[92].mxu1 %v3286_v63 }
 0x695   : > { %6460 = vmatprep.mubr.bf16.mxu1 %v12214_v43 }
 0x69c   : > { %6461 = vmatmul.mubr.bf16.vlgmr.msra.gmra.mrb[96].mxu1 %v12217_v14 }
 0x69d   : > { %6541 = vmatpush3.bf16.msra.mxu1 %v12213_v60  ;;  %6464 = vmatprep.mubr.bf16.mxu1 %v12218_v50 }
 0x69e   : > { %6542 = vmatprep.subr.bf16.mxu1 %v12219_v49 }
 0x6a1   : > { %6543 = vmatpush3.bf16.msra.mxu1 %v12219_v49 }
 0x6a2   : > { %6544 = vmatprep.subr.bf16.mxu1 %v12141_v6 }
 0x6a4   : > { %6465 = vmatmul.mubr.bf16.gmra.mrb[100].mxu1 %v12220_v5 }
 0x6a5   : > { %6545 = vmatpush3.bf16.msra.mxu1 %v12141_v6  ;;  %6468 = vmatprep.mubr.bf16.mxu1 %v12221_v56  ;;  %v12224_v6 = vld [vmem:[#allocation117_spill] sm:$0xff] }
 0x6a6   : > { %6546 = vmatprep.subr.bf16.mxu1 %v12146_v28 }
 0x6a9   : > { %6547 = vmatpush3.bf16.msra.mxu1 %v12146_v28  ;;  %v12226_v28 = vld [vmem:[#allocation74_spill] sm:$0xff] }
 0x6aa   : > { %6548 = vmatprep.subr.bf16.mxu1 %v12150_v47  ;;  %v12227_v31 = vpack.c.bf16 %v12225_v15, %v12226_v28 }
 0x6ac   : > { %6469 = vmatmul.mubr.bf16.gmra.mrb[104].mxu1 %v12222_v32 }
 0x6ad   : > { %6549 = vmatpush3.bf16.msra.mxu1 %v12150_v47  ;;  %6472 = vmatprep.mubr.bf16.mxu1 %v12223_v33 }
 0x6ae   : > { %6550 = vmatprep.subr.bf16.mxu1 %v12151_v22 }
 0x6b1   : > { %6551 = vmatpush3.bf16.msra.mxu1 %v12151_v22 }
 0x6b2   : > { %6552 = vmatprep.subr.bf16.mxu1 %v12224_v6 }
 0x6b4   : > { %6473 = vmatmul.mubr.bf16.gmra.mrb[108].mxu1 %v12227_v31 }
 0x6b5   : > { %6553 = vmatpush3.bf16.msra.mxu1 %v12224_v6 }
 0x6b6   : > { %6554 = vmatprep.subr.bf16.mxu1 %v12228_v29 }
 0x6b9   : > { %6555 = vmatpush3.bf16.msra.mxu1 %v12228_v29 }
 0x6c3   : > { %v10553_v47 = vpop.f32.mrb[64].mxu1 }
 0x6c4   : > { %v10555_v48 = vpop.f32.mrb[65].mxu1 }
 0x6c5   : > { %v10557_v18 = vpop.f32.mrb[66].mxu1 }
 0x6c6   : > { %v10561_v12 = vpop.f32.mrb[67].mxu1 }
 0x6d2   : > { %v10565_v37 = vpop.f32.mrb[68].mxu1 }
 0x6d3   : > { %v10567_v54 = vpop.f32.mrb[69].mxu1 }
 0x6d4   : > { %v10569_v24 = vpop.f32.mrb[70].mxu1 }
 0x6d5   : > { %v10573_v0 = vpop.f32.mrb[71].mxu1 }
 0x6de   : > { %v10577_v27 = vpop.f32.mrb[72].mxu1 }
 0x6df   : > { %12229 = vst [vmem:[#allocation92_spill] sm:$0xff] %v10577_v27  ;;  %v10579_v53 = vpop.f32.mrb[73].mxu1 }
 0x6e0   : > { %v10581_v16 = vpop.f32.mrb[74].mxu1 }
 0x6e1   : > { %v10585_v11 = vpop.f32.mrb[75].mxu1 }
 0x707   : > { %v10589_v51 = vpop.f32.mrb[76].mxu1 }
 0x708   : > { %12230 = vst [vmem:[#allocation100_spill] sm:$0xff] %v10589_v51  ;;  %v10591_v17 = vpop.f32.mrb[77].mxu1 }
 0x709   : > { %12231 = vst [vmem:[#allocation141_spill] sm:$0xff] %v10591_v17  ;;  %v10593_v19 = vpop.f32.mrb[78].mxu1 }
 0x70a   : > { %12232 = vst [vmem:[#allocation108_spill] sm:$0xff] %v10593_v19  ;;  %v10597_v39 = vpop.f32.mrb[79].mxu1 }
 0x70b   : > { %12233 = vst [vmem:[#allocation110_spill] sm:$0xff] %v10597_v39 }
 0x719   : > { %v10601_v1 = vpop.f32.mrb[80].mxu1 }
 0x71a   : > { %v10603_v30 = vpop.f32.mrb[81].mxu1 }
 0x71b   : > { %v10605_v60 = vpop.f32.mrb[82].mxu1 }
 0x71c   : > { %v10609_v62 = vpop.f32.mrb[83].mxu1 }
 0x728   : > { %v10613_v55 = vpop.f32.mrb[84].mxu1 }
 0x729   : > { %v10615_v13 = vpop.f32.mrb[85].mxu1 }
 0x72a   : > { %v10617_v36 = vpop.f32.mrb[86].mxu1 }
 0x72b   : > { %v10621_v26 = vpop.f32.mrb[87].mxu1 }
 0x730   : > { %v10625_v10 = vpop.f32.mrb[88].mxu1 }
 0x731   : > { %v10627_v34 = vpop.f32.mrb[89].mxu1 }
 0x732   : > { %v10629_v46 = vpop.f32.mrb[90].mxu1 }
 0x733   : > { %v10633_v63 = vpop.f32.mrb[91].mxu1 }
 0x767   : > { %v10637_v59 = vpop.f32.mrb[92].mxu1 }
 0x768   : > { %12234 = vst [vmem:[#allocation112_spill] sm:$0xff] %v10637_v59  ;;  %v10639_v45 = vpop.f32.mrb[93].mxu1 }
 0x769   : > { %12235 = vst [vmem:[#allocation114_spill] sm:$0xff] %v10639_v45  ;;  %v10641_v14 = vpop.f32.mrb[94].mxu1 }
 0x76a   : > { %12236 = vst [vmem:[#allocation126_spill] sm:$0xff] %v10641_v14  ;;  %v10645_v49 = vpop.f32.mrb[95].mxu1 }
 0x76b   : > { %12237 = vst [vmem:[#allocation118_spill] sm:$0xff] %v10645_v49 }
 0x76f   : > { %v6462_v56 = vpop.f32.mrb[96].mxu1 }
 0x770   : > { %v3418_v32 = vpop.f32.mrb[97].mxu1 }
 0x771   : > { %3481 = vmax.xlane.f32.xlu0 %v3418_v32  ;;  %v6463_v33 = vpop.f32.mrb[98].mxu1 }
 0x772   : > { %v3421_v6 = vpop.f32.mrb[99].mxu1 }
 0x773   : > { %3483 = vmax.xlane.f32.xlu1 %v3421_v6 }
 0x775   : > { %3485 = vmax.xlane.f32.xlu0 %v6462_v56 }
 0x777   : > { %3487 = vmax.xlane.f32.xlu1 %v6463_v33  ;;  %v6466_v15 = vpop.f32.mrb[100].mxu1 }
 0x778   : > { %v3434_v28 = vpop.f32.mrb[101].mxu1 }
 0x779   : > { %3489 = vmax.xlane.f32.xlu0 %v3434_v28  ;;  %v6467_v31 = vpop.f32.mrb[102].mxu1 }
 0x77a   : > { %v3437_v29 = vpop.f32.mrb[103].mxu1 }
 0x77b   : > { %3491 = vmax.xlane.f32.xlu1 %v3437_v29 }
 0x77d   : > { %3493 = vmax.xlane.f32.xlu0 %v6466_v15 }
 0x77f   : > { %3495 = vmax.xlane.f32.xlu1 %v6467_v31  ;;  %v10649_v4 = vpop.f32.mrb[104].mxu1 }
 0x780   : > { %v3450_v50 = vpop.f32.mrb[105].mxu1 }
 0x781   : > { %3497 = vmax.xlane.f32.xlu0 %v3450_v50  ;;  %v10651_v52 = vpop.f32.mrb[106].mxu1 }
 0x782   : > { %v3453_v5 = vpop.f32.mrb[107].mxu1 }
 0x783   : > { %3499 = vmax.xlane.f32.xlu1 %v3453_v5 }
 0x785   : > { %3501 = vmax.xlane.f32.xlu0 %v10649_v4 }
 0x787   : > { %3503 = vmax.xlane.f32.xlu1 %v10651_v52  ;;  %v10655_v20 = vpop.f32.mrb[108].mxu1 }
 0x788   : > { %v10657_v3 = vpop.f32.mrb[109].mxu1 }
 0x789   : > { %3505 = vmax.xlane.f32.xlu0 %v10657_v3  ;;  %v10660_v25 = vpop.f32.mrb[110].mxu1 }
 0x78a   : > { %v10662_v43 = vpop.f32.mrb[111].mxu1 }
 0x78b   : > { %3507 = vmax.xlane.f32.xlu1 %v10662_v43 }
 0x78d   : > { %3509 = vmax.xlane.f32.xlu0 %v10655_v20 }
 0x78f   : > { %3511 = vmax.xlane.f32.xlu1 %v10660_v25 }
 0x7fe   : > { %v3482_v40 = vpop.xlane.xlu0 %3481 }
 0x7ff   : > { %v3513_v57 = vsub.f32 %v3418_v32, %v3482_v40 }
 0x800   : > { %v3484_v38 = vpop.xlane.xlu1 %3483 }
 0x801   : > { %v3529_v2 = vmul.f32 1.442695, %v3513_v57  ;;  %v3514_v22 = vsub.f32 %v3421_v6, %v3484_v38 }
 0x802   : > { %v3486_v35 = vpop.xlane.xlu0 %3485 }
 0x803   : > { %7099 = vpow2.f32 %v3529_v2  ;;  %v3531_v61 = vmul.f32 1.442695, %v3514_v22  ;;  %v3515_v44 = vsub.f32 %v6462_v56, %v3486_v35 }
 0x804   : > { %v3488_v51 = vpop.xlane.xlu1 %3487 }
 0x805   : > { %7101 = vpow2.f32 %v3531_v61  ;;  %v3533_v19 = vmul.f32 1.442695, %v3515_v44  ;;  %v3516_v59 = vsub.f32 %v6463_v33, %v3488_v51 }
 0x806   : > { %v3490_v14 = vpop.xlane.xlu0 %3489 }
 0x807   : > { %7103 = vpow2.f32 %v3533_v19  ;;  %v3535_v17 = vmul.f32 1.442695, %v3516_v59  ;;  %v3517_v39 = vsub.f32 %v3434_v28, %v3490_v14 }
 0x808   : > { %v3492_v45 = vpop.xlane.xlu1 %3491 }
 0x809   : > { %7105 = vpow2.f32 %v3535_v17  ;;  %v3537_v49 = vmul.f32 1.442695, %v3517_v39  ;;  %v3518_v27 = vsub.f32 %v3437_v29, %v3492_v45 }
 0x80a   : > { %v3494_v40 = vpop.xlane.xlu0 %3493 }
 0x80b   : > { %7107 = vpow2.f32 %v3537_v49  ;;  %v3539_v57 = vmul.f32 1.442695, %v3518_v27  ;;  %v3519_v38 = vsub.f32 %v6466_v15, %v3494_v40 }
 0x80c   : > { %v3496_v32 = vpop.xlane.xlu1 %3495 }
 0x80d   : > { %v10667_v2 = vpop.eup %7099  ;;  %7109 = vpow2.f32 %v3539_v57  ;;  %v3541_v22 = vmul.f32 1.442695, %v3519_v38  ;;  %v3520_v61 = vsub.f32 %v6467_v31, %v3496_v32 }
 0x80e   : > { %v3498_v35 = vpop.xlane.xlu0 %3497  ;;  %3561 = vadd.xlane.f32.xlu0 %v10667_v2 }
 0x80f   : > { %v10670_v51 = vpop.eup %7101  ;;  %7111 = vpow2.f32 %v3541_v22  ;;  %v3543_v19 = vmul.f32 1.442695, %v3520_v61  ;;  %v3521_v17 = vsub.f32 %v3450_v50, %v3498_v35 }
 0x810   : > { %v3500_v39 = vpop.xlane.xlu1 %3499  ;;  %3563 = vadd.xlane.f32.xlu1 %v10670_v51 }
 0x811   : > { %v10673_v44 = vpop.eup %7103  ;;  %7113 = vpow2.f32 %v3543_v19  ;;  %v3545_v27 = vmul.f32 1.442695, %v3521_v17  ;;  %v3522_v59 = vsub.f32 %v3453_v5, %v3500_v39 }
 0x812   : > { %v3502_v45 = vpop.xlane.xlu0 %3501  ;;  %3565 = vadd.xlane.f32.xlu0 %v10673_v44 }
 0x813   : > { %v10676_v14 = vpop.eup %7105  ;;  %7115 = vpow2.f32 %v3545_v27  ;;  %v3547_v49 = vmul.f32 1.442695, %v3522_v59  ;;  %v3523_v56 = vsub.f32 %v10649_v4, %v3502_v45 }
 0x814   : > { %v3504_v33 = vpop.xlane.xlu1 %3503  ;;  %3567 = vadd.xlane.f32.xlu1 %v10676_v14 }
 0x815   : > { %v10680_v50 = vpop.eup %7107  ;;  %7117 = vpow2.f32 %v3547_v49  ;;  %v3549_v6 = vmul.f32 1.442695, %v3523_v56  ;;  %v3524_v15 = vsub.f32 %v10651_v52, %v3504_v33 }
 0x816   : > { %3569 = vadd.xlane.f32.xlu0 %v10680_v50  ;;  %v3506_v5 = vpop.xlane.xlu0 %3505 }
 0x817   : > { %v10684_v28 = vpop.eup %7109  ;;  %7119 = vpow2.f32 %v3549_v6  ;;  %v3551_v31 = vmul.f32 1.442695, %v3524_v15  ;;  %v3525_v29 = vsub.f32 %v10657_v3, %v3506_v5 }
 0x818   : > { %3571 = vadd.xlane.f32.xlu1 %v10684_v28  ;;  %v3508_v4 = vpop.xlane.xlu1 %3507 }
 0x819   : > { %v10688_v40 = vpop.eup %7111  ;;  %7121 = vpow2.f32 %v3551_v31  ;;  %v3553_v57 = vmul.f32 1.442695, %v3525_v29  ;;  %v3526_v38 = vsub.f32 %v10662_v43, %v3508_v4 }
 0x81a   : > { %3573 = vadd.xlane.f32.xlu0 %v10688_v40  ;;  %v3510_v52 = vpop.xlane.xlu0 %3509 }
 0x81b   : > { %v10692_v32 = vpop.eup %7113  ;;  %7123 = vpow2.f32 %v3553_v57  ;;  %v3555_v22 = vmul.f32 1.442695, %v3526_v38  ;;  %v3527_v61 = vsub.f32 %v10655_v20, %v3510_v52 }
 0x81c   : > { %3575 = vadd.xlane.f32.xlu1 %v10692_v32  ;;  %v3512_v3 = vpop.xlane.xlu1 %3511 }
 0x81d   : > { %v10696_v35 = vpop.eup %7115  ;;  %7125 = vpow2.f32 %v3555_v22  ;;  %v3557_v19 = vmul.f32 1.442695, %v3527_v61  ;;  %v3528_v17 = vsub.f32 %v10660_v25, %v3512_v3 }
 0x81e   : > { %3577 = vadd.xlane.f32.xlu0 %v10696_v35 }
 0x81f   : > { %v10700_v43 = vpop.eup %7117  ;;  %7127 = vpow2.f32 %v3557_v19  ;;  %v3559_v39 = vmul.f32 1.442695, %v3528_v17 }
 0x820   : > { %3579 = vadd.xlane.f32.xlu1 %v10700_v43 }
 0x821   : > { %v10703_v27 = vpop.eup %7119  ;;  %7129 = vpow2.f32 %v3559_v39 }
 0x822   : > { %3581 = vadd.xlane.f32.xlu0 %v10703_v27 }
 0x823   : > { %v10706_v20 = vpop.eup %7121 }
 0x824   : > { %3583 = vadd.xlane.f32.xlu1 %v10706_v20 }
 0x825   : > { %v10709_v59 = vpop.eup %7123 }
 0x826   : > { %3585 = vadd.xlane.f32.xlu0 %v10709_v59 }
 0x827   : > { %v10712_v25 = vpop.eup %7125 }
 0x828   : > { %3587 = vadd.xlane.f32.xlu1 %v10712_v25 }
 0x829   : > { %v10715_v45 = vpop.eup %7127 }
 0x82a   : > { %3589 = vadd.xlane.f32.xlu0 %v10715_v45 }
 0x82b   : > { %v10718_v49 = vpop.eup %7129 }
 0x82c   : > { %3591 = vadd.xlane.f32.xlu1 %v10718_v49 }
 0x89b   : > { %v3562_v56 = vpop.xlane.xlu0 %3561 }
 0x89c   : > { %7131 = vrcp.f32 %v3562_v56 }
 0x89d   : > { %v3564_v33 = vpop.xlane.xlu1 %3563 }
 0x89e   : > { %7133 = vrcp.f32 %v3564_v33 }
 0x89f   : > { %v3566_v6 = vpop.xlane.xlu0 %3565 }
 0x8a0   : > { %7135 = vrcp.f32 %v3566_v6 }
 0x8a1   : > { %v3568_v15 = vpop.xlane.xlu1 %3567 }
 0x8a2   : > { %7137 = vrcp.f32 %v3568_v15 }
 0x8a3   : > { %v3570_v5 = vpop.xlane.xlu0 %3569 }
 0x8a4   : > { %7139 = vrcp.f32 %v3570_v5 }
 0x8a5   : > { %v3572_v31 = vpop.xlane.xlu1 %3571 }
 0x8a6   : > { %v7132_v29 = vpop.eup %7131  ;;  %7141 = vrcp.f32 %v3572_v31 }
 0x8a7   : > { %v3574_v4 = vpop.xlane.xlu0 %3573  ;;  %v3609_v52 = vmul.f32 %v7132_v29, %v10667_v2 }
 0x8a8   : > { %v7134_v57 = vpop.eup %7133  ;;  %7143 = vrcp.f32 %v3574_v4 }
 0x8a9   : > { %v3576_v38 = vpop.xlane.xlu1 %3575  ;;  %v3610_v22 = vmul.f32 %v7134_v57, %v10670_v51 }
 0x8aa   : > { %v7136_v61 = vpop.eup %7135  ;;  %7145 = vrcp.f32 %v3576_v38 }
 0x8ab   : > { %v3578_v3 = vpop.xlane.xlu0 %3577  ;;  %v3625_v19 = vpack.c.bf16 %v3610_v22, %v3609_v52  ;;  %v3611_v39 = vmul.f32 %v7136_v61, %v10673_v44 }
 0x8ac   : > { %v7138_v17 = vpop.eup %7137  ;;  %7147 = vrcp.f32 %v3578_v3 }
 0x8ad   : > { %v3612_v56 = vmul.f32 %v7138_v17, %v10676_v14  ;;  %6492 = vmatprep.mubr.bf16.mxu0 %v3625_v19  ;;  %v3580_v33 = vpop.xlane.xlu1 %3579 }
 0x8ae   : > { %v7140_v6 = vpop.eup %7139  ;;  %7149 = vrcp.f32 %v3580_v33 }
 0x8af   : > { %v3582_v15 = vpop.xlane.xlu0 %3581  ;;  %v3626_v5 = vpack.c.bf16 %v3612_v56, %v3611_v39  ;;  %v3613_v51 = vmul.f32 %v7140_v6, %v10680_v50 }
 0x8b0   : > { %v7142_v31 = vpop.eup %7141  ;;  %7151 = vrcp.f32 %v3582_v15 }
 0x8b1   : > { %6493 = vmatmul.mubr.bf16.vlgmr.msra.gmra.mrb[96].mxu0 %v3626_v5  ;;  %v3584_v2 = vpop.xlane.xlu1 %3583  ;;  %v3614_v29 = vmul.f32 %v7142_v31, %v10684_v28 }
 0x8b2   : > { %v7144_v4 = vpop.eup %7143  ;;  %6509 = vmatpush3.bf16.xpose.msra.mxu0 %v12192_v58  ;;  %7153 = vrcp.f32 %v3584_v2 }
 0x8b3   : > { %6510 = vmatprep.subr.bf16.mxu0 %v12206_v7  ;;  %v3586_v44 = vpop.xlane.xlu0 %3585  ;;  %v3627_v14 = vpack.c.bf16 %v3614_v29, %v3613_v51  ;;  %v3615_v52 = vmul.f32 %v7144_v4, %v10688_v40  ;;  %v12238_v29 = vld [vmem:[#allocation76_spill] sm:$0xff] }
 0x8b4   : > { %v7146_v57 = vpop.eup %7145  ;;  %7155 = vrcp.f32 %v3586_v44 }
 0x8b5   : > { %6496 = vmatprep.mubr.bf16.mxu0 %v3627_v14  ;;  %v3588_v38 = vpop.xlane.xlu1 %3587  ;;  %v3616_v22 = vmul.f32 %v7146_v57, %v10692_v32  ;;  %v12248_v14 = vld [vmem:[#allocation123_spill] sm:$0xff] }
 0x8b6   : > { %v7148_v61 = vpop.eup %7147  ;;  %7157 = vrcp.f32 %v3588_v38  ;;  %v12251_v38 = vld [vmem:[#allocation120_spill] sm:$0xff] }
 0x8b7   : > { %v3590_v50 = vpop.xlane.xlu0 %3589  ;;  %v3628_v28 = vpack.c.bf16 %v3616_v22, %v3615_v52  ;;  %v3617_v19 = vmul.f32 %v7148_v61, %v10696_v35  ;;  %v12254_v22 = vld [vmem:[#allocation113_spill] sm:$0xff] }
 0x8b8   : > { %v7150_v3 = vpop.eup %7149  ;;  %7159 = vrcp.f32 %v3590_v50  ;;  %v12257_v50 = vld [vmem:[#allocation82_spill] sm:$0xff] }
 0x8b9   : > { %6497 = vmatmul.mubr.bf16.gmra.mrb[100].mxu0 %v3628_v28  ;;  %v3592_v58 = vpop.xlane.xlu1 %3591  ;;  %v3618_v17 = vmul.f32 %v7150_v3, %v10700_v43  ;;  %v12259_v3 = vld [vmem:[#allocation88_spill] sm:$0xff] }
 0x8ba   : > { %v7152_v39 = vpop.eup %7151  ;;  %6511 = vmatpush3.bf16.xpose.msra.mxu0 %v12206_v7  ;;  %7161 = vrcp.f32 %v3592_v58  ;;  %v12260_v58 = vld [vmem:[#allocation86_spill] sm:$0xff] }
 0x8bb   : > { %6512 = vmatprep.subr.bf16.mxu0 %v12207_v23  ;;  %v3629_v40 = vpack.c.bf16 %v3618_v17, %v3617_v19  ;;  %v3619_v56 = vmul.f32 %v7152_v39, %v10703_v27  ;;  %v12261_v19 = vpack.c.bf16 %v12259_v3, %v12260_v58 }
 0x8bc   : > { %v7154_v32 = vpop.eup %7153 }
 0x8bd   : > { %6500 = vmatprep.mubr.bf16.mxu0 %v3629_v40  ;;  %v3620_v33 = vmul.f32 %v7154_v32, %v10706_v20 }
 0x8be   : > { %v7156_v6 = vpop.eup %7155 }
 0x8bf   : > { %v3630_v15 = vpack.c.bf16 %v3620_v33, %v3619_v56  ;;  %v3621_v35 = vmul.f32 %v7156_v6, %v10709_v59  ;;  %v12239_v59 = vld [vmem:[#allocation73_spill] sm:$0xff] }
 0x8c0   : > { %v7158_v5 = vpop.eup %7157  ;;  %v12240_v4 = vpack.c.bf16 %v12238_v29, %v12239_v59 }
 0x8c1   : > { %6501 = vmatmul.mubr.bf16.gmra.mrb[104].mxu0 %v3630_v15  ;;  %v3622_v43 = vmul.f32 %v7158_v5, %v10712_v25 }
 0x8c2   : > { %v7160_v31 = vpop.eup %7159  ;;  %6513 = vmatpush3.bf16.xpose.msra.mxu0 %v12207_v23  ;;  %v12241_v23 = vld [vmem:[#allocation59_spill] sm:$0xff] }
 0x8c3   : > { %6514 = vmatprep.subr.bf16.mxu0 %v12208_v8  ;;  %v3631_v7 = vpack.c.bf16 %v3622_v43, %v3621_v35  ;;  %v3623_v27 = vmul.f32 %v7160_v31, %v10715_v45  ;;  %v12244_v45 = vld [vmem:[#allocation121_spill] sm:$0xff] }
 0x8c4   : > { %v7162_v2 = vpop.eup %7161 }
 0x8c5   : > { %6504 = vmatprep.mubr.bf16.mxu0 %v3631_v7  ;;  %v3624_v20 = vmul.f32 %v7162_v2, %v10718_v49  ;;  %v12245_v49 = vld [vmem:[#allocation70_spill] sm:$0xff] }
 0x8c6   : > { %v12246_v44 = vpack.c.bf16 %v12244_v45, %v12245_v49 }
 0x8c7   : > { %v3632_v51 = vpack.c.bf16 %v3624_v20, %v3623_v27 }
 0x8c9   : > { %6505 = vmatmul.mubr.bf16.gmra.mrb[108].mxu0 %v3632_v51 }
 0x8ca   : > { %6515 = vmatpush3.bf16.xpose.msra.mxu0 %v12208_v8  ;;  %6524 = vmatprep.mubr.bf16.mxu0 %v12240_v4  ;;  %v12242_v8 = vld [vmem:[#allocation51_spill] sm:$0xff] }
 0x8cb   : > { %6516 = vmatprep.subr.bf16.mxu0 %v12209_v21  ;;  %v12243_v25 = vpack.c.bf16 %v12241_v23, %v12242_v8 }
 0x8d2   : > { %6517 = vmatpush3.bf16.xpose.msra.mxu0 %v12209_v21  ;;  %v12247_v21 = vld [vmem:[#allocation132_spill] sm:$0xff] }
 0x8d3   : > { %6518 = vmatprep.subr.bf16.mxu0 %v12210_v9  ;;  %v12249_v57 = vpack.c.bf16 %v12247_v21, %v12248_v14 }
 0x8da   : > { %6519 = vmatpush3.bf16.xpose.msra.mxu0 %v12210_v9  ;;  %v12250_v9 = vld [vmem:[#allocation133_spill] sm:$0xff] }
 0x8db   : > { %6520 = vmatprep.subr.bf16.mxu0 %v12211_v41  ;;  %v12252_v52 = vpack.c.bf16 %v12250_v9, %v12251_v38 }
 0x8e2   : > { %6521 = vmatpush3.bf16.xpose.msra.mxu0 %v12211_v41  ;;  %v12253_v41 = vld [vmem:[#allocation79_spill] sm:$0xff] }
 0x8e3   : > { %6522 = vmatprep.subr.bf16.mxu0 %v12212_v42  ;;  %v12255_v61 = vpack.c.bf16 %v12253_v41, %v12254_v22 }
 0x8ea   : > { %6523 = vmatpush3.bf16.xpose.msra.mxu0 %v12212_v42  ;;  %v12256_v42 = vld [vmem:[#allocation84_spill] sm:$0xff] }
 0x8eb   : > { %v12258_v28 = vpack.c.bf16 %v12256_v42, %v12257_v50 }
 0x8f1   : > { %6525 = vmatmul.mubr.bf16.vlgmr.msra.gmra.mrb[112].mxu0 %v12243_v25 }
 0x8f2   : > { %6528 = vmatprep.mubr.bf16.mxu0 %v12246_v44 }
 0x8f9   : > { %6529 = vmatmul.mubr.bf16.gmra.mrb[116].mxu0 %v12249_v57 }
 0x8fa   : > { %6532 = vmatprep.mubr.bf16.mxu0 %v12252_v52 }
 0x901   : > { %6533 = vmatmul.mubr.bf16.gmra.mrb[120].mxu0 %v12255_v61 }
 0x902   : > { %6536 = vmatprep.mubr.bf16.mxu0 %v12258_v28 }
 0x909   : > { %6537 = vmatmul.mubr.bf16.gmra.mrb[124].mxu0 %v12261_v19 }
 0x984   : > { %v10776_v17 = vpop.f32.mrb[96].mxu0 }
 0x985   : > { %v10778_v39 = vpop.f32.mrb[97].mxu0 }
 0x986   : > { %v10780_v40 = vpop.f32.mrb[98].mxu0 }
 0x987   : > { %v10784_v56 = vpop.f32.mrb[99].mxu0 }
 0x98c   : > { %v10788_v6 = vpop.f32.mrb[100].mxu0 }
 0x98d   : > { %v10790_v15 = vpop.f32.mrb[101].mxu0 }
 0x98e   : > { %v10792_v5 = vpop.f32.mrb[102].mxu0 }
 0x98f   : > { %v10796_v43 = vpop.f32.mrb[103].mxu0 }
 0x994   : > { %v10800_v7 = vpop.f32.mrb[104].mxu0 }
 0x995   : > { %12262 = vst [vmem:[#allocation134_spill] sm:$0xff] %v10800_v7  ;;  %v10802_v2 = vpop.f32.mrb[105].mxu0 }
 0x996   : > { %12263 = vst [vmem:[#allocation130_spill] sm:$0xff] %v10802_v2  ;;  %v10804_v27 = vpop.f32.mrb[106].mxu0 }
 0x997   : > { %12264 = vst [vmem:[#allocation128_spill] sm:$0xff] %v10804_v27  ;;  %v10808_v51 = vpop.f32.mrb[107].mxu0 }
 0x998   : > { %12265 = vst [vmem:[#allocation127_spill] sm:$0xff] %v10808_v51 }
 0x99c   : > { %v10812_v59 = vpop.f32.mrb[108].mxu0 }
 0x99d   : > { %12266 = vst [vmem:[#allocation122_spill] sm:$0xff] %v10812_v59  ;;  %v10814_v4 = vpop.f32.mrb[109].mxu0 }
 0x99e   : > { %12267 = vst [vmem:[#allocation136_spill] sm:$0xff] %v10814_v4  ;;  %v10816_v23 = vpop.f32.mrb[110].mxu0 }
 0x99f   : > { %12268 = vst [vmem:[#allocation138_spill] sm:$0xff] %v10816_v23  ;;  %v10820_v25 = vpop.f32.mrb[111].mxu0 }
 0x9a0   : > { %12269 = vst [vmem:[#allocation135_spill] sm:$0xff] %v10820_v25 }
 0x9c4   : > { %v6526_v49 = vpop.f32.mrb[112].mxu0 }
 0x9c5   : > { %v3764_v44 = vpop.f32.mrb[113].mxu0 }
 0x9c6   : > { %3827 = vmax.xlane.f32.xlu0 %v3764_v44  ;;  %v6527_v21 = vpop.f32.mrb[114].mxu0 }
 0x9c7   : > { %v3767_v14 = vpop.f32.mrb[115].mxu0 }
 0x9c8   : > { %3829 = vmax.xlane.f32.xlu1 %v3767_v14 }
 0x9ca   : > { %3831 = vmax.xlane.f32.xlu0 %v6526_v49 }
 0x9cc   : > { %3833 = vmax.xlane.f32.xlu1 %v6527_v21  ;;  %v6530_v57 = vpop.f32.mrb[116].mxu0 }
 0x9cd   : > { %v3780_v9 = vpop.f32.mrb[117].mxu0 }
 0x9ce   : > { %3835 = vmax.xlane.f32.xlu0 %v3780_v9  ;;  %v6531_v38 = vpop.f32.mrb[118].mxu0 }
 0x9cf   : > { %v3783_v52 = vpop.f32.mrb[119].mxu0 }
 0x9d0   : > { %3837 = vmax.xlane.f32.xlu1 %v3783_v52 }
 0x9d2   : > { %3839 = vmax.xlane.f32.xlu0 %v6530_v57 }
 0x9d4   : > { %3841 = vmax.xlane.f32.xlu1 %v6531_v38  ;;  %v10824_v41 = vpop.f32.mrb[120].mxu0 }
 0x9d5   : > { %v3796_v22 = vpop.f32.mrb[121].mxu0 }
 0x9d6   : > { %3843 = vmax.xlane.f32.xlu0 %v3796_v22  ;;  %v10826_v61 = vpop.f32.mrb[122].mxu0 }
 0x9d7   : > { %v3799_v42 = vpop.f32.mrb[123].mxu0 }
 0x9d8   : > { %3845 = vmax.xlane.f32.xlu1 %v3799_v42 }
 0x9da   : > { %3847 = vmax.xlane.f32.xlu0 %v10824_v41 }
 0x9dc   : > { %3849 = vmax.xlane.f32.xlu1 %v10826_v61  ;;  %v10830_v50 = vpop.f32.mrb[124].mxu0 }
 0x9dd   : > { %v10832_v28 = vpop.f32.mrb[125].mxu0 }
 0x9de   : > { %3851 = vmax.xlane.f32.xlu0 %v10832_v28  ;;  %v10835_v3 = vpop.f32.mrb[126].mxu0 }
 0x9df   : > { %v10837_v58 = vpop.f32.mrb[127].mxu0 }
 0x9e0   : > { %3853 = vmax.xlane.f32.xlu1 %v10837_v58 }
 0x9e2   : > { %3855 = vmax.xlane.f32.xlu0 %v10830_v50 }
 0x9e4   : > { %3857 = vmax.xlane.f32.xlu1 %v10835_v3 }
 0xa53   : > { %v3828_v19 = vpop.xlane.xlu0 %3827 }
 0xa54   : > { %v3859_v8 = vsub.f32 %v3764_v44, %v3828_v19 }
 0xa55   : > { %v3830_v45 = vpop.xlane.xlu1 %3829 }
 0xa56   : > { %v3875_v20 = vmul.f32 1.442695, %v3859_v8  ;;  %v3860_v29 = vsub.f32 %v3767_v14, %v3830_v45 }
 0xa57   : > { %v3832_v35 = vpop.xlane.xlu0 %3831 }
 0xa58   : > { %7163 = vpow2.f32 %v3875_v20  ;;  %v3877_v31 = vmul.f32 1.442695, %v3860_v29  ;;  %v3861_v32 = vsub.f32 %v6526_v49, %v3832_v35 }
 0xa59   : > { %v3834_v33 = vpop.xlane.xlu1 %3833 }
 0xa5a   : > { %7165 = vpow2.f32 %v3877_v31  ;;  %v3879_v59 = vmul.f32 1.442695, %v3861_v32  ;;  %v3862_v23 = vsub.f32 %v6527_v21, %v3834_v33 }
 0xa5b   : > { %v3836_v4 = vpop.xlane.xlu0 %3835 }
 0xa5c   : > { %7167 = vpow2.f32 %v3879_v59  ;;  %v3881_v25 = vmul.f32 1.442695, %v3862_v23  ;;  %v3863_v7 = vsub.f32 %v3780_v9, %v3836_v4 }
 0xa5d   : > { %v3838_v27 = vpop.xlane.xlu1 %3837 }
 0xa5e   : > { %7169 = vpow2.f32 %v3881_v25  ;;  %v3883_v2 = vmul.f32 1.442695, %v3863_v7  ;;  %v3864_v51 = vsub.f32 %v3783_v52, %v3838_v27 }
 0xa5f   : > { %v3840_v44 = vpop.xlane.xlu0 %3839 }
 0xa60   : > { %7171 = vpow2.f32 %v3883_v2  ;;  %v3885_v8 = vmul.f32 1.442695, %v3864_v51  ;;  %v3865_v45 = vsub.f32 %v6530_v57, %v3840_v44 }
 0xa61   : > { %v3842_v14 = vpop.xlane.xlu1 %3841 }
 0xa62   : > { %v10842_v20 = vpop.eup %7163  ;;  %7173 = vpow2.f32 %v3885_v8  ;;  %v3887_v35 = vmul.f32 1.442695, %v3865_v45  ;;  %v3866_v31 = vsub.f32 %v6531_v38, %v3842_v14 }
 0xa63   : > { %v3844_v32 = vpop.xlane.xlu0 %3843  ;;  %3907 = vadd.xlane.f32.xlu0 %v10842_v20 }
 0xa64   : > { %v10845_v33 = vpop.eup %7165  ;;  %7175 = vpow2.f32 %v3887_v35  ;;  %v3889_v29 = vmul.f32 1.442695, %v3866_v31  ;;  %v3867_v59 = vsub.f32 %v3796_v22, %v3844_v32 }
 0xa65   : > { %v3846_v7 = vpop.xlane.xlu1 %3845  ;;  %3909 = vadd.xlane.f32.xlu1 %v10845_v33 }
 0xa66   : > { %v10848_v2 = vpop.eup %7167  ;;  %7177 = vpow2.f32 %v3889_v29  ;;  %v3891_v27 = vmul.f32 1.442695, %v3867_v59  ;;  %v3868_v51 = vsub.f32 %v3799_v42, %v3846_v7 }
 0xa67   : > { %v3848_v4 = vpop.xlane.xlu0 %3847  ;;  %3911 = vadd.xlane.f32.xlu0 %v10848_v2 }
 0xa68   : > { %v10851_v23 = vpop.eup %7169  ;;  %7179 = vpow2.f32 %v3891_v27  ;;  %v3893_v25 = vmul.f32 1.442695, %v3868_v51  ;;  %v3869_v49 = vsub.f32 %v10824_v41, %v3848_v4 }
 0xa69   : > { %v3850_v21 = vpop.xlane.xlu1 %3849  ;;  %3913 = vadd.xlane.f32.xlu1 %v10851_v23 }
 0xa6a   : > { %v10855_v57 = vpop.eup %7171  ;;  %7181 = vpow2.f32 %v3893_v25  ;;  %v3895_v9 = vmul.f32 1.442695, %v3869_v49  ;;  %v3870_v38 = vsub.f32 %v10826_v61, %v3850_v21  ;;  %v6843_v49 = vld [vmem:[#allocation14 + $0x40] sm:$0xff]  }
 0xa6b   : > { %3915 = vadd.xlane.f32.xlu0 %v10855_v57  ;;  %v3852_v52 = vpop.xlane.xlu0 %3851  ;;  %6124 = vmatprep.subr.bf16.mxu1 %v6843_v49  ;;  %v6859_v21 = vld [vmem:[#allocation14 + $0xc0] sm:$0xff]  }
 0xa6c   : > { %v10859_v22 = vpop.eup %7173  ;;  %7183 = vpow2.f32 %v3895_v9  ;;  %v3897_v42 = vmul.f32 1.442695, %v3870_v38  ;;  %v3871_v19 = vsub.f32 %v10832_v28, %v3852_v52  ;;  %v6860_v9 = vld [vmem:[#allocation14 + $0x80] sm:$0xff]   ;;  %v6861_v38 = vld [vmem:[#allocation14 + $0xc8] sm:$0xff]   ;;  %6188 = vmatprep.subr.bf16.mxu0 %v6859_v21 }
 0xa6d   : > { %3917 = vadd.xlane.f32.xlu1 %v10859_v22  ;;  %v3854_v41 = vpop.xlane.xlu1 %3853  ;;  %6189 = vmatpush3.bf16.msra.mxu0 %v6860_v9  ;;  %v6862_v52 = vld [vmem:[#allocation14 + $0x88] sm:$0xff]  }
 0xa6e   : > { %v10863_v44 = vpop.eup %7175  ;;  %7185 = vpow2.f32 %v3897_v42  ;;  %v3899_v8 = vmul.f32 1.442695, %v3871_v19  ;;  %v3872_v45 = vsub.f32 %v10837_v58, %v3854_v41  ;;  %6190 = vmatprep.subr.bf16.mxu0 %v6861_v38  ;;  %v6863_v42 = vld [vmem:[#allocation14 + $0xd0] sm:$0xff]   ;;  %v6865_v41 = vld [vmem:[#allocation14 + $0xd8] sm:$0xff]  }
 0xa6f   : > { %3919 = vadd.xlane.f32.xlu0 %v10863_v44  ;;  %v3856_v61 = vpop.xlane.xlu0 %3855  ;;  %v6864_v19 = vld [vmem:[#allocation14 + $0x90] sm:$0xff]  }
 0xa70   : > { %v10867_v14 = vpop.eup %7177  ;;  %7187 = vpow2.f32 %v3899_v8  ;;  %v3901_v35 = vmul.f32 1.442695, %v3872_v45  ;;  %v3873_v31 = vsub.f32 %v10830_v50, %v3856_v61  ;;  %v6866_v8 = vld [vmem:[#allocation14 + $0x98] sm:$0xff]   ;;  %v6867_v45 = vld [vmem:[#allocation14 + $0xe0] sm:$0xff]  }
 0xa71   : > { %3921 = vadd.xlane.f32.xlu1 %v10867_v14  ;;  %v3858_v28 = vpop.xlane.xlu1 %3857  ;;  %6191 = vmatpush3.bf16.msra.mxu0 %v6862_v52  ;;  %v6868_v61 = vld [vmem:[#allocation14 + $0xa0] sm:$0xff]  }
 0xa72   : > { %v10871_v32 = vpop.eup %7179  ;;  %7189 = vpow2.f32 %v3901_v35  ;;  %v3903_v29 = vmul.f32 1.442695, %v3873_v31  ;;  %v3874_v59 = vsub.f32 %v10835_v3, %v3858_v28  ;;  %6192 = vmatprep.subr.bf16.mxu0 %v6863_v42  ;;  %v6869_v35 = vld [vmem:[#allocation14 + $0xe8] sm:$0xff]  }
 0xa73   : > { %3923 = vadd.xlane.f32.xlu0 %v10871_v32  ;;  %v6870_v28 = vld [vmem:[#allocation14 + $0xa8] sm:$0xff]  }
 0xa74   : > { %v10875_v58 = vpop.eup %7181  ;;  %7191 = vpow2.f32 %v3903_v29  ;;  %v3905_v7 = vmul.f32 1.442695, %v3874_v59  ;;  %v6871_v59 = vld [vmem:[#allocation14 + $0xf0] sm:$0xff]  }
 0xa75   : > { %3925 = vadd.xlane.f32.xlu1 %v10875_v58  ;;  %6193 = vmatpush3.bf16.msra.mxu0 %v6864_v19 }
 0xa76   : > { %v10878_v27 = vpop.eup %7183  ;;  %7193 = vpow2.f32 %v3905_v7  ;;  %6194 = vmatprep.subr.bf16.mxu0 %v6865_v41 }
 0xa77   : > { %3927 = vadd.xlane.f32.xlu0 %v10878_v27 }
 0xa78   : > { %v10881_v50 = vpop.eup %7185 }
 0xa79   : > { %3929 = vadd.xlane.f32.xlu1 %v10881_v50  ;;  %6195 = vmatpush3.bf16.msra.mxu0 %v6866_v8 }
 0xa7a   : > { %v10884_v51 = vpop.eup %7187  ;;  %6196 = vmatprep.subr.bf16.mxu0 %v6867_v45 }
 0xa7b   : > { %3931 = vadd.xlane.f32.xlu0 %v10884_v51 }
 0xa7c   : > { %v10887_v3 = vpop.eup %7189 }
 0xa7d   : > { %3933 = vadd.xlane.f32.xlu1 %v10887_v3  ;;  %6197 = vmatpush3.bf16.msra.mxu0 %v6868_v61 }
 0xa7e   : > { %v10890_v4 = vpop.eup %7191  ;;  %6198 = vmatprep.subr.bf16.mxu0 %v6869_v35 }
 0xa7f   : > { %3935 = vadd.xlane.f32.xlu0 %v10890_v4 }
 0xa80   : > { %v10893_v25 = vpop.eup %7193 }
 0xa81   : > { %3937 = vadd.xlane.f32.xlu1 %v10893_v25  ;;  %6199 = vmatpush3.bf16.msra.mxu0 %v6870_v28 }
 0xa82   : > { %6200 = vmatprep.subr.bf16.mxu0 %v6871_v59 }
 0xaf0   : > { %v3908_v31 = vpop.xlane.xlu0 %3907 }
 0xaf1   : > { %7195 = vrcp.f32 %v3908_v31 }
 0xaf2   : > { %v3910_v29 = vpop.xlane.xlu1 %3909 }
 0xaf3   : > { %7197 = vrcp.f32 %v3910_v29 }
 0xaf4   : > { %v3912_v7 = vpop.xlane.xlu0 %3911 }
 0xaf5   : > { %7199 = vrcp.f32 %v3912_v7 }
 0xaf6   : > { %v3914_v49 = vpop.xlane.xlu1 %3913 }
 0xaf7   : > { %7201 = vrcp.f32 %v3914_v49  ;;  %v6844_v49 = vld [vmem:[#allocation14] sm:$0xff]  }
 0xaf8   : > { %v3916_v21 = vpop.xlane.xlu0 %3915 }
 0xaf9   : > { %7203 = vrcp.f32 %v3916_v21 }
 0xafa   : > { %v3918_v9 = vpop.xlane.xlu1 %3917 }
 0xafb   : > { %v7196_v38 = vpop.eup %7195  ;;  %7205 = vrcp.f32 %v3918_v9 }
 0xafc   : > { %v3920_v52 = vpop.xlane.xlu0 %3919  ;;  %v3955_v41 = vmul.f32 %v7196_v38, %v10842_v20  ;;  %v6845_v20 = vld [vmem:[#allocation14 + $0x48] sm:$0xff]  }
 0xafd   : > { %v7198_v42 = vpop.eup %7197  ;;  %7207 = vrcp.f32 %v3920_v52 }
 0xafe   : > { %v3922_v19 = vpop.xlane.xlu1 %3921  ;;  %v3956_v8 = vmul.f32 %v7198_v42, %v10845_v33 }
 0xaff   : > { %v7200_v45 = vpop.eup %7199  ;;  %7209 = vrcp.f32 %v3922_v19 }
 0xb00   : > { %v3924_v61 = vpop.xlane.xlu0 %3923  ;;  %v3971_v35 = vpack.c.bf16 %v3956_v8, %v3955_v41  ;;  %v3957_v28 = vmul.f32 %v7200_v45, %v10848_v2  ;;  %v6846_v2 = vld [vmem:[#allocation14 + $0x8] sm:$0xff]   ;;  %v6847_v8 = vld [vmem:[#allocation14 + $0x50] sm:$0xff]  }
 0xb01   : > { %v7202_v31 = vpop.eup %7201  ;;  %7211 = vrcp.f32 %v3924_v61 }
 0xb02   : > { %v3958_v29 = vmul.f32 %v7202_v31, %v10851_v23  ;;  %6556 = vmatprep.mubr.bf16.mxu1 %v3971_v35  ;;  %v3926_v59 = vpop.xlane.xlu1 %3925 }
 0xb03   : > { %v7204_v7 = vpop.eup %7203  ;;  %7213 = vrcp.f32 %v3926_v59  ;;  %v6849_v59 = vld [vmem:[#allocation14 + $0x58] sm:$0xff]  }
 0xb04   : > { %v3928_v21 = vpop.xlane.xlu0 %3927  ;;  %v3972_v9 = vpack.c.bf16 %v3958_v29, %v3957_v28  ;;  %v3959_v52 = vmul.f32 %v7204_v7, %v10855_v57  ;;  %v6848_v57 = vld [vmem:[#allocation14 + $0x10] sm:$0xff]  }
 0xb05   : > { %v7206_v38 = vpop.eup %7205  ;;  %7215 = vrcp.f32 %v3928_v21 }
 0xb06   : > { %6557 = vmatmul.mubr.bf16.vlgmr.msra.gmra.mrb[112].mxu1 %v3972_v9  ;;  %v3930_v33 = vpop.xlane.xlu1 %3929  ;;  %v3960_v42 = vmul.f32 %v7206_v38, %v10859_v22  ;;  %v6851_v38 = vld [vmem:[#allocation14 + $0x60] sm:$0xff]  }
 0xb07   : > { %v7208_v19 = vpop.eup %7207  ;;  %7217 = vrcp.f32 %v3930_v33  ;;  %6125 = vmatpush3.bf16.msra.mxu1 %v6844_v49 }
 0xb08   : > { %v3932_v23 = vpop.xlane.xlu0 %3931  ;;  %v3973_v41 = vpack.c.bf16 %v3960_v42, %v3959_v52  ;;  %6126 = vmatprep.subr.bf16.mxu1 %v6845_v20  ;;  %v3961_v35 = vmul.f32 %v7208_v19, %v10863_v44  ;;  %v6850_v44 = vld [vmem:[#allocation14 + $0x18] sm:$0xff]  }
 0xb09   : > { %v7210_v45 = vpop.eup %7209  ;;  %7219 = vrcp.f32 %v3932_v23 }
 0xb0a   : > { %6560 = vmatprep.mubr.bf16.mxu1 %v3973_v41  ;;  %v3934_v61 = vpop.xlane.xlu1 %3933  ;;  %v3962_v31 = vmul.f32 %v7210_v45, %v10867_v14 }
 0xb0b   : > { %v7212_v28 = vpop.eup %7211  ;;  %7221 = vrcp.f32 %v3934_v61  ;;  %6127 = vmatpush3.bf16.msra.mxu1 %v6846_v2  ;;  %v6852_v2 = vld [vmem:[#allocation14 + $0x20] sm:$0xff]   ;;  %v6854_v61 = vld [vmem:[#allocation14 + $0x28] sm:$0xff]  }
 0xb0c   : > { %v3936_v22 = vpop.xlane.xlu0 %3935  ;;  %v3974_v29 = vpack.c.bf16 %v3962_v31, %v3961_v35  ;;  %6128 = vmatprep.subr.bf16.mxu1 %v6847_v8  ;;  %v3963_v21 = vmul.f32 %v7212_v28, %v10871_v32  ;;  %v6853_v32 = vld [vmem:[#allocation14 + $0x68] sm:$0xff]  }
 0xb0d   : > { %v7214_v7 = vpop.eup %7213  ;;  %7223 = vrcp.f32 %v3936_v22 }
 0xb0e   : > { %6561 = vmatmul.mubr.bf16.gmra.mrb[116].mxu1 %v3974_v29  ;;  %v3938_v49 = vpop.xlane.xlu1 %3937  ;;  %v3964_v9 = vmul.f32 %v7214_v7, %v10875_v58  ;;  %v6857_v29 = vld [vmem:[#allocation14 + $0x78] sm:$0xff]   ;;  %v12274_v7 = vpack.c.bf16 %v10621_v26, %v10615_v13 }
 0xb0f   : > { %v7216_v20 = vpop.eup %7215  ;;  %7225 = vrcp.f32 %v3938_v49  ;;  %6129 = vmatpush3.bf16.msra.mxu1 %v6848_v57  ;;  %v6856_v57 = vld [vmem:[#allocation14 + $0x30] sm:$0xff]   ;;  %v12290_v26 = vld [vmem:[#allocation112_spill] sm:$0xff]  ;;  %v12295_v49 = vmov 0  }
 0xb10   : > { %v3975_v14 = vpack.c.bf16 %v3964_v9, %v3963_v21  ;;  %6130 = vmatprep.subr.bf16.mxu1 %v6849_v59  ;;  %v3965_v52 = vmul.f32 %v7216_v20, %v10878_v27  ;;  %v6855_v27 = vld [vmem:[#allocation14 + $0x70] sm:$0xff]   ;;  %v12271_v59 = vpack.c.bf16 %v10561_v12, %v10555_v48  ;;  %v12276_v48 = vpack.c.bf16 %v10617_v36, %v10613_v55  ;;  %v12287_v55 = vld [vmem:[#allocation141_spill] sm:$0xff]  ;;  %v12289_v36 = vld [vmem:[#allocation126_spill] sm:$0xff] }
 0xb11   : > { %v7218_v33 = vpop.eup %7217  ;;  %v12277_v12 = vpack.c.bf16 %v10569_v24, %v10565_v37  ;;  %v12286_v24 = vld [vmem:[#allocation110_spill] sm:$0xff] }
 0xb12   : > { %6564 = vmatprep.mubr.bf16.mxu1 %v3975_v14  ;;  %v3966_v42 = vmul.f32 %v7218_v33, %v10881_v50  ;;  %v12288_v13 = vpack.c.bf16 %v12286_v24, %v12287_v55  ;;  %v12296_v33 = vpack.c.bf16 %v10784_v56, %v10778_v39  ;;  %v12298_v39 = vpack.c.bf16 %v10796_v43, %v10790_v15  ;;  %v12300_v43 = vld [vmem:[#allocation127_spill] sm:$0xff] }
 0xb13   : > { %v7220_v19 = vpop.eup %7219  ;;  %6131 = vmatpush3.bf16.msra.mxu1 %v6850_v44  ;;  %v12306_v55 = vld [vmem:[#allocation135_spill] sm:$0xff] }
 0xb14   : > { %v3976_v23 = vpack.c.bf16 %v3966_v42, %v3965_v52  ;;  %6132 = vmatprep.subr.bf16.mxu1 %v6851_v38  ;;  %v3967_v41 = vmul.f32 %v7220_v19, %v10884_v51  ;;  %v12270_v51 = vpack.c.bf16 %v10609_v62, %v10603_v30  ;;  %v12275_v30 = vpack.c.bf16 %v10573_v0, %v10567_v54  ;;  %v12281_v0 = vld [vmem:[#allocation92_spill] sm:$0xff]  ;;  %v12284_v62 = vld [vmem:[#allocation114_spill] sm:$0xff] }
 0xb15   : > { %v7222_v58 = vpop.eup %7221  ;;  %v12280_v54 = vpack.c.bf16 %v10629_v46, %v10625_v10  ;;  %v6873_v10 = vld [vmem:[#allocation14 + $0xf8] sm:$0xff]  }
 0xb16   : > { %6565 = vmatmul.mubr.bf16.gmra.mrb[120].mxu1 %v3976_v23  ;;  %v3968_v8 = vmul.f32 %v7222_v58, %v10887_v3  ;;  %v6858_v3 = vld [vmem:[#allocation14 + $0x38] sm:$0xff]   ;;  %v12297_v58 = vpack.c.bf16 %v10780_v40, %v10776_v17  ;;  %v12299_v17 = vpack.c.bf16 %v10792_v5, %v10788_v6 }
 0xb17   : > { %v7224_v45 = vpop.eup %7223  ;;  %6133 = vmatpush3.bf16.msra.mxu1 %v6852_v2  ;;  %v12292_v46 = vld [vmem:[#allocation108_spill] sm:$0xff] }
 0xb18   : > { %v3977_v35 = vpack.c.bf16 %v3968_v8, %v3967_v41  ;;  %6134 = vmatprep.subr.bf16.mxu1 %v6853_v32  ;;  %v3969_v50 = vmul.f32 %v7224_v45, %v10890_v4  ;;  %v12272_v4 = vpack.c.bf16 %v10605_v60, %v10601_v1  ;;  %v12282_v1 = vpack.c.bf16 %v10581_v16, %v12281_v0  ;;  %v12283_v60 = vld [vmem:[#allocation118_spill] sm:$0xff] }
 0xb19   : > { %v7226_v31 = vpop.eup %7225  ;;  %v12285_v37 = vpack.c.bf16 %v12283_v60, %v12284_v62 }
 0xb1a   : > { %6568 = vmatprep.mubr.bf16.mxu1 %v3977_v35  ;;  %v3970_v28 = vmul.f32 %v7226_v31, %v10893_v25  ;;  %v12273_v25 = vpack.c.bf16 %v10557_v18, %v10553_v47  ;;  %v12278_v47 = vpack.c.bf16 %v10633_v63, %v10627_v34  ;;  %v12279_v18 = vpack.c.bf16 %v10585_v11, %v10579_v53  ;;  %v6872_v11 = vld [vmem:[#allocation14 + $0xb0] sm:$0xff]   ;;  %v6874_v34 = vld [vmem:[#allocation14 + $0xb8] sm:$0xff]  }
 0xb1b   : > { %6135 = vmatpush3.bf16.msra.mxu1 %v6854_v61  ;;  %v12291_v53 = vpack.c.bf16 %v12289_v36, %v12290_v26  ;;  %6201 = vmatpush3.bf16.msra.mxu0 %v6872_v11  ;;  %v12293_v63 = vld [vmem:[#allocation100_spill] sm:$0xff] }
 0xb1c   : > { %v3978_v22 = vpack.c.bf16 %v3970_v28, %v3969_v50  ;;  %6136 = vmatprep.subr.bf16.mxu1 %v6855_v27  ;;  %v12294_v16 = vpack.c.bf16 %v12292_v46, %v12293_v63  ;;  %6202 = vmatprep.subr.bf16.mxu0 %v6873_v10  ;;  %v12309_v63 = vld [vmem:[#allocation138_spill] sm:$0xff] }
 0xb1e   : > { %6569 = vmatmul.mubr.bf16.gmra.mrb[124].mxu1 %v3978_v22 }
 0xb1f   : > { %6137 = vmatpush3.bf16.msra.mxu1 %v6856_v57  ;;  %4396 = vmatprep.mubr.bf16.mxu1 %v12270_v51 }
 0xb20   : > { %6138 = vmatprep.subr.bf16.mxu1 %v6857_v29  ;;  %6203 = vmatpush3.bf16.msra.mxu0 %v6874_v34 }
 0xb23   : > { %6139 = vmatpush3.bf16.msra.mxu1 %v6858_v3 }
 0xb26   : > { %4397 = vmatmul.mubr.bf16.vlgmr.msra.gmra.mrb[128].mxu1 %v12271_v59 }
 0xb27   : > { %4404 = vmatprep.mubr.bf16.mxu1 %v12272_v4  ;;  %v12301_v4 = vld [vmem:[#allocation130_spill] sm:$0xff] }
 0xb2e   : > { %4405 = vmatmul.mubr.bf16.gmra.mrb[132].mxu1 %v12273_v25  ;;  %v12302_v25 = vpack.c.bf16 %v12300_v43, %v12301_v4  ;;  %v6895_v43 = vld [vmem:[#allocation19 + $0x14] ss:$8 sps:$4 sm:$0xff]   ;;  %v6893_v4 = vld [vmem:[#allocation19 + $0x10] ss:$8 sps:$4 sm:$0xff]  }
 0xb2f   : > { %4412 = vmatprep.mubr.bf16.mxu1 %v12274_v7 }
 0xb36   : > { %4413 = vmatmul.mubr.bf16.gmra.mrb[136].mxu1 %v12275_v30 }
 0xb37   : > { %4420 = vmatprep.mubr.bf16.mxu1 %v12276_v48 }
 0xb3e   : > { %4421 = vmatmul.mubr.bf16.gmra.mrb[140].mxu1 %v12277_v12 }
 0xb3f   : > { %4428 = vmatprep.mubr.bf16.mxu1 %v12278_v47  ;;  %v12303_v47 = vld [vmem:[#allocation128_spill] sm:$0xff] }
 0xb46   : > { %4429 = vmatmul.mubr.bf16.gmra.mrb[144].mxu1 %v12279_v18  ;;  %v12304_v18 = vld [vmem:[#allocation134_spill] sm:$0xff] }
 0xb47   : > { %4436 = vmatprep.mubr.bf16.mxu1 %v12280_v54  ;;  %v12305_v54 = vpack.c.bf16 %v12303_v47, %v12304_v18  ;;  %v6892_v47 = vld [vmem:[#allocation16 + $0x44] ss:$8 sps:$4 sm:$0xff]   ;;  %v6890_v18 = vld [vmem:[#allocation16 + $0x40] ss:$8 sps:$4 sm:$0xff]  }
 0xb4e   : > { %4437 = vmatmul.mubr.bf16.gmra.mrb[148].mxu1 %v12282_v1 }
 0xb4f   : > { %4444 = vmatprep.mubr.bf16.mxu1 %v12285_v37 }
 0xb56   : > { %4445 = vmatmul.mubr.bf16.gmra.mrb[152].mxu1 %v12288_v13  ;;  %v12307_v13 = vld [vmem:[#allocation136_spill] sm:$0xff] }
 0xb57   : > { %4452 = vmatprep.mubr.bf16.mxu1 %v12291_v53  ;;  %v12308_v36 = vpack.c.bf16 %v12306_v55, %v12307_v13 }
 0xb5e   : > { %4453 = vmatmul.mubr.bf16.gmra.mrb[156].mxu1 %v12294_v16  ;;  %v12310_v16 = vld [vmem:[#allocation122_spill] sm:$0xff] }
 0xb5f   : > { %4845 = vmatprep.mubr.bf16.mxu1 %v12295_v49 }
 0xbd9   : > { %v6558_v21 = vpop.f32.mrb[112].mxu1 }
 0xbda   : > { %v4013_v9 = vpop.f32.mrb[113].mxu1 }
 0xbdb   : > { %v6559_v20 = vpop.f32.mrb[114].mxu1 }
 0xbdc   : > { %v4083_v44 = vpack.c.bf16 %v6559_v20, %v6558_v21  ;;  %v4016_v14 = vpop.f32.mrb[115].mxu1  ;;  %v12311_v21 = vpack.c.bf16 %v12309_v63, %v12310_v16  ;;  %v7422_v63 = vld [vmem:[%s8293_s19 + $0x8] sm:$0xff] }
 0xbdd   : > { %v4079_v38 = vpack.c.bf16 %v4016_v14, %v4013_v9 }
 0xbdf   : > { %4493 = vmatprep.mubr.bf16.mxu0 %v4079_v38 }
 0xbe0   : > { %4494 = vmatmul.mubr.bf16.vlgmr.msra.gmra.mrb[128].mxu0 %v12296_v33 }
 0xbe1   : > { %v6562_v52 = vpop.f32.mrb[116].mxu1  ;;  %4501 = vmatprep.mubr.bf16.mxu0 %v4083_v44 }
 0xbe2   : > { %v4029_v42 = vpop.f32.mrb[117].mxu1 }
 0xbe3   : > { %v6563_v19 = vpop.f32.mrb[118].mxu1 }
 0xbe4   : > { %v4091_v2 = vpack.c.bf16 %v6563_v19, %v6562_v52  ;;  %v4032_v23 = vpop.f32.mrb[119].mxu1 }
 0xbe5   : > { %v4087_v32 = vpack.c.bf16 %v4032_v23, %v4029_v42 }
 0xbe8   : > { %4502 = vmatmul.mubr.bf16.gmra.mrb[132].mxu0 %v12297_v58 }
 0xbe9   : > { %v6566_v41 = vpop.f32.mrb[120].mxu1  ;;  %4509 = vmatprep.mubr.bf16.mxu0 %v4087_v32 }
 0xbea   : > { %v4045_v8 = vpop.f32.mrb[121].mxu1 }
 0xbeb   : > { %v6567_v45 = vpop.f32.mrb[122].mxu1 }
 0xbec   : > { %v4099_v61 = vpack.c.bf16 %v6567_v45, %v6566_v41  ;;  %v4048_v35 = vpop.f32.mrb[123].mxu1 }
 0xbed   : > { %v4095_v27 = vpack.c.bf16 %v4048_v35, %v4045_v8 }
 0xbf0   : > { %4510 = vmatmul.mubr.bf16.gmra.mrb[136].mxu0 %v12298_v39 }
 0xbf1   : > { %v6570_v56 = vpop.f32.mrb[124].mxu1  ;;  %4517 = vmatprep.mubr.bf16.mxu0 %v4091_v2 }
 0xbf2   : > { %v4061_v31 = vpop.f32.mrb[125].mxu1 }
 0xbf3   : > { %v6571_v50 = vpop.f32.mrb[126].mxu1 }
 0xbf4   : > { %v4107_v28 = vpack.c.bf16 %v6571_v50, %v6570_v56  ;;  %v4064_v57 = vpop.f32.mrb[127].mxu1 }
 0xbf5   : > { %v4103_v22 = vpack.c.bf16 %v4064_v57, %v4061_v31  ;;  %v6875_v57 = vld [vmem:[#allocation16] ss:$8 sps:$4 sm:$0xff]  }
 0xbf8   : > { %4518 = vmatmul.mubr.bf16.gmra.mrb[140].mxu0 %v12299_v17  ;;  %v6880_v17 = vld [vmem:[#allocation16 + $0x14] ss:$8 sps:$4 sm:$0xff]  }
 0xbf9   : > { %v6140_v40 = vpop.f32.mrb[128].mxu1  ;;  %4525 = vmatprep.mubr.bf16.mxu0 %v4095_v27 }
 0xbfa   : > { %v6141_v29 = vpop.f32.mrb[129].mxu1 }
 0xbfb   : > { %v10973_v51 = vadd.f32 %v6141_v29, %v6140_v40  ;;  %v6143_v3 = vpop.f32.mrb[130].mxu1  ;;  %v6887_v40 = vld [vmem:[#allocation19] ss:$8 sps:$4 sm:$0xff]   ;;  %v6878_v29 = vld [vmem:[#allocation16 + $0x10] ss:$8 sps:$4 sm:$0xff]  }
 0xbfc   : > { %v6144_v59 = vpop.f32.mrb[131].mxu1 }
 0xbfd   : > { %v10975_v15 = vadd.f32 %v6144_v59, %v6143_v3  ;;  %v6889_v3 = vld [vmem:[#allocation19 + $0x4] ss:$8 sps:$4 sm:$0xff]  }
 0xbfe   : > { %v6883_v59 = vld [vmem:[#allocation16 + $0x24] ss:$8 sps:$4 sm:$0xff]   ;;  %5022 = vmatprep.subr.bf16.mxu0 %v6889_v3 }
 0xbff   : > { %5023 = vmatpush1.bf16.msra.mxu0 %v6887_v40  ;;  %v7426_v3 = vld [vmem:[%s8293_s19 + $0x28] sm:$0xff] }
 0xc00   : > { %4526 = vmatmul.mubr.bf16.gmra.mrb[144].mxu0 %v12302_v25  ;;  %v6881_v25 = vld [vmem:[#allocation16 + $0x20] ss:$8 sps:$4 sm:$0xff]   ;;  %5024 = vmatprep.subr.bf16.mxu0 %v6895_v43 }
 0xc01   : > { %v6146_v7 = vpop.f32.mrb[132].mxu1  ;;  %4533 = vmatprep.mubr.bf16.mxu0 %v4099_v61 }
 0xc02   : > { %v6147_v30 = vpop.f32.mrb[133].mxu1 }
 0xc03   : > { %v10980_v48 = vadd.f32 %v6147_v30, %v6146_v7  ;;  %v6149_v6 = vpop.f32.mrb[134].mxu1  ;;  %v6901_v7 = vld [vmem:[#allocation19 + $0x24] ss:$8 sps:$4 sm:$0xff]   ;;  %v6886_v30 = vld [vmem:[#allocation16 + $0x34] ss:$8 sps:$4 sm:$0xff]   ;;  %5025 = vmatpush1.bf16.msra.mxu0 %v6893_v4 }
 0xc04   : > { %v6150_v5 = vpop.f32.mrb[135].mxu1  ;;  %5026 = vmatprep.subr.bf16.mxu0 %v6901_v7 }
 0xc05   : > { %v10982_v12 = vadd.f32 %v6150_v5, %v6149_v6  ;;  %v6899_v6 = vld [vmem:[#allocation19 + $0x20] ss:$8 sps:$4 sm:$0xff]   ;;  %v6884_v5 = vld [vmem:[#allocation16 + $0x30] ss:$8 sps:$4 sm:$0xff]  }
 0xc07   : > { %5027 = vmatpush1.bf16.msra.mxu0 %v6899_v6 }
 0xc08   : > { %4534 = vmatmul.mubr.bf16.gmra.mrb[148].mxu0 %v12305_v54  ;;  %v6898_v54 = vld [vmem:[#allocation16 + $0x54] ss:$8 sps:$4 sm:$0xff]  }
 0xc09   : > { %v6152_v0 = vpop.f32.mrb[136].mxu1  ;;  %4541 = vmatprep.mubr.bf16.mxu0 %v4103_v22  ;;  %v6877_v22 = vld [vmem:[#allocation16 + $0x4] ss:$8 sps:$4 sm:$0xff]  }
 0xc0a   : > { %v6153_v1 = vpop.f32.mrb[137].mxu1  ;;  %4813 = vmatprep.subr.bf16.mxu1 %v6877_v22 }
 0xc0b   : > { %v10987_v60 = vadd.f32 %v6153_v1, %v6152_v0  ;;  %v6155_v62 = vpop.f32.mrb[138].mxu1  ;;  %4814 = vmatpush1.bf16.msra.mxu1 %v6875_v57  ;;  %v6896_v0 = vld [vmem:[#allocation16 + $0x50] ss:$8 sps:$4 sm:$0xff]  }
 0xc0c   : > { %v6156_v37 = vpop.f32.mrb[139].mxu1  ;;  %4815 = vmatprep.subr.bf16.mxu1 %v6880_v17 }
 0xc0d   : > { %v10989_v24 = vadd.f32 %v6156_v37, %v6155_v62 }
 0xc0f   : > { %4816 = vmatpush1.bf16.msra.mxu1 %v6878_v29 }
 0xc10   : > { %4542 = vmatmul.mubr.bf16.gmra.mrb[152].mxu0 %v12308_v36  ;;  %4817 = vmatprep.subr.bf16.mxu1 %v6883_v59 }
 0xc11   : > { %v6158_v26 = vpop.f32.mrb[140].mxu1  ;;  %4549 = vmatprep.mubr.bf16.mxu0 %v4107_v28 }
 0xc12   : > { %v6159_v53 = vpop.f32.mrb[141].mxu1 }
 0xc13   : > { %v10994_v11 = vadd.f32 %v6159_v53, %v6158_v26  ;;  %v6161_v10 = vpop.f32.mrb[142].mxu1  ;;  %4818 = vmatpush1.bf16.msra.mxu1 %v6881_v25  ;;  %v7421_v53 = vld [vmem:[%s8293_s19] sm:$0xff] }
 0xc14   : > { %v6162_v34 = vpop.f32.mrb[143].mxu1  ;;  %4819 = vmatprep.subr.bf16.mxu1 %v6886_v30 }
 0xc15   : > { %v10996_v46 = vadd.f32 %v6162_v34, %v6161_v10 }
 0xc17   : > { %4820 = vmatpush1.bf16.msra.mxu1 %v6884_v5 }
 0xc18   : > { %4550 = vmatmul.mubr.bf16.gmra.mrb[156].mxu0 %v12311_v21  ;;  %4821 = vmatprep.subr.bf16.mxu1 %v6892_v47 }
 0xc19   : > { %v6164_v9 = vpop.f32.mrb[144].mxu1  ;;  %5054 = vmatprep.mubr.bf16.mxu0 %v12295_v49 }
 0xc1a   : > { %v6165_v20 = vpop.f32.mrb[145].mxu1 }
 0xc1b   : > { %v11002_v44 = vadd.f32 %v6165_v20, %v6164_v9  ;;  %v6167_v14 = vpop.f32.mrb[146].mxu1  ;;  %4822 = vmatpush1.bf16.msra.mxu1 %v6890_v18 }
 0xc1c   : > { %v6168_v38 = vpop.f32.mrb[147].mxu1  ;;  %4823 = vmatprep.subr.bf16.mxu1 %v6898_v54 }
 0xc1d   : > { %v11004_v33 = vadd.f32 %v6168_v38, %v6167_v14 }
 0xc1f   : > { %4824 = vmatpush1.bf16.msra.mxu1 %v6896_v0  ;;  %v7428_v0 = vld [vmem:[%s8293_s19 + $0x38] sm:$0xff] }
 0xc21   : > { %v6170_v52 = vpop.f32.mrb[148].mxu1 }
 0xc22   : > { %v6171_v42 = vpop.f32.mrb[149].mxu1 }
 0xc23   : > { %v11006_v19 = vadd.f32 %v6171_v42, %v6170_v52  ;;  %v6173_v2 = vpop.f32.mrb[150].mxu1 }
 0xc24   : > { %v6174_v23 = vpop.f32.mrb[151].mxu1 }
 0xc25   : > { %v11008_v32 = vadd.f32 %v6174_v23, %v6173_v2 }
 0xc29   : > { %v6176_v58 = vpop.f32.mrb[152].mxu1 }
 0xc2a   : > { %v6177_v41 = vpop.f32.mrb[153].mxu1 }
 0xc2b   : > { %v11010_v8 = vadd.f32 %v6177_v41, %v6176_v58  ;;  %v6179_v45 = vpop.f32.mrb[154].mxu1  ;;  %v7424_v41 = vld [vmem:[%s8293_s19 + $0x18] sm:$0xff] }
 0xc2c   : > { %v6180_v61 = vpop.f32.mrb[155].mxu1 }
 0xc2d   : > { %v11012_v35 = vadd.f32 %v6180_v61, %v6179_v45 }
 0xc31   : > { %v6182_v27 = vpop.f32.mrb[156].mxu1 }
 0xc32   : > { %v6183_v39 = vpop.f32.mrb[157].mxu1 }
 0xc33   : > { %v11014_v56 = vadd.f32 %v6183_v39, %v6182_v27  ;;  %v6185_v31 = vpop.f32.mrb[158].mxu1 }
 0xc34   : > { %v6186_v50 = vpop.f32.mrb[159].mxu1 }
 0xc35   : > { %v11016_v28 = vadd.f32 %v6186_v50, %v6185_v31 }
 0xcb3   : > { %v6204_v1 = vpop.f32.mrb[128].mxu0 }
 0xcb4   : > { %v6205_v62 = vpop.f32.mrb[129].mxu0 }
 0xcb5   : > { %v6206_v37 = vadd.f32 %v6205_v62, %v6204_v1  ;;  %v6207_v55 = vpop.f32.mrb[130].mxu0 }
 0xcb6   : > { %v6208_v13 = vpop.f32.mrb[131].mxu0 }
 0xcb7   : > { %v4496_v36 = vadd.f32 %v6206_v37, %v10973_v51  ;;  %v6209_v26 = vadd.f32 %v6208_v13, %v6207_v55 }
 0xcb9   : > { %v11020_v10 = vadd.f32 %v7421_v53, %v4496_v36  ;;  %v4499_v34 = vadd.f32 %v6209_v26, %v10975_v15  ;;  %v7423_v15 = vld [vmem:[%s8293_s19 + $0x10] sm:$0xff] }
 0xcbb   : > { %v11024_v16 = vadd.f32 %v7422_v63, %v4499_v34  ;;  %v6210_v21 = vpop.f32.mrb[132].mxu0  ;;  %v4574_v9 = vmul.f32 %v11020_v10, %v11020_v10 }
 0xcbc   : > { %v6211_v20 = vpop.f32.mrb[133].mxu0 }
 0xcbd   : > { %v6212_v14 = vadd.f32 %v6211_v20, %v6210_v21  ;;  %v6213_v38 = vpop.f32.mrb[134].mxu0  ;;  %4590 = vadd.xlane.f32.xlu0 %v4574_v9  ;;  %v4575_v51 = vmul.f32 %v11024_v16, %v11024_v16  ;;  %v7430_v9 = vld [vmem:[%s8293_s19 + $0x48] sm:$0xff] }
 0xcbe   : > { %v6214_v52 = vpop.f32.mrb[135].mxu0 }
 0xcbf   : > { %v4504_v42 = vadd.f32 %v6212_v14, %v10980_v48  ;;  %v6215_v2 = vadd.f32 %v6214_v52, %v6213_v38  ;;  %4592 = vadd.xlane.f32.xlu1 %v4575_v51  ;;  %v6902_v52 = vld [vmem:[#allocation19 + $0x30] ss:$8 sps:$4 sm:$0xff]  }
 0xcc1   : > { %v11032_v23 = vadd.f32 %v7423_v15, %v4504_v42  ;;  %v4507_v58 = vadd.f32 %v6215_v2, %v10982_v12  ;;  %v7425_v12 = vld [vmem:[%s8293_s19 + $0x20] sm:$0xff]  ;;  %v6904_v42 = vld [vmem:[#allocation19 + $0x34] ss:$8 sps:$4 sm:$0xff]  }
 0xcc2   : > { %5028 = vmatprep.subr.bf16.mxu0 %v6904_v42 }
 0xcc3   : > { %v11036_v45 = vadd.f32 %v7424_v41, %v4507_v58  ;;  %v6216_v61 = vpop.f32.mrb[136].mxu0  ;;  %v4576_v27 = vmul.f32 %v11032_v23, %v11032_v23  ;;  %v6905_v58 = vld [vmem:[#allocation16 + $0x60] ss:$8 sps:$4 sm:$0xff]   ;;  %v6907_v41 = vld [vmem:[#allocation16 + $0x64] ss:$8 sps:$4 sm:$0xff]   ;;  %5029 = vmatpush1.bf16.msra.mxu0 %v6902_v52  ;;  %v7436_v52 = vld [vmem:[%s8293_s19 + $0x78] sm:$0xff] }
 0xcc4   : > { %v6217_v39 = vpop.f32.mrb[137].mxu0  ;;  %4825 = vmatprep.subr.bf16.mxu1 %v6907_v41 }
 0xcc5   : > { %v6218_v31 = vadd.f32 %v6217_v39, %v6216_v61  ;;  %v6219_v50 = vpop.f32.mrb[138].mxu0  ;;  %4594 = vadd.xlane.f32.xlu0 %v4576_v27  ;;  %v4577_v48 = vmul.f32 %v11036_v45, %v11036_v45  ;;  %v6910_v61 = vld [vmem:[#allocation19 + $0x44] ss:$8 sps:$4 sm:$0xff]   ;;  %4826 = vmatpush1.bf16.msra.mxu1 %v6905_v58 }
 0xcc6   : > { %v6220_v57 = vpop.f32.mrb[139].mxu0  ;;  %5030 = vmatprep.subr.bf16.mxu0 %v6910_v61 }
 0xcc7   : > { %v4512_v22 = vadd.f32 %v6218_v31, %v10987_v60  ;;  %v6221_v17 = vadd.f32 %v6220_v57, %v6219_v50  ;;  %4596 = vadd.xlane.f32.xlu1 %v4577_v48  ;;  %v6908_v31 = vld [vmem:[#allocation19 + $0x40] ss:$8 sps:$4 sm:$0xff]   ;;  %v6913_v50 = vld [vmem:[#allocation19 + $0x54] ss:$8 sps:$4 sm:$0xff]  }
 0xcc8   : > { %v6916_v48 = vld [vmem:[#allocation16 + $0x74] ss:$8 sps:$4 sm:$0xff]   ;;  %5031 = vmatpush1.bf16.msra.mxu0 %v6908_v31 }
 0xcc9   : > { %v11044_v40 = vadd.f32 %v7425_v12, %v4512_v22  ;;  %v4515_v29 = vadd.f32 %v6221_v17, %v10989_v24  ;;  %v7427_v24 = vld [vmem:[%s8293_s19 + $0x30] sm:$0xff]  ;;  %4827 = vmatprep.subr.bf16.mxu1 %v6916_v48  ;;  %5032 = vmatprep.subr.bf16.mxu0 %v6913_v50 }
 0xcca   : > { %v7431_v57 = vld [vmem:[%s8293_s19 + $0x50] sm:$0xff] }
 0xccb   : > { %v11048_v59 = vadd.f32 %v7426_v3, %v4515_v29  ;;  %v6222_v43 = vpop.f32.mrb[140].mxu0  ;;  %v4578_v4 = vmul.f32 %v11044_v40, %v11044_v40  ;;  %v6914_v12 = vld [vmem:[#allocation16 + $0x70] ss:$8 sps:$4 sm:$0xff]  }
 0xccc   : > { %v6223_v25 = vpop.f32.mrb[141].mxu0  ;;  %v7432_v29 = vld [vmem:[%s8293_s19 + $0x58] sm:$0xff]  ;;  %4828 = vmatpush1.bf16.msra.mxu1 %v6914_v12 }
 0xccd   : > { %v6224_v7 = vadd.f32 %v6223_v25, %v6222_v43  ;;  %v6225_v30 = vpop.f32.mrb[142].mxu0  ;;  %4598 = vadd.xlane.f32.xlu0 %v4578_v4  ;;  %v4579_v60 = vmul.f32 %v11048_v59, %v11048_v59  ;;  %v6911_v4 = vld [vmem:[#allocation19 + $0x50] ss:$8 sps:$4 sm:$0xff]  }
 0xcce   : > { %v6226_v6 = vpop.f32.mrb[143].mxu0  ;;  %5033 = vmatpush1.bf16.msra.mxu0 %v6911_v4  ;;  %v11118_v4 = vld [vmem:[%s12320_s21] ss:$0 sm:$0xff] }
 0xccf   : > { %v4520_v5 = vadd.f32 %v6224_v7, %v10994_v11  ;;  %v6227_v47 = vadd.f32 %v6226_v6, %v6225_v30  ;;  %4600 = vadd.xlane.f32.xlu1 %v4579_v60  ;;  %v6919_v7 = vld [vmem:[#allocation19 + $0x64] ss:$8 sps:$4 sm:$0xff]  }
 0xcd0   : > { %5034 = vmatprep.subr.bf16.mxu0 %v6919_v7 }
 0xcd1   : > { %v11056_v18 = vadd.f32 %v7427_v24, %v4520_v5  ;;  %v4523_v54 = vadd.f32 %v6227_v47, %v10996_v46  ;;  %v7429_v46 = vld [vmem:[%s8293_s19 + $0x40] sm:$0xff] }
 0xcd2   : > { %v6917_v24 = vld [vmem:[#allocation19 + $0x60] ss:$8 sps:$4 sm:$0xff]  }
 0xcd3   : > { %v11060_v1 = vadd.f32 %v7428_v0, %v4523_v54  ;;  %v6228_v62 = vpop.f32.mrb[144].mxu0  ;;  %v4580_v37 = vmul.f32 %v11056_v18, %v11056_v18  ;;  %v6922_v54 = vld [vmem:[#allocation19 + $0x74] ss:$8 sps:$4 sm:$0xff]   ;;  %v7433_v0 = vld [vmem:[%s8293_s19 + $0x60] sm:$0xff]  ;;  %5035 = vmatpush1.bf16.msra.mxu0 %v6917_v24 }
 0xcd4   : > { %v6229_v55 = vpop.f32.mrb[145].mxu0  ;;  %5036 = vmatprep.subr.bf16.mxu0 %v6922_v54  ;;  %v6924_v24 = vld [vmem:[#allocation17] sm:$0xff]  }
 0xcd5   : > { %v6230_v13 = vadd.f32 %v6229_v55, %v6228_v62  ;;  %v6231_v36 = vpop.f32.mrb[146].mxu0  ;;  %4602 = vadd.xlane.f32.xlu0 %v4580_v37  ;;  %v4581_v11 = vmul.f32 %v11060_v1, %v11060_v1  ;;  %v7434_v55 = vld [vmem:[%s8293_s19 + $0x68] sm:$0xff] }
 0xcd6   : > { %v6232_v26 = vpop.f32.mrb[147].mxu0 }
 0xcd7   : > { %v4528_v53 = vadd.f32 %v6230_v13, %v11002_v44  ;;  %v6233_v34 = vadd.f32 %v6232_v26, %v6231_v36  ;;  %4604 = vadd.xlane.f32.xlu1 %v4581_v11 }
 0xcd9   : > { %v11068_v63 = vadd.f32 %v7429_v46, %v4528_v53  ;;  %v4531_v21 = vadd.f32 %v6233_v34, %v11004_v33 }
 0xcdb   : > { %12312 = vst [vmem:[#allocation131_spill] sm:$0xff] %v11068_v63  ;;  %v11072_v20 = vadd.f32 %v7430_v9, %v4531_v21  ;;  %v6234_v14 = vpop.f32.mrb[148].mxu0  ;;  %v4582_v38 = vmul.f32 %v11068_v63, %v11068_v63 }
 0xcdc   : > { %v6235_v51 = vpop.f32.mrb[149].mxu0 }
 0xcdd   : > { %12313 = vst [vmem:[#allocation137_spill] sm:$0xff] %v11072_v20  ;;  %v6236_v2 = vadd.f32 %v6235_v51, %v6234_v14  ;;  %v6237_v15 = vpop.f32.mrb[150].mxu0  ;;  %4606 = vadd.xlane.f32.xlu0 %v4582_v38  ;;  %v4583_v44 = vmul.f32 %v11072_v20, %v11072_v20  ;;  %v7435_v14 = vld [vmem:[%s8293_s19 + $0x70] sm:$0xff]  ;;  %s12328_s19 = sld [smem:[#allocation164_spill]] }
 0xcde   : > { %v6238_v33 = vpop.f32.mrb[151].mxu0 }
 0xcdf   : > { %v4536_v27 = vadd.f32 %v6236_v2, %v11006_v19  ;;  %v6239_v39 = vadd.f32 %v6238_v33, %v6237_v15  ;;  %4608 = vadd.xlane.f32.xlu1 %v4583_v44 }
 0xce1   : > { %v11080_v22 = vadd.f32 %v7431_v57, %v4536_v27  ;;  %v4539_v17 = vadd.f32 %v6239_v39, %v11008_v32 }
 0xce3   : > { %12314 = vst [vmem:[#allocation98_spill] sm:$0xff] %v11080_v22  ;;  %v11084_v3 = vadd.f32 %v7432_v29, %v4539_v17  ;;  %v6240_v19 = vpop.f32.mrb[152].mxu0  ;;  %v4584_v43 = vmul.f32 %v11080_v22, %v11080_v22  ;;  %s11427_s3 = scalar_lea.hbm %s12328_s19, %s5995_s17 }
 0xce4   : > { %v6241_v25 = vpop.f32.mrb[153].mxu0 }
 0xce5   : > { %12315 = vst [vmem:[#allocation139_spill] sm:$0xff] %v11084_v3  ;;  %v6242_v30 = vadd.f32 %v6241_v25, %v6240_v19  ;;  %4610 = vadd.xlane.f32.xlu0 %v4584_v43  ;;  %v6243_v32 = vpop.f32.mrb[154].mxu0  ;;  %v4585_v60 = vmul.f32 %v11084_v3, %v11084_v3 }
 0xce6   : > { %v6244_v6 = vpop.f32.mrb[155].mxu0 }
 0xce7   : > { %v4544_v5 = vadd.f32 %v6242_v30, %v11010_v8  ;;  %v6245_v47 = vadd.f32 %v6244_v6, %v6243_v32  ;;  %4612 = vadd.xlane.f32.xlu1 %v4585_v60  ;;  %v6920_v8 = vld [vmem:[#allocation19 + $0x70] ss:$8 sps:$4 sm:$0xff]  }
 0xce8   : > { %5037 = vmatpush1.bf16.msra.mxu0 %v6920_v8 }
 0xce9   : > { %v11092_v62 = vadd.f32 %v7433_v0, %v4544_v5  ;;  %v4547_v37 = vadd.f32 %v6245_v47, %v11012_v35  ;;  %v6925_v0 = vld [vmem:[#allocation17 + $0x48] sm:$0xff]  }
 0xceb   : > { %12316 = vst [vmem:[#allocation102_spill] sm:$0xff] %v11092_v62  ;;  %v11096_v13 = vadd.f32 %v7434_v55, %v4547_v37  ;;  %v6246_v36 = vpop.f32.mrb[156].mxu0  ;;  %v4586_v11 = vmul.f32 %v11092_v62, %v11092_v62 }
 0xcec   : > { %v6247_v26 = vpop.f32.mrb[157].mxu0 }
 0xced   : > { %12317 = vst [vmem:[#allocation156_spill] sm:$0xff] %v11096_v13  ;;  %v6248_v53 = vadd.f32 %v6247_v26, %v6246_v36  ;;  %v6249_v34 = vpop.f32.mrb[158].mxu0  ;;  %4614 = vadd.xlane.f32.xlu0 %v4586_v11  ;;  %v4587_v46 = vmul.f32 %v11096_v13, %v11096_v13 }
 0xcee   : > { %v6250_v35 = vpop.f32.mrb[159].mxu0 }
 0xcef   : > { %v4552_v21 = vadd.f32 %v6248_v53, %v11014_v56  ;;  %v6251_v9 = vadd.f32 %v6250_v35, %v6249_v34  ;;  %4616 = vadd.xlane.f32.xlu1 %v4587_v46  ;;  %v6923_v56 = vld [vmem:[#allocation17 + $0x40] sm:$0xff]  }
 0xcf0   : > { %6572 = vmatprep.subr.bf16.mxu1 %v6923_v56  ;;  %6252 = vmatprep.subr.bf16.mxu0 %v6923_v56 }
 0xcf1   : > { %v11104_v38 = vadd.f32 %v7435_v14, %v4552_v21  ;;  %v4555_v51 = vadd.f32 %v6251_v9, %v11016_v28 }
 0xcf3   : > { %12318 = vst [vmem:[#allocation152_spill] sm:$0xff] %v11104_v38  ;;  %v11108_v42 = vadd.f32 %v7436_v52, %v4555_v51  ;;  %v4588_v2 = vmul.f32 %v11104_v38, %v11104_v38 }
 0xcf5   : > { %12319 = vst [vmem:[#allocation107_spill] sm:$0xff] %v11108_v42  ;;  %4618 = vadd.xlane.f32.xlu0 %v4588_v2  ;;  %v4589_v15 = vmul.f32 %v11108_v42, %v11108_v42 }
 0xcf7   : > { %4620 = vadd.xlane.f32.xlu1 %v4589_v15 }
 0xd4a   : > { %v4591_v44 = vpop.xlane.xlu0 %4590 }
 0xd4b   : > { %v4622_v58 = vmul.f32 0.0078125, %v4591_v44 }
 0xd4c   : > { %v4593_v41 = vpop.xlane.xlu1 %4592 }
 0xd4d   : > { %v4638_v33 = vadd.f32 1e-05, %v4622_v58  ;;  %v4623_v61 = vmul.f32 0.0078125, %v4593_v41 }
 0xd4f   : > { %7227 = vrsqrt.f32 %v4638_v33  ;;  %v4639_v28 = vadd.f32 1e-05, %v4623_v61 }
 0xd51   : > { %7229 = vrsqrt.f32 %v4639_v28 }
 0xd52   : > { %v4595_v27 = vpop.xlane.xlu0 %4594 }
 0xd53   : > { %v4624_v39 = vmul.f32 0.0078125, %v4595_v27 }
 0xd54   : > { %v4597_v31 = vpop.xlane.xlu1 %4596 }
 0xd55   : > { %v4640_v50 = vadd.f32 1e-05, %v4624_v39  ;;  %v4625_v48 = vmul.f32 0.0078125, %v4597_v31 }
 0xd57   : > { %7231 = vrsqrt.f32 %v4640_v50  ;;  %v4641_v57 = vadd.f32 1e-05, %v4625_v48 }
 0xd59   : > { %v7228_v17 = vpop.eup %7227  ;;  %7233 = vrsqrt.f32 %v4641_v57 }
 0xd5a   : > { %v4670_v12 = vmul.f32 %v7228_v17, %v11020_v10  ;;  %v4599_v29 = vpop.xlane.xlu0 %4598 }
 0xd5b   : > { %v7230_v19 = vpop.eup %7229  ;;  %v4626_v43 = vmul.f32 0.0078125, %v4599_v29 }
 0xd5c   : > { %v4671_v25 = vmul.f32 %v7230_v19, %v11024_v16  ;;  %v4601_v7 = vpop.xlane.xlu1 %4600  ;;  %v4693_v60 = vmul.f32 %v11118_v4, %v4670_v12 }
 0xd5d   : > { %v4642_v30 = vadd.f32 1e-05, %v4626_v43  ;;  %v4627_v32 = vmul.f32 0.0078125, %v4601_v7 }
 0xd5e   : > { %v4694_v6 = vmul.f32 %v11118_v4, %v4671_v25 }
 0xd5f   : > { %7235 = vrsqrt.f32 %v4642_v30  ;;  %v4643_v5 = vadd.f32 1e-05, %v4627_v32 }
 0xd60   : > { %v4709_v47 = vpack.c.bf16 %v4694_v6, %v4693_v60 }
 0xd61   : > { %v7232_v54 = vpop.eup %7231  ;;  %7237 = vrsqrt.f32 %v4643_v5 }
 0xd62   : > { %4846 = vmatmul.mubr.bf16.vlgmr.msra.gmra.mrb[160].mxu1 %v4709_v47  ;;  %v4603_v37 = vpop.xlane.xlu0 %4602  ;;  %5055 = vmatmul.mubr.bf16.vlgmr.msra.gmra.mrb[160].mxu0 %v4709_v47  ;;  %v4672_v55 = vmul.f32 %v7232_v54, %v11032_v23 }
 0xd63   : > { %v7234_v36 = vpop.eup %7233  ;;  %v4628_v11 = vmul.f32 0.0078125, %v4603_v37  ;;  %4855 = vmatprep.mubr.bf16.mxu1 %v12295_v49  ;;  %5064 = vmatprep.mubr.bf16.mxu0 %v12295_v49 }
 0xd64   : > { %v4605_v8 = vpop.xlane.xlu1 %4604  ;;  %v4673_v26 = vmul.f32 %v7234_v36, %v11036_v45  ;;  %6580 = vmatpush3.bf16.msra.mxu1 %v6924_v24  ;;  %6253 = vmatpush3.bf16.msra.mxu0 %v6924_v24  ;;  %v4695_v46 = vmul.f32 %v11118_v4, %v4672_v55 }
 0xd65   : > { %v4644_v53 = vadd.f32 1e-05, %v4628_v11  ;;  %v4629_v34 = vmul.f32 0.0078125, %v4605_v8  ;;  %6573 = vmatprep.subr.bf16.mxu1 %v6925_v0  ;;  %6254 = vmatprep.subr.bf16.mxu0 %v6925_v0 }
 0xd66   : > { %v4696_v35 = vmul.f32 %v11118_v4, %v4673_v26 }
 0xd67   : > { %7239 = vrsqrt.f32 %v4644_v53  ;;  %v4645_v21 = vadd.f32 1e-05, %v4629_v34 }
 0xd68   : > { %v4710_v9 = vpack.c.bf16 %v4696_v35, %v4695_v46 }
 0xd69   : > { %v7236_v14 = vpop.eup %7235  ;;  %7241 = vrsqrt.f32 %v4645_v21 }
 0xd6a   : > { %4856 = vmatmul.mubr.bf16.gmra.mrb[164].mxu1 %v4710_v9  ;;  %v4607_v51 = vpop.xlane.xlu0 %4606  ;;  %5065 = vmatmul.mubr.bf16.gmra.mrb[164].mxu0 %v4710_v9  ;;  %v4674_v52 = vmul.f32 %v7236_v14, %v11044_v40 }
 0xd6b   : > { %v7238_v2 = vpop.eup %7237  ;;  %v4630_v15 = vmul.f32 0.0078125, %v4607_v51  ;;  %4865 = vmatprep.mubr.bf16.mxu1 %v12295_v49  ;;  %5074 = vmatprep.mubr.bf16.mxu0 %v12295_v49 }
 0xd6c   : > { %v4609_v56 = vpop.xlane.xlu1 %4608  ;;  %v4675_v44 = vmul.f32 %v7238_v2, %v11048_v59  ;;  %v4697_v33 = vmul.f32 %v11118_v4, %v4674_v52 }
 0xd6d   : > { %v4646_v58 = vadd.f32 1e-05, %v4630_v15  ;;  %v4631_v41 = vmul.f32 0.0078125, %v4609_v56 }
 0xd6e   : > { %v4698_v61 = vmul.f32 %v11118_v4, %v4675_v44 }
 0xd6f   : > { %7243 = vrsqrt.f32 %v4646_v58  ;;  %v4647_v28 = vadd.f32 1e-05, %v4631_v41 }
 0xd70   : > { %v4711_v27 = vpack.c.bf16 %v4698_v61, %v4697_v33 }
 0xd71   : > { %v7240_v39 = vpop.eup %7239  ;;  %7245 = vrsqrt.f32 %v4647_v28 }
 0xd72   : > { %4866 = vmatmul.mubr.bf16.gmra.mrb[168].mxu1 %v4711_v27  ;;  %v4611_v31 = vpop.xlane.xlu0 %4610  ;;  %5075 = vmatmul.mubr.bf16.gmra.mrb[168].mxu0 %v4711_v27  ;;  %v4676_v50 = vmul.f32 %v7240_v39, %v11056_v18 }
 0xd73   : > { %v7242_v48 = vpop.eup %7241  ;;  %v4632_v57 = vmul.f32 0.0078125, %v4611_v31  ;;  %4875 = vmatprep.mubr.bf16.mxu1 %v12295_v49  ;;  %5084 = vmatprep.mubr.bf16.mxu0 %v12295_v49 }
 0xd74   : > { %v4613_v17 = vpop.xlane.xlu1 %4612  ;;  %v4677_v12 = vmul.f32 %v7242_v48, %v11060_v1  ;;  %v4699_v43 = vmul.f32 %v11118_v4, %v4676_v50 }
 0xd75   : > { %v4648_v29 = vadd.f32 1e-05, %v4632_v57  ;;  %v4633_v19 = vmul.f32 0.0078125, %v4613_v17 }
 0xd76   : > { %v4700_v25 = vmul.f32 %v11118_v4, %v4677_v12 }
 0xd77   : > { %7247 = vrsqrt.f32 %v4648_v29  ;;  %v4649_v7 = vadd.f32 1e-05, %v4633_v19  ;;  %v6926_v29 = vld [vmem:[#allocation17 + $0x8] sm:$0xff]   ;;  %v6927_v19 = vld [vmem:[#allocation17 + $0x50] sm:$0xff]  }
 0xd78   : > { %v4712_v30 = vpack.c.bf16 %v4700_v25, %v4699_v43  ;;  %6581 = vmatpush3.bf16.msra.mxu1 %v6926_v29  ;;  %6255 = vmatpush3.bf16.msra.mxu0 %v6926_v29  ;;  %v6928_v43 = vld [vmem:[#allocation17 + $0x10] sm:$0xff]   ;;  %v6929_v25 = vld [vmem:[#allocation17 + $0x58] sm:$0xff]  }
 0xd79   : > { %v7244_v32 = vpop.eup %7243  ;;  %7249 = vrsqrt.f32 %v4649_v7  ;;  %6574 = vmatprep.subr.bf16.mxu1 %v6927_v19  ;;  %6256 = vmatprep.subr.bf16.mxu0 %v6927_v19  ;;  %v6931_v7 = vld [vmem:[#allocation17 + $0x60] sm:$0xff]  }
 0xd7a   : > { %4876 = vmatmul.mubr.bf16.gmra.mrb[172].mxu1 %v4712_v30  ;;  %5085 = vmatmul.mubr.bf16.gmra.mrb[172].mxu0 %v4712_v30  ;;  %v4615_v60 = vpop.xlane.xlu0 %4614  ;;  %v4678_v6 = vmul.f32 %v7244_v32, %v11068_v63  ;;  %v6933_v30 = vld [vmem:[#allocation17 + $0x68] sm:$0xff]  }
 0xd7b   : > { %v7246_v5 = vpop.eup %7245  ;;  %v4634_v47 = vmul.f32 0.0078125, %v4615_v60  ;;  %4885 = vmatprep.mubr.bf16.mxu1 %v12295_v49  ;;  %5094 = vmatprep.mubr.bf16.mxu0 %v12295_v49  ;;  %v6934_v32 = vld [vmem:[#allocation17 + $0x28] sm:$0xff]   ;;  %v6935_v60 = vld [vmem:[#allocation17 + $0x70] sm:$0xff]  }
 0xd7c   : > { %v4617_v24 = vpop.xlane.xlu1 %4616  ;;  %v4679_v54 = vmul.f32 %v7246_v5, %v11072_v20  ;;  %v4701_v55 = vmul.f32 %v11118_v4, %v4678_v6  ;;  %6582 = vmatpush3.bf16.msra.mxu1 %v6928_v43  ;;  %6257 = vmatpush3.bf16.msra.mxu0 %v6928_v43  ;;  %v6936_v6 = vld [vmem:[#allocation17 + $0x30] sm:$0xff]   ;;  %v6937_v5 = vld [vmem:[#allocation17 + $0x78] sm:$0xff]  }
 0xd7d   : > { %v4650_v0 = vadd.f32 1e-05, %v4634_v47  ;;  %v4635_v37 = vmul.f32 0.0078125, %v4617_v24  ;;  %6575 = vmatprep.subr.bf16.mxu1 %v6929_v25  ;;  %6258 = vmatprep.subr.bf16.mxu0 %v6929_v25  ;;  %v6938_v47 = vld [vmem:[#allocation17 + $0x38] sm:$0xff]  }
 0xd7e   : > { %v4702_v36 = vmul.f32 %v11118_v4, %v4679_v54 }
 0xd7f   : > { %7251 = vrsqrt.f32 %v4650_v0  ;;  %v4651_v11 = vadd.f32 1e-05, %v4635_v37 }
 0xd80   : > { %v4713_v8 = vpack.c.bf16 %v4702_v36, %v4701_v55 }
 0xd81   : > { %v7248_v26 = vpop.eup %7247  ;;  %7253 = vrsqrt.f32 %v4651_v11 }
 0xd82   : > { %4886 = vmatmul.mubr.bf16.gmra.mrb[176].mxu1 %v4713_v8  ;;  %5095 = vmatmul.mubr.bf16.gmra.mrb[176].mxu0 %v4713_v8  ;;  %v4619_v53 = vpop.xlane.xlu0 %4618  ;;  %v4680_v34 = vmul.f32 %v7248_v26, %v11080_v22 }
 0xd83   : > { %v7250_v46 = vpop.eup %7249  ;;  %v4636_v35 = vmul.f32 0.0078125, %v4619_v53  ;;  %4895 = vmatprep.mubr.bf16.mxu1 %v12295_v49  ;;  %5104 = vmatprep.mubr.bf16.mxu0 %v12295_v49 }
 0xd84   : > { %v4621_v21 = vpop.xlane.xlu1 %4620  ;;  %v4681_v9 = vmul.f32 %v7250_v46, %v11084_v3  ;;  %v4703_v52 = vmul.f32 %v11118_v4, %v4680_v34 }
 0xd85   : > { %v4652_v14 = vadd.f32 1e-05, %v4636_v35  ;;  %v4637_v51 = vmul.f32 0.0078125, %v4621_v21 }
 0xd86   : > { %v4704_v2 = vmul.f32 %v11118_v4, %v4681_v9 }
 0xd87   : > { %7255 = vrsqrt.f32 %v4652_v14  ;;  %v4653_v15 = vadd.f32 1e-05, %v4637_v51 }
 0xd88   : > { %v4714_v56 = vpack.c.bf16 %v4704_v2, %v4703_v52 }
 0xd89   : > { %v7252_v44 = vpop.eup %7251  ;;  %7257 = vrsqrt.f32 %v4653_v15 }
 0xd8a   : > { %4896 = vmatmul.mubr.bf16.gmra.mrb[180].mxu1 %v4714_v56  ;;  %5105 = vmatmul.mubr.bf16.gmra.mrb[180].mxu0 %v4714_v56  ;;  %v4682_v58 = vmul.f32 %v7252_v44, %v11092_v62 }
 0xd8b   : > { %v7254_v41 = vpop.eup %7253  ;;  %4905 = vmatprep.mubr.bf16.mxu1 %v12295_v49  ;;  %5114 = vmatprep.mubr.bf16.mxu0 %v12295_v49 }
 0xd8c   : > { %v4683_v33 = vmul.f32 %v7254_v41, %v11096_v13  ;;  %v4705_v61 = vmul.f32 %v11118_v4, %v4682_v58 }
 0xd8e   : > { %v4706_v28 = vmul.f32 %v11118_v4, %v4683_v33 }
 0xd90   : > { %v4715_v27 = vpack.c.bf16 %v4706_v28, %v4705_v61 }
 0xd91   : > { %v7256_v39 = vpop.eup %7255 }
 0xd92   : > { %4906 = vmatmul.mubr.bf16.gmra.mrb[184].mxu1 %v4715_v27  ;;  %5115 = vmatmul.mubr.bf16.gmra.mrb[184].mxu0 %v4715_v27  ;;  %v4684_v31 = vmul.f32 %v7256_v39, %v11104_v38 }
 0xd93   : > { %v7258_v50 = vpop.eup %7257  ;;  %4915 = vmatprep.mubr.bf16.mxu1 %v12295_v49  ;;  %5124 = vmatprep.mubr.bf16.mxu0 %v12295_v49  ;;  %v6930_v49 = vld [vmem:[#allocation17 + $0x18] sm:$0xff]  }
 0xd94   : > { %v4685_v48 = vmul.f32 %v7258_v50, %v11108_v42  ;;  %v4707_v57 = vmul.f32 %v11118_v4, %v4684_v31  ;;  %6583 = vmatpush3.bf16.msra.mxu1 %v6930_v49  ;;  %6259 = vmatpush3.bf16.msra.mxu0 %v6930_v49 }
 0xd95   : > { %6260 = vmatprep.subr.bf16.mxu0 %v6931_v7  ;;  %6576 = vmatprep.subr.bf16.mxu1 %v6931_v7 }
 0xd96   : > { %v4708_v17 = vmul.f32 %v11118_v4, %v4685_v48  ;;  %v6932_v4 = vld [vmem:[#allocation17 + $0x20] sm:$0xff]  }
 0xd98   : > { %v4716_v12 = vpack.c.bf16 %v4708_v17, %v4707_v57  ;;  %6261 = vmatpush3.bf16.msra.mxu0 %v6932_v4  ;;  %6584 = vmatpush3.bf16.msra.mxu1 %v6932_v4 }
 0xd99   : > { %6262 = vmatprep.subr.bf16.mxu0 %v6933_v30  ;;  %6577 = vmatprep.subr.bf16.mxu1 %v6933_v30 }
 0xd9a   : > { %4916 = vmatmul.mubr.bf16.gmra.mrb[188].mxu1 %v4716_v12  ;;  %5125 = vmatmul.mubr.bf16.gmra.mrb[188].mxu0 %v4716_v12 }
 0xd9c   : > { %6263 = vmatpush3.bf16.msra.mxu0 %v6934_v32  ;;  %6585 = vmatpush3.bf16.msra.mxu1 %v6934_v32 }
 0xd9d   : > { %6264 = vmatprep.subr.bf16.mxu0 %v6935_v60  ;;  %6578 = vmatprep.subr.bf16.mxu1 %v6935_v60 }
 0xda0   : > { %6265 = vmatpush3.bf16.msra.mxu0 %v6936_v6  ;;  %6586 = vmatpush3.bf16.msra.mxu1 %v6936_v6 }
 0xda1   : > { %6266 = vmatprep.subr.bf16.mxu0 %v6937_v5  ;;  %6579 = vmatprep.subr.bf16.mxu1 %v6937_v5 }
 0xda4   : > { %6267 = vmatpush3.bf16.msra.mxu0 %v6938_v47  ;;  %6587 = vmatpush3.bf16.msra.mxu1 %v6938_v47 }
 0xe35   : > { %v11165_v24 = vpop.f32.mrb[160].mxu1  ;;  %v11167_v54 = vpop.f32.mrb[160].mxu0 }
 0xe36   : > { %v5135_v0 = vsub.f32 0.0, %v11165_v24  ;;  %v11170_v37 = vpop.f32.mrb[161].mxu1  ;;  %v11172_v55 = vpop.f32.mrb[161].mxu0 }
 0xe37   : > { %v5136_v36 = vsub.f32 0.0, %v11170_v37  ;;  %v11175_v11 = vpop.f32.mrb[162].mxu1  ;;  %v11177_v8 = vpop.f32.mrb[162].mxu0 }
 0xe38   : > { %v5167_v26 = vmul.f32 1.442695, %v5135_v0  ;;  %v5137_v53 = vsub.f32 0.0, %v11175_v11  ;;  %v11180_v34 = vpop.f32.mrb[163].mxu1  ;;  %v11182_v46 = vpop.f32.mrb[163].mxu0 }
 0xe39   : > { %v5169_v35 = vmul.f32 1.442695, %v5136_v36  ;;  %v5138_v21 = vsub.f32 0.0, %v11180_v34 }
 0xe3a   : > { %7259 = vpow2.f32 %v5167_v26  ;;  %v5171_v9 = vmul.f32 1.442695, %v5137_v53 }
 0xe3b   : > { %7261 = vpow2.f32 %v5169_v35  ;;  %v5173_v14 = vmul.f32 1.442695, %v5138_v21 }
 0xe3c   : > { %7263 = vpow2.f32 %v5171_v9 }
 0xe3d   : > { %7265 = vpow2.f32 %v5173_v14  ;;  %v11185_v51 = vpop.f32.mrb[164].mxu1  ;;  %v11187_v52 = vpop.f32.mrb[164].mxu0 }
 0xe3e   : > { %v5139_v2 = vsub.f32 0.0, %v11185_v51  ;;  %v11190_v15 = vpop.f32.mrb[165].mxu1  ;;  %v11192_v56 = vpop.f32.mrb[165].mxu0 }
 0xe3f   : > { %v5140_v44 = vsub.f32 0.0, %v11190_v15  ;;  %v11195_v58 = vpop.f32.mrb[166].mxu1  ;;  %v11197_v41 = vpop.f32.mrb[166].mxu0 }
 0xe40   : > { %v5175_v33 = vmul.f32 1.442695, %v5139_v2  ;;  %v5141_v61 = vsub.f32 0.0, %v11195_v58  ;;  %v11200_v28 = vpop.f32.mrb[167].mxu1  ;;  %v11202_v27 = vpop.f32.mrb[167].mxu0 }
 0xe41   : > { %v5177_v39 = vmul.f32 1.442695, %v5140_v44  ;;  %v5142_v31 = vsub.f32 0.0, %v11200_v28 }
 0xe42   : > { %7267 = vpow2.f32 %v5175_v33  ;;  %v5179_v50 = vmul.f32 1.442695, %v5141_v61 }
 0xe43   : > { %7269 = vpow2.f32 %v5177_v39  ;;  %v5181_v48 = vmul.f32 1.442695, %v5142_v31 }
 0xe44   : > { %v7260_v57 = vpop.eup %7259  ;;  %7271 = vpow2.f32 %v5179_v50 }
 0xe45   : > { %v7262_v17 = vpop.eup %7261  ;;  %v5231_v12 = vadd.f32 1.0, %v7260_v57  ;;  %7273 = vpow2.f32 %v5181_v48  ;;  %v11205_v29 = vpop.f32.mrb[168].mxu1 }
 0xe46   : > { %v11207_v19 = vpop.f32.mrb[168].mxu0  ;;  %v7264_v43 = vpop.eup %7263  ;;  %v5232_v25 = vadd.f32 1.0, %v7262_v17  ;;  %v5143_v49 = vsub.f32 0.0, %v11205_v29 }
 0xe47   : > { %v11210_v7 = vpop.f32.mrb[169].mxu1  ;;  %v11212_v4 = vpop.f32.mrb[169].mxu0  ;;  %7275 = vrcp.f32 %v5231_v12  ;;  %v5233_v32 = vadd.f32 1.0, %v7264_v43 }
 0xe48   : > { %v7266_v30 = vpop.eup %7265  ;;  %v5144_v60 = vsub.f32 0.0, %v11210_v7  ;;  %v11215_v6 = vpop.f32.mrb[170].mxu1  ;;  %7277 = vrcp.f32 %v5232_v25  ;;  %v5183_v0 = vmul.f32 1.442695, %v5143_v49 }
 0xe49   : > { %v11217_v5 = vpop.f32.mrb[170].mxu0  ;;  %v5234_v47 = vadd.f32 1.0, %v7266_v30  ;;  %v5145_v36 = vsub.f32 0.0, %v11215_v6  ;;  %v11220_v26 = vpop.f32.mrb[171].mxu1  ;;  %7279 = vrcp.f32 %v5233_v32 }
 0xe4a   : > { %v11222_v53 = vpop.f32.mrb[171].mxu0  ;;  %v5185_v35 = vmul.f32 1.442695, %v5144_v60  ;;  %v5146_v21 = vsub.f32 0.0, %v11220_v26 }
 0xe4b   : > { %7281 = vrcp.f32 %v5234_v47  ;;  %v5187_v9 = vmul.f32 1.442695, %v5145_v36 }
 0xe4c   : > { %7283 = vpow2.f32 %v5183_v0  ;;  %v5189_v14 = vmul.f32 1.442695, %v5146_v21  ;;  %v7268_v2 = vpop.eup %7267 }
 0xe4d   : > { %7285 = vpow2.f32 %v5185_v35  ;;  %v7270_v44 = vpop.eup %7269  ;;  %v5235_v33 = vadd.f32 1.0, %v7268_v2  ;;  %v11225_v61 = vpop.f32.mrb[172].mxu1 }
 0xe4e   : > { %7287 = vpow2.f32 %v5187_v9  ;;  %v11227_v39 = vpop.f32.mrb[172].mxu0  ;;  %v7272_v31 = vpop.eup %7271  ;;  %v5236_v50 = vadd.f32 1.0, %v7270_v44  ;;  %v5147_v48 = vsub.f32 0.0, %v11225_v61 }
 0xe4f   : > { %7289 = vpow2.f32 %v5189_v14  ;;  %v11230_v57 = vpop.f32.mrb[173].mxu1  ;;  %v11232_v17 = vpop.f32.mrb[173].mxu0  ;;  %v5237_v43 = vadd.f32 1.0, %v7272_v31 }
 0xe50   : > { %v7274_v12 = vpop.eup %7273  ;;  %7291 = vrcp.f32 %v5235_v33  ;;  %v5148_v25 = vsub.f32 0.0, %v11230_v57  ;;  %v11235_v49 = vpop.f32.mrb[174].mxu1  ;;  %v5191_v60 = vmul.f32 1.442695, %v5147_v48 }
 0xe51   : > { %v11237_v30 = vpop.f32.mrb[174].mxu0  ;;  %7293 = vrcp.f32 %v5236_v50  ;;  %v5238_v32 = vadd.f32 1.0, %v7274_v12  ;;  %v5149_v47 = vsub.f32 0.0, %v11235_v49  ;;  %v11240_v0 = vpop.f32.mrb[175].mxu1 }
 0xe52   : > { %v11242_v36 = vpop.f32.mrb[175].mxu0  ;;  %v7276_v35 = vpop.eup %7275  ;;  %7295 = vrcp.f32 %v5237_v43  ;;  %v5193_v21 = vmul.f32 1.442695, %v5148_v25  ;;  %v5150_v9 = vsub.f32 0.0, %v11240_v0 }
 0xe53   : > { %v7278_v14 = vpop.eup %7277  ;;  %v5295_v2 = vmul.f32 %v7276_v35, %v11165_v24  ;;  %7297 = vrcp.f32 %v5238_v32  ;;  %v5195_v44 = vmul.f32 1.442695, %v5149_v47 }
 0xe54   : > { %v7280_v33 = vpop.eup %7279  ;;  %v5296_v31 = vmul.f32 %v7278_v14, %v11170_v37  ;;  %7299 = vpow2.f32 %v5191_v60  ;;  %v5197_v50 = vmul.f32 1.442695, %v5150_v9 }
 0xe55   : > { %v7282_v48 = vpop.eup %7281  ;;  %v5327_v12 = vmul.f32 %v5295_v2, %v11167_v54  ;;  %v5297_v42 = vmul.f32 %v7280_v33, %v11175_v11  ;;  %7301 = vpow2.f32 %v5193_v21  ;;  %v11251_v24 = vpop.f32.mrb[176].mxu1 }
 0xe56   : > { %v7284_v43 = vpop.eup %7283  ;;  %v5328_v25 = vmul.f32 %v5296_v31, %v11172_v55  ;;  %v5298_v38 = vmul.f32 %v7282_v48, %v11180_v34  ;;  %7303 = vpow2.f32 %v5195_v44  ;;  %v11253_v32 = vpop.f32.mrb[176].mxu0  ;;  %v5151_v54 = vsub.f32 0.0, %v11251_v24 }
 0xe57   : > { %v7286_v47 = vpop.eup %7285  ;;  %v5329_v37 = vmul.f32 %v5297_v42, %v11177_v8  ;;  %v5239_v60 = vadd.f32 1.0, %v7284_v43  ;;  %7305 = vpow2.f32 %v5197_v50  ;;  %v11257_v35 = vpop.f32.mrb[177].mxu1 }
 0xe58   : > { %v11259_v11 = vpop.f32.mrb[177].mxu0  ;;  %v7288_v21 = vpop.eup %7287  ;;  %v5330_v55 = vmul.f32 %v5298_v38, %v11182_v46  ;;  %v5240_v34 = vadd.f32 1.0, %v7286_v47  ;;  %v5152_v9 = vsub.f32 0.0, %v11257_v35  ;;  %v5199_v33 = vmul.f32 1.442695, %v5151_v54 }
 0xe59   : > { %v11263_v14 = vpop.f32.mrb[178].mxu1  ;;  %v11265_v2 = vpop.f32.mrb[178].mxu0  ;;  %v5359_v42 = vpack.c.bf16 %v5329_v37, %v5327_v12  ;;  %7307 = vrcp.f32 %v5239_v60  ;;  %v5241_v8 = vadd.f32 1.0, %v7288_v21 }
 0xe5a   : > { %v7290_v44 = vpop.eup %7289  ;;  %v11267_v31 = vpop.f32.mrb[179].mxu1  ;;  %v5360_v43 = vpack.c.bf16 %v5330_v55, %v5328_v25  ;;  %7309 = vrcp.f32 %v5240_v34  ;;  %v5201_v46 = vmul.f32 1.442695, %v5152_v9  ;;  %v5153_v62 = vsub.f32 0.0, %v11263_v14 }
 0xe5b   : > { %v11269_v50 = vpop.f32.mrb[179].mxu0  ;;  %v7292_v48 = vpop.eup %7291  ;;  %v5242_v38 = vadd.f32 1.0, %v7290_v44  ;;  %7311 = vrcp.f32 %v5241_v8  ;;  %v5154_v12 = vsub.f32 0.0, %v11267_v31 }
 0xe5c   : > { %v7294_v47 = vpop.eup %7293  ;;  %v5299_v13 = vmul.f32 %v7292_v48, %v11185_v51  ;;  %5535 = vmatprep.mubr.bf16.mxu0 %v5360_v43  ;;  %v5203_v55 = vmul.f32 1.442695, %v5153_v62 }
 0xe5d   : > { %v7296_v37 = vpop.eup %7295  ;;  %v5300_v60 = vmul.f32 %v7294_v47, %v11190_v15  ;;  %7313 = vrcp.f32 %v5242_v38  ;;  %5536 = vmatmul.mubr.bf16.vlgmr.msra.gmra.mrb[192].mxu0 %v5359_v42  ;;  %v5205_v44 = vmul.f32 1.442695, %v5154_v12  ;;  %v11279_v8 = vpop.f32.mrb[180].mxu1 }
 0xe5e   : > { %v7298_v54 = vpop.eup %7297  ;;  %v5331_v21 = vmul.f32 %v5299_v13, %v11187_v52  ;;  %v5301_v25 = vmul.f32 %v7296_v37, %v11195_v58  ;;  %7315 = vpow2.f32 %v5199_v33  ;;  %v11281_v15 = vpop.f32.mrb[180].mxu0  ;;  %v5155_v52 = vsub.f32 0.0, %v11279_v8 }
 0xe5f   : > { %v7300_v34 = vpop.eup %7299  ;;  %v5332_v51 = vmul.f32 %v5300_v60, %v11192_v56  ;;  %v5302_v9 = vmul.f32 %v7298_v54, %v11200_v28  ;;  %7317 = vpow2.f32 %v5201_v46  ;;  %v11285_v62 = vpop.f32.mrb[181].mxu1 }
 0xe60   : > { %v7302_v48 = vpop.eup %7301  ;;  %v5333_v43 = vmul.f32 %v5301_v25, %v11197_v41  ;;  %v5243_v13 = vadd.f32 1.0, %v7300_v34  ;;  %7319 = vpow2.f32 %v5203_v55  ;;  %v11287_v58 = vpop.f32.mrb[181].mxu0  ;;  %v5156_v33 = vsub.f32 0.0, %v11285_v62 }
 0xe61   : > { %v7304_v56 = vpop.eup %7303  ;;  %v5334_v28 = vmul.f32 %v5302_v9, %v11202_v27  ;;  %v5244_v42 = vadd.f32 1.0, %v7302_v48  ;;  %7321 = vpow2.f32 %v5205_v44  ;;  %v11291_v38 = vpop.f32.mrb[182].mxu1  ;;  %v5207_v37 = vmul.f32 1.442695, %v5155_v52 }
 0xe62   : > { %v11293_v46 = vpop.f32.mrb[182].mxu0  ;;  %v7306_v41 = vpop.eup %7305  ;;  %v5361_v47 = vpack.c.bf16 %v5333_v43, %v5331_v21  ;;  %7323 = vrcp.f32 %v5243_v13  ;;  %v5245_v12 = vadd.f32 1.0, %v7304_v56  ;;  %v5209_v55 = vmul.f32 1.442695, %v5156_v33 }
 0xe63   : > { %v11295_v60 = vpop.f32.mrb[183].mxu1  ;;  %v11297_v54 = vpop.f32.mrb[183].mxu0  ;;  %v5362_v25 = vpack.c.bf16 %v5334_v28, %v5332_v51  ;;  %7325 = vrcp.f32 %v5244_v42  ;;  %v5246_v27 = vadd.f32 1.0, %v7306_v41  ;;  %v5157_v9 = vsub.f32 0.0, %v11291_v38 }
 0xe64   : > { %v7308_v34 = vpop.eup %7307  ;;  %7327 = vrcp.f32 %v5245_v12  ;;  %v5158_v44 = vsub.f32 0.0, %v11295_v60 }
 0xe65   : > { %v7310_v48 = vpop.eup %7309  ;;  %v5303_v21 = vmul.f32 %v7308_v34, %v11205_v29  ;;  %7329 = vrcp.f32 %v5246_v27  ;;  %5543 = vmatprep.mubr.bf16.mxu0 %v5362_v25  ;;  %v5211_v52 = vmul.f32 1.442695, %v5157_v9  ;;  %v11305_v33 = vpop.f32.mrb[184].mxu1 }
 0xe66   : > { %v7312_v43 = vpop.eup %7311  ;;  %v5304_v13 = vmul.f32 %v7310_v48, %v11210_v7  ;;  %7331 = vpow2.f32 %v5207_v37  ;;  %v5213_v51 = vmul.f32 1.442695, %v5158_v44  ;;  %5544 = vmatmul.mubr.bf16.gmra.mrb[196].mxu0 %v5361_v47  ;;  %v11307_v41 = vpop.f32.mrb[184].mxu0  ;;  %v5159_v7 = vsub.f32 0.0, %v11305_v33 }
 0xe67   : > { %v7314_v56 = vpop.eup %7313  ;;  %v5335_v28 = vmul.f32 %v5303_v21, %v11207_v19  ;;  %v5305_v42 = vmul.f32 %v7312_v43, %v11215_v6  ;;  %7333 = vpow2.f32 %v5209_v55  ;;  %v11312_v37 = vpop.f32.mrb[185].mxu1 }
 0xe68   : > { %v7316_v29 = vpop.eup %7315  ;;  %v5336_v12 = vmul.f32 %v5304_v13, %v11212_v4  ;;  %v5306_v25 = vmul.f32 %v7314_v56, %v11220_v26  ;;  %7335 = vpow2.f32 %v5211_v52  ;;  %v11314_v47 = vpop.f32.mrb[185].mxu0  ;;  %v5160_v55 = vsub.f32 0.0, %v11312_v37 }
 0xe69   : > { %v7318_v19 = vpop.eup %7317  ;;  %v5337_v6 = vmul.f32 %v5305_v42, %v11217_v5  ;;  %v5247_v27 = vadd.f32 1.0, %v7316_v29  ;;  %7337 = vpow2.f32 %v5213_v51  ;;  %v11318_v34 = vpop.f32.mrb[186].mxu1  ;;  %v5215_v51 = vmul.f32 1.442695, %v5159_v7 }
 0xe6a   : > { %v11320_v9 = vpop.f32.mrb[186].mxu0  ;;  %v7320_v4 = vpop.eup %7319  ;;  %v5338_v26 = vmul.f32 %v5306_v25, %v11222_v53  ;;  %v5248_v44 = vadd.f32 1.0, %v7318_v19  ;;  %v5161_v48 = vsub.f32 0.0, %v11318_v34  ;;  %v5217_v3 = vmul.f32 1.442695, %v5160_v55 }
 0xe6b   : > { %v11324_v21 = vpop.f32.mrb[187].mxu1  ;;  %v11326_v43 = vpop.f32.mrb[187].mxu0  ;;  %v5363_v5 = vpack.c.bf16 %v5337_v6, %v5335_v28  ;;  %7339 = vrcp.f32 %v5247_v27  ;;  %v5249_v52 = vadd.f32 1.0, %v7320_v4 }
 0xe6c   : > { %v7322_v13 = vpop.eup %7321  ;;  %v5364_v42 = vpack.c.bf16 %v5338_v26, %v5336_v12  ;;  %7341 = vrcp.f32 %v5248_v44  ;;  %v5219_v25 = vmul.f32 1.442695, %v5161_v48  ;;  %v5162_v19 = vsub.f32 0.0, %v11324_v21 }
 0xe6d   : > { %v7324_v56 = vpop.eup %7323  ;;  %v5250_v29 = vadd.f32 1.0, %v7322_v13  ;;  %7343 = vrcp.f32 %v5249_v52  ;;  %v11333_v27 = vpop.f32.mrb[188].mxu1 }
 0xe6e   : > { %v7326_v22 = vpop.eup %7325  ;;  %v5307_v53 = vmul.f32 %v7324_v56, %v11225_v61  ;;  %5551 = vmatprep.mubr.bf16.mxu1 %v5364_v42  ;;  %v5221_v6 = vmul.f32 1.442695, %v5162_v19  ;;  %v11335_v61 = vpop.f32.mrb[188].mxu0 }
 0xe6f   : > { %v7328_v20 = vpop.eup %7327  ;;  %v5308_v63 = vmul.f32 %v7326_v22, %v11230_v57  ;;  %7345 = vrcp.f32 %v5250_v29  ;;  %5552 = vmatmul.mubr.bf16.vlgmr.msra.gmra.mrb[192].mxu1 %v5363_v5  ;;  %v5163_v22 = vsub.f32 0.0, %v11333_v27  ;;  %v11340_v57 = vpop.f32.mrb[189].mxu1 }
 0xe70   : > { %v7330_v28 = vpop.eup %7329  ;;  %v5339_v7 = vmul.f32 %v5307_v53, %v11227_v39  ;;  %v5309_v12 = vmul.f32 %v7328_v20, %v11235_v49  ;;  %7347 = vpow2.f32 %v5215_v51  ;;  %v11342_v39 = vpop.f32.mrb[189].mxu0  ;;  %v5164_v48 = vsub.f32 0.0, %v11340_v57 }
 0xe71   : > { %v7332_v55 = vpop.eup %7331  ;;  %v5340_v4 = vmul.f32 %v5308_v63, %v11232_v17  ;;  %v5310_v26 = vmul.f32 %v7330_v28, %v11240_v0  ;;  %7349 = vpow2.f32 %v5217_v3  ;;  %v11346_v13 = vpop.f32.mrb[190].mxu1  ;;  %v5223_v0 = vmul.f32 1.442695, %v5163_v22 }
 0xe72   : > { %v7334_v20 = vpop.eup %7333  ;;  %v5341_v49 = vmul.f32 %v5309_v12, %v11237_v30  ;;  %v5251_v44 = vadd.f32 1.0, %v7332_v55  ;;  %7351 = vpow2.f32 %v5219_v25  ;;  %v11348_v5 = vpop.f32.mrb[190].mxu0  ;;  %v5225_v29 = vmul.f32 1.442695, %v5164_v48 }
 0xe73   : > { %v7336_v63 = vpop.eup %7335  ;;  %v5342_v3 = vmul.f32 %v5310_v26, %v11242_v36  ;;  %v5252_v17 = vadd.f32 1.0, %v7334_v20  ;;  %7353 = vpow2.f32 %v5221_v6  ;;  %v11351_v52 = vpop.f32.mrb[191].mxu1  ;;  %v5165_v19 = vsub.f32 0.0, %v11346_v13 }
 0xe74   : > { %v11353_v51 = vpop.f32.mrb[191].mxu0  ;;  %v7338_v56 = vpop.eup %7337  ;;  %v5365_v30 = vpack.c.bf16 %v5341_v49, %v5339_v7  ;;  %7355 = vrcp.f32 %v5251_v44  ;;  %v5253_v42 = vadd.f32 1.0, %v7336_v63  ;;  %v5166_v36 = vsub.f32 0.0, %v11351_v52 }
 0xe75   : > { %v5366_v53 = vpack.c.bf16 %v5342_v3, %v5340_v4  ;;  %7357 = vrcp.f32 %v5252_v17  ;;  %v5254_v25 = vadd.f32 1.0, %v7338_v56  ;;  %v7340_v28 = vpop.eup %7339  ;;  %v5227_v55 = vmul.f32 1.442695, %v5165_v19 }
 0xe76   : > { %7359 = vrcp.f32 %v5253_v42  ;;  %v7342_v12 = vpop.eup %7341  ;;  %v5311_v6 = vmul.f32 %v7340_v28, %v11251_v24  ;;  %v5229_v22 = vmul.f32 1.442695, %v5166_v36 }
 0xe77   : > { %7361 = vrcp.f32 %v5254_v25  ;;  %5559 = vmatprep.mubr.bf16.mxu1 %v5366_v53  ;;  %v7344_v26 = vpop.eup %7343  ;;  %v5312_v7 = vmul.f32 %v7342_v12, %v11257_v35 }
 0xe78   : > { %7363 = vpow2.f32 %v5223_v0  ;;  %5560 = vmatmul.mubr.bf16.gmra.mrb[196].mxu1 %v5365_v30  ;;  %v5343_v20 = vmul.f32 %v5311_v6, %v11253_v32  ;;  %v5313_v49 = vmul.f32 %v7344_v26, %v11263_v14 }
 0xe79   : > { %v7346_v4 = vpop.eup %7345  ;;  %7365 = vpow2.f32 %v5225_v29  ;;  %v5344_v48 = vmul.f32 %v5312_v7, %v11259_v11 }
 0xe7a   : > { %v7348_v44 = vpop.eup %7347  ;;  %v5314_v24 = vmul.f32 %v7346_v4, %v11267_v31  ;;  %7367 = vpow2.f32 %v5227_v55  ;;  %v5345_v3 = vmul.f32 %v5313_v49, %v11265_v2 }
 0xe7b   : > { %v7350_v63 = vpop.eup %7349  ;;  %v5255_v17 = vadd.f32 1.0, %v7348_v44  ;;  %7369 = vpow2.f32 %v5229_v22 }
 0xe7c   : > { %v7352_v35 = vpop.eup %7351  ;;  %v5346_v0 = vmul.f32 %v5314_v24, %v11269_v50  ;;  %v5256_v56 = vadd.f32 1.0, %v7350_v63  ;;  %v5367_v32 = vpack.c.bf16 %v5345_v3, %v5343_v20 }
 0xe7d   : > { %v7354_v30 = vpop.eup %7353  ;;  %7371 = vrcp.f32 %v5255_v17  ;;  %v5257_v14 = vadd.f32 1.0, %v7352_v35 }
 0xe7e   : > { %v7356_v42 = vpop.eup %7355  ;;  %v5368_v29 = vpack.c.bf16 %v5346_v0, %v5344_v48  ;;  %7373 = vrcp.f32 %v5256_v56  ;;  %v5258_v11 = vadd.f32 1.0, %v7354_v30 }
 0xe7f   : > { %v7358_v53 = vpop.eup %7357  ;;  %v5315_v31 = vmul.f32 %v7356_v42, %v11279_v8  ;;  %7375 = vrcp.f32 %v5257_v14 }
 0xe80   : > { %v7360_v25 = vpop.eup %7359  ;;  %v5316_v2 = vmul.f32 %v7358_v53, %v11285_v62  ;;  %7377 = vrcp.f32 %v5258_v11  ;;  %5567 = vmatprep.mubr.bf16.mxu1 %v5368_v29 }
 0xe81   : > { %v7362_v19 = vpop.eup %7361  ;;  %v5347_v50 = vmul.f32 %v5315_v31, %v11281_v15  ;;  %v5317_v28 = vmul.f32 %v7360_v25, %v11291_v38  ;;  %5568 = vmatmul.mubr.bf16.gmra.mrb[200].mxu1 %v5367_v32 }
 0xe82   : > { %v7364_v36 = vpop.eup %7363  ;;  %v5348_v12 = vmul.f32 %v5316_v2, %v11287_v58  ;;  %v5318_v6 = vmul.f32 %v7362_v19, %v11295_v60 }
 0xe83   : > { %v7366_v55 = vpop.eup %7365  ;;  %v5349_v8 = vmul.f32 %v5317_v28, %v11293_v46  ;;  %v5259_v26 = vadd.f32 1.0, %v7364_v36 }
 0xe84   : > { %v7368_v7 = vpop.eup %7367  ;;  %v5350_v62 = vmul.f32 %v5318_v6, %v11297_v54  ;;  %v5260_v22 = vadd.f32 1.0, %v7366_v55 }
 0xe85   : > { %v7370_v4 = vpop.eup %7369  ;;  %v5369_v20 = vpack.c.bf16 %v5349_v8, %v5347_v50  ;;  %7379 = vrcp.f32 %v5259_v26  ;;  %v5261_v15 = vadd.f32 1.0, %v7368_v7 }
 0xe86   : > { %v5370_v49 = vpack.c.bf16 %v5350_v62, %v5348_v12  ;;  %7381 = vrcp.f32 %v5260_v22  ;;  %v5262_v38 = vadd.f32 1.0, %v7370_v4 }
 0xe87   : > { %v7372_v44 = vpop.eup %7371  ;;  %7383 = vrcp.f32 %v5261_v15 }
 0xe88   : > { %v7374_v58 = vpop.eup %7373  ;;  %v5319_v60 = vmul.f32 %v7372_v44, %v11305_v33  ;;  %7385 = vrcp.f32 %v5262_v38  ;;  %5575 = vmatprep.mubr.bf16.mxu1 %v5370_v49 }
 0xe89   : > { %v7376_v46 = vpop.eup %7375  ;;  %v5320_v48 = vmul.f32 %v7374_v58, %v11312_v37  ;;  %5576 = vmatmul.mubr.bf16.gmra.mrb[204].mxu1 %v5369_v20 }
 0xe8a   : > { %v7378_v54 = vpop.eup %7377  ;;  %v5351_v24 = vmul.f32 %v5319_v60, %v11307_v41  ;;  %v5321_v63 = vmul.f32 %v7376_v46, %v11318_v34  ;;  %v12321_v46 = vld [vmem:[#allocation131_spill] sm:$0xff] }
 0xe8b   : > { %v5352_v3 = vmul.f32 %v5320_v48, %v11314_v47  ;;  %v5322_v17 = vmul.f32 %v7378_v54, %v11324_v21 }
 0xe8c   : > { %v5353_v35 = vmul.f32 %v5321_v63, %v11320_v9 }
 0xe8d   : > { %v5354_v0 = vmul.f32 %v5322_v17, %v11326_v43 }
 0xe8e   : > { %v5371_v33 = vpack.c.bf16 %v5353_v35, %v5351_v24  ;;  %v12322_v24 = vld [vmem:[#allocation137_spill] sm:$0xff] }
 0xe8f   : > { %v7380_v56 = vpop.eup %7379  ;;  %v5372_v30 = vpack.c.bf16 %v5354_v0, %v5352_v3  ;;  %v12323_v0 = vld [vmem:[#allocation98_spill] sm:$0xff] }
 0xe90   : > { %v7382_v32 = vpop.eup %7381  ;;  %v5323_v37 = vmul.f32 %v7380_v56, %v11333_v27 }
 0xe91   : > { %v7384_v14 = vpop.eup %7383  ;;  %v5324_v42 = vmul.f32 %v7382_v32, %v11340_v57  ;;  %5583 = vmatprep.mubr.bf16.mxu1 %v5372_v30  ;;  %v12324_v30 = vld [vmem:[#allocation139_spill] sm:$0xff] }
 0xe92   : > { %v7386_v41 = vpop.eup %7385  ;;  %v5355_v34 = vmul.f32 %v5323_v37, %v11335_v61  ;;  %v5325_v47 = vmul.f32 %v7384_v14, %v11346_v13  ;;  %5584 = vmatmul.mubr.bf16.gmra.mrb[208].mxu1 %v5371_v33 }
 0xe93   : > { %v5356_v9 = vmul.f32 %v5324_v42, %v11342_v39  ;;  %v5326_v21 = vmul.f32 %v7386_v41, %v11351_v52 }
 0xe94   : > { %v5357_v43 = vmul.f32 %v5325_v47, %v11348_v5  ;;  %v12325_v47 = vld [vmem:[#allocation102_spill] sm:$0xff] }
 0xe95   : > { %v5358_v29 = vmul.f32 %v5326_v21, %v11353_v51 }
 0xe96   : > { %v5373_v27 = vpack.c.bf16 %v5357_v43, %v5355_v34  ;;  %v12326_v43 = vld [vmem:[#allocation156_spill] sm:$0xff] }
 0xe97   : > { %v5374_v11 = vpack.c.bf16 %v5358_v29, %v5356_v9 }
 0xe99   : > { %5591 = vmatprep.mubr.bf16.mxu1 %v5374_v11 }
 0xe9a   : > { %5592 = vmatmul.mubr.bf16.gmra.mrb[212].mxu1 %v5373_v27 }
 0xf30   : > { %v6268_v57 = vpop.f32.mrb[192].mxu0 }
 0xf31   : > { %v6269_v53 = vpop.f32.mrb[193].mxu0 }
 0xf32   : > { %v6270_v31 = vadd.f32 %v6269_v53, %v6268_v57  ;;  %v6271_v61 = vpop.f32.mrb[194].mxu0 }
 0xf33   : > { %v6272_v25 = vpop.f32.mrb[195].mxu0 }
 0xf34   : > { %v5600_v13 = vadd.f32 %v6270_v31, %v11020_v10  ;;  %v6273_v2 = vadd.f32 %v6272_v25, %v6271_v61  ;;  %v12327_v61 = vld [vmem:[#allocation152_spill] sm:$0xff] }
 0xf36   : > { %5616 = vst [vmem:[%s11392_s20] sm:$0xff] %v5600_v13  ;;  %v5601_v39 = vadd.f32 %v6273_v2, %v11024_v16  ;;  %v12329_v2 = vld [vmem:[#allocation107_spill] sm:$0xff] }
 0xf38   : > { %5617 = vst [vmem:[%s11392_s20 + $0x8] sm:$0xff] %v5601_v39 }
 0xf39   : > { %v6274_v5 = vpop.f32.mrb[196].mxu0 }
 0xf3a   : > { %v6275_v52 = vpop.f32.mrb[197].mxu0 }
 0xf3b   : > { %v6276_v51 = vadd.f32 %v6275_v52, %v6274_v5  ;;  %v6277_v19 = vpop.f32.mrb[198].mxu0 }
 0xf3c   : > { %v6278_v50 = vpop.f32.mrb[199].mxu0 }
 0xf3d   : > { %v5602_v10 = vadd.f32 %v6276_v51, %v11032_v23  ;;  %v6279_v28 = vadd.f32 %v6278_v50, %v6277_v19 }
 0xf3f   : > { %5618 = vst [vmem:[%s11392_s20 + $0x10] sm:$0xff] %v5602_v10  ;;  %v5603_v36 = vadd.f32 %v6279_v28, %v11036_v45 }
 0xf41   : > { %5619 = vst [vmem:[%s11392_s20 + $0x18] sm:$0xff] %v5603_v36 }
 0xf42   : > { %v6280_v12 = vpop.f32.mrb[192].mxu1 }
 0xf43   : > { %v6281_v6 = vpop.f32.mrb[193].mxu1 }
 0xf44   : > { %v6282_v55 = vadd.f32 %v6281_v6, %v6280_v12  ;;  %v6283_v16 = vpop.f32.mrb[194].mxu1 }
 0xf45   : > { %v6284_v8 = vpop.f32.mrb[195].mxu1 }
 0xf46   : > { %v5604_v26 = vadd.f32 %v6282_v55, %v11044_v40  ;;  %v6285_v7 = vadd.f32 %v6284_v8, %v6283_v16 }
 0xf48   : > { %5620 = vst [vmem:[%s11392_s20 + $0x20] sm:$0xff] %v5604_v26  ;;  %v5605_v62 = vadd.f32 %v6285_v7, %v11048_v59 }
 0xf4a   : > { %5621 = vst [vmem:[%s11392_s20 + $0x28] sm:$0xff] %v5605_v62 }
 0xf4b   : > { %v6286_v23 = vpop.f32.mrb[196].mxu1 }
 0xf4c   : > { %v6287_v22 = vpop.f32.mrb[197].mxu1 }
 0xf4d   : > { %v6288_v4 = vadd.f32 %v6287_v22, %v6286_v23  ;;  %v6289_v45 = vpop.f32.mrb[198].mxu1 }
 0xf4e   : > { %v6290_v20 = vpop.f32.mrb[199].mxu1 }
 0xf4f   : > { %v5606_v15 = vadd.f32 %v6288_v4, %v11056_v18  ;;  %v6291_v49 = vadd.f32 %v6290_v20, %v6289_v45 }
 0xf51   : > { %5622 = vst [vmem:[%s11392_s20 + $0x30] sm:$0xff] %v5606_v15  ;;  %v5607_v38 = vadd.f32 %v6291_v49, %v11060_v1 }
 0xf53   : > { %5623 = vst [vmem:[%s11392_s20 + $0x38] sm:$0xff] %v5607_v38 }
 0xf54   : > { %v6292_v40 = vpop.f32.mrb[200].mxu1 }
 0xf55   : > { %v6293_v44 = vpop.f32.mrb[201].mxu1 }
 0xf56   : > { %v6294_v58 = vadd.f32 %v6293_v44, %v6292_v40  ;;  %v6295_v59 = vpop.f32.mrb[202].mxu1 }
 0xf57   : > { %v6296_v60 = vpop.f32.mrb[203].mxu1 }
 0xf58   : > { %v5608_v48 = vadd.f32 %v6294_v58, %v12321_v46  ;;  %v6297_v54 = vadd.f32 %v6296_v60, %v6295_v59 }
 0xf5a   : > { %5624 = vst [vmem:[%s11392_s20 + $0x40] sm:$0xff] %v5608_v48  ;;  %v5609_v63 = vadd.f32 %v6297_v54, %v12322_v24 }
 0xf5c   : > { %5625 = vst [vmem:[%s11392_s20 + $0x48] sm:$0xff] %v5609_v63  ;;  %v6298_v18 = vpop.f32.mrb[204].mxu1 }
 0xf5d   : > { %v6299_v3 = vpop.f32.mrb[205].mxu1 }
 0xf5e   : > { %v6300_v17 = vadd.f32 %v6299_v3, %v6298_v18  ;;  %v6301_v1 = vpop.f32.mrb[206].mxu1 }
 0xf5f   : > { %v6302_v35 = vpop.f32.mrb[207].mxu1 }
 0xf60   : > { %v5610_v33 = vadd.f32 %v6300_v17, %v12323_v0  ;;  %v6303_v56 = vadd.f32 %v6302_v35, %v6301_v1 }
 0xf62   : > { %5626 = vst [vmem:[%s11392_s20 + $0x50] sm:$0xff] %v5610_v33  ;;  %v5611_v32 = vadd.f32 %v6303_v56, %v12324_v30 }
 0xf64   : > { %5627 = vst [vmem:[%s11392_s20 + $0x58] sm:$0xff] %v5611_v32 }
 0xf65   : > { %v6304_v37 = vpop.f32.mrb[208].mxu1 }
 0xf66   : > { %v6305_v14 = vpop.f32.mrb[209].mxu1 }
 0xf67   : > { %v6306_v42 = vadd.f32 %v6305_v14, %v6304_v37  ;;  %v6307_v41 = vpop.f32.mrb[210].mxu1 }
 0xf68   : > { %v6308_v34 = vpop.f32.mrb[211].mxu1 }
 0xf69   : > { %v5612_v9 = vadd.f32 %v6306_v42, %v12325_v47  ;;  %v6309_v21 = vadd.f32 %v6308_v34, %v6307_v41 }
 0xf6b   : > { %5628 = vst [vmem:[%s11392_s20 + $0x60] sm:$0xff] %v5612_v9  ;;  %v5613_v29 = vadd.f32 %v6309_v21, %v12326_v43 }
 0xf6d   : > { %5629 = vst [vmem:[%s11392_s20 + $0x68] sm:$0xff] %v5613_v29  ;;  %v6310_v27 = vpop.f32.mrb[212].mxu1 }
 0xf6e   : > { %v6311_v11 = vpop.f32.mrb[213].mxu1 }
 0xf6f   : > { %v6312_v57 = vadd.f32 %v6311_v11, %v6310_v27  ;;  %v6313_v53 = vpop.f32.mrb[214].mxu1 }
 0xf70   : > { %v6314_v31 = vpop.f32.mrb[215].mxu1 }
 0xf71   : > { %v5614_v25 = vadd.f32 %v6312_v57, %v12327_v61  ;;  %v6315_v13 = vadd.f32 %v6314_v31, %v6313_v53 }
 0xf73   : > { %5630 = vst [vmem:[%s11392_s20 + $0x70] sm:$0xff] %v5614_v25  ;;  %v5615_v39 = vadd.f32 %v6315_v13, %v12329_v2 }
 0xf75   : > { %5631 = vst [vmem:[%s11392_s20 + $0x78] sm:$0xff] %v5615_v39 }
 0xf76   : > { %7760 = shalt.err (!%p7757_p3)
}
 0xf77   : > { %s7761_s29 = scalar_lea.hbm %s11427_s3, 2048  ;;  %s7765_s17 = scalar_lea.hbm %s12328_s19, 4096 }
 0xf78   : > { %p7762_p5 = scmp.ne.s32.totalorder %s11427_s3, %s7761_s29  ;;  %p7766_p9 = scmp.lt.u32.totalorder %s11427_s3, %s12328_s19 }
 0xf79   : > { %p7767_p12 = scmp.lt.u32.totalorder %s7765_s17, %s7761_s29  ;;  %p7769_p13 = scmp.lt.u32.totalorder %s7761_s29, %s11427_s3 }
 0xf7a   : > { %p7763_p7 = pnand %p7762_p5, %p12330_p0 }
 0xf7b   : > { %p7768_p1 = por %p7767_p12, %p7766_p9 }
 0xf7c   : > { %p7764_p6 = pneg %p7763_p7 }
 0xf7d   : > { %p7770_p2 = por %p7769_p13, %p7768_p1 }
 0xf7f   : > { %p7771_p8 = pnand %p7770_p2, %p7764_p6 }
 0xf81   : > { %7774 = shalt.err (!%p7771_p8)
}
 0xf82   : > { %s7857_s9 = smov 128   ;;  %s7858_s24 = smov 8  }
 0xf83   : > { %6630 = dma.vmem_to_hbm [thread:$0]  (%p12330_p0), %s11429_s22, 2048, %s11427_s3, %s5633_s14, %s7857_s9, %s7857_s9, %s7858_s24  }
 0xf84 PF: > { %s5661_s1 = sand.u32 1, %s7821_s25   ;;  %p12331_p4 = scmp.ne.s32.totalorder %s11728_s0, 0 }
 0xf85   : > { %p12332_p10 = scmp.ge.s32.totalorder %s7833_s28, 2  ;;  %s5662_s4 = scalar_lea.sflag [#allocation4], %s5661_s1 }
 0xf87   : > { %p6668_p11 = pnand %p12332_p10, %p12331_p4 }
 0xf89   : > { %7816 = dma.done.wait (!%p6668_p11), %s5662_s4, 2048  }
 0xf8a   : > { %7818 = vsyncadd (!%p6668_p11), %s5662_s4, 4294965248  ;;  %p31_p3 = scmp.ge.s32.totalorder %s8205_s16, 4   ;;  %s12333_s25 = smov %s7825_s26 }
 0xf8b   : > { %s12334_s26 = smov %s7829_s27  ;;  %s12335_s27 = smov %s8216_s15 }
 0xf8c   : > { %s12336_s28 = smov %s8205_s16  ;;  %33 = sbr.rel (!%p31_p3) target bundleno = 18 (0x12), region = 157 }
 0xf93   :  { %5667 = vsyncpa [#allocation3], 1 }
 0xf94   :  { %5669 = vsyncpa [#allocation3 + $0x1], 1 }
 0xf95   :  { %5670 = vsyncpa [#allocation6], 1 }
 0xf96   :  { %5671 = vsyncpa [#allocation9], 1 }
 0xf97   :  { %5672 = vsyncpa [#allocation12], 1 }
 0xf98   :  { %5673 = vsyncpa [#allocation15], 1 }
 0xf99   :  { %5674 = vsyncpa [#allocation18], 1 }
 0xf9a   :  { %5675 = vsyncpa [#allocation4], 1 }
 0xf9b   :  { %5677 = vsyncpa [#allocation4 + $0x1], 1 }

</bundles_post_ra>
